<compile_context>
chip_gen: v5e
topology: v5e:2x2
jax: 0.10.0
libtpu: 0.0.40
codegen_flags: <defaults>
</compile_context>

<pallas_src>
import functools

import jax
import jax.numpy as jnp
from jax.experimental import pallas as pl
from jax.experimental.pallas import tpu as pltpu

LEAKY_SLOPE = 0.2
IN_EPS = 1e-5


# ---------------------------------------------------------------------------
# Pallas kernel: fused (im2col-GEMM conv) + optional bias + InstanceNorm + LeakyReLU
#   patches block : (1, K, P)   lane axis = P
#   weights block : (C, K)
#   output block  : (1, C, P)   lane axis = P
# ---------------------------------------------------------------------------
def _conv_block_kernel(*refs, norm, act, has_bias):
    if has_bias:
        p_ref, w_ref, b_ref, o_ref = refs
    else:
        p_ref, w_ref, o_ref = refs

    p = p_ref[0]                      # (K, P)  bf16
    w = w_ref[...]                    # (C, K)  bf16
    y = jnp.dot(w, p, preferred_element_type=jnp.float32)   # (C, P) f32

    if has_bias:
        y = y + b_ref[...]            # (C, 1) broadcast over lanes

    if norm:
        # InstanceNorm2d(affine=False): per-(sample, channel) over spatial P.
        # Single-pass moments: E[y], E[y^2]; reduction over the lane axis (XLU).
        mean = jnp.mean(y, axis=-1, keepdims=True)
        ex2 = jnp.mean(y * y, axis=-1, keepdims=True)
        var = jnp.maximum(ex2 - mean * mean, 0.0)
        y = (y - mean) * jax.lax.rsqrt(var + IN_EPS)

    if act:  # LeakyReLU(0.2)
        y = jnp.where(y >= 0.0, y, LEAKY_SLOPE * y)

    o_ref[0] = y.astype(o_ref.dtype)


def conv_gemm_block(patches, w, b, *, norm, act, out_dtype):
    """patches (N, K, P) bf16, w (C, K) bf16, b (C, 1) f32 or None -> (N, C, P)."""
    N, K, P = patches.shape
    C = w.shape[0]
    has_bias = b is not None

    kernel = functools.partial(_conv_block_kernel, norm=norm, act=act,
                               has_bias=has_bias)

    in_specs = [
        pl.BlockSpec((1, K, P), lambda n: (n, 0, 0)),
        pl.BlockSpec((C, K), lambda n: (0, 0)),
    ]
    args = [patches, w]
    if has_bias:
        in_specs.append(pl.BlockSpec((C, 1), lambda n: (0, 0)))
        args.append(b)

    return pl.pallas_call(
        kernel,
        out_shape=jax.ShapeDtypeStruct((N, C, P), out_dtype),
        grid=(N,),
        in_specs=in_specs,
        out_specs=pl.BlockSpec((1, C, P), lambda n: (n, 0, 0)),
        compiler_params=pltpu.CompilerParams(
            dimension_semantics=("parallel",)),
    )(*args)


# ---------------------------------------------------------------------------
# Plain-JAX glue: channel-major im2col (no transposes; K order = (C, kh, kw),
# matching PyTorch's weight.reshape(C_out, C_in*kh*kw)).
# ---------------------------------------------------------------------------
def im2col(x, k, stride, pad_h, pad_w):
    N, C, H, W = x.shape
    xp = jnp.pad(x, ((0, 0), (0, 0), pad_h, pad_w))
    Hp = H + pad_h[0] + pad_h[1]
    Wp = W + pad_w[0] + pad_w[1]
    Ho = (Hp - k) // stride + 1
    Wo = (Wp - k) // stride + 1
    cols = []
    for i in range(k):
        for j in range(k):
            cols.append(
                xp[:, :, i:i + stride * (Ho - 1) + 1:stride,
                          j:j + stride * (Wo - 1) + 1:stride])
    p = jnp.stack(cols, axis=2)            # (N, C, k*k, Ho, Wo)
    p = p.reshape(N, C * k * k, Ho * Wo)   # (N, K, P), K in (C, kh, kw) order
    return p, Ho, Wo


# ---------------------------------------------------------------------------
# Parameters (deterministic synthetic init, PyTorch-shaped: w (C_out, K), b (C_out,))
# ---------------------------------------------------------------------------
def init_params(key, n_in_channels=3, n_fmaps=32):
    ks = jax.random.split(key, 9)

    def w(k, cin, cout):
        return 0.02 * jax.random.normal(k, (cout, cin * 16), jnp.float32)

    def b(k, cout):
        return 0.02 * jax.random.normal(k, (cout,), jnp.float32)

    nf = n_fmaps
    return dict(
        w1=w(ks[0], n_in_channels, nf), b1=b(ks[1], nf),
        w2=w(ks[2], nf, 2 * nf),        b2=b(ks[3], 2 * nf),
        w3=w(ks[4], 2 * nf, 4 * nf),    b3=b(ks[5], 4 * nf),
        w4=w(ks[6], 4 * nf, 8 * nf),    b4=b(ks[7], 8 * nf),
        w5=w(ks[8], 8 * nf, 1),         # output conv, bias=False
    )


def prepare_kernel_params(params):
    """One-time cast/reshape: bf16 weights, f32 layer-1 bias as (C, 1).
    Biases of layers 2-4 are intentionally dropped (cancelled by InstanceNorm)."""
    kp = {k: params[k].astype(jnp.bfloat16) for k in ("w1", "w2", "w3", "w4", "w5")}
    kp["b1"] = params["b1"].reshape(-1, 1).astype(jnp.float32)
    return kp


# ---------------------------------------------------------------------------
# Forward pass (matches PatchGANDiscriminator.forward)
# ---------------------------------------------------------------------------
def patchgan_forward(x, kp):
    N = x.shape[0]

    def stage(x_nchw, w, b, norm):
        p, Ho, Wo = im2col(x_nchw, 4, 2, (1, 1), (1, 1))
        p = p.astype(jnp.bfloat16)
        y = conv_gemm_block(p, w, b, norm=norm, act=True, out_dtype=jnp.bfloat16)
        C = w.shape[0]
        return y.reshape(N, C, Ho, Wo)          # no transpose needed

    x = stage(x, kp["w1"], kp["b1"], norm=False)   # layer1
    x = stage(x, kp["w2"], None, norm=True)        # layer2 (bias cancelled by IN)
    x = stage(x, kp["w3"], None, norm=True)        # layer3
    x = stage(x, kp["w4"], None, norm=True)        # layer4

    # output_layer: ZeroPad2d((1,0,1,0)) + Conv2d(8*nf, 1, 4, padding=1, bias=False)
    # -> asymmetric total padding H:(2,1), W:(2,1), stride 1.
    p, _, _ = im2col(x, 4, 1, (2, 1), (2, 1))
    p = p.astype(jnp.bfloat16)
    y = conv_gemm_block(p, kp["w5"], None, norm=False, act=False,
                        out_dtype=jnp.float32)     # (N, 1, P)
    return y.reshape(-1)                            # .view(-1)


# ---------------------------------------------------------------------------
# Pure-JAX f32 reference (for correctness check only; keeps all conv biases)
# ---------------------------------------------------------------------------
def ref_forward(x, params):
    def conv(x, w_ck, b, stride, pad):
        cin = x.shape[1]
        cout = w_ck.shape[0]
        w = w_ck.reshape(cout, cin, 4, 4)
        y = jax.lax.conv_general_dilated(
            x, w, (stride, stride), pad,
            dimension_numbers=("NCHW", "OIHW", "NCHW"),
            precision=jax.lax.Precision.HIGHEST)
        if b is not None:
            y = y + b.reshape(1, -1, 1, 1)
        return y

    def inorm(y):
        m = y.mean(axis=(2, 3), keepdims=True)
        v = ((y - m) ** 2).mean(axis=(2, 3), keepdims=True)
        return (y - m) * jax.lax.rsqrt(v + IN_EPS)

    def lrelu(y):
        return jnp.where(y >= 0, y, LEAKY_SLOPE * y)

    same = ((1, 1), (1, 1))
    y = lrelu(conv(x, params["w1"], params["b1"], 2, same))
    y = lrelu(inorm(conv(y, params["w2"], params["b2"], 2, same)))
    y = lrelu(inorm(conv(y, params["w3"], params["b3"], 2, same)))
    y = lrelu(inorm(conv(y, params["w4"], params["b4"], 2, same)))
    y = conv(y, params["w5"], None, 1, ((2, 1), (2, 1)))
    return y.reshape(-1)


if __name__ == "__main__":
    key = jax.random.PRNGKey(0)
    pkey, xkey = jax.random.split(key)

    params = init_params(pkey, n_in_channels=3, n_fmaps=32)
    kparams = prepare_kernel_params(params)

    # Small input consistent with the module: NCHW, 3 channels, 32x32 spatial
    # (keeps layer-4 InstanceNorm non-degenerate: 2x2 spatial -> P=4).
    x = jax.random.normal(xkey, (2, 3, 32, 32), jnp.float32)

    out = jax.jit(patchgan_forward)(x, kparams)
    out = jax.block_until_ready(out)

    ref = jax.block_until_ready(ref_forward(x, params))
    assert out.shape == ref.shape == (2 * 2 * 2,), (out.shape, ref.shape)
    assert bool(jnp.all(jnp.isfinite(out)))
    # bf16 GEMM inputs with f32 accumulation -> slightly looser tolerance than
    # the pure-f32 reference.
    assert jnp.allclose(out, ref, atol=5e-2, rtol=5e-2), (
        f"max abs diff {float(jnp.max(jnp.abs(out - ref)))}")

    print("KERNEL_OK")
</pallas_src>

<mosaic_0001>
module attributes {stable_mosaic.version = 11 : i64} {
  func.func @_conv_block_kernel(%arg0: i32, %arg1: memref<1x48x256xbf16, #tpu.memory_space<vmem>>, %arg2: memref<32x48xbf16, #tpu.memory_space<vmem>>, %arg3: memref<32x1xf32, #tpu.memory_space<vmem>>, %arg4: memref<1x32x256xbf16, #tpu.memory_space<vmem>>) attributes {dimension_semantics = [#tpu.dimension_semantics<parallel>], iteration_bounds = array<i64: 2>, scalar_prefetch = 0 : i64, scratch_operands = 0 : i64, tpu.core_type = #tpu.core_type<tc>, window_params = [{transform_indices = @transform_0, window_bounds = array<i64: 1, 48, 256>}, {pipeline_mode = #tpu.pipeline_mode<synchronous>, transform_indices = @transform_1, window_bounds = array<i64: 32, 48>}, {pipeline_mode = #tpu.pipeline_mode<synchronous>, transform_indices = @transform_2, window_bounds = array<i64: 32, 1>}, {transform_indices = @transform_3, window_bounds = array<i64: 1, 32, 256>}]} {
    %c0 = arith.constant 0 : index
    %c0_0 = arith.constant 0 : index
    %c0_1 = arith.constant 0 : index
    %0 = vector.load %arg1[%c0, %c0_0, %c0_1] : memref<1x48x256xbf16, #tpu.memory_space<vmem>>, vector<1x48x256xbf16>
    %1 = vector.shape_cast %0 : vector<1x48x256xbf16> to vector<48x256xbf16>
    %c0_2 = arith.constant 0 : index
    %c0_3 = arith.constant 0 : index
    %2 = vector.load %arg2[%c0_2, %c0_3] : memref<32x48xbf16, #tpu.memory_space<vmem>>, vector<32x48xbf16>
    %cst = arith.constant dense<0.000000e+00> : vector<32x256xf32>
    %3 = tpu.matmul %2, %1, %cst {dimension_numbers = #tpu.dot_dimension_numbers<[1], [0], [0], [1], [0, 0, 1, 1], [], []>} : vector<32x48xbf16>, vector<48x256xbf16>, vector<32x256xf32> -> vector<32x256xf32>
    %c0_4 = arith.constant 0 : index
    %c0_5 = arith.constant 0 : index
    %4 = vector.load %arg3[%c0_4, %c0_5] : memref<32x1xf32, #tpu.memory_space<vmem>>, vector<32x1xf32>
    %5 = vector.broadcast %4 : vector<32x1xf32> to vector<32x256xf32>
    %6 = arith.addf %3, %5 : vector<32x256xf32>
    %cst_6 = arith.constant 0.000000e+00 : f32
    %7 = vector.broadcast %cst_6 : f32 to vector<32x256xf32>
    %8 = arith.cmpf oge, %6, %7 : vector<32x256xf32>
    %cst_7 = arith.constant 2.000000e-01 : f32
    %9 = vector.broadcast %cst_7 : f32 to vector<32x256xf32>
    %10 = arith.mulf %9, %6 : vector<32x256xf32>
    %11 = arith.select %8, %6, %10 : vector<32x256xi1>, vector<32x256xf32>
    %12 = arith.truncf %11 : vector<32x256xf32> to vector<32x256xbf16>
    %c0_8 = arith.constant 0 : index
    %c0_9 = arith.constant 0 : index
    %c0_10 = arith.constant 0 : index
    %13 = vector.load %arg4[%c0_8, %c0_9, %c0_10] : memref<1x32x256xbf16, #tpu.memory_space<vmem>>, vector<1x32x256xbf16>
    %14 = vector.shape_cast %13 : vector<1x32x256xbf16> to vector<32x256xbf16>
    %15 = vector.shape_cast %12 : vector<32x256xbf16> to vector<1x32x256xbf16>
    tpu.vector_store %arg4[%c0_8, %c0_9, %c0_10], %15 {strides = array<i32>} : memref<1x32x256xbf16, #tpu.memory_space<vmem>>, vector<1x32x256xbf16>,
    return
  }
  func.func @transform_0(%arg0: i32) -> (i32, i32, i32) {
    %c0_i32 = arith.constant 0 : i32
    %c0_i32_0 = arith.constant 0 : i32
    %c0_i32_1 = arith.constant 0 : i32
    return %arg0, %c0_i32, %c0_i32_0 : i32, i32, i32
  }
  func.func @transform_1(%arg0: i32) -> (i32, i32) {
    %c0_i32 = arith.constant 0 : i32
    %c0_i32_0 = arith.constant 0 : i32
    %c0_i32_1 = arith.constant 0 : i32
    return %c0_i32, %c0_i32_0 : i32, i32
  }
  func.func @transform_2(%arg0: i32) -> (i32, i32) {
    %c0_i32 = arith.constant 0 : i32
    %c0_i32_0 = arith.constant 0 : i32
    %c0_i32_1 = arith.constant 0 : i32
    return %c0_i32, %c0_i32_0 : i32, i32
  }
  func.func @transform_3(%arg0: i32) -> (i32, i32, i32) {
    %c0_i32 = arith.constant 0 : i32
    %c0_i32_0 = arith.constant 0 : i32
    %c0_i32_1 = arith.constant 0 : i32
    return %arg0, %c0_i32, %c0_i32_0 : i32, i32, i32
  }
}

module attributes {stable_mosaic.version = 11 : i64} {
  func.func @_conv_block_kernel(%arg0: i32, %arg1: memref<1x512x64xbf16, #tpu.memory_space<vmem>>, %arg2: memref<64x512xbf16, #tpu.memory_space<vmem>>, %arg3: memref<1x64x64xbf16, #tpu.memory_space<vmem>>) attributes {dimension_semantics = [#tpu.dimension_semantics<parallel>], iteration_bounds = array<i64: 2>, scalar_prefetch = 0 : i64, scratch_operands = 0 : i64, tpu.core_type = #tpu.core_type<tc>, window_params = [{transform_indices = @transform_0, window_bounds = array<i64: 1, 512, 64>}, {pipeline_mode = #tpu.pipeline_mode<synchronous>, transform_indices = @transform_1, window_bounds = array<i64: 64, 512>}, {transform_indices = @transform_2, window_bounds = array<i64: 1, 64, 64>}]} {
    %c0 = arith.constant 0 : index
    %c0_0 = arith.constant 0 : index
    %c0_1 = arith.constant 0 : index
    %0 = vector.load %arg1[%c0, %c0_0, %c0_1] : memref<1x512x64xbf16, #tpu.memory_space<vmem>>, vector<1x512x64xbf16>
    %1 = vector.shape_cast %0 : vector<1x512x64xbf16> to vector<512x64xbf16>
    %c0_2 = arith.constant 0 : index
    %c0_3 = arith.constant 0 : index
    %2 = vector.load %arg2[%c0_2, %c0_3] : memref<64x512xbf16, #tpu.memory_space<vmem>>, vector<64x512xbf16>
    %cst = arith.constant dense<0.000000e+00> : vector<64x64xf32>
    %3 = tpu.matmul %2, %1, %cst {dimension_numbers = #tpu.dot_dimension_numbers<[1], [0], [0], [1], [0, 0, 1, 1], [], []>} : vector<64x512xbf16>, vector<512x64xbf16>, vector<64x64xf32> -> vector<64x64xf32>
    %cst_4 = arith.constant dense<0.000000e+00> : vector<64xf32>
    %4 = vector.multi_reduction <add>, %3, %cst_4 [1] : vector<64x64xf32> to vector<64xf32>
    %5 = vector.shape_cast %4 : vector<64xf32> to vector<64x1xf32>
    %cst_5 = arith.constant 6.400000e+01 : f32
    %6 = vector.broadcast %cst_5 : f32 to vector<64x1xf32>
    %7 = arith.divf %5, %6 : vector<64x1xf32>
    %8 = arith.mulf %3, %3 : vector<64x64xf32>
    %cst_6 = arith.constant dense<0.000000e+00> : vector<64xf32>
    %9 = vector.multi_reduction <add>, %8, %cst_6 [1] : vector<64x64xf32> to vector<64xf32>
    %10 = vector.shape_cast %9 : vector<64xf32> to vector<64x1xf32>
    %cst_7 = arith.constant 6.400000e+01 : f32
    %11 = vector.broadcast %cst_7 : f32 to vector<64x1xf32>
    %12 = arith.divf %10, %11 : vector<64x1xf32>
    %13 = arith.mulf %7, %7 : vector<64x1xf32>
    %14 = arith.subf %12, %13 : vector<64x1xf32>
    %cst_8 = arith.constant 0.000000e+00 : f32
    %15 = vector.broadcast %cst_8 : f32 to vector<64x1xf32>
    %16 = arith.maximumf %14, %15 : vector<64x1xf32>
    %17 = vector.broadcast %7 : vector<64x1xf32> to vector<64x64xf32>
    %18 = arith.subf %3, %17 : vector<64x64xf32>
    %cst_9 = arith.constant 9.99999974E-6 : f32
    %19 = vector.broadcast %cst_9 : f32 to vector<64x1xf32>
    %20 = arith.addf %16, %19 : vector<64x1xf32>
    %21 = math.rsqrt %20 : vector<64x1xf32>
    %22 = vector.broadcast %21 : vector<64x1xf32> to vector<64x64xf32>
    %23 = arith.mulf %18, %22 : vector<64x64xf32>
    %cst_10 = arith.constant 0.000000e+00 : f32
    %24 = vector.broadcast %cst_10 : f32 to vector<64x64xf32>
    %25 = arith.cmpf oge, %23, %24 : vector<64x64xf32>
    %cst_11 = arith.constant 2.000000e-01 : f32
    %26 = vector.broadcast %cst_11 : f32 to vector<64x64xf32>
    %27 = arith.mulf %26, %23 : vector<64x64xf32>
    %28 = arith.select %25, %23, %27 : vector<64x64xi1>, vector<64x64xf32>
    %29 = arith.truncf %28 : vector<64x64xf32> to vector<64x64xbf16>
    %c0_12 = arith.constant 0 : index
    %c0_13 = arith.constant 0 : index
    %c0_14 = arith.constant 0 : index
    %30 = vector.load %arg3[%c0_12, %c0_13, %c0_14] : memref<1x64x64xbf16, #tpu.memory_space<vmem>>, vector<1x64x64xbf16>
    %31 = vector.shape_cast %30 : vector<1x64x64xbf16> to vector<64x64xbf16>
    %32 = vector.shape_cast %29 : vector<64x64xbf16> to vector<1x64x64xbf16>
    tpu.vector_store %arg3[%c0_12, %c0_13, %c0_14], %32 {strides = array<i32>} : memref<1x64x64xbf16, #tpu.memory_space<vmem>>, vector<1x64x64xbf16>,
    return
  }
  func.func @transform_0(%arg0: i32) -> (i32, i32, i32) {
    %c0_i32 = arith.constant 0 : i32
    %c0_i32_0 = arith.constant 0 : i32
    %c0_i32_1 = arith.constant 0 : i32
    return %arg0, %c0_i32, %c0_i32_0 : i32, i32, i32
  }
  func.func @transform_1(%arg0: i32) -> (i32, i32) {
    %c0_i32 = arith.constant 0 : i32
    %c0_i32_0 = arith.constant 0 : i32
    %c0_i32_1 = arith.constant 0 : i32
    return %c0_i32, %c0_i32_0 : i32, i32
  }
  func.func @transform_2(%arg0: i32) -> (i32, i32, i32) {
    %c0_i32 = arith.constant 0 : i32
    %c0_i32_0 = arith.constant 0 : i32
    %c0_i32_1 = arith.constant 0 : i32
    return %arg0, %c0_i32, %c0_i32_0 : i32, i32, i32
  }
}

module attributes {stable_mosaic.version = 11 : i64} {
  func.func @_conv_block_kernel(%arg0: i32, %arg1: memref<1x1024x16xbf16, #tpu.memory_space<vmem>>, %arg2: memref<128x1024xbf16, #tpu.memory_space<vmem>>, %arg3: memref<1x128x16xbf16, #tpu.memory_space<vmem>>) attributes {dimension_semantics = [#tpu.dimension_semantics<parallel>], iteration_bounds = array<i64: 2>, scalar_prefetch = 0 : i64, scratch_operands = 0 : i64, tpu.core_type = #tpu.core_type<tc>, window_params = [{transform_indices = @transform_0, window_bounds = array<i64: 1, 1024, 16>}, {pipeline_mode = #tpu.pipeline_mode<synchronous>, transform_indices = @transform_1, window_bounds = array<i64: 128, 1024>}, {transform_indices = @transform_2, window_bounds = array<i64: 1, 128, 16>}]} {
    %c0 = arith.constant 0 : index
    %c0_0 = arith.constant 0 : index
    %c0_1 = arith.constant 0 : index
    %0 = vector.load %arg1[%c0, %c0_0, %c0_1] : memref<1x1024x16xbf16, #tpu.memory_space<vmem>>, vector<1x1024x16xbf16>
    %1 = vector.shape_cast %0 : vector<1x1024x16xbf16> to vector<1024x16xbf16>
    %c0_2 = arith.constant 0 : index
    %c0_3 = arith.constant 0 : index
    %2 = vector.load %arg2[%c0_2, %c0_3] : memref<128x1024xbf16, #tpu.memory_space<vmem>>, vector<128x1024xbf16>
    %cst = arith.constant dense<0.000000e+00> : vector<128x16xf32>
    %3 = tpu.matmul %2, %1, %cst {dimension_numbers = #tpu.dot_dimension_numbers<[1], [0], [0], [1], [0, 0, 1, 1], [], []>} : vector<128x1024xbf16>, vector<1024x16xbf16>, vector<128x16xf32> -> vector<128x16xf32>
    %cst_4 = arith.constant dense<0.000000e+00> : vector<128xf32>
    %4 = vector.multi_reduction <add>, %3, %cst_4 [1] : vector<128x16xf32> to vector<128xf32>
    %5 = vector.shape_cast %4 : vector<128xf32> to vector<128x1xf32>
    %cst_5 = arith.constant 1.600000e+01 : f32
    %6 = vector.broadcast %cst_5 : f32 to vector<128x1xf32>
    %7 = arith.divf %5, %6 : vector<128x1xf32>
    %8 = arith.mulf %3, %3 : vector<128x16xf32>
    %cst_6 = arith.constant dense<0.000000e+00> : vector<128xf32>
    %9 = vector.multi_reduction <add>, %8, %cst_6 [1] : vector<128x16xf32> to vector<128xf32>
    %10 = vector.shape_cast %9 : vector<128xf32> to vector<128x1xf32>
    %cst_7 = arith.constant 1.600000e+01 : f32
    %11 = vector.broadcast %cst_7 : f32 to vector<128x1xf32>
    %12 = arith.divf %10, %11 : vector<128x1xf32>
    %13 = arith.mulf %7, %7 : vector<128x1xf32>
    %14 = arith.subf %12, %13 : vector<128x1xf32>
    %cst_8 = arith.constant 0.000000e+00 : f32
    %15 = vector.broadcast %cst_8 : f32 to vector<128x1xf32>
    %16 = arith.maximumf %14, %15 : vector<128x1xf32>
    %17 = vector.broadcast %7 : vector<128x1xf32> to vector<128x16xf32>
    %18 = arith.subf %3, %17 : vector<128x16xf32>
    %cst_9 = arith.constant 9.99999974E-6 : f32
    %19 = vector.broadcast %cst_9 : f32 to vector<128x1xf32>
    %20 = arith.addf %16, %19 : vector<128x1xf32>
    %21 = math.rsqrt %20 : vector<128x1xf32>
    %22 = vector.broadcast %21 : vector<128x1xf32> to vector<128x16xf32>
    %23 = arith.mulf %18, %22 : vector<128x16xf32>
    %cst_10 = arith.constant 0.000000e+00 : f32
    %24 = vector.broadcast %cst_10 : f32 to vector<128x16xf32>
    %25 = arith.cmpf oge, %23, %24 : vector<128x16xf32>
    %cst_11 = arith.constant 2.000000e-01 : f32
    %26 = vector.broadcast %cst_11 : f32 to vector<128x16xf32>
    %27 = arith.mulf %26, %23 : vector<128x16xf32>
    %28 = arith.select %25, %23, %27 : vector<128x16xi1>, vector<128x16xf32>
    %29 = arith.truncf %28 : vector<128x16xf32> to vector<128x16xbf16>
    %c0_12 = arith.constant 0 : index
    %c0_13 = arith.constant 0 : index
    %c0_14 = arith.constant 0 : index
    %30 = vector.load %arg3[%c0_12, %c0_13, %c0_14] : memref<1x128x16xbf16, #tpu.memory_space<vmem>>, vector<1x128x16xbf16>
    %31 = vector.shape_cast %30 : vector<1x128x16xbf16> to vector<128x16xbf16>
    %32 = vector.shape_cast %29 : vector<128x16xbf16> to vector<1x128x16xbf16>
    tpu.vector_store %arg3[%c0_12, %c0_13, %c0_14], %32 {strides = array<i32>} : memref<1x128x16xbf16, #tpu.memory_space<vmem>>, vector<1x128x16xbf16>,
    return
  }
  func.func @transform_0(%arg0: i32) -> (i32, i32, i32) {
    %c0_i32 = arith.constant 0 : i32
    %c0_i32_0 = arith.constant 0 : i32
    %c0_i32_1 = arith.constant 0 : i32
    return %arg0, %c0_i32, %c0_i32_0 : i32, i32, i32
  }
  func.func @transform_1(%arg0: i32) -> (i32, i32) {
    %c0_i32 = arith.constant 0 : i32
    %c0_i32_0 = arith.constant 0 : i32
    %c0_i32_1 = arith.constant 0 : i32
    return %c0_i32, %c0_i32_0 : i32, i32
  }
  func.func @transform_2(%arg0: i32) -> (i32, i32, i32) {
    %c0_i32 = arith.constant 0 : i32
    %c0_i32_0 = arith.constant 0 : i32
    %c0_i32_1 = arith.constant 0 : i32
    return %arg0, %c0_i32, %c0_i32_0 : i32, i32, i32
  }
}

module attributes {stable_mosaic.version = 11 : i64} {
  func.func @_conv_block_kernel(%arg0: i32, %arg1: memref<1x2048x4xbf16, #tpu.memory_space<vmem>>, %arg2: memref<256x2048xbf16, #tpu.memory_space<vmem>>, %arg3: memref<1x256x4xbf16, #tpu.memory_space<vmem>>) attributes {dimension_semantics = [#tpu.dimension_semantics<parallel>], iteration_bounds = array<i64: 2>, scalar_prefetch = 0 : i64, scratch_operands = 0 : i64, tpu.core_type = #tpu.core_type<tc>, window_params = [{transform_indices = @transform_0, window_bounds = array<i64: 1, 2048, 4>}, {pipeline_mode = #tpu.pipeline_mode<synchronous>, transform_indices = @transform_1, window_bounds = array<i64: 256, 2048>}, {transform_indices = @transform_2, window_bounds = array<i64: 1, 256, 4>}]} {
    %c0 = arith.constant 0 : index
    %c0_0 = arith.constant 0 : index
    %c0_1 = arith.constant 0 : index
    %0 = vector.load %arg1[%c0, %c0_0, %c0_1] : memref<1x2048x4xbf16, #tpu.memory_space<vmem>>, vector<1x2048x4xbf16>
    %1 = vector.shape_cast %0 : vector<1x2048x4xbf16> to vector<2048x4xbf16>
    %c0_2 = arith.constant 0 : index
    %c0_3 = arith.constant 0 : index
    %2 = vector.load %arg2[%c0_2, %c0_3] : memref<256x2048xbf16, #tpu.memory_space<vmem>>, vector<256x2048xbf16>
    %cst = arith.constant dense<0.000000e+00> : vector<256x4xf32>
    %3 = tpu.matmul %2, %1, %cst {dimension_numbers = #tpu.dot_dimension_numbers<[1], [0], [0], [1], [0, 0, 1, 1], [], []>} : vector<256x2048xbf16>, vector<2048x4xbf16>, vector<256x4xf32> -> vector<256x4xf32>
    %cst_4 = arith.constant dense<0.000000e+00> : vector<256xf32>
    %4 = vector.multi_reduction <add>, %3, %cst_4 [1] : vector<256x4xf32> to vector<256xf32>
    %5 = vector.shape_cast %4 : vector<256xf32> to vector<256x1xf32>
    %cst_5 = arith.constant 4.000000e+00 : f32
    %6 = vector.broadcast %cst_5 : f32 to vector<256x1xf32>
    %7 = arith.divf %5, %6 : vector<256x1xf32>
    %8 = arith.mulf %3, %3 : vector<256x4xf32>
    %cst_6 = arith.constant dense<0.000000e+00> : vector<256xf32>
    %9 = vector.multi_reduction <add>, %8, %cst_6 [1] : vector<256x4xf32> to vector<256xf32>
    %10 = vector.shape_cast %9 : vector<256xf32> to vector<256x1xf32>
    %cst_7 = arith.constant 4.000000e+00 : f32
    %11 = vector.broadcast %cst_7 : f32 to vector<256x1xf32>
    %12 = arith.divf %10, %11 : vector<256x1xf32>
    %13 = arith.mulf %7, %7 : vector<256x1xf32>
    %14 = arith.subf %12, %13 : vector<256x1xf32>
    %cst_8 = arith.constant 0.000000e+00 : f32
    %15 = vector.broadcast %cst_8 : f32 to vector<256x1xf32>
    %16 = arith.maximumf %14, %15 : vector<256x1xf32>
    %17 = vector.broadcast %7 : vector<256x1xf32> to vector<256x4xf32>
    %18 = arith.subf %3, %17 : vector<256x4xf32>
    %cst_9 = arith.constant 9.99999974E-6 : f32
    %19 = vector.broadcast %cst_9 : f32 to vector<256x1xf32>
    %20 = arith.addf %16, %19 : vector<256x1xf32>
    %21 = math.rsqrt %20 : vector<256x1xf32>
    %22 = vector.broadcast %21 : vector<256x1xf32> to vector<256x4xf32>
    %23 = arith.mulf %18, %22 : vector<256x4xf32>
    %cst_10 = arith.constant 0.000000e+00 : f32
    %24 = vector.broadcast %cst_10 : f32 to vector<256x4xf32>
    %25 = arith.cmpf oge, %23, %24 : vector<256x4xf32>
    %cst_11 = arith.constant 2.000000e-01 : f32
    %26 = vector.broadcast %cst_11 : f32 to vector<256x4xf32>
    %27 = arith.mulf %26, %23 : vector<256x4xf32>
    %28 = arith.select %25, %23, %27 : vector<256x4xi1>, vector<256x4xf32>
    %29 = arith.truncf %28 : vector<256x4xf32> to vector<256x4xbf16>
    %c0_12 = arith.constant 0 : index
    %c0_13 = arith.constant 0 : index
    %c0_14 = arith.constant 0 : index
    %30 = vector.load %arg3[%c0_12, %c0_13, %c0_14] : memref<1x256x4xbf16, #tpu.memory_space<vmem>>, vector<1x256x4xbf16>
    %31 = vector.shape_cast %30 : vector<1x256x4xbf16> to vector<256x4xbf16>
    %32 = vector.shape_cast %29 : vector<256x4xbf16> to vector<1x256x4xbf16>
    tpu.vector_store %arg3[%c0_12, %c0_13, %c0_14], %32 {strides = array<i32>} : memref<1x256x4xbf16, #tpu.memory_space<vmem>>, vector<1x256x4xbf16>,
    return
  }
  func.func @transform_0(%arg0: i32) -> (i32, i32, i32) {
    %c0_i32 = arith.constant 0 : i32
    %c0_i32_0 = arith.constant 0 : i32
    %c0_i32_1 = arith.constant 0 : i32
    return %arg0, %c0_i32, %c0_i32_0 : i32, i32, i32
  }
  func.func @transform_1(%arg0: i32) -> (i32, i32) {
    %c0_i32 = arith.constant 0 : i32
    %c0_i32_0 = arith.constant 0 : i32
    %c0_i32_1 = arith.constant 0 : i32
    return %c0_i32, %c0_i32_0 : i32, i32
  }
  func.func @transform_2(%arg0: i32) -> (i32, i32, i32) {
    %c0_i32 = arith.constant 0 : i32
    %c0_i32_0 = arith.constant 0 : i32
    %c0_i32_1 = arith.constant 0 : i32
    return %arg0, %c0_i32, %c0_i32_0 : i32, i32, i32
  }
}

module attributes {stable_mosaic.version = 11 : i64} {
  func.func @_conv_block_kernel(%arg0: i32, %arg1: memref<1x4096x4xbf16, #tpu.memory_space<vmem>>, %arg2: memref<1x4096xbf16, #tpu.memory_space<vmem>>, %arg3: memref<1x1x4xf32, #tpu.memory_space<vmem>>) attributes {dimension_semantics = [#tpu.dimension_semantics<parallel>], iteration_bounds = array<i64: 2>, scalar_prefetch = 0 : i64, scratch_operands = 0 : i64, tpu.core_type = #tpu.core_type<tc>, window_params = [{transform_indices = @transform_0, window_bounds = array<i64: 1, 4096, 4>}, {pipeline_mode = #tpu.pipeline_mode<synchronous>, transform_indices = @transform_1, window_bounds = array<i64: 1, 4096>}, {transform_indices = @transform_2, window_bounds = array<i64: 1, 1, 4>}]} {
    %c0 = arith.constant 0 : index
    %c0_0 = arith.constant 0 : index
    %c0_1 = arith.constant 0 : index
    %0 = vector.load %arg1[%c0, %c0_0, %c0_1] : memref<1x4096x4xbf16, #tpu.memory_space<vmem>>, vector<1x4096x4xbf16>
    %1 = vector.shape_cast %0 : vector<1x4096x4xbf16> to vector<4096x4xbf16>
    %c0_2 = arith.constant 0 : index
    %c0_3 = arith.constant 0 : index
    %2 = vector.load %arg2[%c0_2, %c0_3] : memref<1x4096xbf16, #tpu.memory_space<vmem>>, vector<1x4096xbf16>
    %cst = arith.constant dense<0.000000e+00> : vector<1x4xf32>
    %3 = tpu.matmul %2, %1, %cst {dimension_numbers = #tpu.dot_dimension_numbers<[1], [0], [0], [1], [0, 0, 1, 1], [], []>} : vector<1x4096xbf16>, vector<4096x4xbf16>, vector<1x4xf32> -> vector<1x4xf32>
    %c0_4 = arith.constant 0 : index
    %c0_5 = arith.constant 0 : index
    %c0_6 = arith.constant 0 : index
    %4 = vector.load %arg3[%c0_4, %c0_5, %c0_6] : memref<1x1x4xf32, #tpu.memory_space<vmem>>, vector<1x1x4xf32>
    %5 = vector.shape_cast %4 : vector<1x1x4xf32> to vector<1x4xf32>
    %6 = vector.shape_cast %3 : vector<1x4xf32> to vector<1x1x4xf32>
    tpu.vector_store %arg3[%c0_4, %c0_5, %c0_6], %6 {strides = array<i32>} : memref<1x1x4xf32, #tpu.memory_space<vmem>>, vector<1x1x4xf32>,
    return
  }
  func.func @transform_0(%arg0: i32) -> (i32, i32, i32) {
    %c0_i32 = arith.constant 0 : i32
    %c0_i32_0 = arith.constant 0 : i32
    %c0_i32_1 = arith.constant 0 : i32
    return %arg0, %c0_i32, %c0_i32_0 : i32, i32, i32
  }
  func.func @transform_1(%arg0: i32) -> (i32, i32) {
    %c0_i32 = arith.constant 0 : i32
    %c0_i32_0 = arith.constant 0 : i32
    %c0_i32_1 = arith.constant 0 : i32
    return %c0_i32, %c0_i32_0 : i32, i32
  }
  func.func @transform_2(%arg0: i32) -> (i32, i32, i32) {
    %c0_i32 = arith.constant 0 : i32
    %c0_i32_0 = arith.constant 0 : i32
    %c0_i32_1 = arith.constant 0 : i32
    return %arg0, %c0_i32, %c0_i32_0 : i32, i32, i32
  }
}

</mosaic_0001>

<bundles_post_ra>
// kernel: patchgan_forward.5
= control target key start
LH: loop header
LB: loop body
LE: loop exit
PB: predicated region body
PF: predicated region fallthrough
CT: control target
= control target key end

     0   :  { %s480_s12 = smov 0   ;;  %s525_s0 = inlined_call_operand.vmem [shape: bf16[2,48,256], index: 0, kind: input, shape index: {}]   ;;  %s526_s1 = inlined_call_operand.vmem [shape: bf16[32,48], index: 1, kind: input, shape index: {}]   ;;  %s527_s2 = inlined_call_operand.vmem [shape: f32[32,1], index: 2, kind: input, shape index: {}]   ;;  %s528_s3 = inlined_call_operand.vmem [shape: bf16[2,32,256], index: 3, kind: output, shape index: {}]  }
   0x1 LB: > { %s378_s13 = sadd.s32 4294967295, %s457_s12   ;;  %p382_p0 = scmp.ge.s32.totalorder %s457_s12, 1  ;;  %s457_s12 = sphi %s480_s12, %s13_s12  }
   0x2   : > { %p137_p1 = scmp.lt.s32.totalorder %s457_s12, 3 }
   0x4   : > { %p138_p2 = pnand %p382_p0, %p137_p1 }
   0x5   : > { %p161_p3 = scmp.lt.s32.totalorder (!%p138_p2), %s378_s13, 1 }
   0x6   : > { %141 = sbr.rel (%p138_p2) target bundleno = 178 (0xb2), region = 32 }
   0xb   : > { %v184_v0 = vld [vmem:[%s527_s2 + $0x10] sm:$0xff]  ;;  %v459_v1 = vmov 0   ;;  %v182_v2 = vld [vmem:[%s527_s2] sm:$0xff]  ;;  %s530_s13 = smov (!%p161_p3, %s378_s13), 1  ;;  %v185_v6 = vld [vmem:[%s527_s2 + $0x18] sm:$0xff]  ;;  %vm246_vm0 = vcmask 392192  }
   0xc   : > { %450 = vset.pattern.permute.xlu1 %v459_v1  ;;  %449 = vset.pattern.permute.xlu0 %v459_v1  ;;  %s439_s18 = smul.u32 48, %s530_s13  ;;  %v183_v14 = vld [vmem:[%s527_s2 + $0x8] sm:$0xff]  ;;  %v431_v23 = vld [vmem:[%s526_s1] sm:$0xff]  ;;  %s424_s30 = sshll.u32 %s530_s13, 5 }
   0xd   : > { %198 = vperm.xlu1 %450, %v184_v0   ;;  %188 = vperm.xlu0 %449, %v182_v2   ;;  %v432_v24 = vld [vmem:[%s526_s1 + $0x8] sm:$0xff]  ;;  %s516_s6 = scalar_lea.vmem %s528_s3, %s424_s30 }
   0xe   : > { %s165_s21 = scalar_lea.vmem %s525_s0, %s439_s18 }
   0xf   : > { %v412_v3 = vld [vmem:[%s165_s21 + $0x20] sm:$0xf]  ;;  %v430_v4 = vld [vmem:[%s165_s21 + $0x24] sm:$0xf0]  ;;  %v429_v5 = vld [vmem:[%s165_s21 + $0x24] sm:$0xf] }
  0x10   : > { %v413_v7 = vor.u32 %v430_v4, %v412_v3  ;;  %v414_v8 = vld [vmem:[%s165_s21 + $0x28] sm:$0xf0]  ;;  %v404_v9 = vld [vmem:[%s165_s21 + $0x10] sm:$0xf]  ;;  %v428_v10 = vld [vmem:[%s165_s21 + $0x14] sm:$0xf0] }
  0x11   : > { %v417_v11 = vor.u32 %v429_v5, %v414_v8  ;;  %v427_v12 = vld [vmem:[%s165_s21 + $0x14] sm:$0xf]  ;;  %v406_v13 = vld [vmem:[%s165_s21 + $0x18] sm:$0xf0]  ;;  %v405_v15 = vor.u32 %v428_v10, %v404_v9  ;;  %v396_v17 = vld [vmem:[%s165_s21] sm:$0xf] }
  0x12   : > { %258 = vmatpush.bf16.msra.mxu0 %v413_v7  ;;  %433 = vmatpush.bf16.msra.mxu2 %v413_v7  ;;  %v409_v16 = vor.u32 %v427_v12, %v406_v13  ;;  %v426_v18 = vld [vmem:[%s165_s21 + $0x4] sm:$0xf0]  ;;  %v425_v19 = vld [vmem:[%s165_s21 + $0x4] sm:$0xf]  ;;  %v398_v20 = vld [vmem:[%s165_s21 + $0x8] sm:$0xf0] }
  0x13   : > { %277 = vmatpush.bf16.msra.mxu1 %v417_v11  ;;  %436 = vmatpush.bf16.msra.mxu3 %v417_v11  ;;  %v397_v21 = vor.u32 %v426_v18, %v396_v17  ;;  %v401_v22 = vor.u32 %v425_v19, %v398_v20 }
  0x15   : > { %203 = vperm.xlu1 %450, %v185_v6   ;;  %193 = vperm.xlu0 %449, %v183_v14  }
  0x16   : > { %259 = vmatpush.bf16.msra.mxu0 %v405_v15  ;;  %434 = vmatpush.bf16.msra.mxu2 %v405_v15 }
  0x17   : > { %278 = vmatpush.bf16.msra.mxu1 %v409_v16  ;;  %437 = vmatpush.bf16.msra.mxu3 %v409_v16 }
  0x1a   : > { %260 = vmatpush.bf16.msra.mxu0 %v397_v21  ;;  %435 = vmatpush.bf16.msra.mxu2 %v397_v21 }
  0x1b   : > { %279 = vmatpush.bf16.msra.mxu1 %v401_v22  ;;  %438 = vmatpush.bf16.msra.mxu3 %v401_v22 }
  0x1d   : > { %418 = vmatmul.msk.bf16.vlgmr.msra.gmra.mxu0 %vm246_vm0, %v431_v23  ;;  %419 = vmatmul.msk.bf16.vlgmr.msra.gmra.mxu2 %vm246_vm0, %v432_v24 }
  0x1e   : > { %420 = vmatmul.msk.bf16.vlgmr.msra.gmra.mxu1 %vm246_vm0, %v431_v23  ;;  %421 = vmatmul.msk.bf16.vlgmr.msra.gmra.mxu3 %vm246_vm0, %v432_v24 }
  0x7f   : > { %v189_v25 = vpop.permute.xlu0 %188  ;;  %v199_v31 = vpop.permute.xlu1 %198 }
  0x87   : > { %v194_v39 = vpop.permute.xlu0 %193  ;;  %v204_v53 = vpop.permute.xlu1 %203 }
  0x9a   : > { %v262_v26 = vpop.f32.mrf.mxu0 }
  0x9b   : > { %v263_v27 = vadd.f32 %v262_v26, %v189_v25  ;;  %v281_v28 = vpop.f32.mrf.mxu1 }
  0x9c   : > { %v282_v29 = vadd.f32 %v281_v28, %v189_v25 }
  0x9d   : > { %vm291_vm1 = vcmp.ge.f32.partialorder %v263_v27, 0.0  ;;  %v299_v30 = vmul.f32 0.2, %v263_v27 }
  0x9e   : > { %vm292_vm2 = vcmp.ge.f32.partialorder %v282_v29, 0.0  ;;  %v300_v32 = vmul.f32 0.2, %v282_v29 }
  0x9f   : > { %v307_v33 = vsel %vm291_vm1, %v263_v27, %v299_v30 }
  0xa0   : > { %v308_v34 = vsel %vm292_vm2, %v282_v29, %v300_v32  ;;  %v267_v35 = vpop.f32.mrf.mxu2 }
  0xa1   : > { %v315_v36 = vpack.c.bf16 %v308_v34, %v307_v33  ;;  %v268_v37 = vadd.f32 %v267_v35, %v199_v31  ;;  %v286_v38 = vpop.f32.mrf.mxu3 }
  0xa2   : > { %v287_v40 = vadd.f32 %v286_v38, %v199_v31  ;;  %v264_v41 = vpop.f32.mrf.mxu0 }
  0xa3   : > { %319 = vst [vmem:[%s516_s6] sm:$0xff] %v315_v36  ;;  %vm295_vm3 = vcmp.ge.f32.partialorder %v268_v37, 0.0  ;;  %v303_v42 = vmul.f32 0.2, %v268_v37  ;;  %v265_v43 = vadd.f32 %v264_v41, %v194_v39  ;;  %v283_v44 = vpop.f32.mrf.mxu1 }
  0xa4   : > { %vm296_vm4 = vcmp.ge.f32.partialorder %v287_v40, 0.0  ;;  %v304_v45 = vmul.f32 0.2, %v287_v40  ;;  %v284_v46 = vadd.f32 %v283_v44, %v194_v39 }
  0xa5   : > { %v311_v47 = vsel %vm295_vm3, %v268_v37, %v303_v42  ;;  %vm293_vm5 = vcmp.ge.f32.partialorder %v265_v43, 0.0  ;;  %v301_v48 = vmul.f32 0.2, %v265_v43 }
  0xa6   : > { %v312_v49 = vsel %vm296_vm4, %v287_v40, %v304_v45  ;;  %vm294_vm6 = vcmp.ge.f32.partialorder %v284_v46, 0.0  ;;  %v302_v50 = vmul.f32 0.2, %v284_v46 }
  0xa7   : > { %v317_v51 = vpack.c.bf16 %v312_v49, %v311_v47  ;;  %v309_v52 = vsel %vm293_vm5, %v265_v43, %v301_v48 }
  0xa8   : > { %v310_v54 = vsel %vm294_vm6, %v284_v46, %v302_v50  ;;  %v269_v55 = vpop.f32.mrf.mxu2 }
  0xa9   : > { %321 = vst [vmem:[%s516_s6 + $0x10] sm:$0xff] %v317_v51  ;;  %v316_v56 = vpack.c.bf16 %v310_v54, %v309_v52  ;;  %v270_v57 = vadd.f32 %v269_v55, %v204_v53  ;;  %v288_v58 = vpop.f32.mrf.mxu3 }
  0xaa   : > { %v289_v59 = vadd.f32 %v288_v58, %v204_v53 }
  0xab   : > { %320 = vst [vmem:[%s516_s6 + $0x8] sm:$0xff] %v316_v56  ;;  %vm297_vm7 = vcmp.ge.f32.partialorder %v270_v57, 0.0  ;;  %v305_v60 = vmul.f32 0.2, %v270_v57 }
  0xac   : > { %vm298_vm8 = vcmp.ge.f32.partialorder %v289_v59, 0.0  ;;  %v306_v61 = vmul.f32 0.2, %v289_v59 }
  0xad   : > { %v313_v62 = vsel %vm297_vm7, %v270_v57, %v305_v60 }
  0xae   : > { %v314_v63 = vsel %vm298_vm8, %v289_v59, %v306_v61 }
  0xaf   : > { %v318_v0 = vpack.c.bf16 %v314_v63, %v313_v62 }
  0xb1   : > { %322 = vst [vmem:[%s516_s6 + $0x18] sm:$0xff] %v318_v0 }
  0xb2 PF: > { %s13_s12 = sadd.s32 1, %s457_s12  }
  0xb3   : > { %p10_p4 = scmp.ge.s32.totalorder %s13_s12, 4  }
  0xb5   :  { %12 = sbr.rel (!%p10_p4) target bundleno = 1 (0x1), region = 62 }

// kernel: patchgan_forward.6
= control target key start
LH: loop header
LB: loop body
LE: loop exit
PB: predicated region body
PF: predicated region fallthrough
CT: control target
= control target key end

     0   :  { %s1220_s9 = smov 0   ;;  %s1506_s0 = inlined_call_operand.vmem [shape: bf16[2,512,64], index: 0, kind: input, shape index: {}]   ;;  %s1507_s1 = inlined_call_operand.vmem [shape: bf16[64,512], index: 1, kind: input, shape index: {}]   ;;  %s1508_s2 = inlined_call_operand.vmem [shape: bf16[2,64,64], index: 2, kind: output, shape index: {}]  }
   0x1 LB: > { %s916_s10 = sadd.s32 4294967295, %s1202_s9   ;;  %p920_p0 = scmp.ge.s32.totalorder %s1202_s9, 1  ;;  %s1202_s9 = sphi %s1220_s9, %s12_s9  }
   0x2   : > { %p112_p1 = scmp.lt.s32.totalorder %s1202_s9, 3 }
   0x4   : > { %p113_p2 = pnand %p920_p0, %p112_p1 }
   0x5   : > { %p134_p3 = scmp.lt.s32.totalorder (!%p113_p2), %s916_s10, 1 }
   0x6   : > { %116 = sbr.rel (%p113_p2) target bundleno = 399 (0x18f), region = 28 }
   0xb   : > { %s1510_s10 = smov (!%p134_p3, %s916_s10), 1  ;;  %v927_v28 = vld [vmem:[%s1507_s1] sm:$0xf]  ;;  %v1155_v29 = vld [vmem:[%s1507_s1 + $0xc] sm:$0xf0]  ;;  %vm612_vm0 = vcmask 523264  }
   0xc   : > { %s1119_s11 = sshll.u32 %s1510_s10, 8  ;;  %v1153_v30 = vld [vmem:[%s1507_s1 + $0x4] sm:$0xf]  ;;  %v929_v35 = vld [vmem:[%s1507_s1 + $0x10] sm:$0xf0]  ;;  %v928_v40 = vor.u32 %v1155_v29, %v927_v28  ;;  %s1120_s27 = sshll.u32 %s1510_s10, 5 }
   0xd   : > { %s1234_s14 = scalar_lea.vmem %s1506_s0, %s1119_s11  ;;  %v935_v36 = vld [vmem:[%s1507_s1 + $0x8] sm:$0xf]  ;;  %v1156_v37 = vld [vmem:[%s1507_s1 + $0x14] sm:$0xf0]  ;;  %v1154_v38 = vld [vmem:[%s1507_s1 + $0xc] sm:$0xf]  ;;  %v932_v41 = vor.u32 %v1153_v30, %v929_v35  ;;  %s1441_s30 = scalar_lea.vmem %s1508_s2, %s1120_s27 }
   0xe   : > { %v1128_v0 = vld [vmem:[%s1234_s14 + $0x38] sm:$0xff]  ;;  %v1127_v4 = vld [vmem:[%s1234_s14 + $0x30] sm:$0xff]  ;;  %v1126_v8 = vld [vmem:[%s1234_s14 + $0x28] sm:$0xff]  ;;  %v936_v42 = vor.u32 %v1156_v37, %v935_v36  ;;  %vm852_vm6 = vcmask 519168  }
   0xf   : > { %v1136_v1 = vld [vmem:[%s1234_s14 + $0x78] sm:$0xff]  ;;  %496 = vmatpush.bf16.msra.mxu0 %v1128_v0  ;;  %v1135_v5 = vld [vmem:[%s1234_s14 + $0x70] sm:$0xff]  ;;  %v1134_v9 = vld [vmem:[%s1234_s14 + $0x68] sm:$0xff] }
  0x10   : > { %v1144_v2 = vld [vmem:[%s1234_s14 + $0xb8] sm:$0xff]  ;;  %525 = vmatpush.bf16.msra.mxu1 %v1136_v1  ;;  %v1143_v6 = vld [vmem:[%s1234_s14 + $0xb0] sm:$0xff]  ;;  %v1142_v10 = vld [vmem:[%s1234_s14 + $0xa8] sm:$0xff] }
  0x11   : > { %v1152_v3 = vld [vmem:[%s1234_s14 + $0xf8] sm:$0xff]  ;;  %554 = vmatpush.bf16.msra.mxu2 %v1144_v2  ;;  %v1151_v7 = vld [vmem:[%s1234_s14 + $0xf0] sm:$0xff]  ;;  %v1150_v11 = vld [vmem:[%s1234_s14 + $0xe8] sm:$0xff] }
  0x12   : > { %583 = vmatpush.bf16.msra.mxu3 %v1152_v3  ;;  %v1125_v12 = vld [vmem:[%s1234_s14 + $0x20] sm:$0xff]  ;;  %v1124_v16 = vld [vmem:[%s1234_s14 + $0x18] sm:$0xff]  ;;  %v1123_v20 = vld [vmem:[%s1234_s14 + $0x10] sm:$0xff] }
  0x13   : > { %497 = vmatpush.bf16.msra.mxu0 %v1127_v4  ;;  %v1133_v13 = vld [vmem:[%s1234_s14 + $0x60] sm:$0xff]  ;;  %v1132_v17 = vld [vmem:[%s1234_s14 + $0x58] sm:$0xff]  ;;  %v1131_v21 = vld [vmem:[%s1234_s14 + $0x50] sm:$0xff] }
  0x14   : > { %526 = vmatpush.bf16.msra.mxu1 %v1135_v5  ;;  %v1141_v14 = vld [vmem:[%s1234_s14 + $0xa0] sm:$0xff]  ;;  %v1140_v18 = vld [vmem:[%s1234_s14 + $0x98] sm:$0xff]  ;;  %v1139_v22 = vld [vmem:[%s1234_s14 + $0x90] sm:$0xff] }
  0x15   : > { %555 = vmatpush.bf16.msra.mxu2 %v1143_v6  ;;  %v1149_v15 = vld [vmem:[%s1234_s14 + $0xe0] sm:$0xff]  ;;  %v1148_v19 = vld [vmem:[%s1234_s14 + $0xd8] sm:$0xff]  ;;  %v1147_v23 = vld [vmem:[%s1234_s14 + $0xd0] sm:$0xff] }
  0x16   : > { %584 = vmatpush.bf16.msra.mxu3 %v1151_v7  ;;  %v1122_v24 = vld [vmem:[%s1234_s14 + $0x8] sm:$0xff]  ;;  %v1121_v31 = vld [vmem:[%s1234_s14] sm:$0xff]  ;;  %v937_v39 = vld [vmem:[%s1507_s1 + $0x18] sm:$0xf0] }
  0x17   : > { %498 = vmatpush.bf16.msra.mxu0 %v1126_v8  ;;  %v1130_v25 = vld [vmem:[%s1234_s14 + $0x48] sm:$0xff]  ;;  %v1129_v32 = vld [vmem:[%s1234_s14 + $0x40] sm:$0xff]  ;;  %v940_v43 = vor.u32 %v1154_v38, %v937_v39  ;;  %v1159_v45 = vld [vmem:[%s1507_s1 + $0x2c] sm:$0xf0] }
  0x18   : > { %527 = vmatpush.bf16.msra.mxu1 %v1134_v9  ;;  %v1138_v26 = vld [vmem:[%s1234_s14 + $0x88] sm:$0xff]  ;;  %v1137_v33 = vld [vmem:[%s1234_s14 + $0x80] sm:$0xff]  ;;  %v945_v47 = vld [vmem:[%s1507_s1 + $0x30] sm:$0xf0] }
  0x19   : > { %556 = vmatpush.bf16.msra.mxu2 %v1142_v10  ;;  %v1146_v27 = vld [vmem:[%s1234_s14 + $0xc8] sm:$0xff]  ;;  %v1145_v34 = vld [vmem:[%s1234_s14 + $0xc0] sm:$0xff]  ;;  %v1160_v49 = vld [vmem:[%s1507_s1 + $0x34] sm:$0xf0] }
  0x1a   : > { %585 = vmatpush.bf16.msra.mxu3 %v1150_v11  ;;  %v943_v44 = vld [vmem:[%s1507_s1 + $0x20] sm:$0xf]  ;;  %v1157_v46 = vld [vmem:[%s1507_s1 + $0x24] sm:$0xf]  ;;  %v951_v48 = vld [vmem:[%s1507_s1 + $0x28] sm:$0xf] }
  0x1b   : > { %499 = vmatpush.bf16.msra.mxu0 %v1125_v12  ;;  %v1158_v50 = vld [vmem:[%s1507_s1 + $0x2c] sm:$0xf]  ;;  %v953_v51 = vld [vmem:[%s1507_s1 + $0x38] sm:$0xf0]  ;;  %v944_v52 = vor.u32 %v1159_v45, %v943_v44  ;;  %v948_v53 = vor.u32 %v1157_v46, %v945_v47  ;;  %v952_v54 = vor.u32 %v1160_v49, %v951_v48  ;;  %v959_v56 = vld [vmem:[%s1507_s1 + $0x40] sm:$0xf] }
  0x1c   : > { %528 = vmatpush.bf16.msra.mxu1 %v1133_v13  ;;  %v956_v55 = vor.u32 %v1158_v50, %v953_v51  ;;  %v1163_v57 = vld [vmem:[%s1507_s1 + $0x4c] sm:$0xf0]  ;;  %v1161_v58 = vld [vmem:[%s1507_s1 + $0x44] sm:$0xf]  ;;  %v961_v59 = vld [vmem:[%s1507_s1 + $0x50] sm:$0xf0] }
  0x1d   : > { %557 = vmatpush.bf16.msra.mxu2 %v1141_v14  ;;  %v967_v60 = vld [vmem:[%s1507_s1 + $0x48] sm:$0xf]  ;;  %v1164_v61 = vld [vmem:[%s1507_s1 + $0x54] sm:$0xf0]  ;;  %v1162_v62 = vld [vmem:[%s1507_s1 + $0x4c] sm:$0xf]  ;;  %v960_v0 = vor.u32 %v1163_v57, %v959_v56  ;;  %v964_v1 = vor.u32 %v1161_v58, %v961_v59 }
  0x1e   : > { %586 = vmatpush.bf16.msra.mxu3 %v1149_v15  ;;  %v969_v63 = vld [vmem:[%s1507_s1 + $0x58] sm:$0xf0]  ;;  %v968_v2 = vor.u32 %v1164_v61, %v967_v60  ;;  %v975_v4 = vld [vmem:[%s1507_s1 + $0x60] sm:$0xf]  ;;  %v1167_v5 = vld [vmem:[%s1507_s1 + $0x6c] sm:$0xf0] }
  0x1f   : > { %500 = vmatpush.bf16.msra.mxu0 %v1124_v16  ;;  %v972_v3 = vor.u32 %v1162_v62, %v969_v63  ;;  %v1165_v6 = vld [vmem:[%s1507_s1 + $0x64] sm:$0xf]  ;;  %v977_v7 = vld [vmem:[%s1507_s1 + $0x70] sm:$0xf0]  ;;  %v983_v8 = vld [vmem:[%s1507_s1 + $0x68] sm:$0xf]  ;;  %v976_v12 = vor.u32 %v1167_v5, %v975_v4 }
  0x20   : > { %529 = vmatpush.bf16.msra.mxu1 %v1132_v17  ;;  %v1168_v9 = vld [vmem:[%s1507_s1 + $0x74] sm:$0xf0]  ;;  %v1166_v10 = vld [vmem:[%s1507_s1 + $0x6c] sm:$0xf]  ;;  %v985_v11 = vld [vmem:[%s1507_s1 + $0x78] sm:$0xf0]  ;;  %v980_v13 = vor.u32 %v1165_v6, %v977_v7 }
  0x21   : > { %558 = vmatpush.bf16.msra.mxu2 %v1140_v18  ;;  %v984_v14 = vor.u32 %v1168_v9, %v983_v8  ;;  %v988_v15 = vor.u32 %v1166_v10, %v985_v11 }
  0x22   : > { %587 = vmatpush.bf16.msra.mxu3 %v1148_v19 }
  0x23   : > { %501 = vmatpush.bf16.msra.mxu0 %v1123_v20 }
  0x24   : > { %530 = vmatpush.bf16.msra.mxu1 %v1131_v21 }
  0x25   : > { %559 = vmatpush.bf16.msra.mxu2 %v1139_v22 }
  0x26   : > { %588 = vmatpush.bf16.msra.mxu3 %v1147_v23 }
  0x27   : > { %502 = vmatpush.bf16.msra.mxu0 %v1122_v24 }
  0x28   : > { %531 = vmatpush.bf16.msra.mxu1 %v1130_v25 }
  0x29   : > { %560 = vmatpush.bf16.msra.mxu2 %v1138_v26 }
  0x2a   : > { %589 = vmatpush.bf16.msra.mxu3 %v1146_v27 }
  0x2b   : > { %503 = vmatpush.bf16.msra.mxu0 %v1121_v31 }
  0x2c   : > { %532 = vmatpush.bf16.msra.mxu1 %v1129_v32 }
  0x2d   : > { %561 = vmatpush.bf16.msra.mxu2 %v1137_v33 }
  0x2e   : > { %590 = vmatpush.bf16.msra.mxu3 %v1145_v34  ;;  %504 = vmatmul.bf16.vlgmr.msra.gmra.mxu0 %v928_v40 }
  0x2f   : > { %533 = vmatmul.bf16.vlgmr.msra.gmra.mxu1 %v932_v41 }
  0x30   : > { %562 = vmatmul.bf16.vlgmr.msra.gmra.mxu2 %v936_v42 }
  0x31   : > { %591 = vmatmul.bf16.vlgmr.msra.gmra.mxu3 %v940_v43 }
  0x3e   : > { %509 = vmatmul.bf16.gmra.mxu0 %v944_v52 }
  0x3f   : > { %538 = vmatmul.bf16.gmra.mxu1 %v948_v53 }
  0x40   : > { %567 = vmatmul.bf16.gmra.mxu2 %v952_v54 }
  0x41   : > { %596 = vmatmul.bf16.gmra.mxu3 %v956_v55 }
  0x4e   : > { %514 = vmatmul.bf16.gmra.mxu0 %v960_v0 }
  0x4f   : > { %543 = vmatmul.bf16.gmra.mxu1 %v964_v1 }
  0x50   : > { %572 = vmatmul.bf16.gmra.mxu2 %v968_v2 }
  0x51   : > { %601 = vmatmul.bf16.gmra.mxu3 %v972_v3 }
  0x5e   : > { %519 = vmatmul.bf16.gmra.mxu0 %v976_v12 }
  0x5f   : > { %548 = vmatmul.bf16.gmra.mxu1 %v980_v13 }
  0x60   : > { %577 = vmatmul.bf16.gmra.mxu2 %v984_v14 }
  0x61   : > { %606 = vmatmul.bf16.gmra.mxu3 %v988_v15 }
  0xab   : > { %v505_v16 = vpop.f32.mrf.mxu0 }
  0xac   : > { %v534_v17 = vpop.f32.mrf.mxu1 }
  0xad   : > { %v535_v18 = vadd.f32 %v534_v17, %v505_v16 }
  0xb3   : > { %v563_v19 = vpop.f32.mrf.mxu2  ;;  %v507_v22 = vpop.f32.mrf.mxu0 }
  0xb4   : > { %v592_v20 = vpop.f32.mrf.mxu3  ;;  %v564_v21 = vadd.f32 %v563_v19, %v535_v18  ;;  %v536_v23 = vpop.f32.mrf.mxu1 }
  0xb5   : > { %v537_v27 = vadd.f32 %v536_v23, %v507_v22 }
  0xb6   : > { %v1364_v24 = vadd.f32 %v592_v20, %v564_v21 }
  0xb8   : > { %v613_v25 = vsel %vm612_vm0, %v1364_v24, 0.0  ;;  %v652_v26 = vmul.f32 %v1364_v24, %v1364_v24 }
  0xb9   : > { %614 = vadd.xlane.f32.xlu0 %v613_v25 }
  0xba   : > { %v660_v28 = vsel %vm612_vm0, %v652_v26, 0.0 }
  0xbb   : > { %v565_v29 = vpop.f32.mrf.mxu2  ;;  %661 = vadd.xlane.f32.xlu2 %v660_v28  ;;  %v510_v32 = vpop.f32.mrf.mxu0 }
  0xbc   : > { %v594_v30 = vpop.f32.mrf.mxu3  ;;  %v566_v31 = vadd.f32 %v565_v29, %v537_v27  ;;  %v539_v33 = vpop.f32.mrf.mxu1 }
  0xbd   : > { %v540_v35 = vadd.f32 %v539_v33, %v510_v32  ;;  %v1204_v33 = vmov 64.0  }
  0xbe   : > { %v1371_v34 = vadd.f32 %v594_v30, %v566_v31  ;;  %1178 = vrcp.f32 %v1204_v33 }
  0xc0   : > { %v616_v36 = vsel %vm612_vm0, %v1371_v34, 0.0  ;;  %v653_v42 = vmul.f32 %v1371_v34, %v1371_v34 }
  0xc1   : > { %617 = vadd.xlane.f32.xlu0 %v616_v36 }
  0xc2   : > { %v663_v44 = vsel %vm612_vm0, %v653_v42, 0.0 }
  0xc3   : > { %v568_v37 = vpop.f32.mrf.mxu2  ;;  %v512_v40 = vpop.f32.mrf.mxu0 }
  0xc4   : > { %v597_v38 = vpop.f32.mrf.mxu3  ;;  %v569_v39 = vadd.f32 %v568_v37, %v540_v35  ;;  %v541_v41 = vpop.f32.mrf.mxu1 }
  0xc5   : > { %v542_v46 = vadd.f32 %v541_v41, %v512_v40  ;;  %v1179_v35 = vpop.eup %1178 }
  0xc6   : > { %v1377_v43 = vadd.f32 %v597_v38, %v569_v39  ;;  %v638_v36 = vmul.f32 64.0, %v1179_v35  ;;  %vm642_vm1 = vweird.f32 %v1179_v35 }
  0xc8   : > { %v619_v45 = vsel %vm612_vm0, %v1377_v43, 0.0  ;;  %v654_v52 = vmul.f32 %v1377_v43, %v1377_v43  ;;  %v639_v37 = vsub.f32 1.0, %v638_v36 }
  0xc9   : > { %664 = vadd.xlane.f32.xlu0 %v663_v44  ;;  %620 = vadd.xlane.f32.xlu1 %v619_v45 }
  0xca   : > { %v666_v55 = vsel %vm612_vm0, %v654_v52, 0.0  ;;  %v640_v38 = vmul.f32 %v1179_v35, %v639_v37 }
  0xcb   : > { %v570_v47 = vpop.f32.mrf.mxu2  ;;  %v515_v50 = vpop.f32.mrf.mxu0 }
  0xcc   : > { %v599_v48 = vpop.f32.mrf.mxu3  ;;  %v571_v49 = vadd.f32 %v570_v47, %v542_v46  ;;  %v544_v51 = vpop.f32.mrf.mxu1  ;;  %v641_v39 = vadd.f32 %v1179_v35, %v640_v38 }
  0xcd   : > { %v545_v54 = vadd.f32 %v544_v51, %v515_v50 }
  0xce   : > { %v1384_v53 = vadd.f32 %v599_v48, %v571_v49  ;;  %v1420_v40 = vsel %vm642_vm1, %v1179_v35, %v641_v39 }
  0xd0   : > { %v655_v56 = vmul.f32 %v1384_v53, %v1384_v53  ;;  %v622_v0 = vsel %vm612_vm0, %v1384_v53, 0.0 }
  0xd1   : > { %667 = vadd.xlane.f32.xlu1 %v666_v55 }
  0xd2   : > { %v669_v57 = vsel %vm612_vm0, %v655_v56, 0.0 }
  0xd3   : > { %v573_v58 = vpop.f32.mrf.mxu2  ;;  %670 = vadd.xlane.f32.xlu2 %v669_v57  ;;  %v517_v61 = vpop.f32.mrf.mxu0 }
  0xd4   : > { %v602_v59 = vpop.f32.mrf.mxu3  ;;  %v574_v60 = vadd.f32 %v573_v58, %v545_v54  ;;  %v546_v62 = vpop.f32.mrf.mxu1 }
  0xd5   : > { %v547_v2 = vadd.f32 %v546_v62, %v517_v61 }
  0xd6   : > { %v1390_v63 = vadd.f32 %v602_v59, %v574_v60 }
  0xd8   : > { %v656_v1 = vmul.f32 %v1390_v63, %v1390_v63  ;;  %v625_v4 = vsel %vm612_vm0, %v1390_v63, 0.0 }
  0xd9   : > { %623 = vadd.xlane.f32.xlu1 %v622_v0 }
  0xda   : > { %v672_v3 = vsel %vm612_vm0, %v656_v1, 0.0 }
  0xdb   : > { %v575_v5 = vpop.f32.mrf.mxu2  ;;  %673 = vadd.xlane.f32.xlu0 %v672_v3  ;;  %626 = vadd.xlane.f32.xlu2 %v625_v4  ;;  %v520_v8 = vpop.f32.mrf.mxu0 }
  0xdc   : > { %v604_v6 = vpop.f32.mrf.mxu3  ;;  %v576_v7 = vadd.f32 %v575_v5, %v547_v2  ;;  %v549_v9 = vpop.f32.mrf.mxu1 }
  0xdd   : > { %v550_v11 = vadd.f32 %v549_v9, %v520_v8 }
  0xde   : > { %v1399_v10 = vadd.f32 %v604_v6, %v576_v7 }
  0xe0   : > { %v628_v12 = vsel %vm612_vm0, %v1399_v10, 0.0  ;;  %v657_v31 = vmul.f32 %v1399_v10, %v1399_v10 }
  0xe2   : > { %v675_v32 = vsel %vm612_vm0, %v657_v31, 0.0 }
  0xe3   : > { %v578_v13 = vpop.f32.mrf.mxu2  ;;  %629 = vadd.xlane.f32.xlu2 %v628_v12  ;;  %v522_v17 = vpop.f32.mrf.mxu0 }
  0xe4   : > { %v607_v14 = vpop.f32.mrf.mxu3  ;;  %v579_v15 = vadd.f32 %v578_v13, %v550_v11  ;;  %v551_v18 = vpop.f32.mrf.mxu1 }
  0xe5   : > { %v552_v21 = vadd.f32 %v551_v18, %v522_v17 }
  0xe6   : > { %v1403_v16 = vadd.f32 %v607_v14, %v579_v15 }
  0xe8   : > { %v631_v19 = vsel %vm612_vm0, %v1403_v16, 0.0  ;;  %v658_v20 = vmul.f32 %v1403_v16, %v1403_v16 }
  0xe9   : > { %632 = vadd.xlane.f32.xlu0 %v631_v19 }
  0xea   : > { %v678_v22 = vsel %vm612_vm0, %v658_v20, 0.0 }
  0xeb   : > { %v580_v23 = vpop.f32.mrf.mxu2  ;;  %679 = vadd.xlane.f32.xlu2 %v678_v22 }
  0xec   : > { %v581_v25 = vadd.f32 %v580_v23, %v552_v21  ;;  %v609_v26 = vpop.f32.mrf.mxu3 }
  0xee   : > { %v1410_v27 = vadd.f32 %v609_v26, %v581_v25 }
  0xf0   : > { %v634_v28 = vsel %vm612_vm0, %v1410_v27, 0.0  ;;  %v659_v29 = vmul.f32 %v1410_v27, %v1410_v27 }
  0xf1   : > { %635 = vadd.xlane.f32.xlu1 %v634_v28 }
  0xf2   : > { %v681_v30 = vsel %vm612_vm0, %v659_v29, 0.0 }
  0xf3   : > { %682 = vadd.xlane.f32.xlu0 %v681_v30 }
  0xf9   : > { %676 = vadd.xlane.f32.xlu1 %v675_v32 }
 0x12c   : > { %v615_v41 = vpop.xlane.xlu0 %614 }
 0x12d   : > { %v644_v42 = vmul.f32 %v1420_v40, %v615_v41 }
 0x12e   : > { %v662_v44 = vpop.xlane.xlu2 %661 }
 0x12f   : > { %v692_v45 = vmul.f32 %v644_v42, %v644_v42  ;;  %v684_v46 = vmul.f32 %v662_v44, %v1420_v40  ;;  %v716_v8 = vsub.f32 %v1364_v24, %v644_v42 }
 0x131   : > { %v700_v47 = vsub.f32 %v684_v46, %v692_v45 }
 0x133   : > { %v708_v48 = vmax.f32 %v700_v47, 0.0 }
 0x134   : > { %v618_v49 = vpop.xlane.xlu0 %617 }
 0x135   : > { %v724_v50 = vadd.f32 1e-05, %v708_v48  ;;  %v1425_v51 = vmul.f32 %v1420_v40, %v618_v49 }
 0x137   : > { %1180 = vrsqrt.f32 %v724_v50  ;;  %v693_v56 = vmul.f32 %v1425_v51, %v1425_v51  ;;  %vm738_vm3 = vweird.f32 %v724_v50  ;;  %v717_v42 = vsub.f32 %v1371_v34, %v1425_v51 }
 0x13c   : > { %v665_v52 = vpop.xlane.xlu0 %664  ;;  %v621_v54 = vpop.xlane.xlu1 %620 }
 0x13d   : > { %v1181_v55 = vpop.eup %1180  ;;  %v685_v57 = vmul.f32 %v665_v52, %v1420_v40  ;;  %v1431_v62 = vmul.f32 %v1420_v40, %v621_v54 }
 0x13e   : > { %v733_v58 = vmul.f32 %v1181_v55, %v724_v50  ;;  %vm739_vm2 = vweird.f32 %v1181_v55 }
 0x13f   : > { %v701_v59 = vsub.f32 %v685_v57, %v693_v56  ;;  %v694_v4 = vmul.f32 %v1431_v62, %v1431_v62  ;;  %vm740_vm4 = vmor %vm738_vm3, %vm739_vm2 }
 0x140   : > { %v734_v60 = vmul.f32 %v1181_v55, %v733_v58 }
 0x141   : > { %v709_v61 = vmax.f32 %v701_v59, 0.0  ;;  %v718_v59 = vsub.f32 %v1377_v43, %v1431_v62 }
 0x142   : > { %v735_v0 = vmul.f32 0.5, %v734_v60 }
 0x143   : > { %v725_v1 = vadd.f32 1e-05, %v709_v61 }
 0x144   : > { %v736_v2 = vsub.f32 1.5, %v735_v0  ;;  %v668_v3 = vpop.xlane.xlu1 %667 }
 0x145   : > { %1182 = vrsqrt.f32 %v725_v1  ;;  %v686_v5 = vmul.f32 %v668_v3, %v1420_v40  ;;  %vm748_vm8 = vweird.f32 %v725_v1 }
 0x146   : > { %v737_v6 = vmul.f32 %v1181_v55, %v736_v2  ;;  %v671_v7 = vpop.xlane.xlu2 %670 }
 0x147   : > { %v702_v9 = vsub.f32 %v686_v5, %v694_v4  ;;  %v687_v26 = vmul.f32 %v671_v7, %v1420_v40 }
 0x148   : > { %v741_v11 = vsel %vm740_vm4, %v1181_v55, %v737_v6 }
 0x149   : > { %v812_v12 = vmul.f32 %v741_v11, %v716_v8  ;;  %v710_v13 = vmax.f32 %v702_v9, 0.0 }
 0x14b   : > { %v1183_v14 = vpop.eup %1182  ;;  %vm820_vm5 = vcmp.ge.f32.partialorder %v812_v12, 0.0  ;;  %v828_v15 = vmul.f32 0.2, %v812_v12  ;;  %v726_v17 = vadd.f32 1e-05, %v710_v13 }
 0x14c   : > { %v743_v18 = vmul.f32 %v1183_v14, %v725_v1  ;;  %v624_v19 = vpop.xlane.xlu1 %623  ;;  %vm749_vm7 = vweird.f32 %v1183_v14 }
 0x14d   : > { %v836_v24 = vsel %vm820_vm5, %v812_v12, %v828_v15  ;;  %1184 = vrsqrt.f32 %v726_v17  ;;  %v1444_v20 = vmul.f32 %v1420_v40, %v624_v19  ;;  %vm750_vm9 = vmor %vm748_vm8, %vm749_vm7  ;;  %vm758_vm12 = vweird.f32 %v726_v17 }
 0x14e   : > { %v844_v21 = vpack.c.bf16 %v836_v24, %v836_v24  ;;  %v744_v22 = vmul.f32 %v1183_v14, %v743_v18  ;;  %v674_v23 = vpop.xlane.xlu0 %673  ;;  %v627_v25 = vpop.xlane.xlu2 %626 }
 0x14f   : > { %v695_v28 = vmul.f32 %v1444_v20, %v1444_v20  ;;  %v1450_v29 = vmul.f32 %v1420_v40, %v627_v25  ;;  %v688_v32 = vmul.f32 %v674_v23, %v1420_v40  ;;  %v719_v23 = vsub.f32 %v1384_v53, %v1444_v20 }
 0x150   : > { %853 = vst.msk [vmem:[%s1441_s30] sm:$0xf] %vm852_vm6, %v844_v21  ;;  %v745_v30 = vmul.f32 0.5, %v744_v22 }
 0x151   : > { %v703_v31 = vsub.f32 %v687_v26, %v695_v28  ;;  %v696_v33 = vmul.f32 %v1450_v29, %v1450_v29 }
 0x152   : > { %v746_v35 = vsub.f32 1.5, %v745_v30 }
 0x153   : > { %v1185_v36 = vpop.eup %1184  ;;  %v711_v37 = vmax.f32 %v703_v31, 0.0  ;;  %v704_v38 = vsub.f32 %v688_v32, %v696_v33  ;;  %v720_v33 = vsub.f32 %v1390_v63, %v1450_v29 }
 0x154   : > { %v747_v39 = vmul.f32 %v1183_v14, %v746_v35  ;;  %v753_v41 = vmul.f32 %v1185_v36, %v726_v17  ;;  %vm759_vm11 = vweird.f32 %v1185_v36 }
 0x155   : > { %v727_v44 = vadd.f32 1e-05, %v711_v37  ;;  %v712_v45 = vmax.f32 %v704_v38, 0.0  ;;  %vm760_vm13 = vmor %vm758_vm12, %vm759_vm11 }
 0x156   : > { %v751_v46 = vsel %vm750_vm9, %v1183_v14, %v747_v39  ;;  %v754_v47 = vmul.f32 %v1185_v36, %v753_v41  ;;  %v630_v48 = vpop.xlane.xlu2 %629 }
 0x157   : > { %v813_v49 = vmul.f32 %v751_v46, %v717_v42  ;;  %1186 = vrsqrt.f32 %v727_v44  ;;  %v728_v50 = vadd.f32 1e-05, %v712_v45  ;;  %vm768_vm0 = vweird.f32 %v727_v44 }
 0x158   : > { %v755_v52 = vmul.f32 0.5, %v754_v47  ;;  %v1477_v25 = vmul.f32 %v1420_v40, %v630_v48 }
 0x159   : > { %vm821_vm10 = vcmp.ge.f32.partialorder %v813_v49, 0.0  ;;  %v829_v54 = vmul.f32 0.2, %v813_v49  ;;  %1188 = vrsqrt.f32 %v728_v50  ;;  %vm778_vm3 = vweird.f32 %v728_v50 }
 0x15a   : > { %v756_v55 = vsub.f32 1.5, %v755_v52  ;;  %v697_v37 = vmul.f32 %v1477_v25, %v1477_v25 }
 0x15b   : > { %v837_v56 = vsel %vm821_vm10, %v813_v49, %v829_v54 }
 0x15c   : > { %v845_v57 = vpack.c.bf16 %v837_v56, %v837_v56  ;;  %v757_v58 = vmul.f32 %v1185_v36, %v756_v55  ;;  %v633_v34 = vpop.xlane.xlu0 %632 }
 0x15d   : > { %v1187_v51 = vpop.eup %1186  ;;  %v1462_v60 = vmul.f32 %v1420_v40, %v633_v34 }
 0x15e   : > { %854 = vst.msk [vmem:[%s1441_s30 + $0x4] sm:$0xf] %vm852_vm6, %v845_v57  ;;  %v761_v61 = vsel %vm760_vm13, %v1185_v36, %v757_v58  ;;  %v763_v0 = vmul.f32 %v1187_v51, %v727_v44  ;;  %v680_v1 = vpop.xlane.xlu2 %679  ;;  %vm769_vm15 = vweird.f32 %v1187_v51 }
 0x15f   : > { %v1189_v2 = vpop.eup %1188  ;;  %v814_v3 = vmul.f32 %v761_v61, %v718_v59  ;;  %v698_v4 = vmul.f32 %v1462_v60, %v1462_v60  ;;  %v690_v5 = vmul.f32 %v680_v1, %v1420_v40  ;;  %vm770_vm2 = vmor %vm768_vm0, %vm769_vm15  ;;  %v722_v58 = vsub.f32 %v1403_v16, %v1462_v60 }
 0x160   : > { %v764_v6 = vmul.f32 %v1187_v51, %v763_v0  ;;  %v773_v7 = vmul.f32 %v1189_v2, %v728_v50  ;;  %vm779_vm1 = vweird.f32 %v1189_v2 }
 0x161   : > { %vm822_vm14 = vcmp.ge.f32.partialorder %v814_v3, 0.0  ;;  %v830_v43 = vmul.f32 0.2, %v814_v3  ;;  %v706_v62 = vsub.f32 %v690_v5, %v698_v4  ;;  %vm780_vm4 = vmor %vm778_vm3, %vm779_vm1 }
 0x162   : > { %v765_v8 = vmul.f32 0.5, %v764_v6  ;;  %v774_v9 = vmul.f32 %v1189_v2, %v773_v7 }
 0x163   : > { %v838_v11 = vsel %vm822_vm14, %v814_v3, %v830_v43  ;;  %v714_v12 = vmax.f32 %v706_v62, 0.0 }
 0x164   : > { %v846_v13 = vpack.c.bf16 %v838_v11, %v838_v11  ;;  %v766_v14 = vsub.f32 1.5, %v765_v8  ;;  %v775_v15 = vmul.f32 0.5, %v774_v9  ;;  %v636_v17 = vpop.xlane.xlu1 %635 }
 0x165   : > { %v730_v18 = vadd.f32 1e-05, %v714_v12  ;;  %v1470_v19 = vmul.f32 %v1420_v40, %v636_v17 }
 0x166   : > { %855 = vst.msk [vmem:[%s1441_s30 + $0x8] sm:$0xf] %vm852_vm6, %v846_v13  ;;  %v767_v24 = vmul.f32 %v1187_v51, %v766_v14  ;;  %v776_v21 = vsub.f32 1.5, %v775_v15  ;;  %v683_v22 = vpop.xlane.xlu0 %682  ;;  %v721_v13 = vsub.f32 %v1399_v10, %v1477_v25 }
 0x167   : > { %1190 = vrsqrt.f32 %v730_v18  ;;  %v699_v26 = vmul.f32 %v1470_v19, %v1470_v19  ;;  %v691_v31 = vmul.f32 %v683_v22, %v1420_v40  ;;  %vm798_vm9 = vweird.f32 %v730_v18 }
 0x168   : > { %v771_v28 = vsel %vm770_vm2, %v1187_v51, %v767_v24  ;;  %v777_v30 = vmul.f32 %v1189_v2, %v776_v21  ;;  %v723_v16 = vsub.f32 %v1410_v27, %v1470_v19 }
 0x169   : > { %v815_v32 = vmul.f32 %v771_v28, %v719_v23  ;;  %v707_v53 = vsub.f32 %v691_v31, %v699_v26 }
 0x16a   : > { %v781_v35 = vsel %vm780_vm4, %v1189_v2, %v777_v30 }
 0x16b   : > { %vm823_vm5 = vcmp.ge.f32.partialorder %v815_v32, 0.0  ;;  %v831_v20 = vmul.f32 0.2, %v815_v32  ;;  %v816_v36 = vmul.f32 %v781_v35, %v720_v33  ;;  %v715_v38 = vmax.f32 %v707_v53, 0.0 }
 0x16c   : > { %v677_v39 = vpop.xlane.xlu1 %676 }
 0x16d   : > { %v1191_v41 = vpop.eup %1190  ;;  %v839_v42 = vsel %vm823_vm5, %v815_v32, %v831_v20  ;;  %vm824_vm7 = vcmp.ge.f32.partialorder %v816_v36, 0.0  ;;  %v832_v44 = vmul.f32 0.2, %v816_v36  ;;  %v689_v45 = vmul.f32 %v677_v39, %v1420_v40 }
 0x16e   : > { %v847_v63 = vpack.c.bf16 %v839_v42, %v839_v42  ;;  %v793_v29 = vmul.f32 %v1191_v41, %v730_v18  ;;  %v731_v46 = vadd.f32 1e-05, %v715_v38  ;;  %vm799_vm8 = vweird.f32 %v1191_v41 }
 0x16f   : > { %v840_v47 = vsel %vm824_vm7, %v816_v36, %v832_v44  ;;  %v705_v48 = vsub.f32 %v689_v45, %v697_v37  ;;  %vm800_vm10 = vmor %vm798_vm9, %vm799_vm8 }
 0x170   : > { %856 = vst.msk [vmem:[%s1441_s30 + $0xc] sm:$0xf] %vm852_vm6, %v847_v63  ;;  %v848_v49 = vpack.c.bf16 %v840_v47, %v840_v47  ;;  %v794_v50 = vmul.f32 %v1191_v41, %v793_v29  ;;  %1192 = vrsqrt.f32 %v731_v46  ;;  %vm808_vm13 = vweird.f32 %v731_v46 }
 0x171   : > { %v713_v52 = vmax.f32 %v705_v48, 0.0 }
 0x172   : > { %857 = vst.msk [vmem:[%s1441_s30 + $0x10] sm:$0xf] %vm852_vm6, %v848_v49  ;;  %v795_v54 = vmul.f32 0.5, %v794_v50 }
 0x173   : > { %v729_v55 = vadd.f32 1e-05, %v713_v52 }
 0x174   : > { %v796_v56 = vsub.f32 1.5, %v795_v54 }
 0x175   : > { %1194 = vrsqrt.f32 %v729_v55  ;;  %vm788_vm1 = vweird.f32 %v729_v55 }
 0x176   : > { %v1193_v57 = vpop.eup %1192  ;;  %v797_v40 = vmul.f32 %v1191_v41, %v796_v56 }
 0x177   : > { %v803_v34 = vmul.f32 %v1193_v57, %v731_v46  ;;  %vm809_vm12 = vweird.f32 %v1193_v57 }
 0x178   : > { %v801_v51 = vsel %vm800_vm10, %v1191_v41, %v797_v40  ;;  %vm810_vm14 = vmor %vm808_vm13, %vm809_vm12 }
 0x179   : > { %v818_v59 = vmul.f32 %v801_v51, %v722_v58  ;;  %v804_v61 = vmul.f32 %v1193_v57, %v803_v34 }
 0x17b   : > { %v1195_v0 = vpop.eup %1194  ;;  %vm826_vm11 = vcmp.ge.f32.partialorder %v818_v59, 0.0  ;;  %v834_v1 = vmul.f32 0.2, %v818_v59  ;;  %v805_v2 = vmul.f32 0.5, %v804_v61 }
 0x17c   : > { %v783_v3 = vmul.f32 %v1195_v0, %v729_v55  ;;  %vm789_vm15 = vweird.f32 %v1195_v0 }
 0x17d   : > { %v842_v4 = vsel %vm826_vm11, %v818_v59, %v834_v1  ;;  %v806_v5 = vsub.f32 1.5, %v805_v2  ;;  %vm790_vm2 = vmor %vm788_vm1, %vm789_vm15 }
 0x17e   : > { %v850_v6 = vpack.c.bf16 %v842_v4, %v842_v4  ;;  %v784_v7 = vmul.f32 %v1195_v0, %v783_v3 }
 0x17f   : > { %v807_v43 = vmul.f32 %v1193_v57, %v806_v5 }
 0x180   : > { %859 = vst.msk [vmem:[%s1441_s30 + $0x18] sm:$0xf] %vm852_vm6, %v850_v6  ;;  %v785_v60 = vmul.f32 0.5, %v784_v7 }
 0x181   : > { %v811_v62 = vsel %vm810_vm14, %v1193_v57, %v807_v43 }
 0x182   : > { %v819_v8 = vmul.f32 %v811_v62, %v723_v16  ;;  %v786_v9 = vsub.f32 1.5, %v785_v60 }
 0x184   : > { %vm827_vm0 = vcmp.ge.f32.partialorder %v819_v8, 0.0  ;;  %v835_v11 = vmul.f32 0.2, %v819_v8  ;;  %v787_v12 = vmul.f32 %v1195_v0, %v786_v9 }
 0x186   : > { %v843_v14 = vsel %vm827_vm0, %v819_v8, %v835_v11  ;;  %v791_v15 = vsel %vm790_vm2, %v1195_v0, %v787_v12 }
 0x187   : > { %v851_v17 = vpack.c.bf16 %v843_v14, %v843_v14  ;;  %v817_v27 = vmul.f32 %v791_v15, %v721_v13 }
 0x189   : > { %860 = vst.msk [vmem:[%s1441_s30 + $0x1c] sm:$0xf] %vm852_vm6, %v851_v17  ;;  %vm825_vm3 = vcmp.ge.f32.partialorder %v817_v27, 0.0  ;;  %v833_v18 = vmul.f32 0.2, %v817_v27 }
 0x18b   : > { %v841_v19 = vsel %vm825_vm3, %v817_v27, %v833_v18 }
 0x18c   : > { %v849_v24 = vpack.c.bf16 %v841_v19, %v841_v19 }
 0x18e   : > { %858 = vst.msk [vmem:[%s1441_s30 + $0x14] sm:$0xf] %vm852_vm6, %v849_v24 }
 0x18f PF: > { %s12_s9 = sadd.s32 1, %s1202_s9  }
 0x190   : > { %p9_p4 = scmp.ge.s32.totalorder %s12_s9, 4  }
 0x192   :  { %11 = sbr.rel (!%p9_p4) target bundleno = 1 (0x1), region = 58 }

// kernel: patchgan_forward.7
= control target key start
LH: loop header
LB: loop body
LE: loop exit
PB: predicated region body
PF: predicated region fallthrough
CT: control target
= control target key end

     0   :  { %s2696_s9 = smov 0   ;;  %s3497_s0 = inlined_call_operand.vmem [shape: bf16[2,1024,16], index: 0, kind: input, shape index: {}]   ;;  %s3498_s1 = inlined_call_operand.vmem [shape: bf16[128,1024], index: 1, kind: input, shape index: {}]   ;;  %s3499_s2 = inlined_call_operand.vmem [shape: bf16[2,128,16], index: 2, kind: output, shape index: {}]  }
   0x1 LB: > { %s1976_s10 = sadd.s32 4294967295, %s2678_s9   ;;  %p1980_p0 = scmp.ge.s32.totalorder %s2678_s9, 1  ;;  %s2678_s9 = sphi %s2696_s9, %s12_s9  }
   0x2   : > { %p112_p1 = scmp.lt.s32.totalorder %s2678_s9, 3 }
   0x4   : > { %p113_p2 = pnand %p1980_p0, %p112_p1 }
   0x5   : > { %p134_p3 = scmp.lt.s32.totalorder (!%p113_p2), %s1976_s10, 1 }
   0x6   : > { %116 = sbr.rel (%p113_p2) target bundleno = 592 (0x250), region = 28 }
   0xb   : > { %s3501_s10 = smov (!%p134_p3, %s1976_s10), 1  ;;  %v1987_v28 = vld [vmem:[%s3498_s1] sm:$0xf]  ;;  %v2565_v30 = vld [vmem:[%s3498_s1 + $0x4] sm:$0xf]  ;;  %vm1432_vm0 = vcmask 130048  }
   0xc   : > { %s2499_s11 = sshll.u32 %s3501_s10, 9  ;;  %v2569_v29 = vld [vmem:[%s3498_s1 + $0x1c] sm:$0xf0]  ;;  %v1989_v35 = vld [vmem:[%s3498_s1 + $0x20] sm:$0xf0]  ;;  %s2500_s15 = sshll.u32 %s3501_s10, 6 }
   0xd   : > { %s2710_s14 = scalar_lea.vmem %s3497_s0, %s2499_s11  ;;  %v1995_v36 = vld [vmem:[%s3498_s1 + $0x8] sm:$0xf]  ;;  %v2566_v38 = vld [vmem:[%s3498_s1 + $0xc] sm:$0xf]  ;;  %v1988_v42 = vor.u32 %v2569_v29, %v1987_v28  ;;  %v1992_v43 = vor.u32 %v2565_v30, %v1989_v35  ;;  %v2019_v56 = vld [vmem:[%s3498_s1 + $0x40] sm:$0xf]  ;;  %s3344_s18 = scalar_lea.vmem %s3499_s2, %s2500_s15 }
   0xe   : > { %v2508_v0 = vld [vmem:[%s2710_s14 + $0x38] sm:$0xff]  ;;  %v2507_v4 = vld [vmem:[%s2710_s14 + $0x30] sm:$0xff]  ;;  %v2506_v8 = vld [vmem:[%s2710_s14 + $0x28] sm:$0xff]  ;;  %vm1904_vm6 = vcmask 125952  }
   0xf   : > { %v2516_v1 = vld [vmem:[%s2710_s14 + $0x78] sm:$0xff]  ;;  %1040 = vmatpush.bf16.msra.mxu0 %v2508_v0  ;;  %v2515_v5 = vld [vmem:[%s2710_s14 + $0x70] sm:$0xff]  ;;  %v2514_v9 = vld [vmem:[%s2710_s14 + $0x68] sm:$0xff] }
  0x10   : > { %v2524_v2 = vld [vmem:[%s2710_s14 + $0xb8] sm:$0xff]  ;;  %1089 = vmatpush.bf16.msra.mxu1 %v2516_v1  ;;  %v2523_v6 = vld [vmem:[%s2710_s14 + $0xb0] sm:$0xff]  ;;  %v2522_v10 = vld [vmem:[%s2710_s14 + $0xa8] sm:$0xff] }
  0x11   : > { %v2532_v3 = vld [vmem:[%s2710_s14 + $0xf8] sm:$0xff]  ;;  %1138 = vmatpush.bf16.msra.mxu2 %v2524_v2  ;;  %v2531_v7 = vld [vmem:[%s2710_s14 + $0xf0] sm:$0xff]  ;;  %v2530_v11 = vld [vmem:[%s2710_s14 + $0xe8] sm:$0xff] }
  0x12   : > { %1187 = vmatpush.bf16.msra.mxu3 %v2532_v3  ;;  %v2505_v12 = vld [vmem:[%s2710_s14 + $0x20] sm:$0xff]  ;;  %v2504_v16 = vld [vmem:[%s2710_s14 + $0x18] sm:$0xff]  ;;  %v2503_v20 = vld [vmem:[%s2710_s14 + $0x10] sm:$0xff] }
  0x13   : > { %1041 = vmatpush.bf16.msra.mxu0 %v2507_v4  ;;  %v2513_v13 = vld [vmem:[%s2710_s14 + $0x60] sm:$0xff]  ;;  %v2512_v17 = vld [vmem:[%s2710_s14 + $0x58] sm:$0xff]  ;;  %v2511_v21 = vld [vmem:[%s2710_s14 + $0x50] sm:$0xff] }
  0x14   : > { %1090 = vmatpush.bf16.msra.mxu1 %v2515_v5  ;;  %v2521_v14 = vld [vmem:[%s2710_s14 + $0xa0] sm:$0xff]  ;;  %v2520_v18 = vld [vmem:[%s2710_s14 + $0x98] sm:$0xff]  ;;  %v2519_v22 = vld [vmem:[%s2710_s14 + $0x90] sm:$0xff] }
  0x15   : > { %1139 = vmatpush.bf16.msra.mxu2 %v2523_v6  ;;  %v2529_v15 = vld [vmem:[%s2710_s14 + $0xe0] sm:$0xff]  ;;  %v2528_v19 = vld [vmem:[%s2710_s14 + $0xd8] sm:$0xff]  ;;  %v2527_v23 = vld [vmem:[%s2710_s14 + $0xd0] sm:$0xff] }
  0x16   : > { %1188 = vmatpush.bf16.msra.mxu3 %v2531_v7  ;;  %v2502_v24 = vld [vmem:[%s2710_s14 + $0x8] sm:$0xff]  ;;  %v2501_v31 = vld [vmem:[%s2710_s14] sm:$0xff]  ;;  %v2556_v40 = vld [vmem:[%s2710_s14 + $0x1b8] sm:$0xff] }
  0x17   : > { %1042 = vmatpush.bf16.msra.mxu0 %v2506_v8  ;;  %v2510_v25 = vld [vmem:[%s2710_s14 + $0x48] sm:$0xff]  ;;  %v2509_v32 = vld [vmem:[%s2710_s14 + $0x40] sm:$0xff]  ;;  %v2540_v41 = vld [vmem:[%s2710_s14 + $0x138] sm:$0xff] }
  0x18   : > { %1091 = vmatpush.bf16.msra.mxu1 %v2514_v9  ;;  %v2518_v26 = vld [vmem:[%s2710_s14 + $0x88] sm:$0xff]  ;;  %v2517_v33 = vld [vmem:[%s2710_s14 + $0x80] sm:$0xff]  ;;  %v2564_v46 = vld [vmem:[%s2710_s14 + $0x1f8] sm:$0xff] }
  0x19   : > { %1140 = vmatpush.bf16.msra.mxu2 %v2522_v10  ;;  %v2526_v27 = vld [vmem:[%s2710_s14 + $0xc8] sm:$0xff]  ;;  %v2525_v34 = vld [vmem:[%s2710_s14 + $0xc0] sm:$0xff]  ;;  %v2548_v47 = vld [vmem:[%s2710_s14 + $0x178] sm:$0xff] }
  0x1a   : > { %1189 = vmatpush.bf16.msra.mxu3 %v2530_v11  ;;  %v2570_v37 = vld [vmem:[%s3498_s1 + $0x24] sm:$0xf0]  ;;  %v1997_v39 = vld [vmem:[%s3498_s1 + $0x28] sm:$0xf0]  ;;  %v2555_v48 = vld [vmem:[%s2710_s14 + $0x1b0] sm:$0xff] }
  0x1b   : > { %1043 = vmatpush.bf16.msra.mxu0 %v2505_v12  ;;  %v1996_v44 = vor.u32 %v2570_v37, %v1995_v36  ;;  %v2000_v45 = vor.u32 %v2566_v38, %v1997_v39  ;;  %v2539_v49 = vld [vmem:[%s2710_s14 + $0x130] sm:$0xff]  ;;  %v2554_v52 = vld [vmem:[%s2710_s14 + $0x1a8] sm:$0xff]  ;;  %v2577_v57 = vld [vmem:[%s3498_s1 + $0x5c] sm:$0xf0] }
  0x1c   : > { %1092 = vmatpush.bf16.msra.mxu1 %v2513_v13  ;;  %v2563_v50 = vld [vmem:[%s2710_s14 + $0x1f0] sm:$0xff]  ;;  %v2538_v53 = vld [vmem:[%s2710_s14 + $0x128] sm:$0xff]  ;;  %v2573_v58 = vld [vmem:[%s3498_s1 + $0x44] sm:$0xf]  ;;  %v2020_v0 = vor.u32 %v2577_v57, %v2019_v56 }
  0x1d   : > { %1141 = vmatpush.bf16.msra.mxu2 %v2521_v14  ;;  %v2547_v51 = vld [vmem:[%s2710_s14 + $0x170] sm:$0xff]  ;;  %v2562_v54 = vld [vmem:[%s2710_s14 + $0x1e8] sm:$0xff]  ;;  %v2021_v59 = vld [vmem:[%s3498_s1 + $0x60] sm:$0xf0] }
  0x1e   : > { %1190 = vmatpush.bf16.msra.mxu3 %v2529_v15  ;;  %v2546_v55 = vld [vmem:[%s2710_s14 + $0x168] sm:$0xff]  ;;  %v2024_v1 = vor.u32 %v2573_v58, %v2021_v59  ;;  %v2553_v4 = vld [vmem:[%s2710_s14 + $0x1a0] sm:$0xff]  ;;  %v2551_v36 = vld [vmem:[%s2710_s14 + $0x190] sm:$0xff] }
  0x1f   : > { %1044 = vmatpush.bf16.msra.mxu0 %v2504_v16  ;;  %v2027_v60 = vld [vmem:[%s3498_s1 + $0x48] sm:$0xf]  ;;  %v2574_v62 = vld [vmem:[%s3498_s1 + $0x4c] sm:$0xf]  ;;  %v2537_v5 = vld [vmem:[%s2710_s14 + $0x120] sm:$0xff] }
  0x20   : > { %1093 = vmatpush.bf16.msra.mxu1 %v2512_v17  ;;  %v2578_v61 = vld [vmem:[%s3498_s1 + $0x64] sm:$0xf0]  ;;  %v2029_v63 = vld [vmem:[%s3498_s1 + $0x68] sm:$0xf0]  ;;  %v2561_v6 = vld [vmem:[%s2710_s14 + $0x1e0] sm:$0xff] }
  0x21   : > { %1142 = vmatpush.bf16.msra.mxu2 %v2520_v18  ;;  %v2028_v2 = vor.u32 %v2578_v61, %v2027_v60  ;;  %v2032_v3 = vor.u32 %v2574_v62, %v2029_v63  ;;  %v2545_v7 = vld [vmem:[%s2710_s14 + $0x160] sm:$0xff]  ;;  %v2059_v12 = vld [vmem:[%s3498_s1 + $0x88] sm:$0xf]  ;;  %v2582_v14 = vld [vmem:[%s3498_s1 + $0x8c] sm:$0xf] }
  0x22   : > { %1191 = vmatpush.bf16.msra.mxu3 %v2528_v19  ;;  %v2051_v8 = vld [vmem:[%s3498_s1 + $0x80] sm:$0xf]  ;;  %v2581_v10 = vld [vmem:[%s3498_s1 + $0x84] sm:$0xf]  ;;  %v2586_v13 = vld [vmem:[%s3498_s1 + $0xa4] sm:$0xf0] }
  0x23   : > { %1045 = vmatpush.bf16.msra.mxu0 %v2503_v20  ;;  %v2585_v9 = vld [vmem:[%s3498_s1 + $0x9c] sm:$0xf0]  ;;  %v2053_v11 = vld [vmem:[%s3498_s1 + $0xa0] sm:$0xf0]  ;;  %v2061_v15 = vld [vmem:[%s3498_s1 + $0xa8] sm:$0xf0]  ;;  %v2060_v18 = vor.u32 %v2586_v13, %v2059_v12 }
  0x24   : > { %1094 = vmatpush.bf16.msra.mxu1 %v2511_v21  ;;  %v2052_v16 = vor.u32 %v2585_v9, %v2051_v8  ;;  %v2056_v17 = vor.u32 %v2581_v10, %v2053_v11  ;;  %v2064_v19 = vor.u32 %v2582_v14, %v2061_v15  ;;  %v2552_v20 = vld [vmem:[%s2710_s14 + $0x198] sm:$0xff]  ;;  %v2091_v28 = vld [vmem:[%s3498_s1 + $0xc8] sm:$0xf]  ;;  %v2590_v30 = vld [vmem:[%s3498_s1 + $0xcc] sm:$0xf] }
  0x25   : > { %1143 = vmatpush.bf16.msra.mxu2 %v2519_v22  ;;  %v2536_v21 = vld [vmem:[%s2710_s14 + $0x118] sm:$0xff]  ;;  %v2594_v29 = vld [vmem:[%s3498_s1 + $0xe4] sm:$0xf0]  ;;  %v2535_v37 = vld [vmem:[%s2710_s14 + $0x110] sm:$0xff] }
  0x26   : > { %1192 = vmatpush.bf16.msra.mxu3 %v2527_v23  ;;  %v2560_v22 = vld [vmem:[%s2710_s14 + $0x1d8] sm:$0xff]  ;;  %v2559_v38 = vld [vmem:[%s2710_s14 + $0x1d0] sm:$0xff]  ;;  %v2147_v56 = vld [vmem:[%s3498_s1 + $0x140] sm:$0xf] }
  0x27   : > { %1046 = vmatpush.bf16.msra.mxu0 %v2502_v24  ;;  %v2544_v23 = vld [vmem:[%s2710_s14 + $0x158] sm:$0xff]  ;;  %v2083_v24 = vld [vmem:[%s3498_s1 + $0xc0] sm:$0xf]  ;;  %v2543_v39 = vld [vmem:[%s2710_s14 + $0x150] sm:$0xff] }
  0x28   : > { %1095 = vmatpush.bf16.msra.mxu1 %v2510_v25  ;;  %v2593_v25 = vld [vmem:[%s3498_s1 + $0xdc] sm:$0xf0]  ;;  %v2605_v58 = vld [vmem:[%s3498_s1 + $0x144] sm:$0xf]  ;;  %v2155_v60 = vld [vmem:[%s3498_s1 + $0x148] sm:$0xf] }
  0x29   : > { %1144 = vmatpush.bf16.msra.mxu2 %v2518_v26  ;;  %v2589_v26 = vld [vmem:[%s3498_s1 + $0xc4] sm:$0xf]  ;;  %v2609_v57 = vld [vmem:[%s3498_s1 + $0x15c] sm:$0xf0]  ;;  %v2610_v61 = vld [vmem:[%s3498_s1 + $0x164] sm:$0xf0] }
  0x2a   : > { %1193 = vmatpush.bf16.msra.mxu3 %v2526_v27  ;;  %v2085_v27 = vld [vmem:[%s3498_s1 + $0xe0] sm:$0xf0]  ;;  %v2606_v62 = vld [vmem:[%s3498_s1 + $0x14c] sm:$0xf]  ;;  %v2179_v8 = vld [vmem:[%s3498_s1 + $0x180] sm:$0xf] }
  0x2b   : > { %1047 = vmatpush.bf16.msra.mxu0 %v2501_v31  ;;  %v2093_v31 = vld [vmem:[%s3498_s1 + $0xe8] sm:$0xf0]  ;;  %v2149_v59 = vld [vmem:[%s3498_s1 + $0x160] sm:$0xf0]  ;;  %v2617_v9 = vld [vmem:[%s3498_s1 + $0x19c] sm:$0xf0] }
  0x2c   : > { %1096 = vmatpush.bf16.msra.mxu1 %v2509_v32  ;;  %v2084_v32 = vor.u32 %v2593_v25, %v2083_v24  ;;  %v2096_v35 = vor.u32 %v2590_v30, %v2093_v31  ;;  %v2157_v63 = vld [vmem:[%s3498_s1 + $0x168] sm:$0xf0]  ;;  %v2613_v10 = vld [vmem:[%s3498_s1 + $0x184] sm:$0xf]  ;;  %v2187_v12 = vld [vmem:[%s3498_s1 + $0x188] sm:$0xf] }
  0x2d   : > { %1145 = vmatpush.bf16.msra.mxu2 %v2517_v33  ;;  %v2088_v33 = vor.u32 %v2589_v26, %v2085_v27  ;;  %v2181_v11 = vld [vmem:[%s3498_s1 + $0x1a0] sm:$0xf0]  ;;  %v2618_v13 = vld [vmem:[%s3498_s1 + $0x1a4] sm:$0xf0]  ;;  %v2614_v14 = vld [vmem:[%s3498_s1 + $0x18c] sm:$0xf] }
  0x2e   : > { %1194 = vmatpush.bf16.msra.mxu3 %v2525_v34  ;;  %1048 = vmatmul.bf16.vlgmr.msra.gmra.mxu0 %v1988_v42  ;;  %v2092_v34 = vor.u32 %v2594_v29, %v2091_v28  ;;  %v2597_v42 = vld [vmem:[%s3498_s1 + $0x104] sm:$0xf]  ;;  %v2189_v15 = vld [vmem:[%s3498_s1 + $0x1a8] sm:$0xf0]  ;;  %v2219_v24 = vld [vmem:[%s3498_s1 + $0x1c8] sm:$0xf] }
  0x2f   : > { %1236 = vmatpush.bf16.msrb.mxu0 %v2540_v41  ;;  %1097 = vmatmul.bf16.vlgmr.msra.gmra.mxu1 %v1992_v43  ;;  %v2601_v41 = vld [vmem:[%s3498_s1 + $0x11c] sm:$0xf0]  ;;  %v2117_v43 = vld [vmem:[%s3498_s1 + $0x120] sm:$0xf0]  ;;  %v2626_v25 = vld [vmem:[%s3498_s1 + $0x1e4] sm:$0xf0] }
  0x30   : > { %1146 = vmatmul.bf16.vlgmr.msra.gmra.mxu2 %v1996_v44  ;;  %1285 = vmatpush.bf16.msrb.mxu1 %v2548_v47  ;;  %v2123_v44 = vld [vmem:[%s3498_s1 + $0x108] sm:$0xf]  ;;  %v2125_v47 = vld [vmem:[%s3498_s1 + $0x128] sm:$0xf0]  ;;  %v2220_v30 = vor.u32 %v2626_v25, %v2219_v24 }
  0x31   : > { %1334 = vmatpush.bf16.msrb.mxu2 %v2556_v40  ;;  %1195 = vmatmul.bf16.vlgmr.msra.gmra.mxu3 %v2000_v45  ;;  %v2115_v40 = vld [vmem:[%s3498_s1 + $0x100] sm:$0xf]  ;;  %v2602_v45 = vld [vmem:[%s3498_s1 + $0x124] sm:$0xf0]  ;;  %v2622_v26 = vld [vmem:[%s3498_s1 + $0x1cc] sm:$0xf] }
  0x32   : > { %1383 = vmatpush.bf16.msrb.mxu3 %v2564_v46  ;;  %v2598_v46 = vld [vmem:[%s3498_s1 + $0x10c] sm:$0xf] }
  0x33   : > { %1237 = vmatpush.bf16.msrb.mxu0 %v2539_v49  ;;  %v2120_v49 = vor.u32 %v2597_v42, %v2117_v43  ;;  %v2221_v27 = vld [vmem:[%s3498_s1 + $0x1e8] sm:$0xf0] }
  0x34   : > { %1286 = vmatpush.bf16.msrb.mxu1 %v2547_v51  ;;  %v2128_v51 = vor.u32 %v2598_v46, %v2125_v47  ;;  %v2224_v31 = vor.u32 %v2622_v26, %v2221_v27 }
  0x35   : > { %1335 = vmatpush.bf16.msrb.mxu2 %v2555_v48  ;;  %v2116_v48 = vor.u32 %v2601_v41, %v2115_v40 }
  0x36   : > { %1384 = vmatpush.bf16.msrb.mxu3 %v2563_v50  ;;  %v2124_v50 = vor.u32 %v2602_v45, %v2123_v44 }
  0x37   : > { %1238 = vmatpush.bf16.msrb.mxu0 %v2538_v53  ;;  %v2534_v53 = vld [vmem:[%s2710_s14 + $0x108] sm:$0xff] }
  0x38   : > { %1287 = vmatpush.bf16.msrb.mxu1 %v2546_v55  ;;  %v2542_v55 = vld [vmem:[%s2710_s14 + $0x148] sm:$0xff] }
  0x39   : > { %1336 = vmatpush.bf16.msrb.mxu2 %v2554_v52  ;;  %v2550_v52 = vld [vmem:[%s2710_s14 + $0x188] sm:$0xff] }
  0x3a   : > { %1385 = vmatpush.bf16.msrb.mxu3 %v2562_v54  ;;  %v2558_v54 = vld [vmem:[%s2710_s14 + $0x1c8] sm:$0xff] }
  0x3b   : > { %1239 = vmatpush.bf16.msrb.mxu0 %v2537_v5  ;;  %v2533_v5 = vld [vmem:[%s2710_s14 + $0x100] sm:$0xff] }
  0x3c   : > { %1288 = vmatpush.bf16.msrb.mxu1 %v2545_v7  ;;  %v2541_v7 = vld [vmem:[%s2710_s14 + $0x140] sm:$0xff] }
  0x3d   : > { %1337 = vmatpush.bf16.msrb.mxu2 %v2553_v4  ;;  %v2549_v4 = vld [vmem:[%s2710_s14 + $0x180] sm:$0xff] }
  0x3e   : > { %1053 = vmatmul.bf16.gmra.mxu0 %v2020_v0  ;;  %1386 = vmatpush.bf16.msrb.mxu3 %v2561_v6  ;;  %v2148_v0 = vor.u32 %v2609_v57, %v2147_v56  ;;  %v2557_v6 = vld [vmem:[%s2710_s14 + $0x1c0] sm:$0xff]  ;;  %v2575_v56 = vld [vmem:[%s3498_s1 + $0x54] sm:$0xf] }
  0x3f   : > { %1102 = vmatmul.bf16.gmra.mxu1 %v2024_v1  ;;  %1240 = vmatpush.bf16.msrb.mxu0 %v2536_v21  ;;  %v2152_v1 = vor.u32 %v2605_v58, %v2149_v59  ;;  %v2625_v21 = vld [vmem:[%s3498_s1 + $0x1dc] sm:$0xf0]  ;;  %v2037_v57 = vld [vmem:[%s3498_s1 + $0x70] sm:$0xf0]  ;;  %v2043_v58 = vld [vmem:[%s3498_s1 + $0x58] sm:$0xf] }
  0x40   : > { %1151 = vmatmul.bf16.gmra.mxu2 %v2028_v2  ;;  %1289 = vmatpush.bf16.msrb.mxu1 %v2544_v23  ;;  %v2156_v2 = vor.u32 %v2610_v61, %v2155_v60  ;;  %v2213_v23 = vld [vmem:[%s3498_s1 + $0x1e0] sm:$0xf0]  ;;  %v2580_v59 = vld [vmem:[%s3498_s1 + $0x74] sm:$0xf0]  ;;  %v2576_v60 = vld [vmem:[%s3498_s1 + $0x5c] sm:$0xf] }
  0x41   : > { %1200 = vmatmul.bf16.gmra.mxu3 %v2032_v3  ;;  %1338 = vmatpush.bf16.msrb.mxu2 %v2552_v20  ;;  %v2160_v3 = vor.u32 %v2606_v62, %v2157_v63  ;;  %v2211_v20 = vld [vmem:[%s3498_s1 + $0x1c0] sm:$0xf]  ;;  %v2045_v61 = vld [vmem:[%s3498_s1 + $0x78] sm:$0xf0] }
  0x42   : > { %1387 = vmatpush.bf16.msrb.mxu3 %v2560_v22  ;;  %v2621_v22 = vld [vmem:[%s3498_s1 + $0x1c4] sm:$0xf]  ;;  %v2212_v28 = vor.u32 %v2625_v21, %v2211_v20  ;;  %v2075_v20 = vld [vmem:[%s3498_s1 + $0x98] sm:$0xf] }
  0x43   : > { %1241 = vmatpush.bf16.msrb.mxu0 %v2535_v37  ;;  %v2216_v29 = vor.u32 %v2621_v22, %v2213_v23  ;;  %v2572_v37 = vld [vmem:[%s3498_s1 + $0x34] sm:$0xf0]  ;;  %v2584_v22 = vld [vmem:[%s3498_s1 + $0x9c] sm:$0xf] }
  0x44   : > { %1290 = vmatpush.bf16.msrb.mxu1 %v2543_v39  ;;  %v2013_v39 = vld [vmem:[%s3498_s1 + $0x38] sm:$0xf0]  ;;  %v2588_v21 = vld [vmem:[%s3498_s1 + $0xb4] sm:$0xf0] }
  0x45   : > { %1339 = vmatpush.bf16.msrb.mxu2 %v2551_v36  ;;  %v2011_v36 = vld [vmem:[%s3498_s1 + $0x18] sm:$0xf]  ;;  %v2077_v23 = vld [vmem:[%s3498_s1 + $0xb8] sm:$0xf0] }
  0x46   : > { %1388 = vmatpush.bf16.msrb.mxu3 %v2559_v38  ;;  %v2568_v38 = vld [vmem:[%s3498_s1 + $0x1c] sm:$0xf]  ;;  %v2012_v44 = vor.u32 %v2572_v37, %v2011_v36 }
  0x47   : > { %1242 = vmatpush.bf16.msrb.mxu0 %v2534_v53  ;;  %v2016_v45 = vor.u32 %v2568_v38, %v2013_v39 }
  0x48   : > { %1291 = vmatpush.bf16.msrb.mxu1 %v2542_v55  ;;  %v2579_v55 = vld [vmem:[%s3498_s1 + $0x6c] sm:$0xf0] }
  0x49   : > { %1340 = vmatpush.bf16.msrb.mxu2 %v2550_v52 }
  0x4a   : > { %1389 = vmatpush.bf16.msrb.mxu3 %v2558_v54  ;;  %v2035_v54 = vld [vmem:[%s3498_s1 + $0x50] sm:$0xf] }
  0x4b   : > { %1243 = vmatpush.bf16.msrb.mxu0 %v2533_v5  ;;  %v2044_v5 = vor.u32 %v2580_v59, %v2043_v58 }
  0x4c   : > { %1292 = vmatpush.bf16.msrb.mxu1 %v2541_v7 }
  0x4d   : > { %1341 = vmatpush.bf16.msrb.mxu2 %v2549_v4 }
  0x4e   : > { %1058 = vmatmul.bf16.gmra.mxu0 %v2052_v16  ;;  %1390 = vmatpush.bf16.msrb.mxu3 %v2557_v6  ;;  %v2180_v16 = vor.u32 %v2617_v9, %v2179_v8  ;;  %v2048_v6 = vor.u32 %v2576_v60, %v2045_v61 }
  0x4f   : > { %1107 = vmatmul.bf16.gmra.mxu1 %v2056_v17  ;;  %v2184_v17 = vor.u32 %v2613_v10, %v2181_v11 }
  0x50   : > { %1156 = vmatmul.bf16.gmra.mxu2 %v2060_v18  ;;  %v2188_v18 = vor.u32 %v2618_v13, %v2187_v12 }
  0x51   : > { %1205 = vmatmul.bf16.gmra.mxu3 %v2064_v19  ;;  %v2192_v19 = vor.u32 %v2614_v14, %v2189_v15 }
  0x5e   : > { %1063 = vmatmul.bf16.gmra.mxu0 %v2084_v32  ;;  %v2003_v32 = vld [vmem:[%s3498_s1 + $0x10] sm:$0xf] }
  0x5f   : > { %1112 = vmatmul.bf16.gmra.mxu1 %v2088_v33  ;;  %v2571_v33 = vld [vmem:[%s3498_s1 + $0x2c] sm:$0xf0] }
  0x60   : > { %1161 = vmatmul.bf16.gmra.mxu2 %v2092_v34  ;;  %v2567_v34 = vld [vmem:[%s3498_s1 + $0x14] sm:$0xf]  ;;  %v2004_v40 = vor.u32 %v2571_v33, %v2003_v32  ;;  %v2080_v32 = vor.u32 %v2584_v22, %v2077_v23 }
  0x61   : > { %1210 = vmatmul.bf16.gmra.mxu3 %v2096_v35  ;;  %v2005_v35 = vld [vmem:[%s3498_s1 + $0x30] sm:$0xf0] }
  0x62   : > { %v2008_v41 = vor.u32 %v2567_v34, %v2005_v35 }
  0x6e   : > { %1068 = vmatmul.bf16.gmra.mxu0 %v2116_v48 }
  0x6f   : > { %1117 = vmatmul.bf16.gmra.mxu1 %v2120_v49 }
  0x70   : > { %1166 = vmatmul.bf16.gmra.mxu2 %v2124_v50 }
  0x71   : > { %1215 = vmatmul.bf16.gmra.mxu3 %v2128_v51 }
  0x7e   : > { %1073 = vmatmul.bf16.gmra.mxu0 %v2148_v0  ;;  %v2036_v0 = vor.u32 %v2579_v55, %v2035_v54 }
  0x7f   : > { %1122 = vmatmul.bf16.gmra.mxu1 %v2152_v1  ;;  %v2040_v1 = vor.u32 %v2575_v56, %v2037_v57 }
  0x80   : > { %1171 = vmatmul.bf16.gmra.mxu2 %v2156_v2 }
  0x81   : > { %1220 = vmatmul.bf16.gmra.mxu3 %v2160_v3 }
  0x8e   : > { %1078 = vmatmul.bf16.gmra.mxu0 %v2180_v16  ;;  %v2067_v16 = vld [vmem:[%s3498_s1 + $0x90] sm:$0xf] }
  0x8f   : > { %1127 = vmatmul.bf16.gmra.mxu1 %v2184_v17  ;;  %v2587_v17 = vld [vmem:[%s3498_s1 + $0xac] sm:$0xf0] }
  0x90   : > { %1176 = vmatmul.bf16.gmra.mxu2 %v2188_v18  ;;  %v2583_v18 = vld [vmem:[%s3498_s1 + $0x94] sm:$0xf]  ;;  %v2068_v26 = vor.u32 %v2587_v17, %v2067_v16 }
  0x91   : > { %1225 = vmatmul.bf16.gmra.mxu3 %v2192_v19  ;;  %v2069_v19 = vld [vmem:[%s3498_s1 + $0xb0] sm:$0xf0] }
  0x92   : > { %v2072_v27 = vor.u32 %v2583_v18, %v2069_v19 }
  0x9e   : > { %1083 = vmatmul.bf16.gmra.mxu0 %v2212_v28 }
  0x9f   : > { %1132 = vmatmul.bf16.gmra.mxu1 %v2216_v29 }
  0xa0   : > { %1181 = vmatmul.bf16.gmra.mxu2 %v2220_v30 }
  0xa1   : > { %1230 = vmatmul.bf16.gmra.mxu3 %v2224_v31  ;;  %v2076_v31 = vor.u32 %v2588_v21, %v2075_v20 }
  0xab   : > { %v1049_v42 = vpop.f32.mrf.mxu0 }
  0xac   : > { %v1098_v43 = vpop.f32.mrf.mxu1 }
  0xad   : > { %v1099_v46 = vadd.f32 %v1098_v43, %v1049_v42  ;;  %v2099_v42 = vld [vmem:[%s3498_s1 + $0xd0] sm:$0xf] }
  0xae   : > { %1244 = vmatmul.bf16.vlgmr.msrb.gmra.mxu0 %v2004_v40  ;;  %v2595_v43 = vld [vmem:[%s3498_s1 + $0xec] sm:$0xf0] }
  0xaf   : > { %1293 = vmatmul.bf16.vlgmr.msrb.gmra.mxu1 %v2008_v41 }
  0xb0   : > { %1342 = vmatmul.bf16.vlgmr.msrb.gmra.mxu2 %v2012_v44  ;;  %v2591_v44 = vld [vmem:[%s3498_s1 + $0xd4] sm:$0xf] }
  0xb1   : > { %1391 = vmatmul.bf16.vlgmr.msrb.gmra.mxu3 %v2016_v45  ;;  %v2101_v45 = vld [vmem:[%s3498_s1 + $0xf0] sm:$0xf0] }
  0xb2   : > { %v2104_v54 = vor.u32 %v2591_v44, %v2101_v45 }
  0xb3   : > { %v1147_v47 = vpop.f32.mrf.mxu2  ;;  %v1051_v50 = vpop.f32.mrf.mxu0 }
  0xb4   : > { %v1196_v48 = vpop.f32.mrf.mxu3  ;;  %v1148_v49 = vadd.f32 %v1147_v47, %v1099_v46  ;;  %v1100_v51 = vpop.f32.mrf.mxu1  ;;  %v2107_v46 = vld [vmem:[%s3498_s1 + $0xd8] sm:$0xf] }
  0xb5   : > { %v1101_v52 = vadd.f32 %v1100_v51, %v1051_v50  ;;  %v2596_v47 = vld [vmem:[%s3498_s1 + $0xf4] sm:$0xf0] }
  0xb6   : > { %v2992_v53 = vadd.f32 %v1196_v48, %v1148_v49  ;;  %v2592_v48 = vld [vmem:[%s3498_s1 + $0xdc] sm:$0xf]  ;;  %v2108_v58 = vor.u32 %v2596_v47, %v2107_v46 }
  0xb7   : > { %v2109_v49 = vld [vmem:[%s3498_s1 + $0xf8] sm:$0xf0] }
  0xb8   : > { %v2112_v59 = vor.u32 %v2592_v48, %v2109_v49 }
  0xbb   : > { %v1149_v62 = vpop.f32.mrf.mxu2  ;;  %v1054_v3 = vpop.f32.mrf.mxu0 }
  0xbc   : > { %v1198_v63 = vpop.f32.mrf.mxu3  ;;  %v1150_v2 = vadd.f32 %v1149_v62, %v1101_v52  ;;  %v1103_v4 = vpop.f32.mrf.mxu1  ;;  %v2100_v52 = vor.u32 %v2595_v43, %v2099_v42  ;;  %v2173_v42 = vld [vmem:[%s3498_s1 + $0x178] sm:$0xf0] }
  0xbd   : > { %v1104_v7 = vadd.f32 %v1103_v4, %v1054_v3 }
  0xbe   : > { %v3018_v8 = vadd.f32 %v1198_v63, %v1150_v2  ;;  %1249 = vmatmul.bf16.gmra.mxu0 %v2036_v0 }
  0xbf   : > { %1298 = vmatmul.bf16.gmra.mxu1 %v2040_v1 }
  0xc0   : > { %1347 = vmatmul.bf16.gmra.mxu2 %v2044_v5  ;;  %v2131_v5 = vld [vmem:[%s3498_s1 + $0x110] sm:$0xf] }
  0xc1   : > { %1396 = vmatmul.bf16.gmra.mxu3 %v2048_v6  ;;  %v2603_v6 = vld [vmem:[%s3498_s1 + $0x12c] sm:$0xf0] }
  0xc2   : > { %v2132_v17 = vor.u32 %v2603_v6, %v2131_v5  ;;  %v2620_v5 = vld [vmem:[%s3498_s1 + $0x1b4] sm:$0xf0]  ;;  %v2616_v6 = vld [vmem:[%s3498_s1 + $0x19c] sm:$0xf] }
  0xc3   : > { %v1152_v9 = vpop.f32.mrf.mxu2  ;;  %v1056_v12 = vpop.f32.mrf.mxu0 }
  0xc4   : > { %v1201_v10 = vpop.f32.mrf.mxu3  ;;  %v1153_v11 = vadd.f32 %v1152_v9, %v1104_v7  ;;  %v1105_v13 = vpop.f32.mrf.mxu1  ;;  %v2599_v7 = vld [vmem:[%s3498_s1 + $0x114] sm:$0xf] }
  0xc5   : > { %v1106_v14 = vadd.f32 %v1105_v13, %v1056_v12  ;;  %v2133_v9 = vld [vmem:[%s3498_s1 + $0x130] sm:$0xf0]  ;;  %v2600_v12 = vld [vmem:[%s3498_s1 + $0x11c] sm:$0xf] }
  0xc6   : > { %v3020_v15 = vadd.f32 %v1201_v10, %v1153_v11  ;;  %v2139_v10 = vld [vmem:[%s3498_s1 + $0x118] sm:$0xf]  ;;  %v2141_v13 = vld [vmem:[%s3498_s1 + $0x138] sm:$0xf0]  ;;  %v2136_v18 = vor.u32 %v2599_v7, %v2133_v9 }
  0xc7   : > { %v2604_v11 = vld [vmem:[%s3498_s1 + $0x134] sm:$0xf0]  ;;  %v2144_v23 = vor.u32 %v2600_v12, %v2141_v13  ;;  %v2205_v7 = vld [vmem:[%s3498_s1 + $0x1b8] sm:$0xf0] }
  0xc8   : > { %v2140_v22 = vor.u32 %v2604_v11, %v2139_v10 }
  0xcb   : > { %v1154_v24 = vpop.f32.mrf.mxu2  ;;  %v1059_v29 = vpop.f32.mrf.mxu0 }
  0xcc   : > { %v1203_v25 = vpop.f32.mrf.mxu3  ;;  %v1155_v28 = vadd.f32 %v1154_v24, %v1106_v14  ;;  %v1108_v30 = vpop.f32.mrf.mxu1 }
  0xcd   : > { %v1109_v33 = vadd.f32 %v1108_v30, %v1059_v29 }
  0xce   : > { %v3046_v34 = vadd.f32 %v1203_v25, %v1155_v28  ;;  %1254 = vmatmul.bf16.gmra.mxu0 %v2068_v26 }
  0xcf   : > { %1303 = vmatmul.bf16.gmra.mxu1 %v2072_v27 }
  0xd0   : > { %1352 = vmatmul.bf16.gmra.mxu2 %v2076_v31 }
  0xd1   : > { %1401 = vmatmul.bf16.gmra.mxu3 %v2080_v32 }
  0xd3   : > { %v1157_v35 = vpop.f32.mrf.mxu2  ;;  %v1061_v38 = vpop.f32.mrf.mxu0 }
  0xd4   : > { %v1206_v36 = vpop.f32.mrf.mxu3  ;;  %v1158_v37 = vadd.f32 %v1157_v35, %v1109_v33  ;;  %v1110_v39 = vpop.f32.mrf.mxu1  ;;  %v2163_v33 = vld [vmem:[%s3498_s1 + $0x150] sm:$0xf] }
  0xd5   : > { %v1111_v40 = vadd.f32 %v1110_v39, %v1061_v38  ;;  %v2611_v35 = vld [vmem:[%s3498_s1 + $0x16c] sm:$0xf0]  ;;  %v2171_v38 = vld [vmem:[%s3498_s1 + $0x158] sm:$0xf] }
  0xd6   : > { %v3048_v41 = vadd.f32 %v1206_v36, %v1158_v37  ;;  %v2607_v36 = vld [vmem:[%s3498_s1 + $0x154] sm:$0xf]  ;;  %v2612_v39 = vld [vmem:[%s3498_s1 + $0x174] sm:$0xf0]  ;;  %v2164_v45 = vor.u32 %v2611_v35, %v2163_v33 }
  0xd7   : > { %v2165_v37 = vld [vmem:[%s3498_s1 + $0x170] sm:$0xf0]  ;;  %v2235_v35 = vld [vmem:[%s3498_s1 + $0x1d8] sm:$0xf] }
  0xd8   : > { %v2168_v46 = vor.u32 %v2607_v36, %v2165_v37  ;;  %v2229_v33 = vld [vmem:[%s3498_s1 + $0x1f0] sm:$0xf0]  ;;  %v2628_v36 = vld [vmem:[%s3498_s1 + $0x1f4] sm:$0xf0]  ;;  %v2624_v37 = vld [vmem:[%s3498_s1 + $0x1dc] sm:$0xf] }
  0xdb   : > { %v1159_v50 = vpop.f32.mrf.mxu2  ;;  %v1064_v56 = vpop.f32.mrf.mxu0 }
  0xdc   : > { %v1208_v51 = vpop.f32.mrf.mxu3  ;;  %v1160_v55 = vadd.f32 %v1159_v50, %v1111_v40  ;;  %v1113_v57 = vpop.f32.mrf.mxu1  ;;  %v2608_v40 = vld [vmem:[%s3498_s1 + $0x15c] sm:$0xf]  ;;  %v2172_v50 = vor.u32 %v2612_v39, %v2171_v38 }
  0xdd   : > { %v1114_v60 = vadd.f32 %v1113_v57, %v1064_v56  ;;  %v2237_v38 = vld [vmem:[%s3498_s1 + $0x1f8] sm:$0xf0] }
  0xde   : > { %v3074_v61 = vadd.f32 %v1208_v51, %v1160_v55  ;;  %1259 = vmatmul.bf16.gmra.mxu0 %v2100_v52  ;;  %v2176_v51 = vor.u32 %v2608_v40, %v2173_v42 }
  0xdf   : > { %1308 = vmatmul.bf16.gmra.mxu1 %v2104_v54 }
  0xe0   : > { %1357 = vmatmul.bf16.gmra.mxu2 %v2108_v58 }
  0xe1   : > { %1406 = vmatmul.bf16.gmra.mxu3 %v2112_v59 }
  0xe3   : > { %v1162_v62 = vpop.f32.mrf.mxu2  ;;  %v1066_v1 = vpop.f32.mrf.mxu0 }
  0xe4   : > { %v1211_v63 = vpop.f32.mrf.mxu3  ;;  %v1163_v0 = vadd.f32 %v1162_v62, %v1114_v60  ;;  %v1115_v2 = vpop.f32.mrf.mxu1 }
  0xe5   : > { %v1116_v3 = vadd.f32 %v1115_v2, %v1066_v1  ;;  %v2615_v1 = vld [vmem:[%s3498_s1 + $0x194] sm:$0xf] }
  0xe6   : > { %v3076_v4 = vadd.f32 %v1211_v63, %v1163_v0  ;;  %v2195_v63 = vld [vmem:[%s3498_s1 + $0x190] sm:$0xf]  ;;  %v2197_v2 = vld [vmem:[%s3498_s1 + $0x1b0] sm:$0xf0] }
  0xe7   : > { %v2619_v0 = vld [vmem:[%s3498_s1 + $0x1ac] sm:$0xf0]  ;;  %v2200_v12 = vor.u32 %v2615_v1, %v2197_v2 }
  0xe8   : > { %v2196_v11 = vor.u32 %v2619_v0, %v2195_v63 }
  0xeb   : > { %v1164_v14 = vpop.f32.mrf.mxu2  ;;  %v1069_v20 = vpop.f32.mrf.mxu0 }
  0xec   : > { %v1213_v16 = vpop.f32.mrf.mxu3  ;;  %v1165_v19 = vadd.f32 %v1164_v14, %v1116_v3  ;;  %v1118_v21 = vpop.f32.mrf.mxu1  ;;  %v2203_v3 = vld [vmem:[%s3498_s1 + $0x198] sm:$0xf] }
  0xed   : > { %v1119_v24 = vadd.f32 %v1118_v21, %v1069_v20 }
  0xee   : > { %v3102_v25 = vadd.f32 %v1213_v16, %v1165_v19  ;;  %1264 = vmatmul.bf16.gmra.mxu0 %v2132_v17  ;;  %v2204_v17 = vor.u32 %v2620_v5, %v2203_v3 }
  0xef   : > { %1313 = vmatmul.bf16.gmra.mxu1 %v2136_v18  ;;  %v2208_v18 = vor.u32 %v2616_v6, %v2205_v7 }
  0xf0   : > { %1362 = vmatmul.bf16.gmra.mxu2 %v2140_v22 }
  0xf1   : > { %1411 = vmatmul.bf16.gmra.mxu3 %v2144_v23 }
  0xf3   : > { %v1167_v26 = vpop.f32.mrf.mxu2  ;;  %v1071_v29 = vpop.f32.mrf.mxu0 }
  0xf4   : > { %v1216_v27 = vpop.f32.mrf.mxu3  ;;  %v1168_v28 = vadd.f32 %v1167_v26, %v1119_v24  ;;  %v1120_v30 = vpop.f32.mrf.mxu1 }
  0xf5   : > { %v1121_v31 = vadd.f32 %v1120_v30, %v1071_v29  ;;  %v2227_v29 = vld [vmem:[%s3498_s1 + $0x1d0] sm:$0xf] }
  0xf6   : > { %v3104_v32 = vadd.f32 %v1216_v27, %v1168_v28  ;;  %v2627_v30 = vld [vmem:[%s3498_s1 + $0x1ec] sm:$0xf0] }
  0xf7   : > { %v2228_v42 = vor.u32 %v2627_v30, %v2227_v29 }
  0xfb   : > { %v1169_v43 = vpop.f32.mrf.mxu2  ;;  %v1074_v48 = vpop.f32.mrf.mxu0 }
  0xfc   : > { %v1218_v44 = vpop.f32.mrf.mxu3  ;;  %v1170_v47 = vadd.f32 %v1169_v43, %v1121_v31  ;;  %v1123_v49 = vpop.f32.mrf.mxu1  ;;  %v2623_v31 = vld [vmem:[%s3498_s1 + $0x1d4] sm:$0xf] }
  0xfd   : > { %v1124_v52 = vadd.f32 %v1123_v49, %v1074_v48  ;;  %v2232_v43 = vor.u32 %v2623_v31, %v2229_v33  ;;  %v2240_v48 = vor.u32 %v2624_v37, %v2237_v38 }
  0xfe   : > { %v3130_v54 = vadd.f32 %v1218_v44, %v1170_v47  ;;  %1269 = vmatmul.bf16.gmra.mxu0 %v2164_v45  ;;  %v2236_v47 = vor.u32 %v2628_v36, %v2235_v35 }
  0xff   : > { %1318 = vmatmul.bf16.gmra.mxu1 %v2168_v46 }
 0x100   : > { %1367 = vmatmul.bf16.gmra.mxu2 %v2172_v50 }
 0x101   : > { %1416 = vmatmul.bf16.gmra.mxu3 %v2176_v51 }
 0x103   : > { %v1172_v55 = vpop.f32.mrf.mxu2  ;;  %v1076_v58 = vpop.f32.mrf.mxu0 }
 0x104   : > { %v1221_v56 = vpop.f32.mrf.mxu3  ;;  %v1173_v57 = vadd.f32 %v1172_v55, %v1124_v52  ;;  %v1125_v59 = vpop.f32.mrf.mxu1 }
 0x105   : > { %v1126_v60 = vadd.f32 %v1125_v59, %v1076_v58 }
 0x106   : > { %v3132_v62 = vadd.f32 %v1221_v56, %v1173_v57 }
 0x10b   : > { %v1174_v9 = vpop.f32.mrf.mxu2  ;;  %v1079_v14 = vpop.f32.mrf.mxu0 }
 0x10c   : > { %v1223_v10 = vpop.f32.mrf.mxu3  ;;  %v1175_v13 = vadd.f32 %v1174_v9, %v1126_v60  ;;  %v1128_v16 = vpop.f32.mrf.mxu1 }
 0x10d   : > { %v1129_v19 = vadd.f32 %v1128_v16, %v1079_v14 }
 0x10e   : > { %v3158_v20 = vadd.f32 %v1223_v10, %v1175_v13  ;;  %1274 = vmatmul.bf16.gmra.mxu0 %v2196_v11 }
 0x10f   : > { %1323 = vmatmul.bf16.gmra.mxu1 %v2200_v12 }
 0x110   : > { %1372 = vmatmul.bf16.gmra.mxu2 %v2204_v17 }
 0x111   : > { %1421 = vmatmul.bf16.gmra.mxu3 %v2208_v18 }
 0x113   : > { %v1177_v21 = vpop.f32.mrf.mxu2  ;;  %v1081_v24 = vpop.f32.mrf.mxu0 }
 0x114   : > { %v1226_v22 = vpop.f32.mrf.mxu3  ;;  %v1178_v23 = vadd.f32 %v1177_v21, %v1129_v19  ;;  %v1130_v26 = vpop.f32.mrf.mxu1 }
 0x115   : > { %v1131_v27 = vadd.f32 %v1130_v26, %v1081_v24 }
 0x116   : > { %v3160_v28 = vadd.f32 %v1226_v22, %v1178_v23 }
 0x11b   : > { %v1179_v39 = vpop.f32.mrf.mxu2  ;;  %v1084_v45 = vpop.f32.mrf.mxu0 }
 0x11c   : > { %v1228_v40 = vpop.f32.mrf.mxu3  ;;  %v1180_v44 = vadd.f32 %v1179_v39, %v1131_v27  ;;  %v1133_v46 = vpop.f32.mrf.mxu1 }
 0x11d   : > { %v1134_v49 = vadd.f32 %v1133_v46, %v1084_v45 }
 0x11e   : > { %v3186_v50 = vadd.f32 %v1228_v40, %v1180_v44  ;;  %1279 = vmatmul.bf16.gmra.mxu0 %v2228_v42 }
 0x11f   : > { %1328 = vmatmul.bf16.gmra.mxu1 %v2232_v43 }
 0x120   : > { %1377 = vmatmul.bf16.gmra.mxu2 %v2236_v47 }
 0x121   : > { %1426 = vmatmul.bf16.gmra.mxu3 %v2240_v48 }
 0x123   : > { %v1182_v51 = vpop.f32.mrf.mxu2  ;;  %v1086_v56 = vpop.f32.mrf.mxu0 }
 0x124   : > { %v1231_v52 = vpop.f32.mrf.mxu3  ;;  %v1183_v55 = vadd.f32 %v1182_v51, %v1134_v49  ;;  %v1135_v57 = vpop.f32.mrf.mxu1 }
 0x125   : > { %v1136_v58 = vadd.f32 %v1135_v57, %v1086_v56 }
 0x126   : > { %v3188_v59 = vadd.f32 %v1231_v52, %v1183_v55 }
 0x12b   : > { %v1184_v60 = vpop.f32.mrf.mxu2  ;;  %v1245_v1 = vpop.f32.mrf.mxu0 }
 0x12c   : > { %v1233_v63 = vpop.f32.mrf.mxu3  ;;  %v1185_v0 = vadd.f32 %v1184_v60, %v1136_v58  ;;  %v1294_v2 = vpop.f32.mrf.mxu1  ;;  %v1246_v5 = vadd.f32 %v1245_v1, %v2992_v53 }
 0x12e   : > { %v3190_v3 = vadd.f32 %v1233_v63, %v1185_v0  ;;  %v1295_v6 = vadd.f32 %v1294_v2, %v1246_v5 }
 0x133   : > { %v1343_v7 = vpop.f32.mrf.mxu2  ;;  %v1247_v11 = vpop.f32.mrf.mxu0 }
 0x134   : > { %v1392_v9 = vpop.f32.mrf.mxu3  ;;  %v1344_v10 = vadd.f32 %v1343_v7, %v1295_v6  ;;  %v1296_v12 = vpop.f32.mrf.mxu1  ;;  %v1248_v14 = vadd.f32 %v1247_v11, %v3018_v8 }
 0x136   : > { %v3193_v13 = vadd.f32 %v1392_v9, %v1344_v10  ;;  %v1297_v18 = vadd.f32 %v1296_v12, %v1248_v14 }
 0x138   : > { %v1433_v16 = vsel %vm1432_vm0, %v3193_v13, 0.0  ;;  %v1504_v17 = vmul.f32 %v3193_v13, %v3193_v13 }
 0x139   : > { %1434 = vadd.xlane.f32.xlu0 %v1433_v16 }
 0x13a   : > { %v1520_v53 = vsel %vm1432_vm0, %v1504_v17, 0.0 }
 0x13b   : > { %v1345_v19 = vpop.f32.mrf.mxu2  ;;  %1521 = vadd.xlane.f32.xlu1 %v1520_v53  ;;  %v1250_v23 = vpop.f32.mrf.mxu0 }
 0x13c   : > { %v1394_v21 = vpop.f32.mrf.mxu3  ;;  %v1346_v22 = vadd.f32 %v1345_v19, %v1297_v18  ;;  %v1299_v24 = vpop.f32.mrf.mxu1  ;;  %v1251_v8 = vadd.f32 %v1250_v23, %v3020_v15 }
 0x13e   : > { %v3201_v26 = vadd.f32 %v1394_v21, %v1346_v22  ;;  %v1300_v30 = vadd.f32 %v1299_v24, %v1251_v8 }
 0x140   : > { %v1436_v27 = vsel %vm1432_vm0, %v3201_v26, 0.0  ;;  %v1505_v29 = vmul.f32 %v3201_v26, %v3201_v26 }
 0x141   : > { %1437 = vadd.xlane.f32.xlu0 %v1436_v27 }
 0x142   : > { %v1523_v31 = vsel %vm1432_vm0, %v1505_v29, 0.0 }
 0x143   : > { %v1348_v33 = vpop.f32.mrf.mxu2  ;;  %1524 = vadd.xlane.f32.xlu2 %v1523_v31  ;;  %v1252_v37 = vpop.f32.mrf.mxu0 }
 0x144   : > { %v1397_v35 = vpop.f32.mrf.mxu3  ;;  %v1349_v36 = vadd.f32 %v1348_v33, %v1300_v30  ;;  %v1301_v38 = vpop.f32.mrf.mxu1  ;;  %v1253_v15 = vadd.f32 %v1252_v37, %v3046_v34 }
 0x146   : > { %v3209_v39 = vadd.f32 %v1397_v35, %v1349_v36  ;;  %v1302_v43 = vadd.f32 %v1301_v38, %v1253_v15 }
 0x148   : > { %v1439_v40 = vsel %vm1432_vm0, %v3209_v39, 0.0  ;;  %v1506_v42 = vmul.f32 %v3209_v39, %v3209_v39 }
 0x149   : > { %1440 = vadd.xlane.f32.xlu1 %v1439_v40 }
 0x14a   : > { %v1526_v44 = vsel %vm1432_vm0, %v1506_v42, 0.0 }
 0x14b   : > { %v1350_v45 = vpop.f32.mrf.mxu2  ;;  %1527 = vadd.xlane.f32.xlu0 %v1526_v44  ;;  %v1255_v48 = vpop.f32.mrf.mxu0 }
 0x14c   : > { %v1399_v46 = vpop.f32.mrf.mxu3  ;;  %v1351_v47 = vadd.f32 %v1350_v45, %v1302_v43  ;;  %v1304_v49 = vpop.f32.mrf.mxu1  ;;  %v1256_v34 = vadd.f32 %v1255_v48, %v3048_v41 }
 0x14e   : > { %v3217_v51 = vadd.f32 %v1399_v46, %v1351_v47  ;;  %v1305_v55 = vadd.f32 %v1304_v49, %v1256_v34 }
 0x150   : > { %v1442_v52 = vsel %vm1432_vm0, %v3217_v51, 0.0  ;;  %v1507_v0 = vmul.f32 %v3217_v51, %v3217_v51 }
 0x151   : > { %1443 = vadd.xlane.f32.xlu1 %v1442_v52 }
 0x152   : > { %v1529_v5 = vsel %vm1432_vm0, %v1507_v0, 0.0 }
 0x153   : > { %v1353_v56 = vpop.f32.mrf.mxu2  ;;  %v1257_v60 = vpop.f32.mrf.mxu0 }
 0x154   : > { %v1402_v57 = vpop.f32.mrf.mxu3  ;;  %v1354_v58 = vadd.f32 %v1353_v56, %v1305_v55  ;;  %v1306_v63 = vpop.f32.mrf.mxu1  ;;  %v1258_v2 = vadd.f32 %v1257_v60, %v3074_v61 }
 0x156   : > { %v3224_v1 = vadd.f32 %v1402_v57, %v1354_v58  ;;  %v1307_v6 = vadd.f32 %v1306_v63, %v1258_v2 }
 0x158   : > { %v1445_v41 = vsel %vm1432_vm0, %v3224_v1, 0.0  ;;  %v1508_v14 = vmul.f32 %v3224_v1, %v3224_v1 }
 0x159   : > { %1446 = vadd.xlane.f32.xlu2 %v1445_v41  ;;  %1530 = vadd.xlane.f32.xlu1 %v1529_v5 }
 0x15a   : > { %v1532_v17 = vsel %vm1432_vm0, %v1508_v14, 0.0 }
 0x15b   : > { %v1355_v7 = vpop.f32.mrf.mxu2  ;;  %v1260_v11 = vpop.f32.mrf.mxu0 }
 0x15c   : > { %v1404_v9 = vpop.f32.mrf.mxu3  ;;  %v1356_v10 = vadd.f32 %v1355_v7, %v1307_v6  ;;  %v1309_v12 = vpop.f32.mrf.mxu1  ;;  %v1261_v61 = vadd.f32 %v1260_v11, %v3076_v4 }
 0x15e   : > { %v3232_v16 = vadd.f32 %v1404_v9, %v1356_v10  ;;  %v1310_v53 = vadd.f32 %v1309_v12, %v1261_v61 }
 0x160   : > { %v1509_v18 = vmul.f32 %v3232_v16, %v3232_v16  ;;  %v1448_v4 = vsel %vm1432_vm0, %v3232_v16, 0.0 }
 0x161   : > { %1533 = vadd.xlane.f32.xlu2 %v1532_v17 }
 0x162   : > { %v1535_v19 = vsel %vm1432_vm0, %v1509_v18, 0.0 }
 0x163   : > { %v1358_v21 = vpop.f32.mrf.mxu2  ;;  %1536 = vadd.xlane.f32.xlu0 %v1535_v19  ;;  %v1262_v24 = vpop.f32.mrf.mxu0 }
 0x164   : > { %v1407_v22 = vpop.f32.mrf.mxu3  ;;  %v1359_v23 = vadd.f32 %v1358_v21, %v1310_v53  ;;  %v1311_v8 = vpop.f32.mrf.mxu1  ;;  %v1263_v29 = vadd.f32 %v1262_v24, %v3102_v25 }
 0x166   : > { %v3239_v27 = vadd.f32 %v1407_v22, %v1359_v23  ;;  %v1312_v31 = vadd.f32 %v1311_v8, %v1263_v29 }
 0x168   : > { %v1510_v30 = vmul.f32 %v3239_v27, %v3239_v27  ;;  %v1451_v35 = vsel %vm1432_vm0, %v3239_v27, 0.0 }
 0x169   : > { %1449 = vadd.xlane.f32.xlu2 %v1448_v4 }
 0x16a   : > { %v1538_v33 = vsel %vm1432_vm0, %v1510_v30, 0.0 }
 0x16b   : > { %v1360_v36 = vpop.f32.mrf.mxu2  ;;  %1539 = vadd.xlane.f32.xlu1 %v1538_v33  ;;  %1452 = vadd.xlane.f32.xlu0 %v1451_v35  ;;  %v1265_v15 = vpop.f32.mrf.mxu0  ;;  %v2680_v35 = vmov 16.0  }
 0x16c   : > { %v1409_v37 = vpop.f32.mrf.mxu3  ;;  %v1361_v38 = vadd.f32 %v1360_v36, %v1312_v31  ;;  %v1314_v25 = vpop.f32.mrf.mxu1  ;;  %v1266_v42 = vadd.f32 %v1265_v15, %v3104_v32  ;;  %2638 = vrcp.f32 %v2680_v35 }
 0x16e   : > { %v3249_v40 = vadd.f32 %v1409_v37, %v1361_v38  ;;  %v1315_v44 = vadd.f32 %v1314_v25, %v1266_v42 }
 0x170   : > { %v1511_v43 = vmul.f32 %v3249_v40, %v3249_v40  ;;  %v1454_v46 = vsel %vm1432_vm0, %v3249_v40, 0.0 }
 0x172   : > { %v1541_v45 = vsel %vm1432_vm0, %v1511_v43, 0.0 }
 0x173   : > { %v1363_v47 = vpop.f32.mrf.mxu2  ;;  %1542 = vadd.xlane.f32.xlu2 %v1541_v45  ;;  %1455 = vadd.xlane.f32.xlu1 %v1454_v46  ;;  %v1267_v34 = vpop.f32.mrf.mxu0 }
 0x174   : > { %v1412_v48 = vpop.f32.mrf.mxu3  ;;  %v1364_v49 = vadd.f32 %v1363_v47, %v1315_v44  ;;  %v1316_v52 = vpop.f32.mrf.mxu1  ;;  %v1268_v32 = vadd.f32 %v1267_v34, %v3130_v54 }
 0x175   : > { %v2639_v46 = vpop.eup %2638 }
 0x176   : > { %v3257_v55 = vadd.f32 %v1412_v48, %v1364_v49  ;;  %v1317_v57 = vadd.f32 %v1316_v52, %v1268_v32  ;;  %v1482_v52 = vmul.f32 16.0, %v2639_v46  ;;  %vm1486_vm1 = vweird.f32 %v2639_v46 }
 0x178   : > { %v1512_v56 = vmul.f32 %v3257_v55, %v3257_v55  ;;  %v1457_v58 = vsel %vm1432_vm0, %v3257_v55, 0.0 }
 0x17a   : > { %v1544_v60 = vsel %vm1432_vm0, %v1512_v56, 0.0 }
 0x17b   : > { %v1365_v63 = vpop.f32.mrf.mxu2  ;;  %1458 = vadd.xlane.f32.xlu2 %v1457_v58  ;;  %1545 = vadd.xlane.f32.xlu0 %v1544_v60  ;;  %v1270_v41 = vpop.f32.mrf.mxu0 }
 0x17c   : > { %v1414_v0 = vpop.f32.mrf.mxu3  ;;  %v1366_v2 = vadd.f32 %v1365_v63, %v1317_v57  ;;  %v1319_v5 = vpop.f32.mrf.mxu1  ;;  %v1271_v54 = vadd.f32 %v1270_v41, %v3132_v62  ;;  %v1483_v63 = vsub.f32 1.0, %v1482_v52 }
 0x17e   : > { %v3265_v6 = vadd.f32 %v1414_v0, %v1366_v2  ;;  %v1320_v9 = vadd.f32 %v1319_v5, %v1271_v54  ;;  %v1484_v5 = vmul.f32 %v2639_v46, %v1483_v63 }
 0x180   : > { %v1513_v7 = vmul.f32 %v3265_v6, %v3265_v6  ;;  %v1460_v11 = vsel %vm1432_vm0, %v3265_v6, 0.0 }
 0x182   : > { %v1547_v10 = vsel %vm1432_vm0, %v1513_v7, 0.0 }
 0x183   : > { %v1368_v12 = vpop.f32.mrf.mxu2  ;;  %1548 = vadd.xlane.f32.xlu1 %v1547_v10  ;;  %1461 = vadd.xlane.f32.xlu0 %v1460_v11  ;;  %v1272_v17 = vpop.f32.mrf.mxu0 }
 0x184   : > { %v1417_v14 = vpop.f32.mrf.mxu3  ;;  %v1369_v61 = vadd.f32 %v1368_v12, %v1320_v9  ;;  %v1321_v18 = vpop.f32.mrf.mxu1  ;;  %v1273_v62 = vadd.f32 %v1272_v17, %v3158_v20 }
 0x186   : > { %v3273_v53 = vadd.f32 %v1417_v14, %v1369_v61  ;;  %v1322_v21 = vadd.f32 %v1321_v18, %v1273_v62  ;;  %v1485_v14 = vadd.f32 %v2639_v46, %v1484_v5 }
 0x188   : > { %v1514_v19 = vmul.f32 %v3273_v53, %v3273_v53  ;;  %v1463_v23 = vsel %vm1432_vm0, %v3273_v53, 0.0  ;;  %v3307_v18 = vsel %vm1486_vm1, %v2639_v46, %v1485_v14 }
 0x18a   : > { %v1550_v22 = vsel %vm1432_vm0, %v1514_v19, 0.0 }
 0x18b   : > { %v1370_v24 = vpop.f32.mrf.mxu2  ;;  %1551 = vadd.xlane.f32.xlu2 %v1550_v22  ;;  %1464 = vadd.xlane.f32.xlu1 %v1463_v23  ;;  %v1275_v4 = vpop.f32.mrf.mxu0 }
 0x18c   : > { %v1419_v8 = vpop.f32.mrf.mxu3  ;;  %v1371_v29 = vadd.f32 %v1370_v24, %v1322_v21  ;;  %v1324_v30 = vpop.f32.mrf.mxu1  ;;  %v1276_v20 = vadd.f32 %v1275_v4, %v3160_v28 }
 0x18e   : > { %v3281_v31 = vadd.f32 %v1419_v8, %v1371_v29  ;;  %v1325_v36 = vadd.f32 %v1324_v30, %v1276_v20 }
 0x190   : > { %v1515_v33 = vmul.f32 %v3281_v31, %v3281_v31  ;;  %v1466_v37 = vsel %vm1432_vm0, %v3281_v31, 0.0 }
 0x192   : > { %v1553_v38 = vsel %vm1432_vm0, %v1515_v33, 0.0 }
 0x193   : > { %v1373_v15 = vpop.f32.mrf.mxu2  ;;  %1467 = vadd.xlane.f32.xlu2 %v1466_v37  ;;  %1554 = vadd.xlane.f32.xlu0 %v1553_v38  ;;  %v1277_v43 = vpop.f32.mrf.mxu0 }
 0x194   : > { %v1422_v25 = vpop.f32.mrf.mxu3  ;;  %v1374_v42 = vadd.f32 %v1373_v15, %v1325_v36  ;;  %v1326_v44 = vpop.f32.mrf.mxu1  ;;  %v1278_v28 = vadd.f32 %v1277_v43, %v3186_v50 }
 0x196   : > { %v3289_v45 = vadd.f32 %v1422_v25, %v1374_v42  ;;  %v1327_v48 = vadd.f32 %v1326_v44, %v1278_v28 }
 0x198   : > { %v1516_v47 = vmul.f32 %v3289_v45, %v3289_v45  ;;  %v1469_v34 = vsel %vm1432_vm0, %v3289_v45, 0.0 }
 0x19a   : > { %v1556_v49 = vsel %vm1432_vm0, %v1516_v47, 0.0 }
 0x19b   : > { %v1375_v32 = vpop.f32.mrf.mxu2  ;;  %1557 = vadd.xlane.f32.xlu1 %v1556_v49  ;;  %1470 = vadd.xlane.f32.xlu0 %v1469_v34  ;;  %v1280_v58 = vpop.f32.mrf.mxu0 }
 0x19c   : > { %v1424_v56 = vpop.f32.mrf.mxu3  ;;  %v1376_v57 = vadd.f32 %v1375_v32, %v1327_v48  ;;  %v1281_v50 = vadd.f32 %v1280_v58, %v3188_v59  ;;  %v1329_v0 = vpop.f32.mrf.mxu1 }
 0x19e   : > { %v3297_v60 = vadd.f32 %v1424_v56, %v1376_v57  ;;  %v1330_v2 = vadd.f32 %v1329_v0, %v1281_v50 }
 0x1a0   : > { %v1472_v41 = vsel %vm1432_vm0, %v3297_v60, 0.0  ;;  %v1517_v22 = vmul.f32 %v3297_v60, %v3297_v60 }
 0x1a2   : > { %v1559_v30 = vsel %vm1432_vm0, %v1517_v22, 0.0 }
 0x1a3   : > { %v1378_v54 = vpop.f32.mrf.mxu2  ;;  %1473 = vadd.xlane.f32.xlu1 %v1472_v41  ;;  %v1282_v10 = vpop.f32.mrf.mxu0 }
 0x1a4   : > { %v1427_v7 = vpop.f32.mrf.mxu3  ;;  %v1379_v9 = vadd.f32 %v1378_v54, %v1330_v2  ;;  %v1283_v12 = vadd.f32 %v1282_v10, %v3190_v3  ;;  %v1331_v61 = vpop.f32.mrf.mxu1 }
 0x1a6   : > { %v3302_v11 = vadd.f32 %v1427_v7, %v1379_v9  ;;  %v1332_v17 = vadd.f32 %v1331_v61, %v1283_v12 }
 0x1a8   : > { %v1475_v59 = vsel %vm1432_vm0, %v3302_v11, 0.0  ;;  %v1518_v15 = vmul.f32 %v3302_v11, %v3302_v11 }
 0x1a9   : > { %1476 = vadd.xlane.f32.xlu2 %v1475_v59 }
 0x1aa   : > { %v1562_v46 = vsel %vm1432_vm0, %v1518_v15, 0.0 }
 0x1ab   : > { %v1380_v62 = vpop.f32.mrf.mxu2 }
 0x1ac   : > { %v1381_v19 = vadd.f32 %v1380_v62, %v1332_v17  ;;  %v1435_v21 = vpop.xlane.xlu0 %1434  ;;  %v1429_v23 = vpop.f32.mrf.mxu3 }
 0x1ad   : > { %v1488_v24 = vmul.f32 %v3307_v18, %v1435_v21 }
 0x1ae   : > { %v3312_v3 = vadd.f32 %v1429_v23, %v1381_v19  ;;  %v1522_v8 = vpop.xlane.xlu1 %1521 }
 0x1af   : > { %v1584_v29 = vmul.f32 %v1488_v24, %v1488_v24  ;;  %v1568_v4 = vmul.f32 %v1522_v8, %v3307_v18  ;;  %v1632_v12 = vsub.f32 %v3193_v13, %v1488_v24 }
 0x1b0   : > { %v1478_v20 = vsel %vm1432_vm0, %v3312_v3, 0.0  ;;  %v1519_v33 = vmul.f32 %v3312_v3, %v3312_v3 }
 0x1b1   : > { %v1600_v35 = vsub.f32 %v1568_v4, %v1584_v29  ;;  %1560 = vadd.xlane.f32.xlu2 %v1559_v30  ;;  %1479 = vadd.xlane.f32.xlu0 %v1478_v20 }
 0x1b2   : > { %v1565_v36 = vsel %vm1432_vm0, %v1519_v33, 0.0 }
 0x1b3   : > { %v1616_v37 = vmax.f32 %v1600_v35, 0.0  ;;  %1566 = vadd.xlane.f32.xlu1 %v1565_v36 }
 0x1b4   : > { %v1438_v38 = vpop.xlane.xlu0 %1437 }
 0x1b5   : > { %v1648_v25 = vadd.f32 1e-05, %v1616_v37  ;;  %v3324_v42 = vmul.f32 %v3307_v18, %v1438_v38 }
 0x1b6   : > { %v1525_v43 = vpop.xlane.xlu2 %1524 }
 0x1b7   : > { %2640 = vrsqrt.f32 %v1648_v25  ;;  %v1585_v44 = vmul.f32 %v3324_v42, %v3324_v42  ;;  %v1569_v28 = vmul.f32 %v1525_v43, %v3307_v18  ;;  %vm1670_vm3 = vweird.f32 %v1648_v25 }
 0x1b8   : > { %v1633_v36 = vsub.f32 %v3201_v26, %v3324_v42 }
 0x1b9   : > { %1563 = vadd.xlane.f32.xlu0 %v1562_v46  ;;  %v1601_v47 = vsub.f32 %v1569_v28, %v1585_v44 }
 0x1bb   : > { %v1617_v48 = vmax.f32 %v1601_v47, 0.0 }
 0x1bc   : > { %v1441_v49 = vpop.xlane.xlu1 %1440 }
 0x1bd   : > { %v2641_v34 = vpop.eup %2640  ;;  %v3331_v52 = vmul.f32 %v3307_v18, %v1441_v49  ;;  %v1649_v56 = vadd.f32 1e-05, %v1617_v48 }
 0x1be   : > { %v1665_v32 = vmul.f32 %v2641_v34, %v1648_v25  ;;  %v1528_v57 = vpop.xlane.xlu0 %1527  ;;  %vm1671_vm2 = vweird.f32 %v2641_v34 }
 0x1bf   : > { %v1586_v58 = vmul.f32 %v3331_v52, %v3331_v52  ;;  %v1570_v50 = vmul.f32 %v1528_v57, %v3307_v18  ;;  %2642 = vrsqrt.f32 %v1649_v56  ;;  %vm1672_vm4 = vmor %vm1670_vm3, %vm1671_vm2  ;;  %vm1680_vm8 = vweird.f32 %v1649_v56 }
 0x1c0   : > { %v1666_v63 = vmul.f32 %v2641_v34, %v1665_v32  ;;  %v1634_v57 = vsub.f32 %v3209_v39, %v3331_v52 }
 0x1c1   : > { %v1602_v0 = vsub.f32 %v1570_v50, %v1586_v58 }
 0x1c2   : > { %v1667_v2 = vmul.f32 0.5, %v1666_v63 }
 0x1c3   : > { %v1618_v41 = vmax.f32 %v1602_v0, 0.0 }
 0x1c4   : > { %v1668_v5 = vsub.f32 1.5, %v1667_v2  ;;  %v1444_v54 = vpop.xlane.xlu1 %1443 }
 0x1c5   : > { %v1650_v7 = vadd.f32 1e-05, %v1618_v41  ;;  %v2643_v9 = vpop.eup %2642  ;;  %v3338_v62 = vmul.f32 %v3307_v18, %v1444_v54 }
 0x1c6   : > { %v1669_v10 = vmul.f32 %v2641_v34, %v1668_v5  ;;  %v1675_v14 = vmul.f32 %v2643_v9, %v1649_v56  ;;  %vm1681_vm7 = vweird.f32 %v2643_v9 }
 0x1c7   : > { %2644 = vrsqrt.f32 %v1650_v7  ;;  %v1587_v29 = vmul.f32 %v3338_v62, %v3338_v62  ;;  %vm1682_vm9 = vmor %vm1680_vm8, %vm1681_vm7  ;;  %vm1690_vm12 = vweird.f32 %v1650_v7 }
 0x1c8   : > { %v1673_v59 = vsel %vm1672_vm4, %v2641_v34, %v1669_v10  ;;  %v1676_v17 = vmul.f32 %v2643_v9, %v1675_v14 }
 0x1c9   : > { %v1824_v61 = vmul.f32 %v1673_v59, %v1632_v12 }
 0x1ca   : > { %v1677_v21 = vmul.f32 0.5, %v1676_v17 }
 0x1cb   : > { %vm1840_vm5 = vcmp.ge.f32.partialorder %v1824_v61, 0.0  ;;  %v1856_v19 = vmul.f32 0.2, %v1824_v61 }
 0x1cc   : > { %v1447_v22 = vpop.xlane.xlu2 %1446  ;;  %v1531_v23 = vpop.xlane.xlu1 %1530  ;;  %v1678_v24 = vsub.f32 1.5, %v1677_v21 }
 0x1cd   : > { %v2645_v8 = vpop.eup %2644  ;;  %v1872_v13 = vsel %vm1840_vm5, %v1824_v61, %v1856_v19  ;;  %v1571_v4 = vmul.f32 %v1531_v23, %v3307_v18  ;;  %v3355_v15 = vmul.f32 %v3307_v18, %v1447_v22 }
 0x1ce   : > { %v1888_v30 = vpack.c.bf16 %v1872_v13, %v1872_v13  ;;  %v1685_v20 = vmul.f32 %v2645_v8, %v1650_v7  ;;  %v1679_v33 = vmul.f32 %v2643_v9, %v1678_v24  ;;  %vm1691_vm11 = vweird.f32 %v2645_v8 }
 0x1cf   : > { %v1603_v35 = vsub.f32 %v1571_v4, %v1587_v29  ;;  %v1588_v26 = vmul.f32 %v3355_v15, %v3355_v15  ;;  %vm1692_vm13 = vmor %vm1690_vm12, %vm1691_vm11 }
 0x1d0   : > { %1905 = vst.msk [vmem:[%s3344_s18] sm:$0xf] %vm1904_vm6, %v1888_v30  ;;  %v1686_v37 = vmul.f32 %v2645_v8, %v1685_v20  ;;  %v1683_v38 = vsel %vm1682_vm9, %v2643_v9, %v1679_v33  ;;  %v1635_v20 = vsub.f32 %v3217_v51, %v3338_v62 }
 0x1d1   : > { %v1619_v25 = vmax.f32 %v1603_v35, 0.0  ;;  %v1825_v43 = vmul.f32 %v1683_v38, %v1633_v36 }
 0x1d2   : > { %v1687_v44 = vmul.f32 0.5, %v1686_v37 }
 0x1d3   : > { %v1651_v28 = vadd.f32 1e-05, %v1619_v25  ;;  %vm1841_vm10 = vcmp.ge.f32.partialorder %v1825_v43, 0.0  ;;  %v1857_v46 = vmul.f32 0.2, %v1825_v43 }
 0x1d4   : > { %v1688_v47 = vsub.f32 1.5, %v1687_v44  ;;  %v1534_v48 = vpop.xlane.xlu2 %1533 }
 0x1d5   : > { %2646 = vrsqrt.f32 %v1651_v28  ;;  %v1572_v42 = vmul.f32 %v1534_v48, %v3307_v18  ;;  %v1873_v49 = vsel %vm1841_vm10, %v1825_v43, %v1857_v46  ;;  %vm1700_vm0 = vweird.f32 %v1651_v28 }
 0x1d6   : > { %v1689_v34 = vmul.f32 %v2645_v8, %v1688_v47  ;;  %v1537_v32 = vpop.xlane.xlu0 %1536  ;;  %v1889_v56 = vpack.c.bf16 %v1873_v49, %v1873_v49 }
 0x1d7   : > { %v1604_v58 = vsub.f32 %v1572_v42, %v1588_v26  ;;  %v1573_v59 = vmul.f32 %v1537_v32, %v3307_v18 }
 0x1d8   : > { %v1693_v50 = vsel %vm1692_vm13, %v2645_v8, %v1689_v34  ;;  %1906 = vst.msk [vmem:[%s3344_s18 + $0x4] sm:$0xf] %vm1904_vm6, %v1889_v56  ;;  %v1636_v56 = vsub.f32 %v3224_v1, %v3355_v15 }
 0x1d9   : > { %v1826_v63 = vmul.f32 %v1693_v50, %v1634_v57  ;;  %v1620_v0 = vmax.f32 %v1604_v58, 0.0 }
 0x1db   : > { %v2647_v2 = vpop.eup %2646  ;;  %vm1842_vm14 = vcmp.ge.f32.partialorder %v1826_v63, 0.0  ;;  %v1858_v41 = vmul.f32 0.2, %v1826_v63  ;;  %v1652_v5 = vadd.f32 1e-05, %v1620_v0 }
 0x1dc   : > { %v1695_v54 = vmul.f32 %v2647_v2, %v1651_v28  ;;  %v1450_v9 = vpop.xlane.xlu2 %1449  ;;  %vm1701_vm15 = vweird.f32 %v2647_v2 }
 0x1dd   : > { %v1874_v7 = vsel %vm1842_vm14, %v1826_v63, %v1858_v41  ;;  %2648 = vrsqrt.f32 %v1652_v5  ;;  %v3365_v10 = vmul.f32 %v3307_v18, %v1450_v9  ;;  %vm1702_vm1 = vmor %vm1700_vm0, %vm1701_vm15  ;;  %vm1710_vm4 = vweird.f32 %v1652_v5 }
 0x1de   : > { %v1890_v39 = vpack.c.bf16 %v1874_v7, %v1874_v7  ;;  %v1696_v52 = vmul.f32 %v2647_v2, %v1695_v54  ;;  %v1540_v12 = vpop.xlane.xlu1 %1539  ;;  %v1453_v14 = vpop.xlane.xlu0 %1452 }
 0x1df   : > { %v1589_v61 = vmul.f32 %v3365_v10, %v3365_v10  ;;  %v3371_v17 = vmul.f32 %v3307_v18, %v1453_v14  ;;  %v1574_v22 = vmul.f32 %v1540_v12, %v3307_v18 }
 0x1e0   : > { %1907 = vst.msk [vmem:[%s3344_s18 + $0x8] sm:$0xf] %vm1904_vm6, %v1890_v39  ;;  %v1697_v19 = vmul.f32 0.5, %v1696_v52 }
 0x1e1   : > { %v1605_v21 = vsub.f32 %v1573_v59, %v1589_v61  ;;  %v1590_v23 = vmul.f32 %v3371_v17, %v3371_v17 }
 0x1e2   : > { %v1698_v8 = vsub.f32 1.5, %v1697_v19 }
 0x1e3   : > { %v2649_v13 = vpop.eup %2648  ;;  %v1621_v24 = vmax.f32 %v1605_v21, 0.0  ;;  %v1606_v29 = vsub.f32 %v1574_v22, %v1590_v23 }
 0x1e4   : > { %v1699_v4 = vmul.f32 %v2647_v2, %v1698_v8  ;;  %v1705_v30 = vmul.f32 %v2649_v13, %v1652_v5  ;;  %vm1711_vm3 = vweird.f32 %v2649_v13 }
 0x1e5   : > { %v1653_v33 = vadd.f32 1e-05, %v1621_v24  ;;  %v1622_v35 = vmax.f32 %v1606_v29, 0.0  ;;  %vm1712_vm5 = vmor %vm1710_vm4, %vm1711_vm3  ;;  %v1637_v29 = vsub.f32 %v3232_v16, %v3365_v10 }
 0x1e6   : > { %v1703_v36 = vsel %vm1702_vm1, %v2647_v2, %v1699_v4  ;;  %v1706_v37 = vmul.f32 %v2649_v13, %v1705_v30  ;;  %v1543_v38 = vpop.xlane.xlu2 %1542  ;;  %v1456_v25 = vpop.xlane.xlu1 %1455 }
 0x1e7   : > { %v1827_v43 = vmul.f32 %v1703_v36, %v1635_v20  ;;  %2650 = vrsqrt.f32 %v1653_v33  ;;  %v1654_v44 = vadd.f32 1e-05, %v1622_v35  ;;  %v3381_v47 = vmul.f32 %v3307_v18, %v1456_v25 }
 0x1e8   : > { %v1707_v46 = vmul.f32 0.5, %v1706_v37  ;;  %v1575_v51 = vmul.f32 %v1543_v38, %v3307_v18  ;;  %vm1720_vm9 = vweird.f32 %v1653_v33 }
 0x1e9   : > { %vm1843_vm2 = vcmp.ge.f32.partialorder %v1827_v43, 0.0  ;;  %v1859_v28 = vmul.f32 0.2, %v1827_v43  ;;  %2652 = vrsqrt.f32 %v1654_v44  ;;  %v1591_v62 = vmul.f32 %v3381_v47, %v3381_v47 }
 0x1ea   : > { %v1708_v48 = vsub.f32 1.5, %v1707_v46  ;;  %vm1730_vm12 = vweird.f32 %v1654_v44 }
 0x1eb   : > { %v1875_v26 = vsel %vm1843_vm2, %v1827_v43, %v1859_v28  ;;  %v1607_v34 = vsub.f32 %v1575_v51, %v1591_v62 }
 0x1ec   : > { %v1891_v42 = vpack.c.bf16 %v1875_v26, %v1875_v26  ;;  %v1709_v49 = vmul.f32 %v2649_v13, %v1708_v48 }
 0x1ed   : > { %v2651_v32 = vpop.eup %2650  ;;  %v1623_v50 = vmax.f32 %v1607_v34, 0.0 }
 0x1ee   : > { %1908 = vst.msk [vmem:[%s3344_s18 + $0xc] sm:$0xf] %vm1904_vm6, %v1891_v42  ;;  %v1713_v57 = vsel %vm1712_vm5, %v2649_v13, %v1709_v49  ;;  %v1715_v58 = vmul.f32 %v2651_v32, %v1653_v33  ;;  %v1459_v63 = vpop.xlane.xlu2 %1458  ;;  %v1546_v0 = vpop.xlane.xlu0 %1545  ;;  %vm1721_vm8 = vweird.f32 %v2651_v32  ;;  %v1638_v33 = vsub.f32 %v3239_v27, %v3371_v17 }
 0x1ef   : > { %v2653_v2 = vpop.eup %2652  ;;  %v1828_v41 = vmul.f32 %v1713_v57, %v1636_v56  ;;  %v3391_v54 = vmul.f32 %v3307_v18, %v1459_v63  ;;  %v3393_v7 = vadd.f32 1e-05, %v1623_v50  ;;  %v1576_v39 = vmul.f32 %v1546_v0, %v3307_v18  ;;  %vm1722_vm11 = vmor %vm1720_vm9, %vm1721_vm8 }
 0x1f0   : > { %v1716_v9 = vmul.f32 %v2651_v32, %v1715_v58  ;;  %v1725_v5 = vmul.f32 %v2653_v2, %v1654_v44  ;;  %vm1731_vm10 = vweird.f32 %v2653_v2 }
 0x1f1   : > { %vm1844_vm7 = vcmp.ge.f32.partialorder %v1828_v41, 0.0  ;;  %v1860_v1 = vmul.f32 0.2, %v1828_v41  ;;  %v1592_v15 = vmul.f32 %v3391_v54, %v3391_v54  ;;  %2654 = vrsqrt.f32 %v3393_v7  ;;  %vm1732_vm13 = vmor %vm1730_vm12, %vm1731_vm10 }
 0x1f2   : > { %v1717_v52 = vmul.f32 0.5, %v1716_v9  ;;  %v1726_v12 = vmul.f32 %v2653_v2, %v1725_v5  ;;  %vm1740_vm1 = vweird.f32 %v3393_v7 }
 0x1f3   : > { %v1876_v14 = vsel %vm1844_vm7, %v1828_v41, %v1860_v1  ;;  %v1608_v59 = vsub.f32 %v1576_v39, %v1592_v15  ;;  %v1639_v41 = vsub.f32 %v3249_v40, %v3381_v47 }
 0x1f4   : > { %v1892_v61 = vpack.c.bf16 %v1876_v14, %v1876_v14  ;;  %v1718_v19 = vsub.f32 1.5, %v1717_v52  ;;  %v1727_v21 = vmul.f32 0.5, %v1726_v12 }
 0x1f5   : > { %v1624_v22 = vmax.f32 %v1608_v59, 0.0 }
 0x1f6   : > { %1909 = vst.msk [vmem:[%s3344_s18 + $0x10] sm:$0xf] %vm1904_vm6, %v1892_v61  ;;  %v1719_v23 = vmul.f32 %v2651_v32, %v1718_v19  ;;  %v1728_v8 = vsub.f32 1.5, %v1727_v21  ;;  %v1549_v13 = vpop.xlane.xlu1 %1548  ;;  %v1462_v24 = vpop.xlane.xlu0 %1461 }
 0x1f7   : > { %v3403_v4 = vadd.f32 1e-05, %v1624_v22  ;;  %v3406_v30 = vmul.f32 %v3307_v18, %v1462_v24  ;;  %v2655_v20 = vpop.eup %2654  ;;  %v1577_v10 = vmul.f32 %v1549_v13, %v3307_v18 }
 0x1f8   : > { %v1723_v35 = vsel %vm1722_vm11, %v2651_v32, %v1719_v23  ;;  %v1729_v36 = vmul.f32 %v2653_v2, %v1728_v8  ;;  %v1735_v38 = vmul.f32 %v2655_v20, %v3393_v7  ;;  %vm1741_vm0 = vweird.f32 %v2655_v20 }
 0x1f9   : > { %v1829_v37 = vmul.f32 %v1723_v35, %v1637_v29  ;;  %2656 = vrsqrt.f32 %v3403_v4  ;;  %v1593_v25 = vmul.f32 %v3406_v30, %v3406_v30  ;;  %vm1742_vm2 = vmor %vm1740_vm1, %vm1741_vm0  ;;  %vm1750_vm5 = vweird.f32 %v3403_v4 }
 0x1fa   : > { %v1733_v16 = vsel %vm1732_vm13, %v2653_v2, %v1729_v36  ;;  %v1736_v44 = vmul.f32 %v2655_v20, %v1735_v38  ;;  %v1640_v23 = vsub.f32 %v3257_v55, %v3391_v54 }
 0x1fb   : > { %vm1845_vm14 = vcmp.ge.f32.partialorder %v1829_v37, 0.0  ;;  %v1861_v43 = vmul.f32 0.2, %v1829_v37  ;;  %v1830_v46 = vmul.f32 %v1733_v16, %v1638_v33  ;;  %v1609_v28 = vsub.f32 %v1577_v10, %v1593_v25 }
 0x1fc   : > { %v1737_v17 = vmul.f32 0.5, %v1736_v44 }
 0x1fd   : > { %v1877_v48 = vsel %vm1845_vm14, %v1829_v37, %v1861_v43  ;;  %vm1846_vm15 = vcmp.ge.f32.partialorder %v1830_v46, 0.0  ;;  %v1862_v27 = vmul.f32 0.2, %v1830_v46  ;;  %v1625_v62 = vmax.f32 %v1609_v28, 0.0 }
 0x1fe   : > { %v1893_v51 = vpack.c.bf16 %v1877_v48, %v1877_v48  ;;  %v1552_v26 = vpop.xlane.xlu2 %1551  ;;  %v1465_v42 = vpop.xlane.xlu1 %1464  ;;  %v1738_v32 = vsub.f32 1.5, %v1737_v17  ;;  %v1641_v17 = vsub.f32 %v3265_v6, %v3406_v30 }
 0x1ff   : > { %v2657_v49 = vpop.eup %2656  ;;  %v1878_v34 = vsel %vm1846_vm15, %v1830_v46, %v1862_v27  ;;  %v3416_v56 = vmul.f32 %v3307_v18, %v1465_v42  ;;  %v1657_v50 = vadd.f32 1e-05, %v1625_v62  ;;  %v1578_v0 = vmul.f32 %v1552_v26, %v3307_v18 }
 0x200   : > { %1910 = vst.msk [vmem:[%s3344_s18 + $0x14] sm:$0xf] %vm1904_vm6, %v1893_v51  ;;  %v1894_v57 = vpack.c.bf16 %v1878_v34, %v1878_v34  ;;  %v1745_v58 = vmul.f32 %v2657_v49, %v3403_v4  ;;  %v1739_v63 = vmul.f32 %v2655_v20, %v1738_v32  ;;  %vm1751_vm4 = vweird.f32 %v2657_v49 }
 0x201   : > { %v1594_v2 = vmul.f32 %v3416_v56, %v3416_v56  ;;  %2658 = vrsqrt.f32 %v1657_v50  ;;  %vm1752_vm7 = vmor %vm1750_vm5, %vm1751_vm4  ;;  %vm1760_vm10 = vweird.f32 %v1657_v50  ;;  %v1642_v6 = vsub.f32 %v3273_v53, %v3416_v56 }
 0x202   : > { %1911 = vst.msk [vmem:[%s3344_s18 + $0x18] sm:$0xf] %vm1904_vm6, %v1894_v57  ;;  %v1746_v9 = vmul.f32 %v2657_v49, %v1745_v58  ;;  %v1743_v5 = vsel %vm1742_vm2, %v2655_v20, %v1739_v63 }
 0x203   : > { %v1610_v1 = vsub.f32 %v1578_v0, %v1594_v2  ;;  %v1831_v15 = vmul.f32 %v1743_v5, %v1639_v41 }
 0x204   : > { %v1747_v39 = vmul.f32 0.5, %v1746_v9 }
 0x205   : > { %v1626_v52 = vmax.f32 %v1610_v1, 0.0  ;;  %vm1847_vm3 = vcmp.ge.f32.partialorder %v1831_v15, 0.0  ;;  %v1863_v7 = vmul.f32 0.2, %v1831_v15 }
 0x206   : > { %v1748_v12 = vsub.f32 1.5, %v1747_v39  ;;  %v1468_v14 = vpop.xlane.xlu2 %1467  ;;  %v1555_v59 = vpop.xlane.xlu0 %1554 }
 0x207   : > { %v1658_v61 = vadd.f32 1e-05, %v1626_v52  ;;  %v3430_v19 = vmul.f32 %v3307_v18, %v1468_v14  ;;  %v2659_v40 = vpop.eup %2658  ;;  %v1879_v47 = vsel %vm1847_vm3, %v1831_v15, %v1863_v7  ;;  %v1579_v29 = vmul.f32 %v1555_v59, %v3307_v18 }
 0x208   : > { %v1749_v21 = vmul.f32 %v2657_v49, %v1748_v12  ;;  %v1895_v22 = vpack.c.bf16 %v1879_v47, %v1879_v47  ;;  %v1755_v8 = vmul.f32 %v2659_v40, %v1657_v50  ;;  %vm1761_vm9 = vweird.f32 %v2659_v40 }
 0x209   : > { %2660 = vrsqrt.f32 %v1658_v61  ;;  %v1595_v24 = vmul.f32 %v3430_v19, %v3430_v19  ;;  %vm1762_vm11 = vmor %vm1760_vm10, %vm1761_vm9  ;;  %vm1770_vm14 = vweird.f32 %v1658_v61 }
 0x20a   : > { %v1753_v13 = vsel %vm1752_vm7, %v2657_v49, %v1749_v21  ;;  %1912 = vst.msk [vmem:[%s3344_s18 + $0x1c] sm:$0xf] %vm1904_vm6, %v1895_v22  ;;  %v1756_v35 = vmul.f32 %v2659_v40, %v1755_v8 }
 0x20b   : > { %v1832_v20 = vmul.f32 %v1753_v13, %v1640_v23  ;;  %v1611_v36 = vsub.f32 %v1579_v29, %v1595_v24 }
 0x20c   : > { %v1757_v37 = vmul.f32 0.5, %v1756_v35 }
 0x20d   : > { %vm1848_vm8 = vcmp.ge.f32.partialorder %v1832_v20, 0.0  ;;  %v1864_v4 = vmul.f32 0.2, %v1832_v20  ;;  %v1627_v33 = vmax.f32 %v1611_v36, 0.0 }
 0x20e   : > { %v1558_v55 = vpop.xlane.xlu1 %1557  ;;  %v1471_v54 = vpop.xlane.xlu0 %1470  ;;  %v1758_v10 = vsub.f32 1.5, %v1757_v37 }
 0x20f   : > { %v2661_v38 = vpop.eup %2660  ;;  %v1880_v16 = vsel %vm1848_vm8, %v1832_v20, %v1864_v4  ;;  %v3441_v25 = vmul.f32 %v3307_v18, %v1471_v54  ;;  %v1659_v44 = vadd.f32 1e-05, %v1627_v33  ;;  %v1580_v48 = vmul.f32 %v1558_v55, %v3307_v18 }
 0x210   : > { %v1896_v43 = vpack.c.bf16 %v1880_v16, %v1880_v16  ;;  %v1765_v46 = vmul.f32 %v2661_v38, %v1658_v61  ;;  %v1759_v28 = vmul.f32 %v2659_v40, %v1758_v10  ;;  %vm1771_vm13 = vweird.f32 %v2661_v38 }
 0x211   : > { %v1596_v27 = vmul.f32 %v3441_v25, %v3441_v25  ;;  %2662 = vrsqrt.f32 %v1659_v44  ;;  %vm1772_vm15 = vmor %vm1770_vm14, %vm1771_vm13  ;;  %vm1780_vm2 = vweird.f32 %v1659_v44 }
 0x212   : > { %1913 = vst.msk [vmem:[%s3344_s18 + $0x20] sm:$0xf] %vm1904_vm6, %v1896_v43  ;;  %v1766_v51 = vmul.f32 %v2661_v38, %v1765_v46  ;;  %v1763_v62 = vsel %vm1762_vm11, %v2659_v40, %v1759_v28  ;;  %v1643_v40 = vsub.f32 %v3281_v31, %v3430_v19 }
 0x213   : > { %v1612_v26 = vsub.f32 %v1580_v48, %v1596_v27  ;;  %v1833_v42 = vmul.f32 %v1763_v62, %v1641_v17 }
 0x214   : > { %v1767_v49 = vmul.f32 0.5, %v1766_v51 }
 0x215   : > { %v1628_v34 = vmax.f32 %v1612_v26, 0.0  ;;  %vm1849_vm12 = vcmp.ge.f32.partialorder %v1833_v42, 0.0  ;;  %v1865_v32 = vmul.f32 0.2, %v1833_v42 }
 0x216   : > { %v1768_v57 = vsub.f32 1.5, %v1767_v49  ;;  %v1474_v52 = vpop.xlane.xlu1 %1473 }
 0x217   : > { %v1660_v58 = vadd.f32 1e-05, %v1628_v34  ;;  %v2663_v50 = vpop.eup %2662  ;;  %v1881_v63 = vsel %vm1849_vm12, %v1833_v42, %v1865_v32  ;;  %v3455_v61 = vmul.f32 %v3307_v18, %v1474_v52 }
 0x218   : > { %v1769_v0 = vmul.f32 %v2661_v38, %v1768_v57  ;;  %v1897_v2 = vpack.c.bf16 %v1881_v63, %v1881_v63  ;;  %v1775_v30 = vmul.f32 %v2663_v50, %v1659_v44  ;;  %vm1781_vm1 = vweird.f32 %v2663_v50 }
 0x219   : > { %2664 = vrsqrt.f32 %v1660_v58  ;;  %vm1782_vm3 = vmor %vm1780_vm2, %vm1781_vm1  ;;  %v1597_v24 = vmul.f32 %v3455_v61, %v3455_v61  ;;  %vm1790_vm7 = vweird.f32 %v1660_v58 }
 0x21a   : > { %v1773_v41 = vsel %vm1772_vm15, %v2661_v38, %v1769_v0  ;;  %1914 = vst.msk [vmem:[%s3344_s18 + $0x24] sm:$0xf] %vm1904_vm6, %v1897_v2  ;;  %v1776_v5 = vmul.f32 %v2663_v50, %v1775_v30  ;;  %v1644_v38 = vsub.f32 %v3289_v45, %v3441_v25 }
 0x21b   : > { %v1834_v9 = vmul.f32 %v1773_v41, %v1642_v6 }
 0x21c   : > { %v1477_v1 = vpop.xlane.xlu2 %1476  ;;  %v1777_v39 = vmul.f32 0.5, %v1776_v5 }
 0x21d   : > { %vm1850_vm0 = vcmp.ge.f32.partialorder %v1834_v9, 0.0  ;;  %v1866_v15 = vmul.f32 0.2, %v1834_v9  ;;  %v3473_v46 = vmul.f32 %v3307_v18, %v1477_v1 }
 0x21e   : > { %v1778_v14 = vsub.f32 1.5, %v1777_v39 }
 0x21f   : > { %v2665_v7 = vpop.eup %2664  ;;  %v1882_v12 = vsel %vm1850_vm0, %v1834_v9, %v1866_v15  ;;  %v1598_v45 = vmul.f32 %v3473_v46, %v3473_v46  ;;  %v1645_v9 = vsub.f32 %v3297_v60, %v3455_v61 }
 0x220   : > { %v1898_v59 = vpack.c.bf16 %v1882_v12, %v1882_v12  ;;  %v1785_v53 = vmul.f32 %v2665_v7, %v1660_v58  ;;  %v1779_v56 = vmul.f32 %v2663_v50, %v1778_v14  ;;  %vm1791_vm5 = vweird.f32 %v2665_v7 }
 0x221   : > { %vm1792_vm8 = vmor %vm1790_vm7, %vm1791_vm5 }
 0x222   : > { %1915 = vst.msk [vmem:[%s3344_s18 + $0x28] sm:$0xf] %vm1904_vm6, %v1898_v59  ;;  %v1786_v47 = vmul.f32 %v2665_v7, %v1785_v53  ;;  %v1783_v21 = vsel %vm1782_vm3, %v2663_v50, %v1779_v56 }
 0x223   : > { %v1835_v22 = vmul.f32 %v1783_v21, %v1643_v40 }
 0x224   : > { %v1787_v23 = vmul.f32 0.5, %v1786_v47  ;;  %v1561_v8 = vpop.xlane.xlu2 %1560  ;;  %v1480_v13 = vpop.xlane.xlu0 %1479 }
 0x225   : > { %v1581_v29 = vmul.f32 %v1561_v8, %v3307_v18  ;;  %v3465_v20 = vmul.f32 %v3307_v18, %v1480_v13  ;;  %vm1851_vm4 = vcmp.ge.f32.partialorder %v1835_v22, 0.0  ;;  %v1867_v35 = vmul.f32 0.2, %v1835_v22 }
 0x226   : > { %v1788_v36 = vsub.f32 1.5, %v1787_v23  ;;  %v1567_v31 = vpop.xlane.xlu1 %1566 }
 0x227   : > { %v1613_v19 = vsub.f32 %v1581_v29, %v1597_v24  ;;  %v1599_v4 = vmul.f32 %v3465_v20, %v3465_v20  ;;  %v1583_v37 = vmul.f32 %v1567_v31, %v3307_v18  ;;  %v1883_v33 = vsel %vm1851_vm4, %v1835_v22, %v1867_v35 }
 0x228   : > { %v1789_v55 = vmul.f32 %v2665_v7, %v1788_v36  ;;  %v1899_v54 = vpack.c.bf16 %v1883_v33, %v1883_v33  ;;  %v1647_v12 = vsub.f32 %v3312_v3, %v3465_v20  ;;  %v1646_v3 = vsub.f32 %v3302_v11, %v3473_v46 }
 0x229   : > { %v1629_v16 = vmax.f32 %v1613_v19, 0.0  ;;  %v1615_v10 = vsub.f32 %v1583_v37, %v1599_v4 }
 0x22a   : > { %v1793_v43 = vsel %vm1792_vm8, %v2665_v7, %v1789_v55  ;;  %1916 = vst.msk [vmem:[%s3344_s18 + $0x2c] sm:$0xf] %vm1904_vm6, %v1899_v54 }
 0x22b   : > { %v1836_v44 = vmul.f32 %v1793_v43, %v1644_v38  ;;  %v1661_v28 = vadd.f32 1e-05, %v1629_v16  ;;  %v1631_v48 = vmax.f32 %v1615_v10, 0.0 }
 0x22c   : > { %v1564_v27 = vpop.xlane.xlu0 %1563 }
 0x22d   : > { %vm1852_vm9 = vcmp.ge.f32.partialorder %v1836_v44, 0.0  ;;  %v1868_v17 = vmul.f32 0.2, %v1836_v44  ;;  %2666 = vrsqrt.f32 %v1661_v28  ;;  %v1663_v25 = vadd.f32 1e-05, %v1631_v48 }
 0x22e   : > { %v1582_v51 = vmul.f32 %v1564_v27, %v3307_v18  ;;  %vm1800_vm11 = vweird.f32 %v1661_v28 }
 0x22f   : > { %v1884_v62 = vsel %vm1852_vm9, %v1836_v44, %v1868_v17  ;;  %2668 = vrsqrt.f32 %v1663_v25  ;;  %vm1820_vm14 = vweird.f32 %v1663_v25 }
 0x230   : > { %v1900_v26 = vpack.c.bf16 %v1884_v62, %v1884_v62  ;;  %v1614_v42 = vsub.f32 %v1582_v51, %v1598_v45 }
 0x232   : > { %1917 = vst.msk [vmem:[%s3344_s18 + $0x30] sm:$0xf] %vm1904_vm6, %v1900_v26  ;;  %v1630_v49 = vmax.f32 %v1614_v42, 0.0 }
 0x233   : > { %v2667_v34 = vpop.eup %2666 }
 0x234   : > { %v1795_v32 = vmul.f32 %v2667_v34, %v1661_v28  ;;  %v1662_v57 = vadd.f32 1e-05, %v1630_v49  ;;  %vm1801_vm10 = vweird.f32 %v2667_v34 }
 0x235   : > { %v2669_v58 = vpop.eup %2668  ;;  %vm1802_vm12 = vmor %vm1800_vm11, %vm1801_vm10 }
 0x236   : > { %v1796_v50 = vmul.f32 %v2667_v34, %v1795_v32  ;;  %2670 = vrsqrt.f32 %v1662_v57  ;;  %v1815_v63 = vmul.f32 %v2669_v58, %v1663_v25  ;;  %vm1821_vm13 = vweird.f32 %v2669_v58 }
 0x237   : > { %vm1822_vm15 = vmor %vm1820_vm14, %vm1821_vm13  ;;  %vm1810_vm3 = vweird.f32 %v1662_v57 }
 0x238   : > { %v1797_v0 = vmul.f32 0.5, %v1796_v50  ;;  %v1816_v2 = vmul.f32 %v2669_v58, %v1815_v63 }
 0x23a   : > { %v1798_v6 = vsub.f32 1.5, %v1797_v0  ;;  %v1817_v30 = vmul.f32 0.5, %v1816_v2 }
 0x23c   : > { %v2671_v18 = vpop.eup %2670  ;;  %v1799_v41 = vmul.f32 %v2667_v34, %v1798_v6  ;;  %v1818_v5 = vsub.f32 1.5, %v1817_v30 }
 0x23d   : > { %v1805_v1 = vmul.f32 %v2671_v18, %v1662_v57  ;;  %vm1811_vm1 = vweird.f32 %v2671_v18 }
 0x23e   : > { %v1803_v15 = vsel %vm1802_vm12, %v2667_v34, %v1799_v41  ;;  %v1819_v52 = vmul.f32 %v2669_v58, %v1818_v5  ;;  %vm1812_vm4 = vmor %vm1810_vm3, %vm1811_vm1 }
 0x23f   : > { %v1837_v39 = vmul.f32 %v1803_v15, %v1645_v9  ;;  %v1806_v7 = vmul.f32 %v2671_v18, %v1805_v1 }
 0x240   : > { %v1823_v59 = vsel %vm1822_vm15, %v2669_v58, %v1819_v52 }
 0x241   : > { %vm1853_vm0 = vcmp.ge.f32.partialorder %v1837_v39, 0.0  ;;  %v1869_v14 = vmul.f32 0.2, %v1837_v39  ;;  %v1807_v53 = vmul.f32 0.5, %v1806_v7  ;;  %v1839_v56 = vmul.f32 %v1823_v59, %v1647_v12 }
 0x243   : > { %v1885_v60 = vsel %vm1853_vm0, %v1837_v39, %v1869_v14  ;;  %v1808_v61 = vsub.f32 1.5, %v1807_v53  ;;  %vm1855_vm2 = vcmp.ge.f32.partialorder %v1839_v56, 0.0  ;;  %v1871_v47 = vmul.f32 0.2, %v1839_v56 }
 0x244   : > { %v1901_v40 = vpack.c.bf16 %v1885_v60, %v1885_v60 }
 0x245   : > { %v1809_v21 = vmul.f32 %v2671_v18, %v1808_v61  ;;  %v1887_v22 = vsel %vm1855_vm2, %v1839_v56, %v1871_v47 }
 0x246   : > { %1918 = vst.msk [vmem:[%s3344_s18 + $0x34] sm:$0xf] %vm1904_vm6, %v1901_v40  ;;  %v1903_v23 = vpack.c.bf16 %v1887_v22, %v1887_v22 }
 0x247   : > { %v1813_v8 = vsel %vm1812_vm4, %v2671_v18, %v1809_v21 }
 0x248   : > { %v1838_v13 = vmul.f32 %v1813_v8, %v1646_v3  ;;  %1920 = vst.msk [vmem:[%s3344_s18 + $0x3c] sm:$0xf] %vm1904_vm6, %v1903_v23 }
 0x24a   : > { %vm1854_vm5 = vcmp.ge.f32.partialorder %v1838_v13, 0.0  ;;  %v1870_v24 = vmul.f32 0.2, %v1838_v13 }
 0x24c   : > { %v1886_v29 = vsel %vm1854_vm5, %v1838_v13, %v1870_v24 }
 0x24d   : > { %v1902_v20 = vpack.c.bf16 %v1886_v29, %v1886_v29 }
 0x24f   : > { %1919 = vst.msk [vmem:[%s3344_s18 + $0x38] sm:$0xf] %vm1904_vm6, %v1902_v20 }
 0x250 PF: > { %s12_s9 = sadd.s32 1, %s2678_s9  }
 0x251   : > { %p9_p4 = scmp.ge.s32.totalorder %s12_s9, 4  }
 0x253   :  { %11 = sbr.rel (!%p9_p4) target bundleno = 1 (0x1), region = 58 }

// kernel: patchgan_forward.8
= control target key start
LH: loop header
LB: loop body
LE: loop exit
PB: predicated region body
PF: predicated region fallthrough
CT: control target
= control target key end

     0   :  { %s7184_s9 = smov 0   ;;  %s9829_s0 = inlined_call_operand.vmem [shape: bf16[2,2048,4], index: 0, kind: input, shape index: {}]   ;;  %s9830_s1 = inlined_call_operand.vmem [shape: bf16[256,2048], index: 1, kind: input, shape index: {}]   ;;  %s9831_s2 = inlined_call_operand.vmem [shape: bf16[2,256,4], index: 2, kind: output, shape index: {}]  }
   0x1 LB: > { %s5152_s10 = sadd.s32 4294967295, %s7166_s9   ;;  %p5156_p0 = scmp.ge.s32.totalorder %s7166_s9, 1  ;;  %s7166_s9 = sphi %s7184_s9, %s12_s9  }
   0x2   : > { %p112_p1 = scmp.lt.s32.totalorder %s7166_s9, 3 }
   0x4   : > { %p113_p2 = pnand %p5156_p0, %p112_p1 }
   0x5   : > { %p134_p3 = scmp.lt.s32.totalorder (!%p113_p2), %s5152_s10, 1 }
   0x6   : > { %116 = sbr.rel (%p113_p2) target bundleno = 1359 (0x54f), region = 28 }
   0xb   : > { %s9833_s10 = smov (!%p134_p3, %s5152_s10), 1  ;;  %v5163_v28 = vld [vmem:[%s9830_s1] sm:$0xf]  ;;  %v6829_v30 = vld [vmem:[%s9830_s1 + $0x4] sm:$0xf]  ;;  %vm4128_vm0 = vcmask 31744  }
   0xc   : > { %s6699_s11 = sshll.u32 %s9833_s10, 10  ;;  %v6837_v29 = vld [vmem:[%s9830_s1 + $0x3c] sm:$0xf0]  ;;  %v5165_v35 = vld [vmem:[%s9830_s1 + $0x40] sm:$0xf0]  ;;  %s6700_s27 = sshll.u32 %s9833_s10, 7 }
   0xd   : > { %s7198_s14 = scalar_lea.vmem %s9829_s0, %s6699_s11  ;;  %v5171_v36 = vld [vmem:[%s9830_s1 + $0x8] sm:$0xf]  ;;  %v6830_v38 = vld [vmem:[%s9830_s1 + $0xc] sm:$0xf]  ;;  %v5164_v42 = vor.u32 %v6837_v29, %v5163_v28  ;;  %v5168_v43 = vor.u32 %v6829_v30, %v5165_v35  ;;  %v5227_v52 = vld [vmem:[%s9830_s1 + $0x80] sm:$0xf]  ;;  %s9305_s30 = scalar_lea.vmem %s9831_s2, %s6700_s27 }
   0xe   : > { %v6708_v0 = vld [vmem:[%s7198_s14 + $0x38] sm:$0xff]  ;;  %v6707_v4 = vld [vmem:[%s7198_s14 + $0x30] sm:$0xff]  ;;  %v6706_v8 = vld [vmem:[%s7198_s14 + $0x28] sm:$0xff]  ;;  %vm5064_vm6 = vcmask 27648  }
   0xf   : > { %v6716_v1 = vld [vmem:[%s7198_s14 + $0x78] sm:$0xff]  ;;  %2704 = vmatpush.bf16.msra.mxu0 %v6708_v0  ;;  %v6715_v5 = vld [vmem:[%s7198_s14 + $0x70] sm:$0xff]  ;;  %v6714_v9 = vld [vmem:[%s7198_s14 + $0x68] sm:$0xff] }
  0x10   : > { %v6724_v2 = vld [vmem:[%s7198_s14 + $0xb8] sm:$0xff]  ;;  %2793 = vmatpush.bf16.msra.mxu1 %v6716_v1  ;;  %v6723_v6 = vld [vmem:[%s7198_s14 + $0xb0] sm:$0xff]  ;;  %v6722_v10 = vld [vmem:[%s7198_s14 + $0xa8] sm:$0xff] }
  0x11   : > { %v6732_v3 = vld [vmem:[%s7198_s14 + $0xf8] sm:$0xff]  ;;  %2882 = vmatpush.bf16.msra.mxu2 %v6724_v2  ;;  %v6731_v7 = vld [vmem:[%s7198_s14 + $0xf0] sm:$0xff]  ;;  %v6730_v11 = vld [vmem:[%s7198_s14 + $0xe8] sm:$0xff] }
  0x12   : > { %2971 = vmatpush.bf16.msra.mxu3 %v6732_v3  ;;  %v6705_v12 = vld [vmem:[%s7198_s14 + $0x20] sm:$0xff]  ;;  %v6704_v16 = vld [vmem:[%s7198_s14 + $0x18] sm:$0xff]  ;;  %v6703_v20 = vld [vmem:[%s7198_s14 + $0x10] sm:$0xff] }
  0x13   : > { %2705 = vmatpush.bf16.msra.mxu0 %v6707_v4  ;;  %v6713_v13 = vld [vmem:[%s7198_s14 + $0x60] sm:$0xff]  ;;  %v6712_v17 = vld [vmem:[%s7198_s14 + $0x58] sm:$0xff]  ;;  %v6711_v21 = vld [vmem:[%s7198_s14 + $0x50] sm:$0xff] }
  0x14   : > { %2794 = vmatpush.bf16.msra.mxu1 %v6715_v5  ;;  %v6721_v14 = vld [vmem:[%s7198_s14 + $0xa0] sm:$0xff]  ;;  %v6720_v18 = vld [vmem:[%s7198_s14 + $0x98] sm:$0xff]  ;;  %v6719_v22 = vld [vmem:[%s7198_s14 + $0x90] sm:$0xff] }
  0x15   : > { %2883 = vmatpush.bf16.msra.mxu2 %v6723_v6  ;;  %v6729_v15 = vld [vmem:[%s7198_s14 + $0xe0] sm:$0xff]  ;;  %v6728_v19 = vld [vmem:[%s7198_s14 + $0xd8] sm:$0xff]  ;;  %v6727_v23 = vld [vmem:[%s7198_s14 + $0xd0] sm:$0xff] }
  0x16   : > { %2972 = vmatpush.bf16.msra.mxu3 %v6731_v7  ;;  %v6702_v24 = vld [vmem:[%s7198_s14 + $0x8] sm:$0xff]  ;;  %v6701_v31 = vld [vmem:[%s7198_s14] sm:$0xff]  ;;  %v6756_v40 = vld [vmem:[%s7198_s14 + $0x1b8] sm:$0xff] }
  0x17   : > { %2706 = vmatpush.bf16.msra.mxu0 %v6706_v8  ;;  %v6710_v25 = vld [vmem:[%s7198_s14 + $0x48] sm:$0xff]  ;;  %v6709_v32 = vld [vmem:[%s7198_s14 + $0x40] sm:$0xff]  ;;  %v6740_v41 = vld [vmem:[%s7198_s14 + $0x138] sm:$0xff] }
  0x18   : > { %2795 = vmatpush.bf16.msra.mxu1 %v6714_v9  ;;  %v6718_v26 = vld [vmem:[%s7198_s14 + $0x88] sm:$0xff]  ;;  %v6717_v33 = vld [vmem:[%s7198_s14 + $0x80] sm:$0xff]  ;;  %v6764_v46 = vld [vmem:[%s7198_s14 + $0x1f8] sm:$0xff] }
  0x19   : > { %2884 = vmatpush.bf16.msra.mxu2 %v6722_v10  ;;  %v6726_v27 = vld [vmem:[%s7198_s14 + $0xc8] sm:$0xff]  ;;  %v6725_v34 = vld [vmem:[%s7198_s14 + $0xc0] sm:$0xff]  ;;  %v6748_v47 = vld [vmem:[%s7198_s14 + $0x178] sm:$0xff] }
  0x1a   : > { %2973 = vmatpush.bf16.msra.mxu3 %v6730_v11  ;;  %v6838_v37 = vld [vmem:[%s9830_s1 + $0x44] sm:$0xf0]  ;;  %v5173_v39 = vld [vmem:[%s9830_s1 + $0x48] sm:$0xf0]  ;;  %v6755_v48 = vld [vmem:[%s7198_s14 + $0x1b0] sm:$0xff] }
  0x1b   : > { %2707 = vmatpush.bf16.msra.mxu0 %v6705_v12  ;;  %v5172_v44 = vor.u32 %v6838_v37, %v5171_v36  ;;  %v5176_v45 = vor.u32 %v6830_v38, %v5173_v39  ;;  %v6739_v49 = vld [vmem:[%s7198_s14 + $0x130] sm:$0xff]  ;;  %v6853_v53 = vld [vmem:[%s9830_s1 + $0xbc] sm:$0xf0]  ;;  %v6845_v54 = vld [vmem:[%s9830_s1 + $0x84] sm:$0xf] }
  0x1c   : > { %2796 = vmatpush.bf16.msra.mxu1 %v6713_v13  ;;  %v6763_v50 = vld [vmem:[%s7198_s14 + $0x1f0] sm:$0xff]  ;;  %v5229_v55 = vld [vmem:[%s9830_s1 + $0xc0] sm:$0xf0]  ;;  %v5235_v56 = vld [vmem:[%s9830_s1 + $0x88] sm:$0xf]  ;;  %v5228_v60 = vor.u32 %v6853_v53, %v5227_v52 }
  0x1d   : > { %2885 = vmatpush.bf16.msra.mxu2 %v6721_v14  ;;  %v6747_v51 = vld [vmem:[%s7198_s14 + $0x170] sm:$0xff]  ;;  %v6854_v57 = vld [vmem:[%s9830_s1 + $0xc4] sm:$0xf0]  ;;  %v6846_v58 = vld [vmem:[%s9830_s1 + $0x8c] sm:$0xf]  ;;  %v5232_v61 = vor.u32 %v6845_v54, %v5229_v55 }
  0x1e   : > { %2974 = vmatpush.bf16.msra.mxu3 %v6729_v15  ;;  %v5237_v59 = vld [vmem:[%s9830_s1 + $0xc8] sm:$0xf0]  ;;  %v5236_v62 = vor.u32 %v6854_v57, %v5235_v56  ;;  %v5291_v0 = vld [vmem:[%s9830_s1 + $0x100] sm:$0xf]  ;;  %v6861_v2 = vld [vmem:[%s9830_s1 + $0x104] sm:$0xf] }
  0x1f   : > { %2708 = vmatpush.bf16.msra.mxu0 %v6704_v16  ;;  %v5240_v63 = vor.u32 %v6846_v58, %v5237_v59  ;;  %v6869_v1 = vld [vmem:[%s9830_s1 + $0x13c] sm:$0xf0]  ;;  %v5293_v3 = vld [vmem:[%s9830_s1 + $0x140] sm:$0xf0]  ;;  %v5299_v4 = vld [vmem:[%s9830_s1 + $0x108] sm:$0xf] }
  0x20   : > { %2797 = vmatpush.bf16.msra.mxu1 %v6712_v17  ;;  %v6870_v5 = vld [vmem:[%s9830_s1 + $0x144] sm:$0xf0]  ;;  %v6862_v6 = vld [vmem:[%s9830_s1 + $0x10c] sm:$0xf]  ;;  %v5292_v8 = vor.u32 %v6869_v1, %v5291_v0  ;;  %v5296_v9 = vor.u32 %v6861_v2, %v5293_v3  ;;  %v5355_v16 = vld [vmem:[%s9830_s1 + $0x180] sm:$0xf] }
  0x21   : > { %2886 = vmatpush.bf16.msra.mxu2 %v6720_v18  ;;  %v5301_v7 = vld [vmem:[%s9830_s1 + $0x148] sm:$0xf0]  ;;  %v5300_v10 = vor.u32 %v6870_v5, %v5299_v4  ;;  %v6885_v17 = vld [vmem:[%s9830_s1 + $0x1bc] sm:$0xf0]  ;;  %v6877_v18 = vld [vmem:[%s9830_s1 + $0x184] sm:$0xf] }
  0x22   : > { %2975 = vmatpush.bf16.msra.mxu3 %v6728_v19  ;;  %v5304_v11 = vor.u32 %v6862_v6, %v5301_v7  ;;  %v6754_v12 = vld [vmem:[%s7198_s14 + $0x1a8] sm:$0xff]  ;;  %v5357_v19 = vld [vmem:[%s9830_s1 + $0x1c0] sm:$0xf0]  ;;  %v5419_v28 = vld [vmem:[%s9830_s1 + $0x200] sm:$0xf] }
  0x23   : > { %2709 = vmatpush.bf16.msra.mxu0 %v6703_v20  ;;  %v6738_v13 = vld [vmem:[%s7198_s14 + $0x128] sm:$0xff]  ;;  %v6901_v29 = vld [vmem:[%s9830_s1 + $0x23c] sm:$0xf0]  ;;  %v6893_v30 = vld [vmem:[%s9830_s1 + $0x204] sm:$0xf] }
  0x24   : > { %2798 = vmatpush.bf16.msra.mxu1 %v6711_v21  ;;  %v6762_v14 = vld [vmem:[%s7198_s14 + $0x1e8] sm:$0xff]  ;;  %v5420_v36 = vor.u32 %v6901_v29, %v5419_v28  ;;  %v5547_v56 = vld [vmem:[%s9830_s1 + $0x300] sm:$0xf]  ;;  %v6925_v58 = vld [vmem:[%s9830_s1 + $0x304] sm:$0xf] }
  0x25   : > { %2887 = vmatpush.bf16.msra.mxu2 %v6719_v22  ;;  %v6746_v15 = vld [vmem:[%s7198_s14 + $0x168] sm:$0xff]  ;;  %v6933_v57 = vld [vmem:[%s9830_s1 + $0x33c] sm:$0xf0]  ;;  %v5549_v59 = vld [vmem:[%s9830_s1 + $0x340] sm:$0xf0] }
  0x26   : > { %2976 = vmatpush.bf16.msra.mxu3 %v6727_v23  ;;  %v5363_v20 = vld [vmem:[%s9830_s1 + $0x188] sm:$0xf]  ;;  %v6878_v22 = vld [vmem:[%s9830_s1 + $0x18c] sm:$0xf]  ;;  %v5548_v0 = vor.u32 %v6933_v57, %v5547_v56  ;;  %v5552_v1 = vor.u32 %v6925_v58, %v5549_v59  ;;  %v6752_v4 = vld [vmem:[%s7198_s14 + $0x198] sm:$0xff] }
  0x27   : > { %2710 = vmatpush.bf16.msra.mxu0 %v6702_v24  ;;  %v6886_v21 = vld [vmem:[%s9830_s1 + $0x1c4] sm:$0xf0]  ;;  %v5365_v23 = vld [vmem:[%s9830_s1 + $0x1c8] sm:$0xf0]  ;;  %v5356_v24 = vor.u32 %v6885_v17, %v5355_v16  ;;  %v6736_v5 = vld [vmem:[%s7198_s14 + $0x118] sm:$0xff] }
  0x28   : > { %2799 = vmatpush.bf16.msra.mxu1 %v6710_v25  ;;  %v5360_v25 = vor.u32 %v6877_v18, %v5357_v19  ;;  %v5429_v35 = vld [vmem:[%s9830_s1 + $0x248] sm:$0xf0]  ;;  %v6760_v6 = vld [vmem:[%s7198_s14 + $0x1d8] sm:$0xff] }
  0x29   : > { %2888 = vmatpush.bf16.msra.mxu2 %v6718_v26  ;;  %v5364_v26 = vor.u32 %v6886_v21, %v5363_v20  ;;  %v6744_v7 = vld [vmem:[%s7198_s14 + $0x158] sm:$0xff]  ;;  %v5675_v20 = vld [vmem:[%s9830_s1 + $0x400] sm:$0xf] }
  0x2a   : > { %2977 = vmatpush.bf16.msra.mxu3 %v6726_v27  ;;  %v5368_v27 = vor.u32 %v6878_v22, %v5365_v23  ;;  %v6965_v21 = vld [vmem:[%s9830_s1 + $0x43c] sm:$0xf0]  ;;  %v6957_v22 = vld [vmem:[%s9830_s1 + $0x404] sm:$0xf] }
  0x2b   : > { %2711 = vmatpush.bf16.msra.mxu0 %v6701_v31  ;;  %v5421_v31 = vld [vmem:[%s9830_s1 + $0x240] sm:$0xf0]  ;;  %v5676_v28 = vor.u32 %v6965_v21, %v5675_v20 }
  0x2c   : > { %2800 = vmatpush.bf16.msra.mxu1 %v6709_v32  ;;  %v5427_v32 = vld [vmem:[%s9830_s1 + $0x208] sm:$0xf]  ;;  %v5424_v37 = vor.u32 %v6893_v30, %v5421_v31  ;;  %v5677_v23 = vld [vmem:[%s9830_s1 + $0x440] sm:$0xf0] }
  0x2d   : > { %2889 = vmatpush.bf16.msra.mxu2 %v6717_v33  ;;  %v6902_v33 = vld [vmem:[%s9830_s1 + $0x244] sm:$0xf0]  ;;  %v5680_v29 = vor.u32 %v6957_v22, %v5677_v23 }
  0x2e   : > { %2978 = vmatpush.bf16.msra.mxu3 %v6725_v34  ;;  %2712 = vmatmul.bf16.vlgmr.msra.gmra.mxu0 %v5164_v42  ;;  %v6894_v34 = vld [vmem:[%s9830_s1 + $0x20c] sm:$0xf]  ;;  %v5428_v38 = vor.u32 %v6902_v33, %v5427_v32  ;;  %v6761_v42 = vld [vmem:[%s7198_s14 + $0x1e0] sm:$0xff] }
  0x2f   : > { %3060 = vmatpush.bf16.msrb.mxu0 %v6740_v41  ;;  %2801 = vmatmul.bf16.vlgmr.msra.gmra.mxu1 %v5168_v43  ;;  %v5432_v39 = vor.u32 %v6894_v34, %v5429_v35  ;;  %v6737_v41 = vld [vmem:[%s7198_s14 + $0x120] sm:$0xff]  ;;  %v6751_v35 = vld [vmem:[%s7198_s14 + $0x190] sm:$0xff] }
  0x30   : > { %2890 = vmatmul.bf16.vlgmr.msra.gmra.mxu2 %v5172_v44  ;;  %3149 = vmatpush.bf16.msrb.mxu1 %v6748_v47  ;;  %v6745_v43 = vld [vmem:[%s7198_s14 + $0x160] sm:$0xff] }
  0x31   : > { %3238 = vmatpush.bf16.msrb.mxu2 %v6756_v40  ;;  %2979 = vmatmul.bf16.vlgmr.msra.gmra.mxu3 %v5176_v45  ;;  %v6753_v40 = vld [vmem:[%s7198_s14 + $0x1a0] sm:$0xff] }
  0x32   : > { %3327 = vmatpush.bf16.msrb.mxu3 %v6764_v46  ;;  %v5483_v44 = vld [vmem:[%s9830_s1 + $0x280] sm:$0xf]  ;;  %v6909_v46 = vld [vmem:[%s9830_s1 + $0x284] sm:$0xf] }
  0x33   : > { %3061 = vmatpush.bf16.msrb.mxu0 %v6739_v49  ;;  %v6917_v45 = vld [vmem:[%s9830_s1 + $0x2bc] sm:$0xf0]  ;;  %v5485_v47 = vld [vmem:[%s9830_s1 + $0x2c0] sm:$0xf0]  ;;  %v6918_v49 = vld [vmem:[%s9830_s1 + $0x2c4] sm:$0xf0] }
  0x34   : > { %3150 = vmatpush.bf16.msrb.mxu1 %v6747_v51  ;;  %v5493_v51 = vld [vmem:[%s9830_s1 + $0x2c8] sm:$0xf0]  ;;  %v5484_v52 = vor.u32 %v6917_v45, %v5483_v44  ;;  %v5488_v53 = vor.u32 %v6909_v46, %v5485_v47  ;;  %v6743_v45 = vld [vmem:[%s7198_s14 + $0x150] sm:$0xff]  ;;  %v5739_v46 = vld [vmem:[%s9830_s1 + $0x480] sm:$0xf] }
  0x35   : > { %3239 = vmatpush.bf16.msrb.mxu2 %v6755_v48  ;;  %v5491_v48 = vld [vmem:[%s9830_s1 + $0x288] sm:$0xf]  ;;  %v6981_v47 = vld [vmem:[%s9830_s1 + $0x4bc] sm:$0xf0] }
  0x36   : > { %3328 = vmatpush.bf16.msrb.mxu3 %v6763_v50  ;;  %v6910_v50 = vld [vmem:[%s9830_s1 + $0x28c] sm:$0xf]  ;;  %v5492_v54 = vor.u32 %v6918_v49, %v5491_v48  ;;  %v6973_v48 = vld [vmem:[%s9830_s1 + $0x484] sm:$0xf]  ;;  %v5740_v56 = vor.u32 %v6981_v47, %v5739_v46 }
  0x37   : > { %3062 = vmatpush.bf16.msrb.mxu0 %v6738_v13  ;;  %v5496_v55 = vor.u32 %v6910_v50, %v5493_v51  ;;  %v6950_v13 = vld [vmem:[%s9830_s1 + $0x3c4] sm:$0xf0]  ;;  %v5741_v49 = vld [vmem:[%s9830_s1 + $0x4c0] sm:$0xf0]  ;;  %v5877_v46 = vld [vmem:[%s9830_s1 + $0x5c8] sm:$0xf0] }
  0x38   : > { %3151 = vmatpush.bf16.msrb.mxu1 %v6746_v15  ;;  %v5621_v15 = vld [vmem:[%s9830_s1 + $0x3c8] sm:$0xf0]  ;;  %v5747_v50 = vld [vmem:[%s9830_s1 + $0x488] sm:$0xf]  ;;  %v5744_v57 = vor.u32 %v6973_v48, %v5741_v49 }
  0x39   : > { %3240 = vmatpush.bf16.msrb.mxu2 %v6754_v12  ;;  %v5619_v12 = vld [vmem:[%s9830_s1 + $0x388] sm:$0xf] }
  0x3a   : > { %3329 = vmatpush.bf16.msrb.mxu3 %v6762_v14  ;;  %v6942_v14 = vld [vmem:[%s9830_s1 + $0x38c] sm:$0xf]  ;;  %v5620_v18 = vor.u32 %v6950_v13, %v5619_v12  ;;  %v6982_v51 = vld [vmem:[%s9830_s1 + $0x4c4] sm:$0xf0] }
  0x3b   : > { %3063 = vmatpush.bf16.msrb.mxu0 %v6737_v41  ;;  %v5624_v19 = vor.u32 %v6942_v14, %v5621_v15  ;;  %v5811_v12 = vld [vmem:[%s9830_s1 + $0x508] sm:$0xf]  ;;  %v6990_v14 = vld [vmem:[%s9830_s1 + $0x50c] sm:$0xf] }
  0x3c   : > { %3152 = vmatpush.bf16.msrb.mxu1 %v6745_v43  ;;  %v6998_v13 = vld [vmem:[%s9830_s1 + $0x544] sm:$0xf0]  ;;  %v5813_v15 = vld [vmem:[%s9830_s1 + $0x548] sm:$0xf0] }
  0x3d   : > { %3241 = vmatpush.bf16.msrb.mxu2 %v6753_v40  ;;  %v5812_v23 = vor.u32 %v6998_v13, %v5811_v12 }
  0x3e   : > { %2717 = vmatmul.bf16.gmra.mxu0 %v5228_v60  ;;  %3330 = vmatpush.bf16.msrb.mxu3 %v6761_v42  ;;  %v5555_v60 = vld [vmem:[%s9830_s1 + $0x308] sm:$0xf] }
  0x3f   : > { %2806 = vmatmul.bf16.gmra.mxu1 %v5232_v61  ;;  %v6934_v61 = vld [vmem:[%s9830_s1 + $0x344] sm:$0xf0]  ;;  %3064 = vmatpush.bf16.msrb.mxu0 %v6736_v5 }
  0x40   : > { %2895 = vmatmul.bf16.gmra.mxu2 %v5236_v62  ;;  %v6926_v62 = vld [vmem:[%s9830_s1 + $0x30c] sm:$0xf]  ;;  %v5556_v2 = vor.u32 %v6934_v61, %v5555_v60  ;;  %3153 = vmatpush.bf16.msrb.mxu1 %v6744_v7  ;;  %v5748_v61 = vor.u32 %v6982_v51, %v5747_v50 }
  0x41   : > { %2984 = vmatmul.bf16.gmra.mxu3 %v5240_v63  ;;  %v5557_v63 = vld [vmem:[%s9830_s1 + $0x348] sm:$0xf0]  ;;  %3242 = vmatpush.bf16.msrb.mxu2 %v6752_v4 }
  0x42   : > { %v5560_v3 = vor.u32 %v6926_v62, %v5557_v63  ;;  %3331 = vmatpush.bf16.msrb.mxu3 %v6760_v6 }
  0x44   : > { %3154 = vmatpush.bf16.msrb.mxu1 %v6743_v45  ;;  %v7006_v45 = vld [vmem:[%s9830_s1 + $0x58c] sm:$0xf] }
  0x45   : > { %3243 = vmatpush.bf16.msrb.mxu2 %v6751_v35 }
  0x4e   : > { %2722 = vmatmul.bf16.gmra.mxu0 %v5292_v8  ;;  %v5611_v8 = vld [vmem:[%s9830_s1 + $0x380] sm:$0xf] }
  0x4f   : > { %2811 = vmatmul.bf16.gmra.mxu1 %v5296_v9  ;;  %v6949_v9 = vld [vmem:[%s9830_s1 + $0x3bc] sm:$0xf0] }
  0x50   : > { %2900 = vmatmul.bf16.gmra.mxu2 %v5300_v10  ;;  %v6941_v10 = vld [vmem:[%s9830_s1 + $0x384] sm:$0xf]  ;;  %v5612_v16 = vor.u32 %v6949_v9, %v5611_v8  ;;  %v5803_v8 = vld [vmem:[%s9830_s1 + $0x500] sm:$0xf] }
  0x51   : > { %2989 = vmatmul.bf16.gmra.mxu3 %v5304_v11  ;;  %v5613_v11 = vld [vmem:[%s9830_s1 + $0x3c0] sm:$0xf0]  ;;  %v6997_v9 = vld [vmem:[%s9830_s1 + $0x53c] sm:$0xf0] }
  0x52   : > { %v5616_v17 = vor.u32 %v6941_v10, %v5613_v11  ;;  %v6989_v10 = vld [vmem:[%s9830_s1 + $0x504] sm:$0xf] }
  0x53   : > { %v5805_v11 = vld [vmem:[%s9830_s1 + $0x540] sm:$0xf0] }
  0x5e   : > { %2727 = vmatmul.bf16.gmra.mxu0 %v5356_v24  ;;  %v5683_v24 = vld [vmem:[%s9830_s1 + $0x408] sm:$0xf] }
  0x5f   : > { %2816 = vmatmul.bf16.gmra.mxu1 %v5360_v25  ;;  %v6966_v25 = vld [vmem:[%s9830_s1 + $0x444] sm:$0xf0] }
  0x60   : > { %2905 = vmatmul.bf16.gmra.mxu2 %v5364_v26  ;;  %v6958_v26 = vld [vmem:[%s9830_s1 + $0x40c] sm:$0xf]  ;;  %v5684_v32 = vor.u32 %v6966_v25, %v5683_v24  ;;  %v5816_v24 = vor.u32 %v6990_v14, %v5813_v15 }
  0x61   : > { %2994 = vmatmul.bf16.gmra.mxu3 %v5368_v27  ;;  %v5685_v27 = vld [vmem:[%s9830_s1 + $0x448] sm:$0xf0] }
  0x62   : > { %v5688_v33 = vor.u32 %v6958_v26, %v5685_v27  ;;  %v6750_v27 = vld [vmem:[%s7198_s14 + $0x188] sm:$0xff] }
  0x63   : > { %3244 = vmatpush.bf16.msrb.mxu2 %v6750_v27 }
  0x6e   : > { %2732 = vmatmul.bf16.gmra.mxu0 %v5420_v36  ;;  %v6735_v36 = vld [vmem:[%s7198_s14 + $0x110] sm:$0xff] }
  0x6f   : > { %2821 = vmatmul.bf16.gmra.mxu1 %v5424_v37  ;;  %v6759_v37 = vld [vmem:[%s7198_s14 + $0x1d0] sm:$0xff]  ;;  %3065 = vmatpush.bf16.msrb.mxu0 %v6735_v36 }
  0x70   : > { %2910 = vmatmul.bf16.gmra.mxu2 %v5428_v38  ;;  %3332 = vmatpush.bf16.msrb.mxu3 %v6759_v37  ;;  %v6742_v37 = vld [vmem:[%s7198_s14 + $0x148] sm:$0xff] }
  0x71   : > { %2999 = vmatmul.bf16.gmra.mxu3 %v5432_v39  ;;  %3155 = vmatpush.bf16.msrb.mxu1 %v6742_v37  ;;  %v7037_v37 = vld [vmem:[%s9830_s1 + $0x684] sm:$0xf] }
  0x7e   : > { %2737 = vmatmul.bf16.gmra.mxu0 %v5484_v52  ;;  %v6974_v52 = vld [vmem:[%s9830_s1 + $0x48c] sm:$0xf] }
  0x7f   : > { %2826 = vmatmul.bf16.gmra.mxu1 %v5488_v53  ;;  %v5749_v53 = vld [vmem:[%s9830_s1 + $0x4c8] sm:$0xf0] }
  0x80   : > { %2915 = vmatmul.bf16.gmra.mxu2 %v5492_v54  ;;  %v5752_v62 = vor.u32 %v6974_v52, %v5749_v53 }
  0x81   : > { %3004 = vmatmul.bf16.gmra.mxu3 %v5496_v55 }
  0x8e   : > { %2742 = vmatmul.bf16.gmra.mxu0 %v5548_v0 }
  0x8f   : > { %2831 = vmatmul.bf16.gmra.mxu1 %v5552_v1 }
  0x90   : > { %2920 = vmatmul.bf16.gmra.mxu2 %v5556_v2 }
  0x91   : > { %3009 = vmatmul.bf16.gmra.mxu3 %v5560_v3 }
  0x9e   : > { %2747 = vmatmul.bf16.gmra.mxu0 %v5612_v16 }
  0x9f   : > { %2836 = vmatmul.bf16.gmra.mxu1 %v5616_v17 }
  0xa0   : > { %2925 = vmatmul.bf16.gmra.mxu2 %v5620_v18  ;;  %v5804_v18 = vor.u32 %v6997_v9, %v5803_v8  ;;  %v7030_v8 = vld [vmem:[%s9830_s1 + $0x644] sm:$0xf0]  ;;  %v7022_v9 = vld [vmem:[%s9830_s1 + $0x60c] sm:$0xf] }
  0xa1   : > { %3014 = vmatmul.bf16.gmra.mxu3 %v5624_v19  ;;  %v5808_v19 = vor.u32 %v6989_v10, %v5805_v11  ;;  %v5941_v10 = vld [vmem:[%s9830_s1 + $0x648] sm:$0xf0] }
  0xab   : > { %v2713_v30 = vpop.f32.mrf.mxu0 }
  0xac   : > { %v2802_v31 = vpop.f32.mrf.mxu1 }
  0xad   : > { %v2803_v34 = vadd.f32 %v2802_v31, %v2713_v30 }
  0xae   : > { %2752 = vmatmul.bf16.gmra.mxu0 %v5676_v28  ;;  %v6734_v28 = vld [vmem:[%s7198_s14 + $0x108] sm:$0xff] }
  0xaf   : > { %2841 = vmatmul.bf16.gmra.mxu1 %v5680_v29  ;;  %v6758_v29 = vld [vmem:[%s7198_s14 + $0x1c8] sm:$0xff]  ;;  %3066 = vmatpush.bf16.msrb.mxu0 %v6734_v28 }
  0xb0   : > { %2930 = vmatmul.bf16.gmra.mxu2 %v5684_v32  ;;  %3333 = vmatpush.bf16.msrb.mxu3 %v6758_v29 }
  0xb1   : > { %3019 = vmatmul.bf16.gmra.mxu3 %v5688_v33 }
  0xb3   : > { %v2891_v38 = vpop.f32.mrf.mxu2  ;;  %v2715_v41 = vpop.f32.mrf.mxu0 }
  0xb4   : > { %v2980_v39 = vpop.f32.mrf.mxu3  ;;  %v2892_v40 = vadd.f32 %v2891_v38, %v2803_v34  ;;  %v2804_v42 = vpop.f32.mrf.mxu1  ;;  %v5867_v38 = vld [vmem:[%s9830_s1 + $0x580] sm:$0xf] }
  0xb5   : > { %v2805_v43 = vadd.f32 %v2804_v42, %v2715_v41  ;;  %v5869_v41 = vld [vmem:[%s9830_s1 + $0x5c0] sm:$0xf0]  ;;  %v5875_v42 = vld [vmem:[%s9830_s1 + $0x588] sm:$0xf] }
  0xb6   : > { %v7471_v44 = vadd.f32 %v2980_v39, %v2892_v40  ;;  %v7013_v39 = vld [vmem:[%s9830_s1 + $0x5bc] sm:$0xf0]  ;;  %v7005_v40 = vld [vmem:[%s9830_s1 + $0x584] sm:$0xf] }
  0xb7   : > { %v5868_v49 = vor.u32 %v7013_v39, %v5867_v38  ;;  %v5872_v50 = vor.u32 %v7005_v40, %v5869_v41  ;;  %v5997_v38 = vld [vmem:[%s9830_s1 + $0x6c0] sm:$0xf0]  ;;  %v6003_v39 = vld [vmem:[%s9830_s1 + $0x688] sm:$0xf]  ;;  %v7038_v41 = vld [vmem:[%s9830_s1 + $0x68c] sm:$0xf] }
  0xb8   : > { %v7046_v40 = vld [vmem:[%s9830_s1 + $0x6c4] sm:$0xf0] }
  0xbb   : > { %v2893_v54 = vpop.f32.mrf.mxu2  ;;  %v2718_v59 = vpop.f32.mrf.mxu0 }
  0xbc   : > { %v2982_v55 = vpop.f32.mrf.mxu3  ;;  %v2894_v58 = vadd.f32 %v2893_v54, %v2805_v43  ;;  %v2807_v60 = vpop.f32.mrf.mxu1  ;;  %v7014_v43 = vld [vmem:[%s9830_s1 + $0x5c4] sm:$0xf0] }
  0xbd   : > { %v2808_v63 = vadd.f32 %v2807_v60, %v2718_v59  ;;  %v5876_v54 = vor.u32 %v7014_v43, %v5875_v42  ;;  %v6005_v42 = vld [vmem:[%s9830_s1 + $0x6c8] sm:$0xf0] }
  0xbe   : > { %v7498_v0 = vadd.f32 %v2982_v55, %v2894_v58  ;;  %2757 = vmatmul.bf16.gmra.mxu0 %v5740_v56  ;;  %v5880_v55 = vor.u32 %v7006_v45, %v5877_v46 }
  0xbf   : > { %2846 = vmatmul.bf16.gmra.mxu1 %v5744_v57 }
  0xc0   : > { %2935 = vmatmul.bf16.gmra.mxu2 %v5748_v61 }
  0xc1   : > { %3024 = vmatmul.bf16.gmra.mxu3 %v5752_v62 }
  0xc3   : > { %v2896_v1 = vpop.f32.mrf.mxu2  ;;  %v2720_v4 = vpop.f32.mrf.mxu0 }
  0xc4   : > { %v2985_v2 = vpop.f32.mrf.mxu3  ;;  %v2897_v3 = vadd.f32 %v2896_v1, %v2808_v63  ;;  %v2809_v5 = vpop.f32.mrf.mxu1 }
  0xc5   : > { %v2810_v6 = vadd.f32 %v2809_v5, %v2720_v4  ;;  %v7021_v4 = vld [vmem:[%s9830_s1 + $0x604] sm:$0xf] }
  0xc6   : > { %v7500_v7 = vadd.f32 %v2985_v2, %v2897_v3  ;;  %v5931_v2 = vld [vmem:[%s9830_s1 + $0x600] sm:$0xf]  ;;  %v5933_v5 = vld [vmem:[%s9830_s1 + $0x640] sm:$0xf0] }
  0xc7   : > { %v7029_v3 = vld [vmem:[%s9830_s1 + $0x63c] sm:$0xf0]  ;;  %v5936_v14 = vor.u32 %v7021_v4, %v5933_v5  ;;  %v6061_v4 = vld [vmem:[%s9830_s1 + $0x740] sm:$0xf0]  ;;  %v6067_v5 = vld [vmem:[%s9830_s1 + $0x708] sm:$0xf] }
  0xc8   : > { %v5932_v13 = vor.u32 %v7029_v3, %v5931_v2  ;;  %v7061_v2 = vld [vmem:[%s9830_s1 + $0x73c] sm:$0xf0]  ;;  %v7053_v3 = vld [vmem:[%s9830_s1 + $0x704] sm:$0xf] }
  0xcb   : > { %v2898_v16 = vpop.f32.mrf.mxu2  ;;  %v2723_v21 = vpop.f32.mrf.mxu0 }
  0xcc   : > { %v2987_v17 = vpop.f32.mrf.mxu3  ;;  %v2899_v20 = vadd.f32 %v2898_v16, %v2810_v6  ;;  %v2812_v22 = vpop.f32.mrf.mxu1  ;;  %v5939_v6 = vld [vmem:[%s9830_s1 + $0x608] sm:$0xf] }
  0xcd   : > { %v2813_v25 = vadd.f32 %v2812_v22, %v2723_v21  ;;  %v6749_v22 = vld [vmem:[%s7198_s14 + $0x180] sm:$0xff] }
  0xce   : > { %v7526_v26 = vadd.f32 %v2987_v17, %v2899_v20  ;;  %2762 = vmatmul.bf16.gmra.mxu0 %v5804_v18  ;;  %v5940_v18 = vor.u32 %v7030_v8, %v5939_v6  ;;  %3245 = vmatpush.bf16.msrb.mxu2 %v6749_v22  ;;  %v7062_v6 = vld [vmem:[%s9830_s1 + $0x744] sm:$0xf0]  ;;  %v7054_v8 = vld [vmem:[%s9830_s1 + $0x70c] sm:$0xf]  ;;  %v6788_v22 = vld [vmem:[%s7198_s14 + $0x2b8] sm:$0xff] }
  0xcf   : > { %2851 = vmatmul.bf16.gmra.mxu1 %v5808_v19  ;;  %v5944_v19 = vor.u32 %v7022_v9, %v5941_v10  ;;  %v6069_v9 = vld [vmem:[%s9830_s1 + $0x748] sm:$0xf0] }
  0xd0   : > { %2940 = vmatmul.bf16.gmra.mxu2 %v5812_v23  ;;  %v6733_v23 = vld [vmem:[%s7198_s14 + $0x100] sm:$0xff] }
  0xd1   : > { %3029 = vmatmul.bf16.gmra.mxu3 %v5816_v24  ;;  %v6757_v24 = vld [vmem:[%s7198_s14 + $0x1c0] sm:$0xff]  ;;  %3067 = vmatpush.bf16.msrb.mxu0 %v6733_v23  ;;  %v6772_v23 = vld [vmem:[%s7198_s14 + $0x238] sm:$0xff] }
  0xd2   : > { %3334 = vmatpush.bf16.msrb.mxu3 %v6757_v24  ;;  %v6796_v24 = vld [vmem:[%s7198_s14 + $0x2f8] sm:$0xff]  ;;  %3594 = vmatpush.bf16.msra.mxu2 %v6788_v22 }
  0xd3   : > { %v2901_v30 = vpop.f32.mrf.mxu2  ;;  %v2725_v33 = vpop.f32.mrf.mxu0 }
  0xd4   : > { %v2990_v31 = vpop.f32.mrf.mxu3  ;;  %v2902_v32 = vadd.f32 %v2901_v30, %v2813_v25  ;;  %v2814_v34 = vpop.f32.mrf.mxu1 }
  0xd5   : > { %v2815_v35 = vadd.f32 %v2814_v34, %v2725_v33  ;;  %v6741_v33 = vld [vmem:[%s7198_s14 + $0x140] sm:$0xff]  ;;  %3416 = vmatpush.bf16.msra.mxu0 %v6772_v23 }
  0xd6   : > { %v7531_v36 = vadd.f32 %v2990_v31, %v2902_v32  ;;  %v5995_v34 = vld [vmem:[%s9830_s1 + $0x680] sm:$0xf]  ;;  %3156 = vmatpush.bf16.msrb.mxu1 %v6741_v33  ;;  %3683 = vmatpush.bf16.msra.mxu3 %v6796_v24 }
  0xdb   : > { %v2903_v47 = vpop.f32.mrf.mxu2  ;;  %v2728_v52 = vpop.f32.mrf.mxu0 }
  0xdc   : > { %v2992_v48 = vpop.f32.mrf.mxu3  ;;  %v2904_v51 = vadd.f32 %v2903_v47, %v2815_v35  ;;  %v2817_v53 = vpop.f32.mrf.mxu1  ;;  %v7045_v35 = vld [vmem:[%s9830_s1 + $0x6bc] sm:$0xf0]  ;;  %v6000_v47 = vor.u32 %v7037_v37, %v5997_v38  ;;  %v7069_v38 = vld [vmem:[%s9830_s1 + $0x784] sm:$0xf] }
  0xdd   : > { %v2818_v56 = vadd.f32 %v2817_v53, %v2728_v52  ;;  %v5996_v46 = vor.u32 %v7045_v35, %v5995_v34  ;;  %v6008_v52 = vor.u32 %v7038_v41, %v6005_v42  ;;  %v6780_v34 = vld [vmem:[%s7198_s14 + $0x278] sm:$0xff]  ;;  %v6123_v35 = vld [vmem:[%s9830_s1 + $0x780] sm:$0xf]  ;;  %v7078_v41 = vld [vmem:[%s9830_s1 + $0x7c4] sm:$0xf0] }
  0xde   : > { %v7558_v57 = vadd.f32 %v2992_v48, %v2904_v51  ;;  %2767 = vmatmul.bf16.gmra.mxu0 %v5868_v49  ;;  %v6004_v51 = vor.u32 %v7046_v40, %v6003_v39  ;;  %v7077_v37 = vld [vmem:[%s9830_s1 + $0x7bc] sm:$0xf0]  ;;  %v6125_v39 = vld [vmem:[%s9830_s1 + $0x7c0] sm:$0xf0]  ;;  %v6131_v40 = vld [vmem:[%s9830_s1 + $0x788] sm:$0xf]  ;;  %3505 = vmatpush.bf16.msra.mxu1 %v6780_v34 }
  0xdf   : > { %2856 = vmatmul.bf16.gmra.mxu1 %v5872_v50  ;;  %v7070_v42 = vld [vmem:[%s9830_s1 + $0x78c] sm:$0xf] }
  0xe0   : > { %2945 = vmatmul.bf16.gmra.mxu2 %v5876_v54 }
  0xe1   : > { %3034 = vmatmul.bf16.gmra.mxu3 %v5880_v55 }
  0xe3   : > { %v2906_v58 = vpop.f32.mrf.mxu2  ;;  %v2730_v61 = vpop.f32.mrf.mxu0 }
  0xe4   : > { %v2995_v59 = vpop.f32.mrf.mxu3  ;;  %v2907_v60 = vadd.f32 %v2906_v58, %v2818_v56  ;;  %v2819_v62 = vpop.f32.mrf.mxu1 }
  0xe5   : > { %v2820_v63 = vadd.f32 %v2819_v62, %v2730_v61 }
  0xe6   : > { %v7560_v1 = vadd.f32 %v2995_v59, %v2907_v60 }
  0xeb   : > { %v2908_v11 = vpop.f32.mrf.mxu2  ;;  %v2733_v16 = vpop.f32.mrf.mxu0 }
  0xec   : > { %v2997_v12 = vpop.f32.mrf.mxu3  ;;  %v2909_v15 = vadd.f32 %v2908_v11, %v2820_v63  ;;  %v2822_v17 = vpop.f32.mrf.mxu1  ;;  %v6059_v63 = vld [vmem:[%s9830_s1 + $0x700] sm:$0xf] }
  0xed   : > { %v2823_v20 = vadd.f32 %v2822_v17, %v2733_v16  ;;  %v6068_v17 = vor.u32 %v7062_v6, %v6067_v5  ;;  %v6839_v5 = vld [vmem:[%s9830_s1 + $0x4c] sm:$0xf0]  ;;  %v6831_v6 = vld [vmem:[%s9830_s1 + $0x14] sm:$0xf] }
  0xee   : > { %v7586_v21 = vadd.f32 %v2997_v12, %v2909_v15  ;;  %2772 = vmatmul.bf16.gmra.mxu0 %v5932_v13  ;;  %v6060_v12 = vor.u32 %v7061_v2, %v6059_v63  ;;  %v6064_v13 = vor.u32 %v7053_v3, %v6061_v4  ;;  %v5179_v4 = vld [vmem:[%s9830_s1 + $0x10] sm:$0xf] }
  0xef   : > { %2861 = vmatmul.bf16.gmra.mxu1 %v5936_v14 }
  0xf0   : > { %2950 = vmatmul.bf16.gmra.mxu2 %v5940_v18  ;;  %v6072_v18 = vor.u32 %v7054_v8, %v6069_v9  ;;  %v5181_v8 = vld [vmem:[%s9830_s1 + $0x50] sm:$0xf0]  ;;  %v5187_v9 = vld [vmem:[%s9830_s1 + $0x18] sm:$0xf] }
  0xf1   : > { %3039 = vmatmul.bf16.gmra.mxu3 %v5944_v19 }
  0xf3   : > { %v2911_v25 = vpop.f32.mrf.mxu2  ;;  %v2735_v29 = vpop.f32.mrf.mxu0 }
  0xf4   : > { %v3000_v27 = vpop.f32.mrf.mxu3  ;;  %v2912_v28 = vadd.f32 %v2911_v25, %v2823_v20  ;;  %v2824_v30 = vpop.f32.mrf.mxu1 }
  0xf5   : > { %v2825_v31 = vadd.f32 %v2824_v30, %v2735_v29 }
  0xf6   : > { %v7591_v32 = vadd.f32 %v3000_v27, %v2912_v28 }
  0xfb   : > { %v2913_v43 = vpop.f32.mrf.mxu2  ;;  %v2738_v49 = vpop.f32.mrf.mxu0 }
  0xfc   : > { %v3002_v45 = vpop.f32.mrf.mxu3  ;;  %v2914_v48 = vadd.f32 %v2913_v43, %v2825_v31  ;;  %v2827_v50 = vpop.f32.mrf.mxu1  ;;  %v6133_v43 = vld [vmem:[%s9830_s1 + $0x7c8] sm:$0xf0] }
  0xfd   : > { %v2828_v53 = vadd.f32 %v2827_v50, %v2738_v49 }
  0xfe   : > { %v7618_v54 = vadd.f32 %v3002_v45, %v2914_v48  ;;  %2777 = vmatmul.bf16.gmra.mxu0 %v5996_v46  ;;  %v6128_v48 = vor.u32 %v7069_v38, %v6125_v39 }
  0xff   : > { %2866 = vmatmul.bf16.gmra.mxu1 %v6000_v47  ;;  %v6124_v47 = vor.u32 %v7077_v37, %v6123_v35 }
 0x100   : > { %2955 = vmatmul.bf16.gmra.mxu2 %v6004_v51 }
 0x101   : > { %3044 = vmatmul.bf16.gmra.mxu3 %v6008_v52  ;;  %v6132_v52 = vor.u32 %v7078_v41, %v6131_v40  ;;  %v6779_v40 = vld [vmem:[%s7198_s14 + $0x270] sm:$0xff] }
 0x102   : > { %v5243_v41 = vld [vmem:[%s9830_s1 + $0x90] sm:$0xf]  ;;  %3506 = vmatpush.bf16.msra.mxu1 %v6779_v40  ;;  %v6770_v40 = vld [vmem:[%s7198_s14 + $0x228] sm:$0xff] }
 0x103   : > { %v2916_v55 = vpop.f32.mrf.mxu2  ;;  %v2740_v59 = vpop.f32.mrf.mxu0 }
 0x104   : > { %v3005_v56 = vpop.f32.mrf.mxu3  ;;  %v2917_v58 = vadd.f32 %v2916_v55, %v2828_v53  ;;  %v2829_v60 = vpop.f32.mrf.mxu1  ;;  %v6136_v53 = vor.u32 %v7070_v42, %v6133_v43  ;;  %v6855_v42 = vld [vmem:[%s9830_s1 + $0xcc] sm:$0xf0]  ;;  %v6847_v43 = vld [vmem:[%s9830_s1 + $0x94] sm:$0xf] }
 0x105   : > { %v2830_v61 = vadd.f32 %v2829_v60, %v2740_v59 }
 0x106   : > { %v7620_v62 = vadd.f32 %v3005_v56, %v2917_v58 }
 0x10b   : > { %v2918_v10 = vpop.f32.mrf.mxu2  ;;  %v2743_v15 = vpop.f32.mrf.mxu0 }
 0x10c   : > { %v3007_v11 = vpop.f32.mrf.mxu3  ;;  %v2919_v14 = vadd.f32 %v2918_v10, %v2830_v61  ;;  %v2832_v16 = vpop.f32.mrf.mxu1  ;;  %v6840_v10 = vld [vmem:[%s9830_s1 + $0x54] sm:$0xf0] }
 0x10d   : > { %v2833_v19 = vadd.f32 %v2832_v16, %v2743_v15  ;;  %v5180_v15 = vor.u32 %v6839_v5, %v5179_v4  ;;  %v5184_v16 = vor.u32 %v6831_v6, %v5181_v8  ;;  %v5188_v22 = vor.u32 %v6840_v10, %v5187_v9 }
 0x10e   : > { %v7646_v20 = vadd.f32 %v3007_v11, %v2919_v14  ;;  %2782 = vmatmul.bf16.gmra.mxu0 %v6060_v12  ;;  %v6832_v11 = vld [vmem:[%s9830_s1 + $0x1c] sm:$0xf] }
 0x10f   : > { %2871 = vmatmul.bf16.gmra.mxu1 %v6064_v13  ;;  %v5189_v12 = vld [vmem:[%s9830_s1 + $0x58] sm:$0xf0] }
 0x110   : > { %2960 = vmatmul.bf16.gmra.mxu2 %v6068_v17  ;;  %v5192_v23 = vor.u32 %v6832_v11, %v5189_v12  ;;  %v5307_v12 = vld [vmem:[%s9830_s1 + $0x110] sm:$0xf] }
 0x111   : > { %3049 = vmatmul.bf16.gmra.mxu3 %v6072_v18 }
 0x113   : > { %v2921_v25 = vpop.f32.mrf.mxu2  ;;  %v2745_v29 = vpop.f32.mrf.mxu0 }
 0x114   : > { %v3010_v27 = vpop.f32.mrf.mxu3  ;;  %v2922_v28 = vadd.f32 %v2921_v25, %v2833_v19  ;;  %v2834_v30 = vpop.f32.mrf.mxu1 }
 0x115   : > { %v2835_v31 = vadd.f32 %v2834_v30, %v2745_v29  ;;  %v6795_v29 = vld [vmem:[%s7198_s14 + $0x2f0] sm:$0xff] }
 0x116   : > { %v7651_v33 = vadd.f32 %v3010_v27, %v2922_v28  ;;  %v6787_v27 = vld [vmem:[%s7198_s14 + $0x2b0] sm:$0xff]  ;;  %3684 = vmatpush.bf16.msra.mxu3 %v6795_v29 }
 0x117   : > { %v6771_v28 = vld [vmem:[%s7198_s14 + $0x230] sm:$0xff]  ;;  %3595 = vmatpush.bf16.msra.mxu2 %v6787_v27 }
 0x118   : > { %3417 = vmatpush.bf16.msra.mxu0 %v6771_v28 }
 0x11b   : > { %v2923_v45 = vpop.f32.mrf.mxu2  ;;  %v2748_v50 = vpop.f32.mrf.mxu0 }
 0x11c   : > { %v3012_v46 = vpop.f32.mrf.mxu3  ;;  %v2924_v49 = vadd.f32 %v2923_v45, %v2835_v31  ;;  %v2837_v51 = vpop.f32.mrf.mxu1  ;;  %v5245_v45 = vld [vmem:[%s9830_s1 + $0xd0] sm:$0xf0]  ;;  %3418 = vmatpush.bf16.msra.mxu0 %v6770_v40 }
 0x11d   : > { %v2838_v55 = vadd.f32 %v2837_v51, %v2748_v50 }
 0x11e   : > { %v7678_v56 = vadd.f32 %v3012_v46, %v2924_v49  ;;  %2787 = vmatmul.bf16.gmra.mxu0 %v6124_v47  ;;  %v5251_v46 = vld [vmem:[%s9830_s1 + $0x98] sm:$0xf]  ;;  %v5253_v49 = vld [vmem:[%s9830_s1 + $0xd8] sm:$0xf0] }
 0x11f   : > { %2876 = vmatmul.bf16.gmra.mxu1 %v6128_v48  ;;  %v6856_v47 = vld [vmem:[%s9830_s1 + $0xd4] sm:$0xf0]  ;;  %v6848_v48 = vld [vmem:[%s9830_s1 + $0x9c] sm:$0xf] }
 0x120   : > { %2965 = vmatmul.bf16.gmra.mxu2 %v6132_v52  ;;  %v5244_v52 = vor.u32 %v6855_v42, %v5243_v41  ;;  %v6794_v41 = vld [vmem:[%s7198_s14 + $0x2e8] sm:$0xff] }
 0x121   : > { %3054 = vmatmul.bf16.gmra.mxu3 %v6136_v53  ;;  %v5248_v53 = vor.u32 %v6847_v43, %v5245_v45 }
 0x122   : > { %3685 = vmatpush.bf16.msra.mxu3 %v6794_v41 }
 0x123   : > { %v2926_v58 = vpop.f32.mrf.mxu2  ;;  %v2750_v61 = vpop.f32.mrf.mxu0 }
 0x124   : > { %v3015_v59 = vpop.f32.mrf.mxu3  ;;  %v2927_v60 = vadd.f32 %v2926_v58, %v2838_v55  ;;  %v2839_v63 = vpop.f32.mrf.mxu1 }
 0x125   : > { %v2840_v2 = vadd.f32 %v2839_v63, %v2750_v61  ;;  %v5256_v61 = vor.u32 %v6848_v48, %v5253_v49 }
 0x126   : > { %v7680_v3 = vadd.f32 %v3015_v59, %v2927_v60  ;;  %v5252_v60 = vor.u32 %v6856_v47, %v5251_v46 }
 0x12b   : > { %v2928_v13 = vpop.f32.mrf.mxu2  ;;  %v2753_v18 = vpop.f32.mrf.mxu0 }
 0x12c   : > { %v3017_v14 = vpop.f32.mrf.mxu3  ;;  %v2929_v17 = vadd.f32 %v2928_v13, %v2840_v2  ;;  %v2842_v19 = vpop.f32.mrf.mxu1  ;;  %v6871_v13 = vld [vmem:[%s9830_s1 + $0x14c] sm:$0xf0] }
 0x12d   : > { %v2843_v24 = vadd.f32 %v2842_v19, %v2753_v18  ;;  %v6864_v18 = vld [vmem:[%s9830_s1 + $0x11c] sm:$0xf] }
 0x12e   : > { %v7706_v25 = vadd.f32 %v3017_v14, %v2929_v17  ;;  %3068 = vmatmul.bf16.vlgmr.msrb.gmra.mxu0 %v5180_v15  ;;  %v6863_v14 = vld [vmem:[%s9830_s1 + $0x114] sm:$0xf]  ;;  %v6872_v17 = vld [vmem:[%s9830_s1 + $0x154] sm:$0xf0]  ;;  %v5317_v19 = vld [vmem:[%s9830_s1 + $0x158] sm:$0xf0] }
 0x12f   : > { %3157 = vmatmul.bf16.vlgmr.msrb.gmra.mxu1 %v5184_v16  ;;  %v5309_v15 = vld [vmem:[%s9830_s1 + $0x150] sm:$0xf0]  ;;  %v5315_v16 = vld [vmem:[%s9830_s1 + $0x118] sm:$0xf] }
 0x130   : > { %3246 = vmatmul.bf16.vlgmr.msrb.gmra.mxu2 %v5188_v22  ;;  %v5312_v27 = vor.u32 %v6863_v14, %v5309_v15 }
 0x131   : > { %3335 = vmatmul.bf16.vlgmr.msrb.gmra.mxu3 %v5192_v23 }
 0x133   : > { %v2931_v30 = vpop.f32.mrf.mxu2  ;;  %v2755_v35 = vpop.f32.mrf.mxu0 }
 0x134   : > { %v3020_v31 = vpop.f32.mrf.mxu3  ;;  %v2932_v34 = vadd.f32 %v2931_v30, %v2843_v24  ;;  %v2844_v37 = vpop.f32.mrf.mxu1  ;;  %v5308_v24 = vor.u32 %v6871_v13, %v5307_v12 }
 0x135   : > { %v2845_v38 = vadd.f32 %v2844_v37, %v2755_v35 }
 0x136   : > { %v7711_v39 = vadd.f32 %v3020_v31, %v2932_v34  ;;  %v5316_v31 = vor.u32 %v6872_v17, %v5315_v16  ;;  %v5320_v34 = vor.u32 %v6864_v18, %v5317_v19 }
 0x13b   : > { %v2933_v50 = vpop.f32.mrf.mxu2  ;;  %v2758_v58 = vpop.f32.mrf.mxu0 }
 0x13c   : > { %v3022_v51 = vpop.f32.mrf.mxu3  ;;  %v2934_v55 = vadd.f32 %v2933_v50, %v2845_v38  ;;  %v2847_v59 = vpop.f32.mrf.mxu1  ;;  %v6786_v38 = vld [vmem:[%s7198_s14 + $0x2a8] sm:$0xff] }
 0x13d   : > { %v2848_v63 = vadd.f32 %v2847_v59, %v2758_v58  ;;  %3596 = vmatpush.bf16.msra.mxu2 %v6786_v38  ;;  %v6778_v50 = vld [vmem:[%s7198_s14 + $0x268] sm:$0xff]  ;;  %v5379_v58 = vld [vmem:[%s9830_s1 + $0x198] sm:$0xf]  ;;  %v5445_v38 = vld [vmem:[%s9830_s1 + $0x258] sm:$0xf0] }
 0x13e   : > { %v7738_v2 = vadd.f32 %v3022_v51, %v2934_v55  ;;  %3073 = vmatmul.bf16.gmra.mxu0 %v5244_v52  ;;  %v5371_v51 = vld [vmem:[%s9830_s1 + $0x190] sm:$0xf]  ;;  %v5373_v55 = vld [vmem:[%s9830_s1 + $0x1d0] sm:$0xf0]  ;;  %3507 = vmatpush.bf16.msra.mxu1 %v6778_v50  ;;  %v6888_v59 = vld [vmem:[%s9830_s1 + $0x1d4] sm:$0xf0] }
 0x13f   : > { %3162 = vmatmul.bf16.gmra.mxu1 %v5248_v53  ;;  %v6887_v52 = vld [vmem:[%s9830_s1 + $0x1cc] sm:$0xf0]  ;;  %v6879_v53 = vld [vmem:[%s9830_s1 + $0x194] sm:$0xf]  ;;  %v5380_v12 = vor.u32 %v6888_v59, %v5379_v58  ;;  %v6793_v58 = vld [vmem:[%s7198_s14 + $0x2e0] sm:$0xff] }
 0x140   : > { %3251 = vmatmul.bf16.gmra.mxu2 %v5252_v60  ;;  %v6880_v60 = vld [vmem:[%s9830_s1 + $0x19c] sm:$0xf]  ;;  %3686 = vmatpush.bf16.msra.mxu3 %v6793_v58  ;;  %v6936_v58 = vld [vmem:[%s9830_s1 + $0x354] sm:$0xf0] }
 0x141   : > { %3340 = vmatmul.bf16.gmra.mxu3 %v5256_v61  ;;  %v5381_v61 = vld [vmem:[%s9830_s1 + $0x1d8] sm:$0xf0] }
 0x142   : > { %v5384_v13 = vor.u32 %v6880_v60, %v5381_v61 }
 0x143   : > { %v2936_v4 = vpop.f32.mrf.mxu2  ;;  %v2760_v8 = vpop.f32.mrf.mxu0 }
 0x144   : > { %v3025_v5 = vpop.f32.mrf.mxu3  ;;  %v2937_v6 = vadd.f32 %v2936_v4, %v2848_v63  ;;  %v2849_v9 = vpop.f32.mrf.mxu1 }
 0x145   : > { %v2850_v10 = vadd.f32 %v2849_v9, %v2760_v8 }
 0x146   : > { %v7740_v11 = vadd.f32 %v3025_v5, %v2937_v6  ;;  %v5372_v5 = vor.u32 %v6887_v52, %v5371_v51  ;;  %v5376_v6 = vor.u32 %v6879_v53, %v5373_v55  ;;  %v6785_v53 = vld [vmem:[%s7198_s14 + $0x2a0] sm:$0xff] }
 0x147   : > { %v6769_v55 = vld [vmem:[%s7198_s14 + $0x220] sm:$0xff]  ;;  %3597 = vmatpush.bf16.msra.mxu2 %v6785_v53  ;;  %v5565_v53 = vld [vmem:[%s9830_s1 + $0x350] sm:$0xf0] }
 0x148   : > { %3419 = vmatpush.bf16.msra.mxu0 %v6769_v55  ;;  %v5571_v55 = vld [vmem:[%s9830_s1 + $0x318] sm:$0xf] }
 0x14b   : > { %v2938_v22 = vpop.f32.mrf.mxu2  ;;  %v2763_v29 = vpop.f32.mrf.mxu0 }
 0x14c   : > { %v3027_v23 = vpop.f32.mrf.mxu3  ;;  %v2939_v28 = vadd.f32 %v2938_v22, %v2850_v10  ;;  %v2852_v30 = vpop.f32.mrf.mxu1 }
 0x14d   : > { %v2853_v35 = vadd.f32 %v2852_v30, %v2763_v29  ;;  %v6895_v29 = vld [vmem:[%s9830_s1 + $0x214] sm:$0xf] }
 0x14e   : > { %v7766_v37 = vadd.f32 %v3027_v23, %v2939_v28  ;;  %3078 = vmatmul.bf16.gmra.mxu0 %v5308_v24  ;;  %v6903_v28 = vld [vmem:[%s9830_s1 + $0x24c] sm:$0xf0]  ;;  %v5437_v30 = vld [vmem:[%s9830_s1 + $0x250] sm:$0xf0] }
 0x14f   : > { %3167 = vmatmul.bf16.gmra.mxu1 %v5312_v27  ;;  %v5435_v27 = vld [vmem:[%s9830_s1 + $0x210] sm:$0xf] }
 0x150   : > { %3256 = vmatmul.bf16.gmra.mxu2 %v5316_v31  ;;  %v5443_v31 = vld [vmem:[%s9830_s1 + $0x218] sm:$0xf] }
 0x151   : > { %3345 = vmatmul.bf16.gmra.mxu3 %v5320_v34  ;;  %v6904_v34 = vld [vmem:[%s9830_s1 + $0x254] sm:$0xf0] }
 0x153   : > { %v2941_v42 = vpop.f32.mrf.mxu2  ;;  %v2765_v46 = vpop.f32.mrf.mxu0 }
 0x154   : > { %v3030_v43 = vpop.f32.mrf.mxu3  ;;  %v2942_v45 = vadd.f32 %v2941_v42, %v2853_v35  ;;  %v2854_v47 = vpop.f32.mrf.mxu1  ;;  %v6896_v35 = vld [vmem:[%s9830_s1 + $0x21c] sm:$0xf]  ;;  %v5436_v42 = vor.u32 %v6903_v28, %v5435_v27 }
 0x155   : > { %v2855_v48 = vadd.f32 %v2854_v47, %v2765_v46  ;;  %v5448_v50 = vor.u32 %v6896_v35, %v5445_v38 }
 0x156   : > { %v7771_v49 = vadd.f32 %v3030_v43, %v2942_v45  ;;  %v5440_v43 = vor.u32 %v6895_v29, %v5437_v30 }
 0x15b   : > { %v2943_v63 = vpop.f32.mrf.mxu2  ;;  %v2768_v9 = vpop.f32.mrf.mxu0 }
 0x15c   : > { %v3032_v4 = vpop.f32.mrf.mxu3  ;;  %v2944_v8 = vadd.f32 %v2943_v63, %v2855_v48  ;;  %v2857_v10 = vpop.f32.mrf.mxu1  ;;  %v5444_v48 = vor.u32 %v6904_v34, %v5443_v31 }
 0x15d   : > { %v2858_v14 = vadd.f32 %v2857_v10, %v2768_v9  ;;  %v5499_v9 = vld [vmem:[%s9830_s1 + $0x290] sm:$0xf] }
 0x15e   : > { %v7798_v15 = vadd.f32 %v3032_v4, %v2944_v8  ;;  %3083 = vmatmul.bf16.gmra.mxu0 %v5372_v5  ;;  %v6777_v8 = vld [vmem:[%s7198_s14 + $0x260] sm:$0xff]  ;;  %v6919_v10 = vld [vmem:[%s9830_s1 + $0x2cc] sm:$0xf0] }
 0x15f   : > { %3172 = vmatmul.bf16.gmra.mxu1 %v5376_v6 }
 0x160   : > { %3261 = vmatmul.bf16.gmra.mxu2 %v5380_v12  ;;  %v6911_v12 = vld [vmem:[%s9830_s1 + $0x294] sm:$0xf]  ;;  %3508 = vmatpush.bf16.msra.mxu1 %v6777_v8 }
 0x161   : > { %3350 = vmatmul.bf16.gmra.mxu3 %v5384_v13  ;;  %v5501_v13 = vld [vmem:[%s9830_s1 + $0x2d0] sm:$0xf0] }
 0x162   : > { %v5504_v27 = vor.u32 %v6911_v12, %v5501_v13  ;;  %v5572_v12 = vor.u32 %v6936_v58, %v5571_v55 }
 0x163   : > { %v2946_v16 = vpop.f32.mrf.mxu2  ;;  %v2770_v19 = vpop.f32.mrf.mxu0 }
 0x164   : > { %v3035_v17 = vpop.f32.mrf.mxu3  ;;  %v2947_v18 = vadd.f32 %v2946_v16, %v2858_v14  ;;  %v2859_v22 = vpop.f32.mrf.mxu1  ;;  %v5507_v14 = vld [vmem:[%s9830_s1 + $0x298] sm:$0xf] }
 0x165   : > { %v2860_v23 = vadd.f32 %v2859_v22, %v2770_v19  ;;  %v6920_v16 = vld [vmem:[%s9830_s1 + $0x2d4] sm:$0xf0] }
 0x166   : > { %v7800_v24 = vadd.f32 %v3035_v17, %v2947_v18  ;;  %v6912_v17 = vld [vmem:[%s9830_s1 + $0x29c] sm:$0xf]  ;;  %v5508_v31 = vor.u32 %v6920_v16, %v5507_v14 }
 0x167   : > { %v5509_v18 = vld [vmem:[%s9830_s1 + $0x2d8] sm:$0xf0] }
 0x168   : > { %v5512_v34 = vor.u32 %v6912_v17, %v5509_v18  ;;  %v6784_v17 = vld [vmem:[%s7198_s14 + $0x298] sm:$0xff] }
 0x169   : > { %v6768_v18 = vld [vmem:[%s7198_s14 + $0x218] sm:$0xff]  ;;  %3598 = vmatpush.bf16.msra.mxu2 %v6784_v17 }
 0x16a   : > { %3420 = vmatpush.bf16.msra.mxu0 %v6768_v18  ;;  %v5691_v18 = vld [vmem:[%s9830_s1 + $0x410] sm:$0xf] }
 0x16b   : > { %v2948_v40 = vpop.f32.mrf.mxu2  ;;  %v2773_v46 = vpop.f32.mrf.mxu0 }
 0x16c   : > { %v3037_v41 = vpop.f32.mrf.mxu3  ;;  %v2949_v45 = vadd.f32 %v2948_v40, %v2860_v23  ;;  %v2862_v47 = vpop.f32.mrf.mxu1  ;;  %v5500_v23 = vor.u32 %v6919_v10, %v5499_v9 }
 0x16d   : > { %v2863_v51 = vadd.f32 %v2862_v47, %v2773_v46 }
 0x16e   : > { %v7826_v52 = vadd.f32 %v3037_v41, %v2949_v45  ;;  %3088 = vmatmul.bf16.gmra.mxu0 %v5436_v42 }
 0x16f   : > { %3177 = vmatmul.bf16.gmra.mxu1 %v5440_v43 }
 0x170   : > { %3266 = vmatmul.bf16.gmra.mxu2 %v5444_v48  ;;  %v5563_v48 = vld [vmem:[%s9830_s1 + $0x310] sm:$0xf] }
 0x171   : > { %3355 = vmatmul.bf16.gmra.mxu3 %v5448_v50  ;;  %v6935_v50 = vld [vmem:[%s9830_s1 + $0x34c] sm:$0xf0] }
 0x173   : > { %v2951_v59 = vpop.f32.mrf.mxu2  ;;  %v2775_v63 = vpop.f32.mrf.mxu0 }
 0x174   : > { %v3040_v60 = vpop.f32.mrf.mxu3  ;;  %v2952_v61 = vadd.f32 %v2951_v59, %v2863_v51  ;;  %v2864_v4 = vpop.f32.mrf.mxu1  ;;  %v6927_v51 = vld [vmem:[%s9830_s1 + $0x314] sm:$0xf]  ;;  %v6928_v59 = vld [vmem:[%s9830_s1 + $0x31c] sm:$0xf] }
 0x175   : > { %v2865_v5 = vadd.f32 %v2864_v4, %v2775_v63  ;;  %v5564_v4 = vor.u32 %v6935_v50, %v5563_v48  ;;  %v5637_v48 = vld [vmem:[%s9830_s1 + $0x3d8] sm:$0xf0] }
 0x176   : > { %v7831_v6 = vadd.f32 %v3040_v60, %v2952_v61  ;;  %v5573_v60 = vld [vmem:[%s9830_s1 + $0x358] sm:$0xf0] }
 0x177   : > { %v5576_v13 = vor.u32 %v6928_v59, %v5573_v60 }
 0x17b   : > { %v2953_v19 = vpop.f32.mrf.mxu2  ;;  %v2778_v29 = vpop.f32.mrf.mxu0 }
 0x17c   : > { %v3042_v22 = vpop.f32.mrf.mxu3  ;;  %v2954_v28 = vadd.f32 %v2953_v19, %v2865_v5  ;;  %v2867_v30 = vpop.f32.mrf.mxu1  ;;  %v5568_v5 = vor.u32 %v6927_v51, %v5565_v53  ;;  %v6792_v19 = vld [vmem:[%s7198_s14 + $0x2d8] sm:$0xff] }
 0x17d   : > { %v2868_v35 = vadd.f32 %v2867_v30, %v2778_v29  ;;  %3687 = vmatpush.bf16.msra.mxu3 %v6792_v19  ;;  %v6967_v19 = vld [vmem:[%s9830_s1 + $0x44c] sm:$0xf0] }
 0x17e   : > { %v7858_v38 = vadd.f32 %v3042_v22, %v2954_v28  ;;  %3093 = vmatmul.bf16.gmra.mxu0 %v5500_v23 }
 0x17f   : > { %3182 = vmatmul.bf16.gmra.mxu1 %v5504_v27 }
 0x180   : > { %3271 = vmatmul.bf16.gmra.mxu2 %v5508_v31 }
 0x181   : > { %3360 = vmatmul.bf16.gmra.mxu3 %v5512_v34  ;;  %v6776_v34 = vld [vmem:[%s7198_s14 + $0x258] sm:$0xff] }
 0x182   : > { %3509 = vmatpush.bf16.msra.mxu1 %v6776_v34 }
 0x183   : > { %v2956_v40 = vpop.f32.mrf.mxu2  ;;  %v2780_v43 = vpop.f32.mrf.mxu0 }
 0x184   : > { %v3045_v41 = vpop.f32.mrf.mxu3  ;;  %v2957_v42 = vadd.f32 %v2956_v40, %v2868_v35  ;;  %v2869_v45 = vpop.f32.mrf.mxu1  ;;  %v5627_v35 = vld [vmem:[%s9830_s1 + $0x390] sm:$0xf] }
 0x185   : > { %v2870_v46 = vadd.f32 %v2869_v45, %v2780_v43  ;;  %v6951_v40 = vld [vmem:[%s9830_s1 + $0x3cc] sm:$0xf0]  ;;  %v5635_v43 = vld [vmem:[%s9830_s1 + $0x398] sm:$0xf] }
 0x186   : > { %v7860_v47 = vadd.f32 %v3045_v41, %v2957_v42  ;;  %v6943_v41 = vld [vmem:[%s9830_s1 + $0x394] sm:$0xf]  ;;  %v6952_v45 = vld [vmem:[%s9830_s1 + $0x3d4] sm:$0xf0]  ;;  %v5628_v53 = vor.u32 %v6951_v40, %v5627_v35  ;;  %v5692_v40 = vor.u32 %v6967_v19, %v5691_v18 }
 0x187   : > { %v5629_v42 = vld [vmem:[%s9830_s1 + $0x3d0] sm:$0xf0]  ;;  %v5763_v19 = vld [vmem:[%s9830_s1 + $0x498] sm:$0xf] }
 0x188   : > { %v5632_v55 = vor.u32 %v6943_v41, %v5629_v42  ;;  %v6975_v18 = vld [vmem:[%s9830_s1 + $0x494] sm:$0xf] }
 0x18b   : > { %v2958_v61 = vpop.f32.mrf.mxu2  ;;  %v2783_v9 = vpop.f32.mrf.mxu0 }
 0x18c   : > { %v3047_v63 = vpop.f32.mrf.mxu3  ;;  %v2959_v8 = vadd.f32 %v2958_v61, %v2870_v46  ;;  %v2872_v10 = vpop.f32.mrf.mxu1  ;;  %v6944_v46 = vld [vmem:[%s9830_s1 + $0x39c] sm:$0xf]  ;;  %v5636_v61 = vor.u32 %v6952_v45, %v5635_v43 }
 0x18d   : > { %v2873_v14 = vadd.f32 %v2872_v10, %v2783_v9 }
 0x18e   : > { %v7886_v16 = vadd.f32 %v3047_v63, %v2959_v8  ;;  %3098 = vmatmul.bf16.gmra.mxu0 %v5564_v4  ;;  %v5640_v63 = vor.u32 %v6944_v46, %v5637_v48 }
 0x18f   : > { %3187 = vmatmul.bf16.gmra.mxu1 %v5568_v5 }
 0x190   : > { %3276 = vmatmul.bf16.gmra.mxu2 %v5572_v12 }
 0x191   : > { %3365 = vmatmul.bf16.gmra.mxu3 %v5576_v13 }
 0x193   : > { %v2961_v22 = vpop.f32.mrf.mxu2  ;;  %v2785_v28 = vpop.f32.mrf.mxu0 }
 0x194   : > { %v3050_v23 = vpop.f32.mrf.mxu3  ;;  %v2962_v27 = vadd.f32 %v2961_v22, %v2873_v14  ;;  %v2874_v29 = vpop.f32.mrf.mxu1  ;;  %v6959_v22 = vld [vmem:[%s9830_s1 + $0x414] sm:$0xf] }
 0x195   : > { %v2875_v30 = vadd.f32 %v2874_v29, %v2785_v28  ;;  %v6968_v28 = vld [vmem:[%s9830_s1 + $0x454] sm:$0xf0]  ;;  %v6960_v29 = vld [vmem:[%s9830_s1 + $0x41c] sm:$0xf] }
 0x196   : > { %v7891_v31 = vadd.f32 %v3050_v23, %v2962_v27  ;;  %v5693_v23 = vld [vmem:[%s9830_s1 + $0x450] sm:$0xf0]  ;;  %v5699_v27 = vld [vmem:[%s9830_s1 + $0x418] sm:$0xf] }
 0x197   : > { %v5696_v41 = vor.u32 %v6959_v22, %v5693_v23  ;;  %v5700_v46 = vor.u32 %v6968_v28, %v5699_v27  ;;  %v6984_v22 = vld [vmem:[%s9830_s1 + $0x4d4] sm:$0xf0]  ;;  %v6976_v23 = vld [vmem:[%s9830_s1 + $0x49c] sm:$0xf] }
 0x198   : > { %v5765_v27 = vld [vmem:[%s9830_s1 + $0x4d8] sm:$0xf0] }
 0x19b   : > { %v2963_v50 = vpop.f32.mrf.mxu2  ;;  %v2788_v59 = vpop.f32.mrf.mxu0 }
 0x19c   : > { %v3052_v51 = vpop.f32.mrf.mxu3  ;;  %v2964_v58 = vadd.f32 %v2963_v50, %v2875_v30  ;;  %v2877_v60 = vpop.f32.mrf.mxu1  ;;  %v5701_v30 = vld [vmem:[%s9830_s1 + $0x458] sm:$0xf0] }
 0x19d   : > { %v2878_v4 = vadd.f32 %v2877_v60, %v2788_v59  ;;  %v5704_v48 = vor.u32 %v6960_v29, %v5701_v30  ;;  %v6791_v59 = vld [vmem:[%s7198_s14 + $0x2d0] sm:$0xff] }
 0x19e   : > { %v7918_v5 = vadd.f32 %v3052_v51, %v2964_v58  ;;  %3103 = vmatmul.bf16.gmra.mxu0 %v5628_v53  ;;  %v6767_v58 = vld [vmem:[%s7198_s14 + $0x210] sm:$0xff]  ;;  %3688 = vmatpush.bf16.msra.mxu3 %v6791_v59 }
 0x19f   : > { %3192 = vmatmul.bf16.gmra.mxu1 %v5632_v55  ;;  %v6783_v55 = vld [vmem:[%s7198_s14 + $0x290] sm:$0xff]  ;;  %3421 = vmatpush.bf16.msra.mxu0 %v6767_v58 }
 0x1a0   : > { %3281 = vmatmul.bf16.gmra.mxu2 %v5636_v61 }
 0x1a1   : > { %3370 = vmatmul.bf16.gmra.mxu3 %v5640_v63  ;;  %3599 = vmatpush.bf16.msra.mxu2 %v6783_v55 }
 0x1a3   : > { %v2966_v8 = vpop.f32.mrf.mxu2  ;;  %v2790_v12 = vpop.f32.mrf.mxu0 }
 0x1a4   : > { %v3055_v9 = vpop.f32.mrf.mxu3  ;;  %v2967_v10 = vadd.f32 %v2966_v8, %v2878_v4  ;;  %v2879_v13 = vpop.f32.mrf.mxu1 }
 0x1a5   : > { %v2880_v14 = vadd.f32 %v2879_v13, %v2790_v12  ;;  %v5755_v13 = vld [vmem:[%s9830_s1 + $0x490] sm:$0xf] }
 0x1a6   : > { %v7920_v17 = vadd.f32 %v3055_v9, %v2967_v10  ;;  %v6775_v10 = vld [vmem:[%s7198_s14 + $0x250] sm:$0xff] }
 0x1a7   : > { %3510 = vmatpush.bf16.msra.mxu1 %v6775_v10  ;;  %v7000_v10 = vld [vmem:[%s9830_s1 + $0x554] sm:$0xf0] }
 0x1ab   : > { %v2968_v34 = vpop.f32.mrf.mxu2  ;;  %v3069_v43 = vpop.f32.mrf.mxu0 }
 0x1ac   : > { %v3057_v35 = vpop.f32.mrf.mxu3  ;;  %v2969_v42 = vadd.f32 %v2968_v34, %v2880_v14  ;;  %v3158_v45 = vpop.f32.mrf.mxu1  ;;  %v3070_v50 = vadd.f32 %v3069_v43, %v7471_v44  ;;  %v6983_v14 = vld [vmem:[%s9830_s1 + $0x4cc] sm:$0xf0]  ;;  %v5768_v43 = vor.u32 %v6976_v23, %v5765_v27 }
 0x1ad   : > { %v5756_v30 = vor.u32 %v6983_v14, %v5755_v13  ;;  %v5829_v13 = vld [vmem:[%s9830_s1 + $0x558] sm:$0xf0] }
 0x1ae   : > { %v7947_v51 = vadd.f32 %v3057_v35, %v2969_v42  ;;  %v3159_v53 = vadd.f32 %v3158_v45, %v3070_v50  ;;  %3108 = vmatmul.bf16.gmra.mxu0 %v5692_v40  ;;  %v5764_v42 = vor.u32 %v6984_v22, %v5763_v19 }
 0x1af   : > { %3197 = vmatmul.bf16.gmra.mxu1 %v5696_v41 }
 0x1b0   : > { %3286 = vmatmul.bf16.gmra.mxu2 %v5700_v46 }
 0x1b1   : > { %3375 = vmatmul.bf16.gmra.mxu3 %v5704_v48 }
 0x1b3   : > { %v3247_v60 = vpop.f32.mrf.mxu2  ;;  %v3071_v4 = vpop.f32.mrf.mxu0 }
 0x1b4   : > { %v3336_v61 = vpop.f32.mrf.mxu3  ;;  %v3248_v63 = vadd.f32 %v3247_v60, %v3159_v53  ;;  %v3160_v8 = vpop.f32.mrf.mxu1  ;;  %v3072_v44 = vadd.f32 %v3071_v4, %v7498_v0  ;;  %v5757_v0 = vld [vmem:[%s9830_s1 + $0x4d0] sm:$0xf0]  ;;  %v6999_v4 = vld [vmem:[%s9830_s1 + $0x54c] sm:$0xf0] }
 0x1b5   : > { %v5760_v34 = vor.u32 %v6975_v18, %v5757_v0 }
 0x1b6   : > { %v7953_v9 = vadd.f32 %v3336_v61, %v3248_v63  ;;  %v3161_v12 = vadd.f32 %v3160_v8, %v3072_v44  ;;  %v6991_v8 = vld [vmem:[%s9830_s1 + $0x514] sm:$0xf] }
 0x1b7   : > { %v5821_v44 = vld [vmem:[%s9830_s1 + $0x550] sm:$0xf0] }
 0x1b8   : > { %v5824_v19 = vor.u32 %v6991_v8, %v5821_v44  ;;  %v7016_v8 = vld [vmem:[%s9830_s1 + $0x5d4] sm:$0xf0]  ;;  %v7008_v44 = vld [vmem:[%s9830_s1 + $0x59c] sm:$0xf] }
 0x1bb   : > { %v3249_v28 = vpop.f32.mrf.mxu2  ;;  %v3074_v40 = vpop.f32.mrf.mxu0 }
 0x1bc   : > { %v3338_v29 = vpop.f32.mrf.mxu3  ;;  %v3250_v35 = vadd.f32 %v3249_v28, %v3161_v12  ;;  %v3163_v41 = vpop.f32.mrf.mxu1  ;;  %v3075_v45 = vadd.f32 %v3074_v40, %v7500_v7  ;;  %v5819_v7 = vld [vmem:[%s9830_s1 + $0x510] sm:$0xf]  ;;  %v6992_v12 = vld [vmem:[%s9830_s1 + $0x51c] sm:$0xf]  ;;  %v6782_v40 = vld [vmem:[%s7198_s14 + $0x288] sm:$0xff] }
 0x1bd   : > { %v5820_v0 = vor.u32 %v6999_v4, %v5819_v7  ;;  %3600 = vmatpush.bf16.msra.mxu2 %v6782_v40  ;;  %v7007_v7 = vld [vmem:[%s9830_s1 + $0x594] sm:$0xf]  ;;  %v5891_v4 = vld [vmem:[%s9830_s1 + $0x598] sm:$0xf] }
 0x1be   : > { %v7981_v46 = vadd.f32 %v3338_v29, %v3250_v35  ;;  %v3164_v48 = vadd.f32 %v3163_v41, %v3075_v45  ;;  %3113 = vmatmul.bf16.gmra.mxu0 %v5756_v30  ;;  %v5832_v29 = vor.u32 %v6992_v12, %v5829_v13  ;;  %v6766_v41 = vld [vmem:[%s7198_s14 + $0x208] sm:$0xff] }
 0x1bf   : > { %3202 = vmatmul.bf16.gmra.mxu1 %v5760_v34  ;;  %3422 = vmatpush.bf16.msra.mxu0 %v6766_v41 }
 0x1c0   : > { %3291 = vmatmul.bf16.gmra.mxu2 %v5764_v42  ;;  %v6790_v42 = vld [vmem:[%s7198_s14 + $0x2c8] sm:$0xff] }
 0x1c1   : > { %3380 = vmatmul.bf16.gmra.mxu3 %v5768_v43 }
 0x1c2   : > { %3689 = vmatpush.bf16.msra.mxu3 %v6790_v42 }
 0x1c3   : > { %v3252_v50 = vpop.f32.mrf.mxu2  ;;  %v3076_v58 = vpop.f32.mrf.mxu0 }
 0x1c4   : > { %v3341_v53 = vpop.f32.mrf.mxu3  ;;  %v3253_v55 = vadd.f32 %v3252_v50, %v3164_v48  ;;  %v3165_v59 = vpop.f32.mrf.mxu1  ;;  %v3077_v60 = vadd.f32 %v3076_v58, %v7526_v26  ;;  %v5827_v26 = vld [vmem:[%s9830_s1 + $0x518] sm:$0xf]  ;;  %v6774_v58 = vld [vmem:[%s7198_s14 + $0x248] sm:$0xff] }
 0x1c5   : > { %v5828_v28 = vor.u32 %v7000_v10, %v5827_v26  ;;  %3511 = vmatpush.bf16.msra.mxu1 %v6774_v58  ;;  %v5893_v26 = vld [vmem:[%s9830_s1 + $0x5d8] sm:$0xf0]  ;;  %v7032_v58 = vld [vmem:[%s9830_s1 + $0x654] sm:$0xf0] }
 0x1c6   : > { %v7984_v61 = vadd.f32 %v3341_v53, %v3253_v55  ;;  %v3166_v63 = vadd.f32 %v3165_v59, %v3077_v60  ;;  %v5883_v60 = vld [vmem:[%s9830_s1 + $0x590] sm:$0xf] }
 0x1cb   : > { %v3254_v14 = vpop.f32.mrf.mxu2  ;;  %v3079_v23 = vpop.f32.mrf.mxu0 }
 0x1cc   : > { %v3343_v18 = vpop.f32.mrf.mxu3  ;;  %v3255_v22 = vadd.f32 %v3254_v14, %v3166_v63  ;;  %v3168_v27 = vpop.f32.mrf.mxu1  ;;  %v3080_v30 = vadd.f32 %v3079_v23, %v7531_v36  ;;  %v7015_v63 = vld [vmem:[%s9830_s1 + $0x5cc] sm:$0xf0]  ;;  %v5896_v23 = vor.u32 %v7008_v44, %v5893_v26 }
 0x1cd   : > { %v5884_v13 = vor.u32 %v7015_v63, %v5883_v60  ;;  %v5957_v60 = vld [vmem:[%s9830_s1 + $0x658] sm:$0xf0] }
 0x1ce   : > { %v8011_v34 = vadd.f32 %v3343_v18, %v3255_v22  ;;  %v3169_v35 = vadd.f32 %v3168_v27, %v3080_v30  ;;  %3118 = vmatmul.bf16.gmra.mxu0 %v5820_v0  ;;  %v5892_v22 = vor.u32 %v7016_v8, %v5891_v4 }
 0x1cf   : > { %3207 = vmatmul.bf16.gmra.mxu1 %v5824_v19 }
 0x1d0   : > { %3296 = vmatmul.bf16.gmra.mxu2 %v5828_v28 }
 0x1d1   : > { %3385 = vmatmul.bf16.gmra.mxu3 %v5832_v29 }
 0x1d3   : > { %v3257_v43 = vpop.f32.mrf.mxu2  ;;  %v3081_v50 = vpop.f32.mrf.mxu0 }
 0x1d4   : > { %v3346_v45 = vpop.f32.mrf.mxu3  ;;  %v3258_v48 = vadd.f32 %v3257_v43, %v3169_v35  ;;  %v3170_v53 = vpop.f32.mrf.mxu1  ;;  %v3082_v36 = vadd.f32 %v3081_v50, %v7558_v57  ;;  %v5885_v57 = vld [vmem:[%s9830_s1 + $0x5d0] sm:$0xf0]  ;;  %v7031_v50 = vld [vmem:[%s9830_s1 + $0x64c] sm:$0xf0] }
 0x1d5   : > { %v5888_v14 = vor.u32 %v7007_v7, %v5885_v57 }
 0x1d6   : > { %v8017_v55 = vadd.f32 %v3346_v45, %v3258_v48  ;;  %v3171_v59 = vadd.f32 %v3170_v53, %v3082_v36  ;;  %v7023_v53 = vld [vmem:[%s9830_s1 + $0x614] sm:$0xf] }
 0x1d7   : > { %v5949_v36 = vld [vmem:[%s9830_s1 + $0x650] sm:$0xf0] }
 0x1d8   : > { %v5952_v4 = vor.u32 %v7023_v53, %v5949_v36  ;;  %v7048_v53 = vld [vmem:[%s9830_s1 + $0x6d4] sm:$0xf0]  ;;  %v7040_v36 = vld [vmem:[%s9830_s1 + $0x69c] sm:$0xf] }
 0x1db   : > { %v3259_v10 = vpop.f32.mrf.mxu2  ;;  %v3084_v0 = vpop.f32.mrf.mxu0 }
 0x1dc   : > { %v3348_v12 = vpop.f32.mrf.mxu3  ;;  %v3260_v18 = vadd.f32 %v3259_v10, %v3171_v59  ;;  %v3173_v19 = vpop.f32.mrf.mxu1  ;;  %v3085_v27 = vadd.f32 %v3084_v0, %v7560_v1  ;;  %v5947_v1 = vld [vmem:[%s9830_s1 + $0x610] sm:$0xf]  ;;  %v7024_v59 = vld [vmem:[%s9830_s1 + $0x61c] sm:$0xf]  ;;  %v6781_v0 = vld [vmem:[%s7198_s14 + $0x280] sm:$0xff] }
 0x1dd   : > { %v5948_v57 = vor.u32 %v7031_v50, %v5947_v1  ;;  %3601 = vmatpush.bf16.msra.mxu2 %v6781_v0  ;;  %v7039_v1 = vld [vmem:[%s9830_s1 + $0x694] sm:$0xf]  ;;  %v6019_v50 = vld [vmem:[%s9830_s1 + $0x698] sm:$0xf] }
 0x1de   : > { %v8045_v28 = vadd.f32 %v3348_v12, %v3260_v18  ;;  %v3174_v29 = vadd.f32 %v3173_v19, %v3085_v27  ;;  %3123 = vmatmul.bf16.gmra.mxu0 %v5884_v13  ;;  %v5960_v12 = vor.u32 %v7024_v59, %v5957_v60  ;;  %v6765_v19 = vld [vmem:[%s7198_s14 + $0x200] sm:$0xff] }
 0x1df   : > { %3212 = vmatmul.bf16.gmra.mxu1 %v5888_v14  ;;  %3423 = vmatpush.bf16.msra.mxu0 %v6765_v19 }
 0x1e0   : > { %3301 = vmatmul.bf16.gmra.mxu2 %v5892_v22  ;;  %v6789_v22 = vld [vmem:[%s7198_s14 + $0x2c0] sm:$0xff] }
 0x1e1   : > { %3390 = vmatmul.bf16.gmra.mxu3 %v5896_v23 }
 0x1e2   : > { %3690 = vmatpush.bf16.msra.mxu3 %v6789_v22 }
 0x1e3   : > { %v3262_v30 = vpop.f32.mrf.mxu2  ;;  %v3086_v41 = vpop.f32.mrf.mxu0 }
 0x1e4   : > { %v3351_v35 = vpop.f32.mrf.mxu3  ;;  %v3263_v40 = vadd.f32 %v3262_v30, %v3174_v29  ;;  %v3175_v42 = vpop.f32.mrf.mxu1  ;;  %v3087_v43 = vadd.f32 %v3086_v41, %v7586_v21  ;;  %v5955_v21 = vld [vmem:[%s9830_s1 + $0x618] sm:$0xf]  ;;  %v6773_v41 = vld [vmem:[%s7198_s14 + $0x240] sm:$0xff] }
 0x1e5   : > { %v5956_v10 = vor.u32 %v7032_v58, %v5955_v21  ;;  %3512 = vmatpush.bf16.msra.mxu1 %v6773_v41  ;;  %v6021_v21 = vld [vmem:[%s9830_s1 + $0x6d8] sm:$0xf0]  ;;  %v7064_v41 = vld [vmem:[%s9830_s1 + $0x754] sm:$0xf0] }
 0x1e6   : > { %v8048_v45 = vadd.f32 %v3351_v35, %v3263_v40  ;;  %v3176_v48 = vadd.f32 %v3175_v42, %v3087_v43  ;;  %v6011_v43 = vld [vmem:[%s9830_s1 + $0x690] sm:$0xf] }
 0x1eb   : > { %v3264_v63 = vpop.f32.mrf.mxu2  ;;  %v3089_v44 = vpop.f32.mrf.mxu0 }
 0x1ec   : > { %v3353_v7 = vpop.f32.mrf.mxu3  ;;  %v3265_v8 = vadd.f32 %v3264_v63, %v3176_v48  ;;  %v3178_v26 = vpop.f32.mrf.mxu1  ;;  %v3090_v13 = vadd.f32 %v3089_v44, %v7591_v32  ;;  %v7047_v48 = vld [vmem:[%s9830_s1 + $0x6cc] sm:$0xf0]  ;;  %v6024_v44 = vor.u32 %v7040_v36, %v6021_v21 }
 0x1ed   : > { %v6012_v60 = vor.u32 %v7047_v48, %v6011_v43  ;;  %v6085_v43 = vld [vmem:[%s9830_s1 + $0x758] sm:$0xf0] }
 0x1ee   : > { %v8075_v14 = vadd.f32 %v3353_v7, %v3265_v8  ;;  %v3179_v18 = vadd.f32 %v3178_v26, %v3090_v13  ;;  %3128 = vmatmul.bf16.gmra.mxu0 %v5948_v57  ;;  %v6020_v8 = vor.u32 %v7048_v53, %v6019_v50 }
 0x1ef   : > { %3217 = vmatmul.bf16.gmra.mxu1 %v5952_v4 }
 0x1f0   : > { %3306 = vmatmul.bf16.gmra.mxu2 %v5956_v10 }
 0x1f1   : > { %3395 = vmatmul.bf16.gmra.mxu3 %v5960_v12 }
 0x1f3   : > { %v3267_v23 = vpop.f32.mrf.mxu2  ;;  %v3091_v30 = vpop.f32.mrf.mxu0 }
 0x1f4   : > { %v3356_v27 = vpop.f32.mrf.mxu3  ;;  %v3268_v29 = vadd.f32 %v3267_v23, %v3179_v18  ;;  %v3180_v35 = vpop.f32.mrf.mxu1  ;;  %v3092_v32 = vadd.f32 %v3091_v30, %v7618_v54  ;;  %v6013_v54 = vld [vmem:[%s9830_s1 + $0x6d0] sm:$0xf0]  ;;  %v7063_v30 = vld [vmem:[%s9830_s1 + $0x74c] sm:$0xf0] }
 0x1f5   : > { %v6016_v63 = vor.u32 %v7039_v1, %v6013_v54 }
 0x1f6   : > { %v8081_v40 = vadd.f32 %v3356_v27, %v3268_v29  ;;  %v3181_v42 = vadd.f32 %v3180_v35, %v3092_v32  ;;  %v7055_v35 = vld [vmem:[%s9830_s1 + $0x714] sm:$0xf] }
 0x1f7   : > { %v6077_v32 = vld [vmem:[%s9830_s1 + $0x750] sm:$0xf0] }
 0x1f8   : > { %v6080_v50 = vor.u32 %v7055_v35, %v6077_v32  ;;  %v7080_v35 = vld [vmem:[%s9830_s1 + $0x7d4] sm:$0xf0]  ;;  %v7072_v32 = vld [vmem:[%s9830_s1 + $0x79c] sm:$0xf] }
 0x1fb   : > { %v3269_v58 = vpop.f32.mrf.mxu2  ;;  %v3094_v57 = vpop.f32.mrf.mxu0 }
 0x1fc   : > { %v3358_v59 = vpop.f32.mrf.mxu3  ;;  %v3270_v7 = vadd.f32 %v3269_v58, %v3181_v42  ;;  %v3183_v4 = vpop.f32.mrf.mxu1  ;;  %v3095_v26 = vadd.f32 %v3094_v57, %v7620_v62  ;;  %v6075_v62 = vld [vmem:[%s9830_s1 + $0x710] sm:$0xf]  ;;  %v7056_v42 = vld [vmem:[%s9830_s1 + $0x71c] sm:$0xf] }
 0x1fd   : > { %v6076_v54 = vor.u32 %v7063_v30, %v6075_v62  ;;  %v6820_v57 = vld [vmem:[%s7198_s14 + $0x3b8] sm:$0xff]  ;;  %v7071_v62 = vld [vmem:[%s9830_s1 + $0x794] sm:$0xf] }
 0x1fe   : > { %v8109_v10 = vadd.f32 %v3358_v59, %v3270_v7  ;;  %v3184_v12 = vadd.f32 %v3183_v4, %v3095_v26  ;;  %3133 = vmatmul.bf16.gmra.mxu0 %v6012_v60  ;;  %v6088_v59 = vor.u32 %v7056_v42, %v6085_v43  ;;  %v6804_v4 = vld [vmem:[%s7198_s14 + $0x338] sm:$0xff]  ;;  %3950 = vmatpush.bf16.msrb.mxu2 %v6820_v57 }
 0x1ff   : > { %3222 = vmatmul.bf16.gmra.mxu1 %v6016_v63  ;;  %3772 = vmatpush.bf16.msrb.mxu0 %v6804_v4  ;;  %v6147_v30 = vld [vmem:[%s9830_s1 + $0x798] sm:$0xf] }
 0x200   : > { %3311 = vmatmul.bf16.gmra.mxu2 %v6020_v8  ;;  %v6828_v8 = vld [vmem:[%s7198_s14 + $0x3f8] sm:$0xff] }
 0x201   : > { %3400 = vmatmul.bf16.gmra.mxu3 %v6024_v44 }
 0x202   : > { %4039 = vmatpush.bf16.msrb.mxu3 %v6828_v8 }
 0x203   : > { %v3272_v13 = vpop.f32.mrf.mxu2  ;;  %v3096_v19 = vpop.f32.mrf.mxu0 }
 0x204   : > { %v3361_v18 = vpop.f32.mrf.mxu3  ;;  %v3273_v0 = vadd.f32 %v3272_v13, %v3184_v12  ;;  %v3185_v22 = vpop.f32.mrf.mxu1  ;;  %v3097_v23 = vadd.f32 %v3096_v19, %v7646_v20  ;;  %v6083_v20 = vld [vmem:[%s9830_s1 + $0x718] sm:$0xf] }
 0x205   : > { %v6084_v58 = vor.u32 %v7064_v41, %v6083_v20  ;;  %v6812_v19 = vld [vmem:[%s7198_s14 + $0x378] sm:$0xff] }
 0x206   : > { %v8112_v27 = vadd.f32 %v3361_v18, %v3273_v0  ;;  %v3186_v29 = vadd.f32 %v3185_v22, %v3097_v23  ;;  %v6139_v23 = vld [vmem:[%s9830_s1 + $0x790] sm:$0xf]  ;;  %3861 = vmatpush.bf16.msrb.mxu1 %v6812_v19  ;;  %v6149_v20 = vld [vmem:[%s9830_s1 + $0x7d8] sm:$0xf0]  ;;  %v6842_v19 = vld [vmem:[%s9830_s1 + $0x64] sm:$0xf0] }
 0x20b   : > { %v3274_v48 = vpop.f32.mrf.mxu2  ;;  %v3099_v36 = vpop.f32.mrf.mxu0 }
 0x20c   : > { %v3363_v1 = vpop.f32.mrf.mxu3  ;;  %v3275_v53 = vadd.f32 %v3274_v48, %v3186_v29  ;;  %v3188_v21 = vpop.f32.mrf.mxu1  ;;  %v3100_v60 = vadd.f32 %v3099_v36, %v7651_v33  ;;  %v7079_v29 = vld [vmem:[%s9830_s1 + $0x7cc] sm:$0xf0]  ;;  %v6152_v36 = vor.u32 %v7072_v32, %v6149_v20 }
 0x20d   : > { %v6140_v43 = vor.u32 %v7079_v29, %v6139_v23  ;;  %v5205_v23 = vld [vmem:[%s9830_s1 + $0x68] sm:$0xf0] }
 0x20e   : > { %v8139_v63 = vadd.f32 %v3363_v1, %v3275_v53  ;;  %v3189_v7 = vadd.f32 %v3188_v21, %v3100_v60  ;;  %3138 = vmatmul.bf16.gmra.mxu0 %v6076_v54  ;;  %v6148_v53 = vor.u32 %v7080_v35, %v6147_v30 }
 0x20f   : > { %3227 = vmatmul.bf16.gmra.mxu1 %v6080_v50 }
 0x210   : > { %3316 = vmatmul.bf16.gmra.mxu2 %v6084_v58 }
 0x211   : > { %3405 = vmatmul.bf16.gmra.mxu3 %v6088_v59 }
 0x213   : > { %v3277_v44 = vpop.f32.mrf.mxu2  ;;  %v3101_v13 = vpop.f32.mrf.mxu0 }
 0x214   : > { %v3366_v26 = vpop.f32.mrf.mxu3  ;;  %v3278_v12 = vadd.f32 %v3277_v44, %v3189_v7  ;;  %v3190_v18 = vpop.f32.mrf.mxu1  ;;  %v3102_v33 = vadd.f32 %v3101_v13, %v7678_v56  ;;  %v6141_v56 = vld [vmem:[%s9830_s1 + $0x7d0] sm:$0xf0]  ;;  %v6841_v13 = vld [vmem:[%s9830_s1 + $0x5c] sm:$0xf0] }
 0x215   : > { %v6144_v48 = vor.u32 %v7071_v62, %v6141_v56 }
 0x216   : > { %v8145_v0 = vadd.f32 %v3366_v26, %v3278_v12  ;;  %v3191_v22 = vadd.f32 %v3190_v18, %v3102_v33  ;;  %v6833_v18 = vld [vmem:[%s9830_s1 + $0x24] sm:$0xf] }
 0x217   : > { %v5197_v33 = vld [vmem:[%s9830_s1 + $0x60] sm:$0xf0] }
 0x218   : > { %v5200_v30 = vor.u32 %v6833_v18, %v5197_v33  ;;  %v6858_v18 = vld [vmem:[%s9830_s1 + $0xe4] sm:$0xf0]  ;;  %v6850_v33 = vld [vmem:[%s9830_s1 + $0xac] sm:$0xf] }
 0x21b   : > { %v3279_v41 = vpop.f32.mrf.mxu2  ;;  %v3104_v54 = vpop.f32.mrf.mxu0 }
 0x21c   : > { %v3368_v42 = vpop.f32.mrf.mxu3  ;;  %v3280_v1 = vadd.f32 %v3279_v41, %v3191_v22  ;;  %v3193_v50 = vpop.f32.mrf.mxu1  ;;  %v3105_v21 = vadd.f32 %v3104_v54, %v7680_v3  ;;  %v5195_v3 = vld [vmem:[%s9830_s1 + $0x20] sm:$0xf]  ;;  %v6834_v22 = vld [vmem:[%s9830_s1 + $0x2c] sm:$0xf]  ;;  %v6819_v54 = vld [vmem:[%s7198_s14 + $0x3b0] sm:$0xff] }
 0x21d   : > { %v5196_v56 = vor.u32 %v6841_v13, %v5195_v3  ;;  %3951 = vmatpush.bf16.msrb.mxu2 %v6819_v54  ;;  %v6849_v3 = vld [vmem:[%s9830_s1 + $0xa4] sm:$0xf]  ;;  %v5267_v13 = vld [vmem:[%s9830_s1 + $0xa8] sm:$0xf] }
 0x21e   : > { %v8173_v58 = vadd.f32 %v3368_v42, %v3280_v1  ;;  %v3194_v59 = vadd.f32 %v3193_v50, %v3105_v21  ;;  %3143 = vmatmul.bf16.gmra.mxu0 %v6140_v43  ;;  %v5208_v42 = vor.u32 %v6834_v22, %v5205_v23  ;;  %v6803_v50 = vld [vmem:[%s7198_s14 + $0x330] sm:$0xff] }
 0x21f   : > { %3232 = vmatmul.bf16.gmra.mxu1 %v6144_v48  ;;  %3773 = vmatpush.bf16.msrb.mxu0 %v6803_v50 }
 0x220   : > { %3321 = vmatmul.bf16.gmra.mxu2 %v6148_v53  ;;  %v6827_v53 = vld [vmem:[%s7198_s14 + $0x3f0] sm:$0xff] }
 0x221   : > { %3410 = vmatmul.bf16.gmra.mxu3 %v6152_v36 }
 0x222   : > { %4040 = vmatpush.bf16.msrb.mxu3 %v6827_v53 }
 0x223   : > { %v3282_v60 = vpop.f32.mrf.mxu2  ;;  %v3106_v4 = vpop.f32.mrf.mxu0 }
 0x224   : > { %v3371_v7 = vpop.f32.mrf.mxu3  ;;  %v3283_v57 = vadd.f32 %v3282_v60, %v3194_v59  ;;  %v3195_v8 = vpop.f32.mrf.mxu1  ;;  %v3107_v44 = vadd.f32 %v3106_v4, %v7706_v25  ;;  %v5203_v25 = vld [vmem:[%s9830_s1 + $0x28] sm:$0xf]  ;;  %v6811_v4 = vld [vmem:[%s7198_s14 + $0x370] sm:$0xff] }
 0x225   : > { %v5204_v41 = vor.u32 %v6842_v19, %v5203_v25  ;;  %3862 = vmatpush.bf16.msrb.mxu1 %v6811_v4  ;;  %v5269_v25 = vld [vmem:[%s9830_s1 + $0xe8] sm:$0xf0]  ;;  %v6874_v4 = vld [vmem:[%s9830_s1 + $0x164] sm:$0xf0] }
 0x226   : > { %v8176_v26 = vadd.f32 %v3371_v7, %v3283_v57  ;;  %v3196_v12 = vadd.f32 %v3195_v8, %v3107_v44  ;;  %v5259_v44 = vld [vmem:[%s9830_s1 + $0xa0] sm:$0xf] }
 0x22b   : > { %v3284_v29 = vpop.f32.mrf.mxu2  ;;  %v3109_v32 = vpop.f32.mrf.mxu0 }
 0x22c   : > { %v3373_v62 = vpop.f32.mrf.mxu3  ;;  %v3285_v35 = vadd.f32 %v3284_v29, %v3196_v12  ;;  %v3198_v20 = vpop.f32.mrf.mxu1  ;;  %v3110_v43 = vadd.f32 %v3109_v32, %v7711_v39  ;;  %v6857_v12 = vld [vmem:[%s9830_s1 + $0xdc] sm:$0xf0]  ;;  %v5272_v32 = vor.u32 %v6850_v33, %v5269_v25 }
 0x22d   : > { %v5260_v23 = vor.u32 %v6857_v12, %v5259_v44  ;;  %v5333_v44 = vld [vmem:[%s9830_s1 + $0x168] sm:$0xf0] }
 0x22e   : > { %v8203_v48 = vadd.f32 %v3373_v62, %v3285_v35  ;;  %v3199_v1 = vadd.f32 %v3198_v20, %v3110_v43  ;;  %3424 = vmatmul.bf16.vlgmr.msra.gmra.mxu0 %v5196_v56  ;;  %v5268_v35 = vor.u32 %v6858_v18, %v5267_v13 }
 0x22f   : > { %3513 = vmatmul.bf16.vlgmr.msra.gmra.mxu1 %v5200_v30 }
 0x230   : > { %3602 = vmatmul.bf16.vlgmr.msra.gmra.mxu2 %v5204_v41 }
 0x231   : > { %3691 = vmatmul.bf16.vlgmr.msra.gmra.mxu3 %v5208_v42 }
 0x233   : > { %v3287_v36 = vpop.f32.mrf.mxu2  ;;  %v3111_v60 = vpop.f32.mrf.mxu0 }
 0x234   : > { %v3376_v21 = vpop.f32.mrf.mxu3  ;;  %v3288_v59 = vadd.f32 %v3287_v36, %v3199_v1  ;;  %v3200_v7 = vpop.f32.mrf.mxu1  ;;  %v3112_v39 = vadd.f32 %v3111_v60, %v7738_v2  ;;  %v5261_v2 = vld [vmem:[%s9830_s1 + $0xe0] sm:$0xf0]  ;;  %v6873_v60 = vld [vmem:[%s9830_s1 + $0x15c] sm:$0xf0] }
 0x235   : > { %v5264_v29 = vor.u32 %v6849_v3, %v5261_v2 }
 0x236   : > { %v8209_v57 = vadd.f32 %v3376_v21, %v3288_v59  ;;  %v3201_v8 = vadd.f32 %v3200_v7, %v3112_v39  ;;  %v6865_v7 = vld [vmem:[%s9830_s1 + $0x124] sm:$0xf] }
 0x237   : > { %v5325_v39 = vld [vmem:[%s9830_s1 + $0x160] sm:$0xf0] }
 0x238   : > { %v5328_v13 = vor.u32 %v6865_v7, %v5325_v39  ;;  %v6890_v7 = vld [vmem:[%s9830_s1 + $0x1e4] sm:$0xf0]  ;;  %v6882_v39 = vld [vmem:[%s9830_s1 + $0x1ac] sm:$0xf] }
 0x23b   : > { %v3289_v19 = vpop.f32.mrf.mxu2  ;;  %v3114_v56 = vpop.f32.mrf.mxu0 }
 0x23c   : > { %v3378_v22 = vpop.f32.mrf.mxu3  ;;  %v3290_v62 = vadd.f32 %v3289_v19, %v3201_v8  ;;  %v3203_v30 = vpop.f32.mrf.mxu1  ;;  %v3115_v20 = vadd.f32 %v3114_v56, %v7740_v11  ;;  %v5323_v11 = vld [vmem:[%s9830_s1 + $0x120] sm:$0xf]  ;;  %v6866_v8 = vld [vmem:[%s9830_s1 + $0x12c] sm:$0xf] }
 0x23d   : > { %v5324_v2 = vor.u32 %v6873_v60, %v5323_v11  ;;  %v6818_v56 = vld [vmem:[%s7198_s14 + $0x3a8] sm:$0xff]  ;;  %v6881_v11 = vld [vmem:[%s9830_s1 + $0x1a4] sm:$0xf] }
 0x23e   : > { %v8237_v41 = vadd.f32 %v3378_v22, %v3290_v62  ;;  %v3204_v42 = vadd.f32 %v3203_v30, %v3115_v20  ;;  %3429 = vmatmul.bf16.gmra.mxu0 %v5260_v23  ;;  %v5336_v22 = vor.u32 %v6866_v8, %v5333_v44  ;;  %v6802_v30 = vld [vmem:[%s7198_s14 + $0x328] sm:$0xff]  ;;  %3952 = vmatpush.bf16.msrb.mxu2 %v6818_v56 }
 0x23f   : > { %3518 = vmatmul.bf16.gmra.mxu1 %v5264_v29  ;;  %3774 = vmatpush.bf16.msrb.mxu0 %v6802_v30  ;;  %v5395_v60 = vld [vmem:[%s9830_s1 + $0x1a8] sm:$0xf] }
 0x240   : > { %3607 = vmatmul.bf16.gmra.mxu2 %v5268_v35  ;;  %v6826_v35 = vld [vmem:[%s7198_s14 + $0x3e8] sm:$0xff] }
 0x241   : > { %3696 = vmatmul.bf16.gmra.mxu3 %v5272_v32 }
 0x242   : > { %4041 = vmatpush.bf16.msrb.mxu3 %v6826_v35 }
 0x243   : > { %v3292_v43 = vpop.f32.mrf.mxu2  ;;  %v3116_v50 = vpop.f32.mrf.mxu0 }
 0x244   : > { %v3381_v1 = vpop.f32.mrf.mxu3  ;;  %v3293_v54 = vadd.f32 %v3292_v43, %v3204_v42  ;;  %v3205_v53 = vpop.f32.mrf.mxu1  ;;  %v3117_v36 = vadd.f32 %v3116_v50, %v7766_v37  ;;  %v5331_v37 = vld [vmem:[%s9830_s1 + $0x128] sm:$0xf] }
 0x245   : > { %v5332_v19 = vor.u32 %v6874_v4, %v5331_v37  ;;  %v6810_v50 = vld [vmem:[%s7198_s14 + $0x368] sm:$0xff] }
 0x246   : > { %v8240_v21 = vadd.f32 %v3381_v1, %v3293_v54  ;;  %v3206_v59 = vadd.f32 %v3205_v53, %v3117_v36  ;;  %v5387_v36 = vld [vmem:[%s9830_s1 + $0x1a0] sm:$0xf]  ;;  %3863 = vmatpush.bf16.msrb.mxu1 %v6810_v50  ;;  %v5397_v37 = vld [vmem:[%s9830_s1 + $0x1e8] sm:$0xf0]  ;;  %v6906_v50 = vld [vmem:[%s9830_s1 + $0x264] sm:$0xf0] }
 0x24b   : > { %v3294_v12 = vpop.f32.mrf.mxu2  ;;  %v3119_v33 = vpop.f32.mrf.mxu0 }
 0x24c   : > { %v3383_v3 = vpop.f32.mrf.mxu3  ;;  %v3295_v18 = vadd.f32 %v3294_v12, %v3206_v59  ;;  %v3208_v25 = vpop.f32.mrf.mxu1  ;;  %v3120_v23 = vadd.f32 %v3119_v33, %v7771_v49  ;;  %v6889_v59 = vld [vmem:[%s9830_s1 + $0x1dc] sm:$0xf0]  ;;  %v5400_v33 = vor.u32 %v6882_v39, %v5397_v37 }
 0x24d   : > { %v5388_v44 = vor.u32 %v6889_v59, %v5387_v36  ;;  %v5461_v36 = vld [vmem:[%s9830_s1 + $0x268] sm:$0xf0] }
 0x24e   : > { %v8267_v29 = vadd.f32 %v3383_v3, %v3295_v18  ;;  %v3209_v62 = vadd.f32 %v3208_v25, %v3120_v23  ;;  %3434 = vmatmul.bf16.gmra.mxu0 %v5324_v2  ;;  %v5396_v18 = vor.u32 %v6890_v7, %v5395_v60 }
 0x24f   : > { %3523 = vmatmul.bf16.gmra.mxu1 %v5328_v13 }
 0x250   : > { %3612 = vmatmul.bf16.gmra.mxu2 %v5332_v19 }
 0x251   : > { %3701 = vmatmul.bf16.gmra.mxu3 %v5336_v22 }
 0x253   : > { %v3297_v32 = vpop.f32.mrf.mxu2  ;;  %v3121_v43 = vpop.f32.mrf.mxu0 }
 0x254   : > { %v3386_v20 = vpop.f32.mrf.mxu3  ;;  %v3298_v42 = vadd.f32 %v3297_v32, %v3209_v62  ;;  %v3210_v1 = vpop.f32.mrf.mxu1  ;;  %v3122_v49 = vadd.f32 %v3121_v43, %v7798_v15  ;;  %v5389_v15 = vld [vmem:[%s9830_s1 + $0x1e0] sm:$0xf0]  ;;  %v6905_v43 = vld [vmem:[%s9830_s1 + $0x25c] sm:$0xf0] }
 0x255   : > { %v5392_v12 = vor.u32 %v6881_v11, %v5389_v15 }
 0x256   : > { %v8273_v54 = vadd.f32 %v3386_v20, %v3298_v42  ;;  %v3211_v53 = vadd.f32 %v3210_v1, %v3122_v49  ;;  %v6897_v1 = vld [vmem:[%s9830_s1 + $0x224] sm:$0xf] }
 0x257   : > { %v5453_v49 = vld [vmem:[%s9830_s1 + $0x260] sm:$0xf0] }
 0x258   : > { %v5456_v60 = vor.u32 %v6897_v1, %v5453_v49  ;;  %v6922_v1 = vld [vmem:[%s9830_s1 + $0x2e4] sm:$0xf0]  ;;  %v6914_v49 = vld [vmem:[%s9830_s1 + $0x2ac] sm:$0xf] }
 0x25b   : > { %v3299_v4 = vpop.f32.mrf.mxu2  ;;  %v3124_v2 = vpop.f32.mrf.mxu0 }
 0x25c   : > { %v3388_v8 = vpop.f32.mrf.mxu3  ;;  %v3300_v3 = vadd.f32 %v3299_v4, %v3211_v53  ;;  %v3213_v13 = vpop.f32.mrf.mxu1  ;;  %v3125_v25 = vadd.f32 %v3124_v2, %v7800_v24  ;;  %v5451_v24 = vld [vmem:[%s9830_s1 + $0x220] sm:$0xf]  ;;  %v6898_v53 = vld [vmem:[%s9830_s1 + $0x22c] sm:$0xf] }
 0x25d   : > { %v5452_v15 = vor.u32 %v6905_v43, %v5451_v24  ;;  %v6817_v2 = vld [vmem:[%s7198_s14 + $0x3a0] sm:$0xff]  ;;  %v5523_v43 = vld [vmem:[%s9830_s1 + $0x2a8] sm:$0xf] }
 0x25e   : > { %v8301_v19 = vadd.f32 %v3388_v8, %v3300_v3  ;;  %v3214_v22 = vadd.f32 %v3213_v13, %v3125_v25  ;;  %3439 = vmatmul.bf16.gmra.mxu0 %v5388_v44  ;;  %v5464_v8 = vor.u32 %v6898_v53, %v5461_v36  ;;  %v6801_v13 = vld [vmem:[%s7198_s14 + $0x320] sm:$0xff]  ;;  %3953 = vmatpush.bf16.msrb.mxu2 %v6817_v2 }
 0x25f   : > { %3528 = vmatmul.bf16.gmra.mxu1 %v5392_v12  ;;  %3775 = vmatpush.bf16.msrb.mxu0 %v6801_v13  ;;  %v6913_v24 = vld [vmem:[%s9830_s1 + $0x2a4] sm:$0xf] }
 0x260   : > { %3617 = vmatmul.bf16.gmra.mxu2 %v5396_v18  ;;  %v6825_v18 = vld [vmem:[%s7198_s14 + $0x3e0] sm:$0xff] }
 0x261   : > { %3706 = vmatmul.bf16.gmra.mxu3 %v5400_v33 }
 0x262   : > { %4042 = vmatpush.bf16.msrb.mxu3 %v6825_v18 }
 0x263   : > { %v3302_v23 = vpop.f32.mrf.mxu2  ;;  %v3126_v30 = vpop.f32.mrf.mxu0 }
 0x264   : > { %v3391_v62 = vpop.f32.mrf.mxu3  ;;  %v3303_v56 = vadd.f32 %v3302_v23, %v3214_v22  ;;  %v3215_v35 = vpop.f32.mrf.mxu1  ;;  %v3127_v32 = vadd.f32 %v3126_v30, %v7826_v52  ;;  %v5459_v52 = vld [vmem:[%s9830_s1 + $0x228] sm:$0xf]  ;;  %v6809_v30 = vld [vmem:[%s7198_s14 + $0x360] sm:$0xff] }
 0x265   : > { %v5460_v4 = vor.u32 %v6906_v50, %v5459_v52  ;;  %3864 = vmatpush.bf16.msrb.mxu1 %v6809_v30  ;;  %v5525_v52 = vld [vmem:[%s9830_s1 + $0x2e8] sm:$0xf0]  ;;  %v6938_v30 = vld [vmem:[%s9830_s1 + $0x364] sm:$0xf0] }
 0x266   : > { %v8304_v20 = vadd.f32 %v3391_v62, %v3303_v56  ;;  %v3216_v42 = vadd.f32 %v3215_v35, %v3127_v32  ;;  %v5515_v32 = vld [vmem:[%s9830_s1 + $0x2a0] sm:$0xf] }
 0x26b   : > { %v3304_v59 = vpop.f32.mrf.mxu2  ;;  %v3129_v39 = vpop.f32.mrf.mxu0 }
 0x26c   : > { %v3393_v11 = vpop.f32.mrf.mxu3  ;;  %v3305_v7 = vadd.f32 %v3304_v59, %v3216_v42  ;;  %v3218_v37 = vpop.f32.mrf.mxu1  ;;  %v3130_v44 = vadd.f32 %v3129_v39, %v7831_v6  ;;  %v6921_v42 = vld [vmem:[%s9830_s1 + $0x2dc] sm:$0xf0]  ;;  %v5528_v39 = vor.u32 %v6914_v49, %v5525_v52 }
 0x26d   : > { %v5516_v36 = vor.u32 %v6921_v42, %v5515_v32  ;;  %v5589_v32 = vld [vmem:[%s9830_s1 + $0x368] sm:$0xf0] }
 0x26e   : > { %v8331_v12 = vadd.f32 %v3393_v11, %v3305_v7  ;;  %v3219_v3 = vadd.f32 %v3218_v37, %v3130_v44  ;;  %3444 = vmatmul.bf16.gmra.mxu0 %v5452_v15  ;;  %v5524_v7 = vor.u32 %v6922_v1, %v5523_v43 }
 0x26f   : > { %3533 = vmatmul.bf16.gmra.mxu1 %v5456_v60 }
 0x270   : > { %3622 = vmatmul.bf16.gmra.mxu2 %v5460_v4 }
 0x271   : > { %3711 = vmatmul.bf16.gmra.mxu3 %v5464_v8 }
 0x273   : > { %v3307_v33 = vpop.f32.mrf.mxu2  ;;  %v3131_v23 = vpop.f32.mrf.mxu0 }
 0x274   : > { %v3396_v25 = vpop.f32.mrf.mxu3  ;;  %v3308_v22 = vadd.f32 %v3307_v33, %v3219_v3  ;;  %v3220_v62 = vpop.f32.mrf.mxu1  ;;  %v3132_v6 = vadd.f32 %v3131_v23, %v7858_v38  ;;  %v5517_v38 = vld [vmem:[%s9830_s1 + $0x2e0] sm:$0xf0]  ;;  %v6937_v23 = vld [vmem:[%s9830_s1 + $0x35c] sm:$0xf0] }
 0x275   : > { %v5520_v59 = vor.u32 %v6913_v24, %v5517_v38 }
 0x276   : > { %v8337_v56 = vadd.f32 %v3396_v25, %v3308_v22  ;;  %v3221_v35 = vadd.f32 %v3220_v62, %v3132_v6  ;;  %v6929_v62 = vld [vmem:[%s9830_s1 + $0x324] sm:$0xf] }
 0x277   : > { %v5581_v6 = vld [vmem:[%s9830_s1 + $0x360] sm:$0xf0] }
 0x278   : > { %v5584_v43 = vor.u32 %v6929_v62, %v5581_v6  ;;  %v6954_v62 = vld [vmem:[%s9830_s1 + $0x3e4] sm:$0xf0]  ;;  %v6946_v6 = vld [vmem:[%s9830_s1 + $0x3ac] sm:$0xf] }
 0x27b   : > { %v3309_v50 = vpop.f32.mrf.mxu2  ;;  %v3134_v15 = vpop.f32.mrf.mxu0 }
 0x27c   : > { %v3398_v53 = vpop.f32.mrf.mxu3  ;;  %v3310_v11 = vadd.f32 %v3309_v50, %v3221_v35  ;;  %v3223_v60 = vpop.f32.mrf.mxu1  ;;  %v3135_v37 = vadd.f32 %v3134_v15, %v7860_v47  ;;  %v5579_v47 = vld [vmem:[%s9830_s1 + $0x320] sm:$0xf]  ;;  %v6930_v35 = vld [vmem:[%s9830_s1 + $0x32c] sm:$0xf]  ;;  %v6816_v15 = vld [vmem:[%s7198_s14 + $0x398] sm:$0xff] }
 0x27d   : > { %v5580_v38 = vor.u32 %v6937_v23, %v5579_v47  ;;  %3954 = vmatpush.bf16.msrb.mxu2 %v6816_v15  ;;  %v6945_v47 = vld [vmem:[%s9830_s1 + $0x3a4] sm:$0xf]  ;;  %v5651_v23 = vld [vmem:[%s9830_s1 + $0x3a8] sm:$0xf] }
 0x27e   : > { %v8365_v4 = vadd.f32 %v3398_v53, %v3310_v11  ;;  %v3224_v8 = vadd.f32 %v3223_v60, %v3135_v37  ;;  %3449 = vmatmul.bf16.gmra.mxu0 %v5516_v36  ;;  %v5592_v53 = vor.u32 %v6930_v35, %v5589_v32  ;;  %v6800_v60 = vld [vmem:[%s7198_s14 + $0x318] sm:$0xff] }
 0x27f   : > { %3538 = vmatmul.bf16.gmra.mxu1 %v5520_v59  ;;  %3776 = vmatpush.bf16.msrb.mxu0 %v6800_v60 }
 0x280   : > { %3627 = vmatmul.bf16.gmra.mxu2 %v5524_v7  ;;  %v6824_v7 = vld [vmem:[%s7198_s14 + $0x3d8] sm:$0xff] }
 0x281   : > { %3716 = vmatmul.bf16.gmra.mxu3 %v5528_v39 }
 0x282   : > { %4043 = vmatpush.bf16.msrb.mxu3 %v6824_v7 }
 0x283   : > { %v3312_v44 = vpop.f32.mrf.mxu2  ;;  %v3136_v13 = vpop.f32.mrf.mxu0 }
 0x284   : > { %v3401_v3 = vpop.f32.mrf.mxu3  ;;  %v3313_v2 = vadd.f32 %v3312_v44, %v3224_v8  ;;  %v3225_v18 = vpop.f32.mrf.mxu1  ;;  %v3137_v33 = vadd.f32 %v3136_v13, %v7886_v16  ;;  %v5587_v16 = vld [vmem:[%s9830_s1 + $0x328] sm:$0xf]  ;;  %v6808_v13 = vld [vmem:[%s7198_s14 + $0x358] sm:$0xff] }
 0x285   : > { %v5588_v50 = vor.u32 %v6938_v30, %v5587_v16  ;;  %3865 = vmatpush.bf16.msrb.mxu1 %v6808_v13  ;;  %v5653_v16 = vld [vmem:[%s9830_s1 + $0x3e8] sm:$0xf0]  ;;  %v6970_v13 = vld [vmem:[%s9830_s1 + $0x464] sm:$0xf0] }
 0x286   : > { %v8368_v25 = vadd.f32 %v3401_v3, %v3313_v2  ;;  %v3226_v22 = vadd.f32 %v3225_v18, %v3137_v33  ;;  %v5643_v33 = vld [vmem:[%s9830_s1 + $0x3a0] sm:$0xf] }
 0x28b   : > { %v3314_v42 = vpop.f32.mrf.mxu2  ;;  %v3139_v49 = vpop.f32.mrf.mxu0 }
 0x28c   : > { %v3403_v24 = vpop.f32.mrf.mxu3  ;;  %v3315_v1 = vadd.f32 %v3314_v42, %v3226_v22  ;;  %v3228_v52 = vpop.f32.mrf.mxu1  ;;  %v3140_v36 = vadd.f32 %v3139_v49, %v7891_v31  ;;  %v6953_v22 = vld [vmem:[%s9830_s1 + $0x3dc] sm:$0xf0]  ;;  %v5656_v49 = vor.u32 %v6946_v6, %v5653_v16 }
 0x28d   : > { %v5644_v32 = vor.u32 %v6953_v22, %v5643_v33  ;;  %v5717_v33 = vld [vmem:[%s9830_s1 + $0x468] sm:$0xf0] }
 0x28e   : > { %v8395_v59 = vadd.f32 %v3403_v24, %v3315_v1  ;;  %v3229_v11 = vadd.f32 %v3228_v52, %v3140_v36  ;;  %3454 = vmatmul.bf16.gmra.mxu0 %v5580_v38  ;;  %v5652_v1 = vor.u32 %v6954_v62, %v5651_v23 }
 0x28f   : > { %3543 = vmatmul.bf16.gmra.mxu1 %v5584_v43 }
 0x290   : > { %3632 = vmatmul.bf16.gmra.mxu2 %v5588_v50 }
 0x291   : > { %3721 = vmatmul.bf16.gmra.mxu3 %v5592_v53 }
 0x293   : > { %v3317_v39 = vpop.f32.mrf.mxu2  ;;  %v3141_v44 = vpop.f32.mrf.mxu0 }
 0x294   : > { %v3406_v37 = vpop.f32.mrf.mxu3  ;;  %v3318_v8 = vadd.f32 %v3317_v39, %v3229_v11  ;;  %v3230_v3 = vpop.f32.mrf.mxu1  ;;  %v3142_v31 = vadd.f32 %v3141_v44, %v7918_v5  ;;  %v5645_v5 = vld [vmem:[%s9830_s1 + $0x3e0] sm:$0xf0]  ;;  %v6969_v44 = vld [vmem:[%s9830_s1 + $0x45c] sm:$0xf0] }
 0x295   : > { %v5648_v42 = vor.u32 %v6945_v47, %v5645_v5 }
 0x296   : > { %v8401_v2 = vadd.f32 %v3406_v37, %v3318_v8  ;;  %v3231_v18 = vadd.f32 %v3230_v3, %v3142_v31  ;;  %v6961_v3 = vld [vmem:[%s9830_s1 + $0x424] sm:$0xf] }
 0x297   : > { %v5709_v31 = vld [vmem:[%s9830_s1 + $0x460] sm:$0xf0] }
 0x298   : > { %v5712_v23 = vor.u32 %v6961_v3, %v5709_v31  ;;  %v6986_v3 = vld [vmem:[%s9830_s1 + $0x4e4] sm:$0xf0]  ;;  %v6978_v31 = vld [vmem:[%s9830_s1 + $0x4ac] sm:$0xf] }
 0x29b   : > { %v3319_v30 = vpop.f32.mrf.mxu2  ;;  %v3144_v38 = vpop.f32.mrf.mxu0 }
 0x29c   : > { %v3408_v35 = vpop.f32.mrf.mxu3  ;;  %v3320_v24 = vadd.f32 %v3319_v30, %v3231_v18  ;;  %v3233_v43 = vpop.f32.mrf.mxu1  ;;  %v3145_v52 = vadd.f32 %v3144_v38, %v7920_v17  ;;  %v5707_v17 = vld [vmem:[%s9830_s1 + $0x420] sm:$0xf]  ;;  %v6962_v18 = vld [vmem:[%s9830_s1 + $0x42c] sm:$0xf]  ;;  %v6815_v38 = vld [vmem:[%s7198_s14 + $0x390] sm:$0xff] }
 0x29d   : > { %v5708_v5 = vor.u32 %v6969_v44, %v5707_v17  ;;  %3955 = vmatpush.bf16.msrb.mxu2 %v6815_v38  ;;  %v6977_v17 = vld [vmem:[%s9830_s1 + $0x4a4] sm:$0xf]  ;;  %v5779_v44 = vld [vmem:[%s9830_s1 + $0x4a8] sm:$0xf] }
 0x29e   : > { %v8429_v50 = vadd.f32 %v3408_v35, %v3320_v24  ;;  %v3234_v53 = vadd.f32 %v3233_v43, %v3145_v52  ;;  %3459 = vmatmul.bf16.gmra.mxu0 %v5644_v32  ;;  %v5720_v35 = vor.u32 %v6962_v18, %v5717_v33  ;;  %v6799_v43 = vld [vmem:[%s7198_s14 + $0x310] sm:$0xff] }
 0x29f   : > { %3548 = vmatmul.bf16.gmra.mxu1 %v5648_v42  ;;  %3777 = vmatpush.bf16.msrb.mxu0 %v6799_v43 }
 0x2a0   : > { %3637 = vmatmul.bf16.gmra.mxu2 %v5652_v1  ;;  %v6823_v1 = vld [vmem:[%s7198_s14 + $0x3d0] sm:$0xff] }
 0x2a1   : > { %3726 = vmatmul.bf16.gmra.mxu3 %v5656_v49 }
 0x2a2   : > { %4044 = vmatpush.bf16.msrb.mxu3 %v6823_v1 }
 0x2a3   : > { %v3322_v36 = vpop.f32.mrf.mxu2  ;;  %v3146_v60 = vpop.f32.mrf.mxu0 }
 0x2a4   : > { %v3411_v11 = vpop.f32.mrf.mxu3  ;;  %v3323_v15 = vadd.f32 %v3322_v36, %v3234_v53  ;;  %v3235_v7 = vpop.f32.mrf.mxu1  ;;  %v3147_v39 = vadd.f32 %v3146_v60, %v7947_v51  ;;  %v5715_v51 = vld [vmem:[%s9830_s1 + $0x428] sm:$0xf]  ;;  %v6807_v60 = vld [vmem:[%s7198_s14 + $0x350] sm:$0xff] }
 0x2a5   : > { %v5716_v30 = vor.u32 %v6970_v13, %v5715_v51  ;;  %3866 = vmatpush.bf16.msrb.mxu1 %v6807_v60  ;;  %v5781_v51 = vld [vmem:[%s9830_s1 + $0x4e8] sm:$0xf0]  ;;  %v7002_v60 = vld [vmem:[%s9830_s1 + $0x564] sm:$0xf0] }
 0x2a6   : > { %v8432_v37 = vadd.f32 %v3411_v11, %v3323_v15  ;;  %v3236_v8 = vadd.f32 %v3235_v7, %v3147_v39  ;;  %v5771_v39 = vld [vmem:[%s9830_s1 + $0x4a0] sm:$0xf] }
 0x2ab   : > { %v3324_v22 = vpop.f32.mrf.mxu2  ;;  %v3425_v6 = vpop.f32.mrf.mxu0 }
 0x2ac   : > { %v3413_v47 = vpop.f32.mrf.mxu3  ;;  %v3325_v62 = vadd.f32 %v3324_v22, %v3236_v8  ;;  %v3514_v16 = vpop.f32.mrf.mxu1  ;;  %v3426_v32 = vadd.f32 %v3425_v6, %v7953_v9  ;;  %v6985_v8 = vld [vmem:[%s9830_s1 + $0x4dc] sm:$0xf0]  ;;  %v5784_v6 = vor.u32 %v6978_v31, %v5781_v51 }
 0x2ad   : > { %v5772_v33 = vor.u32 %v6985_v8, %v5771_v39  ;;  %v5845_v39 = vld [vmem:[%s9830_s1 + $0x568] sm:$0xf0] }
 0x2ae   : > { %v8459_v42 = vadd.f32 %v3413_v47, %v3325_v62  ;;  %v3515_v24 = vadd.f32 %v3514_v16, %v3426_v32  ;;  %3464 = vmatmul.bf16.gmra.mxu0 %v5708_v5  ;;  %v5780_v62 = vor.u32 %v6986_v3, %v5779_v44 }
 0x2af   : > { %3553 = vmatmul.bf16.gmra.mxu1 %v5712_v23 }
 0x2b0   : > { %3642 = vmatmul.bf16.gmra.mxu2 %v5716_v30 }
 0x2b1   : > { %3731 = vmatmul.bf16.gmra.mxu3 %v5720_v35 }
 0x2b3   : > { %v3603_v49 = vpop.f32.mrf.mxu2  ;;  %v3427_v36 = vpop.f32.mrf.mxu0 }
 0x2b4   : > { %v3692_v52 = vpop.f32.mrf.mxu3  ;;  %v3604_v53 = vadd.f32 %v3603_v49, %v3515_v24  ;;  %v3516_v11 = vpop.f32.mrf.mxu1  ;;  %v3428_v9 = vadd.f32 %v3427_v36, %v7981_v46  ;;  %v5773_v46 = vld [vmem:[%s9830_s1 + $0x4e0] sm:$0xf0]  ;;  %v7001_v36 = vld [vmem:[%s9830_s1 + $0x55c] sm:$0xf0] }
 0x2b5   : > { %v5776_v22 = vor.u32 %v6977_v17, %v5773_v46 }
 0x2b6   : > { %v8465_v15 = vadd.f32 %v3692_v52, %v3604_v53  ;;  %v3517_v7 = vadd.f32 %v3516_v11, %v3428_v9  ;;  %v6993_v11 = vld [vmem:[%s9830_s1 + $0x524] sm:$0xf] }
 0x2b7   : > { %v5837_v9 = vld [vmem:[%s9830_s1 + $0x560] sm:$0xf0] }
 0x2b8   : > { %v5840_v44 = vor.u32 %v6993_v11, %v5837_v9  ;;  %v7018_v11 = vld [vmem:[%s9830_s1 + $0x5e4] sm:$0xf0]  ;;  %v7010_v9 = vld [vmem:[%s9830_s1 + $0x5ac] sm:$0xf] }
 0x2bb   : > { %v3605_v13 = vpop.f32.mrf.mxu2  ;;  %v3430_v5 = vpop.f32.mrf.mxu0 }
 0x2bc   : > { %v3694_v18 = vpop.f32.mrf.mxu3  ;;  %v3606_v47 = vadd.f32 %v3605_v13, %v3517_v7  ;;  %v3519_v23 = vpop.f32.mrf.mxu1  ;;  %v3431_v16 = vadd.f32 %v3430_v5, %v7984_v61  ;;  %v5835_v61 = vld [vmem:[%s9830_s1 + $0x520] sm:$0xf]  ;;  %v6994_v7 = vld [vmem:[%s9830_s1 + $0x52c] sm:$0xf] }
 0x2bd   : > { %v5836_v46 = vor.u32 %v7001_v36, %v5835_v61  ;;  %v6814_v5 = vld [vmem:[%s7198_s14 + $0x388] sm:$0xff]  ;;  %v7009_v61 = vld [vmem:[%s9830_s1 + $0x5a4] sm:$0xf] }
 0x2be   : > { %v8493_v30 = vadd.f32 %v3694_v18, %v3606_v47  ;;  %v3520_v35 = vadd.f32 %v3519_v23, %v3431_v16  ;;  %3469 = vmatmul.bf16.gmra.mxu0 %v5772_v33  ;;  %v5848_v18 = vor.u32 %v6994_v7, %v5845_v39  ;;  %v6798_v23 = vld [vmem:[%s7198_s14 + $0x308] sm:$0xff]  ;;  %3956 = vmatpush.bf16.msrb.mxu2 %v6814_v5 }
 0x2bf   : > { %3558 = vmatmul.bf16.gmra.mxu1 %v5776_v22  ;;  %3778 = vmatpush.bf16.msrb.mxu0 %v6798_v23  ;;  %v5907_v36 = vld [vmem:[%s9830_s1 + $0x5a8] sm:$0xf] }
 0x2c0   : > { %3647 = vmatmul.bf16.gmra.mxu2 %v5780_v62  ;;  %v6822_v62 = vld [vmem:[%s7198_s14 + $0x3c8] sm:$0xff] }
 0x2c1   : > { %3736 = vmatmul.bf16.gmra.mxu3 %v5784_v6 }
 0x2c2   : > { %4045 = vmatpush.bf16.msrb.mxu3 %v6822_v62 }
 0x2c3   : > { %v3608_v32 = vpop.f32.mrf.mxu2  ;;  %v3432_v43 = vpop.f32.mrf.mxu0 }
 0x2c4   : > { %v3697_v24 = vpop.f32.mrf.mxu3  ;;  %v3609_v38 = vadd.f32 %v3608_v32, %v3520_v35  ;;  %v3521_v1 = vpop.f32.mrf.mxu1  ;;  %v3433_v49 = vadd.f32 %v3432_v43, %v8011_v34  ;;  %v5843_v34 = vld [vmem:[%s9830_s1 + $0x528] sm:$0xf] }
 0x2c5   : > { %v5844_v13 = vor.u32 %v7002_v60, %v5843_v34  ;;  %v6806_v43 = vld [vmem:[%s7198_s14 + $0x348] sm:$0xff] }
 0x2c6   : > { %v8496_v52 = vadd.f32 %v3697_v24, %v3609_v38  ;;  %v3522_v53 = vadd.f32 %v3521_v1, %v3433_v49  ;;  %v5899_v49 = vld [vmem:[%s9830_s1 + $0x5a0] sm:$0xf]  ;;  %3867 = vmatpush.bf16.msrb.mxu1 %v6806_v43  ;;  %v5909_v34 = vld [vmem:[%s9830_s1 + $0x5e8] sm:$0xf0]  ;;  %v7034_v43 = vld [vmem:[%s9830_s1 + $0x664] sm:$0xf0] }
 0x2cb   : > { %v3610_v8 = vpop.f32.mrf.mxu2  ;;  %v3435_v31 = vpop.f32.mrf.mxu0 }
 0x2cc   : > { %v3699_v17 = vpop.f32.mrf.mxu3  ;;  %v3611_v3 = vadd.f32 %v3610_v8, %v3522_v53  ;;  %v3524_v51 = vpop.f32.mrf.mxu1  ;;  %v3436_v33 = vadd.f32 %v3435_v31, %v8017_v55  ;;  %v7017_v53 = vld [vmem:[%s9830_s1 + $0x5dc] sm:$0xf0]  ;;  %v5912_v31 = vor.u32 %v7010_v9, %v5909_v34 }
 0x2cd   : > { %v5900_v39 = vor.u32 %v7017_v53, %v5899_v49  ;;  %v5973_v49 = vld [vmem:[%s9830_s1 + $0x668] sm:$0xf0] }
 0x2ce   : > { %v8523_v22 = vadd.f32 %v3699_v17, %v3611_v3  ;;  %v3525_v47 = vadd.f32 %v3524_v51, %v3436_v33  ;;  %3474 = vmatmul.bf16.gmra.mxu0 %v5836_v46  ;;  %v5908_v3 = vor.u32 %v7018_v11, %v5907_v36 }
 0x2cf   : > { %3563 = vmatmul.bf16.gmra.mxu1 %v5840_v44 }
 0x2d0   : > { %3652 = vmatmul.bf16.gmra.mxu2 %v5844_v13 }
 0x2d1   : > { %3741 = vmatmul.bf16.gmra.mxu3 %v5848_v18 }
 0x2d3   : > { %v3613_v6 = vpop.f32.mrf.mxu2  ;;  %v3437_v32 = vpop.f32.mrf.mxu0 }
 0x2d4   : > { %v3702_v16 = vpop.f32.mrf.mxu3  ;;  %v3614_v35 = vadd.f32 %v3613_v6, %v3525_v47  ;;  %v3526_v24 = vpop.f32.mrf.mxu1  ;;  %v3438_v55 = vadd.f32 %v3437_v32, %v8045_v28  ;;  %v5901_v28 = vld [vmem:[%s9830_s1 + $0x5e0] sm:$0xf0]  ;;  %v7033_v32 = vld [vmem:[%s9830_s1 + $0x65c] sm:$0xf0] }
 0x2d5   : > { %v5904_v8 = vor.u32 %v7009_v61, %v5901_v28 }
 0x2d6   : > { %v8529_v38 = vadd.f32 %v3702_v16, %v3614_v35  ;;  %v3527_v1 = vadd.f32 %v3526_v24, %v3438_v55  ;;  %v7025_v24 = vld [vmem:[%s9830_s1 + $0x624] sm:$0xf] }
 0x2d7   : > { %v5965_v55 = vld [vmem:[%s9830_s1 + $0x660] sm:$0xf0] }
 0x2d8   : > { %v5968_v36 = vor.u32 %v7025_v24, %v5965_v55  ;;  %v7050_v24 = vld [vmem:[%s9830_s1 + $0x6e4] sm:$0xf0]  ;;  %v7042_v55 = vld [vmem:[%s9830_s1 + $0x6ac] sm:$0xf] }
 0x2db   : > { %v3615_v60 = vpop.f32.mrf.mxu2  ;;  %v3440_v46 = vpop.f32.mrf.mxu0 }
 0x2dc   : > { %v3704_v7 = vpop.f32.mrf.mxu3  ;;  %v3616_v17 = vadd.f32 %v3615_v60, %v3527_v1  ;;  %v3529_v44 = vpop.f32.mrf.mxu1  ;;  %v3441_v51 = vadd.f32 %v3440_v46, %v8048_v45  ;;  %v5963_v45 = vld [vmem:[%s9830_s1 + $0x620] sm:$0xf]  ;;  %v7026_v1 = vld [vmem:[%s9830_s1 + $0x62c] sm:$0xf] }
 0x2dd   : > { %v5964_v28 = vor.u32 %v7033_v32, %v5963_v45  ;;  %v6813_v46 = vld [vmem:[%s7198_s14 + $0x380] sm:$0xff]  ;;  %v6035_v32 = vld [vmem:[%s9830_s1 + $0x6a8] sm:$0xf] }
 0x2de   : > { %v8557_v13 = vadd.f32 %v3704_v7, %v3616_v17  ;;  %v3530_v18 = vadd.f32 %v3529_v44, %v3441_v51  ;;  %3479 = vmatmul.bf16.gmra.mxu0 %v5900_v39  ;;  %v5976_v7 = vor.u32 %v7026_v1, %v5973_v49  ;;  %v6797_v44 = vld [vmem:[%s7198_s14 + $0x300] sm:$0xff]  ;;  %3957 = vmatpush.bf16.msrb.mxu2 %v6813_v46 }
 0x2df   : > { %3568 = vmatmul.bf16.gmra.mxu1 %v5904_v8  ;;  %3779 = vmatpush.bf16.msrb.mxu0 %v6797_v44  ;;  %v7041_v45 = vld [vmem:[%s9830_s1 + $0x6a4] sm:$0xf] }
 0x2e0   : > { %3657 = vmatmul.bf16.gmra.mxu2 %v5908_v3  ;;  %v6821_v3 = vld [vmem:[%s7198_s14 + $0x3c0] sm:$0xff] }
 0x2e1   : > { %3746 = vmatmul.bf16.gmra.mxu3 %v5912_v31 }
 0x2e2   : > { %4046 = vmatpush.bf16.msrb.mxu3 %v6821_v3 }
 0x2e3   : > { %v3618_v33 = vpop.f32.mrf.mxu2  ;;  %v3442_v23 = vpop.f32.mrf.mxu0 }
 0x2e4   : > { %v3707_v47 = vpop.f32.mrf.mxu3  ;;  %v3619_v5 = vadd.f32 %v3618_v33, %v3530_v18  ;;  %v3531_v62 = vpop.f32.mrf.mxu1  ;;  %v3443_v6 = vadd.f32 %v3442_v23, %v8075_v14  ;;  %v5971_v14 = vld [vmem:[%s9830_s1 + $0x628] sm:$0xf]  ;;  %v6805_v23 = vld [vmem:[%s7198_s14 + $0x340] sm:$0xff] }
 0x2e5   : > { %v5972_v60 = vor.u32 %v7034_v43, %v5971_v14  ;;  %3868 = vmatpush.bf16.msrb.mxu1 %v6805_v23  ;;  %v6037_v14 = vld [vmem:[%s9830_s1 + $0x6e8] sm:$0xf0]  ;;  %v7066_v23 = vld [vmem:[%s9830_s1 + $0x764] sm:$0xf0] }
 0x2e6   : > { %v8560_v16 = vadd.f32 %v3707_v47, %v3619_v5  ;;  %v3532_v35 = vadd.f32 %v3531_v62, %v3443_v6  ;;  %v6027_v6 = vld [vmem:[%s9830_s1 + $0x6a0] sm:$0xf] }
 0x2eb   : > { %v3620_v53 = vpop.f32.mrf.mxu2  ;;  %v3445_v9 = vpop.f32.mrf.mxu0 }
 0x2ec   : > { %v3709_v61 = vpop.f32.mrf.mxu3  ;;  %v3621_v11 = vadd.f32 %v3620_v53, %v3532_v35  ;;  %v3534_v34 = vpop.f32.mrf.mxu1  ;;  %v3446_v39 = vadd.f32 %v3445_v9, %v8081_v40  ;;  %v7049_v35 = vld [vmem:[%s9830_s1 + $0x6dc] sm:$0xf0]  ;;  %v6040_v9 = vor.u32 %v7042_v55, %v6037_v14 }
 0x2ed   : > { %v6028_v49 = vor.u32 %v7049_v35, %v6027_v6  ;;  %v6101_v6 = vld [vmem:[%s9830_s1 + $0x768] sm:$0xf0] }
 0x2ee   : > { %v8587_v8 = vadd.f32 %v3709_v61, %v3621_v11  ;;  %v3535_v17 = vadd.f32 %v3534_v34, %v3446_v39  ;;  %3484 = vmatmul.bf16.gmra.mxu0 %v5964_v28  ;;  %v6036_v11 = vor.u32 %v7050_v24, %v6035_v32 }
 0x2ef   : > { %3573 = vmatmul.bf16.gmra.mxu1 %v5968_v36 }
 0x2f0   : > { %3662 = vmatmul.bf16.gmra.mxu2 %v5972_v60 }
 0x2f1   : > { %3751 = vmatmul.bf16.gmra.mxu3 %v5976_v7 }
 0x2f3   : > { %v3623_v31 = vpop.f32.mrf.mxu2  ;;  %v3447_v33 = vpop.f32.mrf.mxu0 }
 0x2f4   : > { %v3712_v51 = vpop.f32.mrf.mxu3  ;;  %v3624_v18 = vadd.f32 %v3623_v31, %v3535_v17  ;;  %v3536_v47 = vpop.f32.mrf.mxu1  ;;  %v3448_v40 = vadd.f32 %v3447_v33, %v8109_v10  ;;  %v6029_v10 = vld [vmem:[%s9830_s1 + $0x6e0] sm:$0xf0]  ;;  %v7065_v33 = vld [vmem:[%s9830_s1 + $0x75c] sm:$0xf0] }
 0x2f5   : > { %v6032_v53 = vor.u32 %v7041_v45, %v6029_v10 }
 0x2f6   : > { %v8593_v5 = vadd.f32 %v3712_v51, %v3624_v18  ;;  %v3537_v62 = vadd.f32 %v3536_v47, %v3448_v40  ;;  %v7057_v47 = vld [vmem:[%s9830_s1 + $0x724] sm:$0xf] }
 0x2f7   : > { %v6093_v40 = vld [vmem:[%s9830_s1 + $0x760] sm:$0xf0] }
 0x2f8   : > { %v6096_v32 = vor.u32 %v7057_v47, %v6093_v40 }
 0x2fb   : > { %v3625_v43 = vpop.f32.mrf.mxu2  ;;  %v3450_v28 = vpop.f32.mrf.mxu0 }
 0x2fc   : > { %v3714_v1 = vpop.f32.mrf.mxu3  ;;  %v3626_v61 = vadd.f32 %v3625_v43, %v3537_v62  ;;  %v3539_v36 = vpop.f32.mrf.mxu1  ;;  %v3451_v34 = vadd.f32 %v3450_v28, %v8112_v27  ;;  %v6091_v27 = vld [vmem:[%s9830_s1 + $0x720] sm:$0xf]  ;;  %v7058_v62 = vld [vmem:[%s9830_s1 + $0x72c] sm:$0xf] }
 0x2fd   : > { %v6092_v10 = vor.u32 %v7065_v33, %v6091_v27  ;;  %v6165_v27 = vld [vmem:[%s9830_s1 + $0x7e8] sm:$0xf0] }
 0x2fe   : > { %v8621_v60 = vadd.f32 %v3714_v1, %v3626_v61  ;;  %v3540_v7 = vadd.f32 %v3539_v36, %v3451_v34  ;;  %3489 = vmatmul.bf16.gmra.mxu0 %v6028_v49  ;;  %v6104_v1 = vor.u32 %v7058_v62, %v6101_v6 }
 0x2ff   : > { %3578 = vmatmul.bf16.gmra.mxu1 %v6032_v53 }
 0x300   : > { %3667 = vmatmul.bf16.gmra.mxu2 %v6036_v11 }
 0x301   : > { %3756 = vmatmul.bf16.gmra.mxu3 %v6040_v9 }
 0x303   : > { %v3628_v39 = vpop.f32.mrf.mxu2  ;;  %v3452_v44 = vpop.f32.mrf.mxu0 }
 0x304   : > { %v3717_v17 = vpop.f32.mrf.mxu3  ;;  %v3629_v46 = vadd.f32 %v3628_v39, %v3540_v7  ;;  %v3541_v3 = vpop.f32.mrf.mxu1  ;;  %v3453_v31 = vadd.f32 %v3452_v44, %v8139_v63  ;;  %v6099_v63 = vld [vmem:[%s9830_s1 + $0x728] sm:$0xf]  ;;  %v7073_v44 = vld [vmem:[%s9830_s1 + $0x7a4] sm:$0xf] }
 0x305   : > { %v6100_v43 = vor.u32 %v7066_v23, %v6099_v63 }
 0x306   : > { %v8624_v51 = vadd.f32 %v3717_v17, %v3629_v46  ;;  %v3542_v18 = vadd.f32 %v3541_v3, %v3453_v31  ;;  %v7081_v46 = vld [vmem:[%s9830_s1 + $0x7dc] sm:$0xf0]  ;;  %v6157_v3 = vld [vmem:[%s9830_s1 + $0x7e0] sm:$0xf0]  ;;  %v7082_v31 = vld [vmem:[%s9830_s1 + $0x7e4] sm:$0xf0] }
 0x307   : > { %v6160_v63 = vor.u32 %v7073_v44, %v6157_v3 }
 0x30b   : > { %v3630_v35 = vpop.f32.mrf.mxu2  ;;  %v3455_v55 = vpop.f32.mrf.mxu0 }
 0x30c   : > { %v3719_v45 = vpop.f32.mrf.mxu3  ;;  %v3631_v24 = vadd.f32 %v3630_v35, %v3542_v18  ;;  %v3544_v14 = vpop.f32.mrf.mxu1  ;;  %v3456_v49 = vadd.f32 %v3455_v55, %v8145_v0  ;;  %v6155_v0 = vld [vmem:[%s9830_s1 + $0x7a0] sm:$0xf]  ;;  %v7074_v18 = vld [vmem:[%s9830_s1 + $0x7ac] sm:$0xf] }
 0x30d   : > { %v6156_v40 = vor.u32 %v7081_v46, %v6155_v0  ;;  %v5221_v0 = vld [vmem:[%s9830_s1 + $0x78] sm:$0xf0] }
 0x30e   : > { %v8651_v53 = vadd.f32 %v3719_v45, %v3631_v24  ;;  %v3545_v61 = vadd.f32 %v3544_v14, %v3456_v49  ;;  %3494 = vmatmul.bf16.gmra.mxu0 %v6092_v10  ;;  %v6168_v45 = vor.u32 %v7074_v18, %v6165_v27 }
 0x30f   : > { %3583 = vmatmul.bf16.gmra.mxu1 %v6096_v32 }
 0x310   : > { %3672 = vmatmul.bf16.gmra.mxu2 %v6100_v43 }
 0x311   : > { %3761 = vmatmul.bf16.gmra.mxu3 %v6104_v1 }
 0x313   : > { %v3633_v28 = vpop.f32.mrf.mxu2  ;;  %v3457_v9 = vpop.f32.mrf.mxu0 }
 0x314   : > { %v3722_v36 = vpop.f32.mrf.mxu3  ;;  %v3634_v11 = vadd.f32 %v3633_v28, %v3545_v61  ;;  %v3546_v34 = vpop.f32.mrf.mxu1  ;;  %v3458_v7 = vadd.f32 %v3457_v9, %v8173_v58  ;;  %v6163_v58 = vld [vmem:[%s9830_s1 + $0x7a8] sm:$0xf]  ;;  %v6835_v9 = vld [vmem:[%s9830_s1 + $0x34] sm:$0xf] }
 0x315   : > { %v6164_v35 = vor.u32 %v7082_v31, %v6163_v58 }
 0x316   : > { %v8654_v39 = vadd.f32 %v3722_v36, %v3634_v11  ;;  %v3547_v17 = vadd.f32 %v3546_v34, %v3458_v7  ;;  %v6843_v11 = vld [vmem:[%s9830_s1 + $0x6c] sm:$0xf0]  ;;  %v5213_v34 = vld [vmem:[%s9830_s1 + $0x70] sm:$0xf0]  ;;  %v6844_v7 = vld [vmem:[%s9830_s1 + $0x74] sm:$0xf0] }
 0x317   : > { %v5216_v58 = vor.u32 %v6835_v9, %v5213_v34 }
 0x31b   : > { %v3635_v33 = vpop.f32.mrf.mxu2  ;;  %v3460_v62 = vpop.f32.mrf.mxu0 }
 0x31c   : > { %v3724_v47 = vpop.f32.mrf.mxu3  ;;  %v3636_v23 = vadd.f32 %v3635_v33, %v3547_v17  ;;  %v3549_v6 = vpop.f32.mrf.mxu1  ;;  %v3461_v10 = vadd.f32 %v3460_v62, %v8176_v26  ;;  %v5211_v26 = vld [vmem:[%s9830_s1 + $0x30] sm:$0xf]  ;;  %v6836_v17 = vld [vmem:[%s9830_s1 + $0x3c] sm:$0xf] }
 0x31d   : > { %v5212_v3 = vor.u32 %v6843_v11, %v5211_v26  ;;  %v5285_v26 = vld [vmem:[%s9830_s1 + $0xf8] sm:$0xf0] }
 0x31e   : > { %v8681_v32 = vadd.f32 %v3724_v47, %v3636_v23  ;;  %v3550_v24 = vadd.f32 %v3549_v6, %v3461_v10  ;;  %3499 = vmatmul.bf16.gmra.mxu0 %v6156_v40  ;;  %v5224_v47 = vor.u32 %v6836_v17, %v5221_v0 }
 0x31f   : > { %3588 = vmatmul.bf16.gmra.mxu1 %v6160_v63 }
 0x320   : > { %3677 = vmatmul.bf16.gmra.mxu2 %v6164_v35 }
 0x321   : > { %3766 = vmatmul.bf16.gmra.mxu3 %v6168_v45 }
 0x323   : > { %v3638_v55 = vpop.f32.mrf.mxu2  ;;  %v3462_v1 = vpop.f32.mrf.mxu0 }
 0x324   : > { %v3727_v14 = vpop.f32.mrf.mxu3  ;;  %v3639_v43 = vadd.f32 %v3638_v55, %v3550_v24  ;;  %v3551_v49 = vpop.f32.mrf.mxu1  ;;  %v3463_v61 = vadd.f32 %v3462_v1, %v8203_v48  ;;  %v5219_v48 = vld [vmem:[%s9830_s1 + $0x38] sm:$0xf]  ;;  %v6851_v1 = vld [vmem:[%s9830_s1 + $0xb4] sm:$0xf] }
 0x325   : > { %v5220_v33 = vor.u32 %v6844_v7, %v5219_v48 }
 0x326   : > { %v8684_v28 = vadd.f32 %v3727_v14, %v3639_v43  ;;  %v3552_v36 = vadd.f32 %v3551_v49, %v3463_v61  ;;  %v6859_v43 = vld [vmem:[%s9830_s1 + $0xec] sm:$0xf0]  ;;  %v5277_v49 = vld [vmem:[%s9830_s1 + $0xf0] sm:$0xf0]  ;;  %v6860_v61 = vld [vmem:[%s9830_s1 + $0xf4] sm:$0xf0] }
 0x327   : > { %v5280_v48 = vor.u32 %v6851_v1, %v5277_v49 }
 0x32b   : > { %v3640_v46 = vpop.f32.mrf.mxu2  ;;  %v3465_v18 = vpop.f32.mrf.mxu0 }
 0x32c   : > { %v3729_v44 = vpop.f32.mrf.mxu3  ;;  %v3641_v31 = vadd.f32 %v3640_v46, %v3552_v36  ;;  %v3554_v27 = vpop.f32.mrf.mxu1  ;;  %v3466_v40 = vadd.f32 %v3465_v18, %v8209_v57  ;;  %v5275_v57 = vld [vmem:[%s9830_s1 + $0xb0] sm:$0xf]  ;;  %v6852_v36 = vld [vmem:[%s9830_s1 + $0xbc] sm:$0xf] }
 0x32d   : > { %v5276_v34 = vor.u32 %v6859_v43, %v5275_v57  ;;  %v5349_v57 = vld [vmem:[%s9830_s1 + $0x178] sm:$0xf0] }
 0x32e   : > { %v8711_v63 = vadd.f32 %v3729_v44, %v3641_v31  ;;  %v3555_v23 = vadd.f32 %v3554_v27, %v3466_v40  ;;  %3780 = vmatmul.bf16.vlgmr.msrb.gmra.mxu0 %v5212_v3  ;;  %v5288_v44 = vor.u32 %v6852_v36, %v5285_v26 }
 0x32f   : > { %3869 = vmatmul.bf16.vlgmr.msrb.gmra.mxu1 %v5216_v58 }
 0x330   : > { %3958 = vmatmul.bf16.vlgmr.msrb.gmra.mxu2 %v5220_v33 }
 0x331   : > { %4047 = vmatmul.bf16.vlgmr.msrb.gmra.mxu3 %v5224_v47 }
 0x333   : > { %v3643_v62 = vpop.f32.mrf.mxu2  ;;  %v3467_v45 = vpop.f32.mrf.mxu0 }
 0x334   : > { %v3732_v6 = vpop.f32.mrf.mxu3  ;;  %v3644_v35 = vadd.f32 %v3643_v62, %v3555_v23  ;;  %v3556_v10 = vpop.f32.mrf.mxu1  ;;  %v3468_v24 = vadd.f32 %v3467_v45, %v8237_v41  ;;  %v5283_v41 = vld [vmem:[%s9830_s1 + $0xb8] sm:$0xf]  ;;  %v6867_v45 = vld [vmem:[%s9830_s1 + $0x134] sm:$0xf] }
 0x335   : > { %v5284_v46 = vor.u32 %v6860_v61, %v5283_v41 }
 0x336   : > { %v8714_v55 = vadd.f32 %v3732_v6, %v3644_v35  ;;  %v3557_v14 = vadd.f32 %v3556_v10, %v3468_v24  ;;  %v6875_v35 = vld [vmem:[%s9830_s1 + $0x16c] sm:$0xf0]  ;;  %v5341_v10 = vld [vmem:[%s9830_s1 + $0x170] sm:$0xf0]  ;;  %v6876_v24 = vld [vmem:[%s9830_s1 + $0x174] sm:$0xf0] }
 0x337   : > { %v5344_v41 = vor.u32 %v6867_v45, %v5341_v10 }
 0x33b   : > { %v3645_v11 = vpop.f32.mrf.mxu2  ;;  %v3470_v17 = vpop.f32.mrf.mxu0 }
 0x33c   : > { %v3734_v9 = vpop.f32.mrf.mxu3  ;;  %v3646_v7 = vadd.f32 %v3645_v11, %v3557_v14  ;;  %v3559_v0 = vpop.f32.mrf.mxu1  ;;  %v3471_v3 = vadd.f32 %v3470_v17, %v8240_v21  ;;  %v5339_v21 = vld [vmem:[%s9830_s1 + $0x130] sm:$0xf]  ;;  %v6868_v14 = vld [vmem:[%s9830_s1 + $0x13c] sm:$0xf] }
 0x33d   : > { %v5340_v49 = vor.u32 %v6875_v35, %v5339_v21  ;;  %v5413_v21 = vld [vmem:[%s9830_s1 + $0x1f8] sm:$0xf0] }
 0x33e   : > { %v8741_v58 = vadd.f32 %v3734_v9, %v3646_v7  ;;  %v3560_v31 = vadd.f32 %v3559_v0, %v3471_v3  ;;  %3785 = vmatmul.bf16.gmra.mxu0 %v5276_v34  ;;  %v5352_v9 = vor.u32 %v6868_v14, %v5349_v57 }
 0x33f   : > { %3874 = vmatmul.bf16.gmra.mxu1 %v5280_v48 }
 0x340   : > { %3963 = vmatmul.bf16.gmra.mxu2 %v5284_v46 }
 0x341   : > { %4052 = vmatmul.bf16.gmra.mxu3 %v5288_v44 }
 0x343   : > { %v3648_v18 = vpop.f32.mrf.mxu2  ;;  %v3472_v47 = vpop.f32.mrf.mxu0 }
 0x344   : > { %v3737_v27 = vpop.f32.mrf.mxu3  ;;  %v3649_v33 = vadd.f32 %v3648_v18, %v3560_v31  ;;  %v3561_v40 = vpop.f32.mrf.mxu1  ;;  %v3473_v23 = vadd.f32 %v3472_v47, %v8267_v29  ;;  %v5347_v29 = vld [vmem:[%s9830_s1 + $0x138] sm:$0xf]  ;;  %v6883_v47 = vld [vmem:[%s9830_s1 + $0x1b4] sm:$0xf] }
 0x345   : > { %v5348_v11 = vor.u32 %v6876_v24, %v5347_v29 }
 0x346   : > { %v8744_v62 = vadd.f32 %v3737_v27, %v3649_v33  ;;  %v3562_v6 = vadd.f32 %v3561_v40, %v3473_v23  ;;  %v6891_v33 = vld [vmem:[%s9830_s1 + $0x1ec] sm:$0xf0]  ;;  %v5405_v40 = vld [vmem:[%s9830_s1 + $0x1f0] sm:$0xf0]  ;;  %v6892_v23 = vld [vmem:[%s9830_s1 + $0x1f4] sm:$0xf0] }
 0x347   : > { %v5408_v29 = vor.u32 %v6883_v47, %v5405_v40 }
 0x34b   : > { %v3650_v43 = vpop.f32.mrf.mxu2  ;;  %v3475_v36 = vpop.f32.mrf.mxu0 }
 0x34c   : > { %v3739_v1 = vpop.f32.mrf.mxu3  ;;  %v3651_v61 = vadd.f32 %v3650_v43, %v3562_v6  ;;  %v3564_v26 = vpop.f32.mrf.mxu1  ;;  %v3476_v34 = vadd.f32 %v3475_v36, %v8273_v54  ;;  %v5403_v54 = vld [vmem:[%s9830_s1 + $0x1b0] sm:$0xf]  ;;  %v6884_v6 = vld [vmem:[%s9830_s1 + $0x1bc] sm:$0xf] }
 0x34d   : > { %v5404_v10 = vor.u32 %v6891_v33, %v5403_v54  ;;  %v5477_v54 = vld [vmem:[%s9830_s1 + $0x278] sm:$0xf0] }
 0x34e   : > { %v8771_v48 = vadd.f32 %v3739_v1, %v3651_v61  ;;  %v3565_v7 = vadd.f32 %v3564_v26, %v3476_v34  ;;  %3790 = vmatmul.bf16.gmra.mxu0 %v5340_v49  ;;  %v5416_v1 = vor.u32 %v6884_v6, %v5413_v21 }
 0x34f   : > { %3879 = vmatmul.bf16.gmra.mxu1 %v5344_v41 }
 0x350   : > { %3968 = vmatmul.bf16.gmra.mxu2 %v5348_v11 }
 0x351   : > { %4057 = vmatmul.bf16.gmra.mxu3 %v5352_v9 }
 0x353   : > { %v3653_v17 = vpop.f32.mrf.mxu2  ;;  %v3477_v44 = vpop.f32.mrf.mxu0 }
 0x354   : > { %v3742_v0 = vpop.f32.mrf.mxu3  ;;  %v3654_v46 = vadd.f32 %v3653_v17, %v3565_v7  ;;  %v3566_v3 = vpop.f32.mrf.mxu1  ;;  %v3478_v31 = vadd.f32 %v3477_v44, %v8301_v19  ;;  %v5411_v19 = vld [vmem:[%s9830_s1 + $0x1b8] sm:$0xf]  ;;  %v6899_v44 = vld [vmem:[%s9830_s1 + $0x234] sm:$0xf] }
 0x355   : > { %v5412_v43 = vor.u32 %v6892_v23, %v5411_v19 }
 0x356   : > { %v8774_v18 = vadd.f32 %v3742_v0, %v3654_v46  ;;  %v3567_v27 = vadd.f32 %v3566_v3, %v3478_v31  ;;  %v6907_v46 = vld [vmem:[%s9830_s1 + $0x26c] sm:$0xf0]  ;;  %v5469_v3 = vld [vmem:[%s9830_s1 + $0x270] sm:$0xf0]  ;;  %v6908_v31 = vld [vmem:[%s9830_s1 + $0x274] sm:$0xf0] }
 0x357   : > { %v5472_v19 = vor.u32 %v6899_v44, %v5469_v3 }
 0x35b   : > { %v3655_v35 = vpop.f32.mrf.mxu2  ;;  %v3480_v14 = vpop.f32.mrf.mxu0 }
 0x35c   : > { %v3744_v45 = vpop.f32.mrf.mxu3  ;;  %v3656_v24 = vadd.f32 %v3655_v35, %v3567_v27  ;;  %v3569_v57 = vpop.f32.mrf.mxu1  ;;  %v3481_v49 = vadd.f32 %v3480_v14, %v8304_v20  ;;  %v5467_v20 = vld [vmem:[%s9830_s1 + $0x230] sm:$0xf]  ;;  %v6900_v27 = vld [vmem:[%s9830_s1 + $0x23c] sm:$0xf] }
 0x35d   : > { %v5468_v40 = vor.u32 %v6907_v46, %v5467_v20  ;;  %v5541_v20 = vld [vmem:[%s9830_s1 + $0x2f8] sm:$0xf0] }
 0x35e   : > { %v8801_v41 = vadd.f32 %v3744_v45, %v3656_v24  ;;  %v3570_v61 = vadd.f32 %v3569_v57, %v3481_v49  ;;  %3795 = vmatmul.bf16.gmra.mxu0 %v5404_v10  ;;  %v5480_v45 = vor.u32 %v6900_v27, %v5477_v54 }
 0x35f   : > { %3884 = vmatmul.bf16.gmra.mxu1 %v5408_v29 }
 0x360   : > { %3973 = vmatmul.bf16.gmra.mxu2 %v5412_v43 }
 0x361   : > { %4062 = vmatmul.bf16.gmra.mxu3 %v5416_v1 }
 0x363   : > { %v3658_v36 = vpop.f32.mrf.mxu2  ;;  %v3482_v9 = vpop.f32.mrf.mxu0 }
 0x364   : > { %v3747_v26 = vpop.f32.mrf.mxu3  ;;  %v3659_v11 = vadd.f32 %v3658_v36, %v3570_v61  ;;  %v3571_v34 = vpop.f32.mrf.mxu1  ;;  %v3483_v7 = vadd.f32 %v3482_v9, %v8331_v12  ;;  %v5475_v12 = vld [vmem:[%s9830_s1 + $0x238] sm:$0xf]  ;;  %v6915_v9 = vld [vmem:[%s9830_s1 + $0x2b4] sm:$0xf] }
 0x365   : > { %v5476_v35 = vor.u32 %v6908_v31, %v5475_v12 }
 0x366   : > { %v8804_v17 = vadd.f32 %v3747_v26, %v3659_v11  ;;  %v3572_v0 = vadd.f32 %v3571_v34, %v3483_v7  ;;  %v6923_v11 = vld [vmem:[%s9830_s1 + $0x2ec] sm:$0xf0]  ;;  %v5533_v34 = vld [vmem:[%s9830_s1 + $0x2f0] sm:$0xf0]  ;;  %v6924_v7 = vld [vmem:[%s9830_s1 + $0x2f4] sm:$0xf0] }
 0x367   : > { %v5536_v12 = vor.u32 %v6915_v9, %v5533_v34 }
 0x36b   : > { %v3660_v33 = vpop.f32.mrf.mxu2  ;;  %v3485_v6 = vpop.f32.mrf.mxu0 }
 0x36c   : > { %v3749_v47 = vpop.f32.mrf.mxu3  ;;  %v3661_v23 = vadd.f32 %v3660_v33, %v3572_v0  ;;  %v3574_v21 = vpop.f32.mrf.mxu1  ;;  %v3486_v10 = vadd.f32 %v3485_v6, %v8337_v56  ;;  %v5531_v56 = vld [vmem:[%s9830_s1 + $0x2b0] sm:$0xf]  ;;  %v6916_v0 = vld [vmem:[%s9830_s1 + $0x2bc] sm:$0xf] }
 0x36d   : > { %v5532_v3 = vor.u32 %v6923_v11, %v5531_v56  ;;  %v5605_v56 = vld [vmem:[%s9830_s1 + $0x378] sm:$0xf0] }
 0x36e   : > { %v8831_v29 = vadd.f32 %v3749_v47, %v3661_v23  ;;  %v3575_v24 = vadd.f32 %v3574_v21, %v3486_v10  ;;  %3800 = vmatmul.bf16.gmra.mxu0 %v5468_v40  ;;  %v5544_v47 = vor.u32 %v6916_v0, %v5541_v20 }
 0x36f   : > { %3889 = vmatmul.bf16.gmra.mxu1 %v5472_v19 }
 0x370   : > { %3978 = vmatmul.bf16.gmra.mxu2 %v5476_v35 }
 0x371   : > { %4067 = vmatmul.bf16.gmra.mxu3 %v5480_v45 }
 0x373   : > { %v3663_v14 = vpop.f32.mrf.mxu2  ;;  %v3487_v1 = vpop.f32.mrf.mxu0 }
 0x374   : > { %v3752_v57 = vpop.f32.mrf.mxu3  ;;  %v3664_v43 = vadd.f32 %v3663_v14, %v3575_v24  ;;  %v3576_v49 = vpop.f32.mrf.mxu1  ;;  %v3488_v61 = vadd.f32 %v3487_v1, %v8365_v4  ;;  %v5539_v4 = vld [vmem:[%s9830_s1 + $0x2b8] sm:$0xf]  ;;  %v6931_v1 = vld [vmem:[%s9830_s1 + $0x334] sm:$0xf] }
 0x375   : > { %v5540_v33 = vor.u32 %v6924_v7, %v5539_v4 }
 0x376   : > { %v8834_v36 = vadd.f32 %v3752_v57, %v3664_v43  ;;  %v3577_v26 = vadd.f32 %v3576_v49, %v3488_v61  ;;  %v6939_v43 = vld [vmem:[%s9830_s1 + $0x36c] sm:$0xf0]  ;;  %v5597_v49 = vld [vmem:[%s9830_s1 + $0x370] sm:$0xf0]  ;;  %v6940_v61 = vld [vmem:[%s9830_s1 + $0x374] sm:$0xf0] }
 0x377   : > { %v5600_v4 = vor.u32 %v6931_v1, %v5597_v49 }
 0x37b   : > { %v3665_v46 = vpop.f32.mrf.mxu2  ;;  %v3490_v27 = vpop.f32.mrf.mxu0 }
 0x37c   : > { %v3754_v44 = vpop.f32.mrf.mxu3  ;;  %v3666_v31 = vadd.f32 %v3665_v46, %v3577_v26  ;;  %v3579_v54 = vpop.f32.mrf.mxu1  ;;  %v3491_v40 = vadd.f32 %v3490_v27, %v8368_v25  ;;  %v5595_v25 = vld [vmem:[%s9830_s1 + $0x330] sm:$0xf]  ;;  %v6932_v26 = vld [vmem:[%s9830_s1 + $0x33c] sm:$0xf] }
 0x37d   : > { %v5596_v34 = vor.u32 %v6939_v43, %v5595_v25  ;;  %v5669_v25 = vld [vmem:[%s9830_s1 + $0x3f8] sm:$0xf0] }
 0x37e   : > { %v8861_v19 = vadd.f32 %v3754_v44, %v3666_v31  ;;  %v3580_v23 = vadd.f32 %v3579_v54, %v3491_v40  ;;  %3805 = vmatmul.bf16.gmra.mxu0 %v5532_v3  ;;  %v5608_v44 = vor.u32 %v6932_v26, %v5605_v56 }
 0x37f   : > { %3894 = vmatmul.bf16.gmra.mxu1 %v5536_v12 }
 0x380   : > { %3983 = vmatmul.bf16.gmra.mxu2 %v5540_v33 }
 0x381   : > { %4072 = vmatmul.bf16.gmra.mxu3 %v5544_v47 }
 0x383   : > { %v3668_v6 = vpop.f32.mrf.mxu2  ;;  %v3492_v45 = vpop.f32.mrf.mxu0 }
 0x384   : > { %v3757_v21 = vpop.f32.mrf.mxu3  ;;  %v3669_v35 = vadd.f32 %v3668_v6, %v3580_v23  ;;  %v3581_v10 = vpop.f32.mrf.mxu1  ;;  %v3493_v24 = vadd.f32 %v3492_v45, %v8395_v59  ;;  %v5603_v59 = vld [vmem:[%s9830_s1 + $0x338] sm:$0xf]  ;;  %v6947_v45 = vld [vmem:[%s9830_s1 + $0x3b4] sm:$0xf] }
 0x385   : > { %v5604_v46 = vor.u32 %v6940_v61, %v5603_v59 }
 0x386   : > { %v8864_v14 = vadd.f32 %v3757_v21, %v3669_v35  ;;  %v3582_v57 = vadd.f32 %v3581_v10, %v3493_v24  ;;  %v6955_v35 = vld [vmem:[%s9830_s1 + $0x3ec] sm:$0xf0]  ;;  %v5661_v10 = vld [vmem:[%s9830_s1 + $0x3f0] sm:$0xf0]  ;;  %v6956_v24 = vld [vmem:[%s9830_s1 + $0x3f4] sm:$0xf0] }
 0x387   : > { %v5664_v59 = vor.u32 %v6947_v45, %v5661_v10 }
 0x38b   : > { %v3670_v11 = vpop.f32.mrf.mxu2  ;;  %v3495_v0 = vpop.f32.mrf.mxu0 }
 0x38c   : > { %v3759_v9 = vpop.f32.mrf.mxu3  ;;  %v3671_v7 = vadd.f32 %v3670_v11, %v3582_v57  ;;  %v3584_v20 = vpop.f32.mrf.mxu1  ;;  %v3496_v3 = vadd.f32 %v3495_v0, %v8401_v2  ;;  %v5659_v2 = vld [vmem:[%s9830_s1 + $0x3b0] sm:$0xf]  ;;  %v6948_v57 = vld [vmem:[%s9830_s1 + $0x3bc] sm:$0xf] }
 0x38d   : > { %v5660_v49 = vor.u32 %v6955_v35, %v5659_v2  ;;  %v5733_v2 = vld [vmem:[%s9830_s1 + $0x478] sm:$0xf0] }
 0x38e   : > { %v8891_v12 = vadd.f32 %v3759_v9, %v3671_v7  ;;  %v3585_v31 = vadd.f32 %v3584_v20, %v3496_v3  ;;  %3810 = vmatmul.bf16.gmra.mxu0 %v5596_v34  ;;  %v5672_v9 = vor.u32 %v6948_v57, %v5669_v25 }
 0x38f   : > { %3899 = vmatmul.bf16.gmra.mxu1 %v5600_v4 }
 0x390   : > { %3988 = vmatmul.bf16.gmra.mxu2 %v5604_v46 }
 0x391   : > { %4077 = vmatmul.bf16.gmra.mxu3 %v5608_v44 }
 0x393   : > { %v3673_v27 = vpop.f32.mrf.mxu2  ;;  %v3497_v47 = vpop.f32.mrf.mxu0 }
 0x394   : > { %v3762_v54 = vpop.f32.mrf.mxu3  ;;  %v3674_v33 = vadd.f32 %v3673_v27, %v3585_v31  ;;  %v3586_v40 = vpop.f32.mrf.mxu1  ;;  %v3498_v23 = vadd.f32 %v3497_v47, %v8429_v50  ;;  %v5667_v50 = vld [vmem:[%s9830_s1 + $0x3b8] sm:$0xf]  ;;  %v6963_v47 = vld [vmem:[%s9830_s1 + $0x434] sm:$0xf] }
 0x395   : > { %v5668_v11 = vor.u32 %v6956_v24, %v5667_v50 }
 0x396   : > { %v8894_v6 = vadd.f32 %v3762_v54, %v3674_v33  ;;  %v3587_v21 = vadd.f32 %v3586_v40, %v3498_v23  ;;  %v6971_v33 = vld [vmem:[%s9830_s1 + $0x46c] sm:$0xf0]  ;;  %v5725_v40 = vld [vmem:[%s9830_s1 + $0x470] sm:$0xf0]  ;;  %v6972_v23 = vld [vmem:[%s9830_s1 + $0x474] sm:$0xf0] }
 0x397   : > { %v5728_v50 = vor.u32 %v6963_v47, %v5725_v40 }
 0x39b   : > { %v3675_v43 = vpop.f32.mrf.mxu2  ;;  %v3500_v26 = vpop.f32.mrf.mxu0 }
 0x39c   : > { %v3764_v1 = vpop.f32.mrf.mxu3  ;;  %v3676_v61 = vadd.f32 %v3675_v43, %v3587_v21  ;;  %v3589_v56 = vpop.f32.mrf.mxu1  ;;  %v3501_v34 = vadd.f32 %v3500_v26, %v8432_v37  ;;  %v5723_v37 = vld [vmem:[%s9830_s1 + $0x430] sm:$0xf]  ;;  %v6964_v21 = vld [vmem:[%s9830_s1 + $0x43c] sm:$0xf] }
 0x39d   : > { %v5724_v10 = vor.u32 %v6971_v33, %v5723_v37  ;;  %v6980_v37 = vld [vmem:[%s9830_s1 + $0x4bc] sm:$0xf] }
 0x39e   : > { %v8921_v4 = vadd.f32 %v3764_v1, %v3676_v61  ;;  %v3590_v7 = vadd.f32 %v3589_v56, %v3501_v34  ;;  %3815 = vmatmul.bf16.gmra.mxu0 %v5660_v49  ;;  %v5736_v1 = vor.u32 %v6964_v21, %v5733_v2  ;;  %v5797_v33 = vld [vmem:[%s9830_s1 + $0x4f8] sm:$0xf0] }
 0x39f   : > { %3904 = vmatmul.bf16.gmra.mxu1 %v5664_v59 }
 0x3a0   : > { %3993 = vmatmul.bf16.gmra.mxu2 %v5668_v11 }
 0x3a1   : > { %4082 = vmatmul.bf16.gmra.mxu3 %v5672_v9 }
 0x3a3   : > { %v3678_v0 = vpop.f32.mrf.mxu2  ;;  %v3502_v44 = vpop.f32.mrf.mxu0 }
 0x3a4   : > { %v3767_v20 = vpop.f32.mrf.mxu3  ;;  %v3679_v46 = vadd.f32 %v3678_v0, %v3590_v7  ;;  %v3591_v3 = vpop.f32.mrf.mxu1  ;;  %v3503_v31 = vadd.f32 %v3502_v44, %v8459_v42  ;;  %v5731_v42 = vld [vmem:[%s9830_s1 + $0x438] sm:$0xf] }
 0x3a5   : > { %v5732_v43 = vor.u32 %v6972_v23, %v5731_v42 }
 0x3a6   : > { %v8924_v27 = vadd.f32 %v3767_v20, %v3679_v46  ;;  %v3592_v54 = vadd.f32 %v3591_v3, %v3503_v31  ;;  %v5787_v20 = vld [vmem:[%s9830_s1 + $0x4b0] sm:$0xf]  ;;  %v6979_v46 = vld [vmem:[%s9830_s1 + $0x4b4] sm:$0xf]  ;;  %v5795_v31 = vld [vmem:[%s9830_s1 + $0x4b8] sm:$0xf] }
 0x3ab   : > { %v3680_v35 = vpop.f32.mrf.mxu2  ;;  %v3781_v57 = vpop.f32.mrf.mxu0 }
 0x3ac   : > { %v3769_v45 = vpop.f32.mrf.mxu3  ;;  %v3681_v24 = vadd.f32 %v3680_v35, %v3592_v54  ;;  %v3870_v25 = vpop.f32.mrf.mxu1  ;;  %v3782_v59 = vadd.f32 %v3781_v57, %v8465_v15  ;;  %v6987_v15 = vld [vmem:[%s9830_s1 + $0x4ec] sm:$0xf0]  ;;  %v6988_v54 = vld [vmem:[%s9830_s1 + $0x4f4] sm:$0xf0] }
 0x3ad   : > { %v5788_v21 = vor.u32 %v6987_v15, %v5787_v20  ;;  %v7003_v20 = vld [vmem:[%s9830_s1 + $0x56c] sm:$0xf0]  ;;  %v6995_v15 = vld [vmem:[%s9830_s1 + $0x534] sm:$0xf] }
 0x3ae   : > { %v8950_v49 = vadd.f32 %v3769_v45, %v3681_v24  ;;  %3820 = vmatmul.bf16.gmra.mxu0 %v5724_v10  ;;  %v3871_v61 = vadd.f32 %v3870_v25, %v3782_v59  ;;  %v5800_v24 = vor.u32 %v6980_v37, %v5797_v33 }
 0x3af   : > { %3909 = vmatmul.bf16.gmra.mxu1 %v5728_v50  ;;  %v5796_v50 = vor.u32 %v6988_v54, %v5795_v31  ;;  %v6996_v31 = vld [vmem:[%s9830_s1 + $0x53c] sm:$0xf] }
 0x3b0   : > { %3998 = vmatmul.bf16.gmra.mxu2 %v5732_v43  ;;  %v5861_v54 = vld [vmem:[%s9830_s1 + $0x578] sm:$0xf0] }
 0x3b1   : > { %4087 = vmatmul.bf16.gmra.mxu3 %v5736_v1 }
 0x3b3   : > { %v3959_v26 = vpop.f32.mrf.mxu2  ;;  %v3783_v9 = vpop.f32.mrf.mxu0 }
 0x3b4   : > { %v4048_v56 = vpop.f32.mrf.mxu3  ;;  %v3960_v11 = vadd.f32 %v3959_v26, %v3871_v61  ;;  %v3872_v34 = vpop.f32.mrf.mxu1  ;;  %v3784_v0 = vadd.f32 %v3783_v9, %v8493_v30  ;;  %v5789_v30 = vld [vmem:[%s9830_s1 + $0x4f0] sm:$0xf0] }
 0x3b5   : > { %v5792_v2 = vor.u32 %v6979_v46, %v5789_v30  ;;  %v7004_v30 = vld [vmem:[%s9830_s1 + $0x574] sm:$0xf0] }
 0x3b6   : > { %v8953_v7 = vadd.f32 %v4048_v56, %v3960_v11  ;;  %v3873_v47 = vadd.f32 %v3872_v34, %v3784_v0  ;;  %v5851_v0 = vld [vmem:[%s9830_s1 + $0x530] sm:$0xf] }
 0x3b8   : > { %v4129_v44 = vsel %vm4128_vm0, %v8953_v7, 0.0  ;;  %v4264_v3 = vmul.f32 %v8953_v7, %v8953_v7 }
 0x3b9   : > { %4130 = vadd.xlane.f32.xlu0 %v4129_v44 }
 0x3ba   : > { %v4296_v40 = vsel %vm4128_vm0, %v4264_v3, 0.0  ;;  %v5859_v3 = vld [vmem:[%s9830_s1 + $0x538] sm:$0xf] }
 0x3bb   : > { %v3961_v42 = vpop.f32.mrf.mxu2  ;;  %4297 = vadd.xlane.f32.xlu2 %v4296_v40  ;;  %v3786_v45 = vpop.f32.mrf.mxu0  ;;  %v5852_v40 = vor.u32 %v7003_v20, %v5851_v0  ;;  %v5915_v0 = vld [vmem:[%s9830_s1 + $0x5b0] sm:$0xf] }
 0x3bc   : > { %v4050_v23 = vpop.f32.mrf.mxu3  ;;  %v3962_v35 = vadd.f32 %v3961_v42, %v3873_v47  ;;  %v3875_v10 = vpop.f32.mrf.mxu1  ;;  %v3787_v25 = vadd.f32 %v3786_v45, %v8496_v52  ;;  %v5864_v45 = vor.u32 %v6996_v31, %v5861_v54  ;;  %v7019_v20 = vld [vmem:[%s9830_s1 + $0x5ec] sm:$0xf0]  ;;  %v5925_v31 = vld [vmem:[%s9830_s1 + $0x5f8] sm:$0xf0] }
 0x3be   : > { %v8985_v57 = vadd.f32 %v4050_v23, %v3962_v35  ;;  %3825 = vmatmul.bf16.gmra.mxu0 %v5788_v21  ;;  %v3876_v1 = vadd.f32 %v3875_v10, %v3787_v25  ;;  %v5860_v35 = vor.u32 %v7004_v30, %v5859_v3  ;;  %v7020_v3 = vld [vmem:[%s9830_s1 + $0x5f4] sm:$0xf0]  ;;  %v7012_v30 = vld [vmem:[%s9830_s1 + $0x5bc] sm:$0xf] }
 0x3bf   : > { %3914 = vmatmul.bf16.gmra.mxu1 %v5792_v2 }
 0x3c0   : > { %4003 = vmatmul.bf16.gmra.mxu2 %v5796_v50  ;;  %v4132_v43 = vsel %vm4128_vm0, %v8985_v57, 0.0  ;;  %v4265_v9 = vmul.f32 %v8985_v57, %v8985_v57 }
 0x3c1   : > { %4092 = vmatmul.bf16.gmra.mxu3 %v5800_v24  ;;  %4133 = vadd.xlane.f32.xlu0 %v4132_v43 }
 0x3c2   : > { %v4299_v44 = vsel %vm4128_vm0, %v4265_v9, 0.0 }
 0x3c3   : > { %v3964_v59 = vpop.f32.mrf.mxu2  ;;  %v3788_v56 = vpop.f32.mrf.mxu0 }
 0x3c4   : > { %v4053_v61 = vpop.f32.mrf.mxu3  ;;  %v3965_v26 = vadd.f32 %v3964_v59, %v3876_v1  ;;  %v3877_v11 = vpop.f32.mrf.mxu1  ;;  %v3789_v52 = vadd.f32 %v3788_v56, %v8523_v22  ;;  %v5853_v22 = vld [vmem:[%s9830_s1 + $0x570] sm:$0xf0] }
 0x3c5   : > { %v5856_v42 = vor.u32 %v6995_v15, %v5853_v22  ;;  %v7011_v15 = vld [vmem:[%s9830_s1 + $0x5b4] sm:$0xf]  ;;  %v5923_v22 = vld [vmem:[%s9830_s1 + $0x5b8] sm:$0xf] }
 0x3c6   : > { %v8992_v34 = vadd.f32 %v4053_v61, %v3965_v26  ;;  %v3878_v37 = vadd.f32 %v3877_v11, %v3789_v52 }
 0x3c8   : > { %v4135_v46 = vsel %vm4128_vm0, %v8992_v34, 0.0  ;;  %v4266_v10 = vmul.f32 %v8992_v34, %v8992_v34 }
 0x3c9   : > { %4136 = vadd.xlane.f32.xlu1 %v4135_v46  ;;  %4300 = vadd.xlane.f32.xlu0 %v4299_v44 }
 0x3ca   : > { %v4302_v25 = vsel %vm4128_vm0, %v4266_v10, 0.0  ;;  %v5928_v10 = vor.u32 %v7012_v30, %v5925_v31  ;;  %v7028_v30 = vld [vmem:[%s9830_s1 + $0x63c] sm:$0xf] }
 0x3cb   : > { %v3966_v33 = vpop.f32.mrf.mxu2  ;;  %v3791_v21 = vpop.f32.mrf.mxu0  ;;  %v5989_v31 = vld [vmem:[%s9830_s1 + $0x678] sm:$0xf0] }
 0x3cc   : > { %v4055_v47 = vpop.f32.mrf.mxu3  ;;  %v3967_v23 = vadd.f32 %v3966_v33, %v3878_v37  ;;  %v3880_v2 = vpop.f32.mrf.mxu1  ;;  %v3792_v24 = vadd.f32 %v3791_v21, %v8529_v38 }
 0x3ce   : > { %v9024_v50 = vadd.f32 %v4055_v47, %v3967_v23  ;;  %3830 = vmatmul.bf16.gmra.mxu0 %v5852_v40  ;;  %v3881_v1 = vadd.f32 %v3880_v2, %v3792_v24 }
 0x3cf   : > { %3919 = vmatmul.bf16.gmra.mxu1 %v5856_v42  ;;  %v5916_v42 = vor.u32 %v7019_v20, %v5915_v0  ;;  %v5979_v20 = vld [vmem:[%s9830_s1 + $0x630] sm:$0xf] }
 0x3d0   : > { %4008 = vmatmul.bf16.gmra.mxu2 %v5860_v35  ;;  %v4267_v43 = vmul.f32 %v9024_v50, %v9024_v50  ;;  %v4138_v46 = vsel %vm4128_vm0, %v9024_v50, 0.0 }
 0x3d1   : > { %4097 = vmatmul.bf16.gmra.mxu3 %v5864_v45  ;;  %4303 = vadd.xlane.f32.xlu1 %v4302_v25  ;;  %v5924_v45 = vor.u32 %v7020_v3, %v5923_v22  ;;  %v5987_v22 = vld [vmem:[%s9830_s1 + $0x638] sm:$0xf] }
 0x3d2   : > { %v4305_v59 = vsel %vm4128_vm0, %v4267_v43, 0.0  ;;  %v7036_v3 = vld [vmem:[%s9830_s1 + $0x674] sm:$0xf0] }
 0x3d3   : > { %v3969_v61 = vpop.f32.mrf.mxu2  ;;  %4306 = vadd.xlane.f32.xlu2 %v4305_v59  ;;  %v3793_v11 = vpop.f32.mrf.mxu0 }
 0x3d4   : > { %v4058_v26 = vpop.f32.mrf.mxu3  ;;  %v3970_v56 = vadd.f32 %v3969_v61, %v3881_v1  ;;  %v3882_v9 = vpop.f32.mrf.mxu1  ;;  %v3794_v52 = vadd.f32 %v3793_v11, %v8557_v13  ;;  %v5917_v13 = vld [vmem:[%s9830_s1 + $0x5f0] sm:$0xf0] }
 0x3d5   : > { %v5920_v23 = vor.u32 %v7011_v15, %v5917_v13  ;;  %v7035_v15 = vld [vmem:[%s9830_s1 + $0x66c] sm:$0xf0] }
 0x3d6   : > { %v9031_v38 = vadd.f32 %v4058_v26, %v3970_v56  ;;  %v3883_v54 = vadd.f32 %v3882_v9, %v3794_v52 }
 0x3d8   : > { %v4268_v44 = vmul.f32 %v9031_v38, %v9031_v38  ;;  %v4141_v37 = vsel %vm4128_vm0, %v9031_v38, 0.0 }
 0x3d9   : > { %4139 = vadd.xlane.f32.xlu1 %v4138_v46  ;;  %v7027_v46 = vld [vmem:[%s9830_s1 + $0x634] sm:$0xf] }
 0x3da   : > { %v4308_v33 = vsel %vm4128_vm0, %v4268_v44, 0.0 }
 0x3db   : > { %v3971_v47 = vpop.f32.mrf.mxu2  ;;  %4142 = vadd.xlane.f32.xlu2 %v4141_v37  ;;  %4309 = vadd.xlane.f32.xlu0 %v4308_v33  ;;  %v3796_v2 = vpop.f32.mrf.mxu0 }
 0x3dc   : > { %v4060_v40 = vpop.f32.mrf.mxu3  ;;  %v3972_v21 = vadd.f32 %v3971_v47, %v3883_v54  ;;  %v3885_v35 = vpop.f32.mrf.mxu1  ;;  %v3797_v25 = vadd.f32 %v3796_v2, %v8560_v16 }
 0x3de   : > { %v9065_v24 = vadd.f32 %v4060_v40, %v3972_v21  ;;  %3835 = vmatmul.bf16.gmra.mxu0 %v5916_v42  ;;  %v3886_v1 = vadd.f32 %v3885_v35, %v3797_v25  ;;  %v5980_v40 = vor.u32 %v7035_v15, %v5979_v20  ;;  %v5988_v35 = vor.u32 %v7036_v3, %v5987_v22  ;;  %v6043_v20 = vld [vmem:[%s9830_s1 + $0x6b0] sm:$0xf]  ;;  %v7052_v22 = vld [vmem:[%s9830_s1 + $0x6f4] sm:$0xf0]  ;;  %v7044_v3 = vld [vmem:[%s9830_s1 + $0x6bc] sm:$0xf] }
 0x3df   : > { %3924 = vmatmul.bf16.gmra.mxu1 %v5920_v23  ;;  %v7051_v15 = vld [vmem:[%s9830_s1 + $0x6ec] sm:$0xf0] }
 0x3e0   : > { %4013 = vmatmul.bf16.gmra.mxu2 %v5924_v45  ;;  %v4269_v43 = vmul.f32 %v9065_v24, %v9065_v24  ;;  %v4144_v61 = vsel %vm4128_vm0, %v9065_v24, 0.0  ;;  %v5992_v45 = vor.u32 %v7028_v30, %v5989_v31  ;;  %v6053_v30 = vld [vmem:[%s9830_s1 + $0x6f8] sm:$0xf0] }
 0x3e1   : > { %4102 = vmatmul.bf16.gmra.mxu3 %v5928_v10 }
 0x3e2   : > { %v4311_v59 = vsel %vm4128_vm0, %v4269_v43, 0.0 }
 0x3e3   : > { %v3974_v26 = vpop.f32.mrf.mxu2  ;;  %4312 = vadd.xlane.f32.xlu1 %v4311_v59  ;;  %4145 = vadd.xlane.f32.xlu2 %v4144_v61  ;;  %v3798_v9 = vpop.f32.mrf.mxu0 }
 0x3e4   : > { %v4063_v56 = vpop.f32.mrf.mxu3  ;;  %v3975_v11 = vadd.f32 %v3974_v26, %v3886_v1  ;;  %v3887_v16 = vpop.f32.mrf.mxu1  ;;  %v3799_v0 = vadd.f32 %v3798_v9, %v8587_v8  ;;  %v5981_v8 = vld [vmem:[%s9830_s1 + $0x670] sm:$0xf0] }
 0x3e5   : > { %v5984_v42 = vor.u32 %v7027_v46, %v5981_v8  ;;  %v7043_v46 = vld [vmem:[%s9830_s1 + $0x6b4] sm:$0xf]  ;;  %v6051_v8 = vld [vmem:[%s9830_s1 + $0x6b8] sm:$0xf] }
 0x3e6   : > { %v9073_v52 = vadd.f32 %v4063_v56, %v3975_v11  ;;  %v3888_v54 = vadd.f32 %v3887_v16, %v3799_v0 }
 0x3e8   : > { %v4147_v44 = vsel %vm4128_vm0, %v9073_v52, 0.0  ;;  %v4270_v13 = vmul.f32 %v9073_v52, %v9073_v52 }
 0x3e9   : > { %4148 = vadd.xlane.f32.xlu0 %v4147_v44 }
 0x3ea   : > { %v4314_v37 = vsel %vm4128_vm0, %v4270_v13, 0.0 }
 0x3eb   : > { %v3976_v33 = vpop.f32.mrf.mxu2  ;;  %4315 = vadd.xlane.f32.xlu2 %v4314_v37  ;;  %v3801_v21 = vpop.f32.mrf.mxu0 }
 0x3ec   : > { %v4065_v47 = vpop.f32.mrf.mxu3  ;;  %v3977_v23 = vadd.f32 %v3976_v33, %v3888_v54  ;;  %v3890_v2 = vpop.f32.mrf.mxu1  ;;  %v3802_v25 = vadd.f32 %v3801_v21, %v8593_v5 }
 0x3ee   : > { %v9105_v10 = vadd.f32 %v4065_v47, %v3977_v23  ;;  %3840 = vmatmul.bf16.gmra.mxu0 %v5980_v40  ;;  %v3891_v59 = vadd.f32 %v3890_v2, %v3802_v25  ;;  %v6044_v47 = vor.u32 %v7051_v15, %v6043_v20  ;;  %v6052_v2 = vor.u32 %v7052_v22, %v6051_v8  ;;  %v6107_v20 = vld [vmem:[%s9830_s1 + $0x730] sm:$0xf]  ;;  %v7068_v8 = vld [vmem:[%s9830_s1 + $0x774] sm:$0xf0]  ;;  %v7060_v22 = vld [vmem:[%s9830_s1 + $0x73c] sm:$0xf] }
 0x3ef   : > { %3929 = vmatmul.bf16.gmra.mxu1 %v5984_v42  ;;  %v7067_v15 = vld [vmem:[%s9830_s1 + $0x76c] sm:$0xf0] }
 0x3f0   : > { %4018 = vmatmul.bf16.gmra.mxu2 %v5988_v35  ;;  %v4150_v43 = vsel %vm4128_vm0, %v9105_v10, 0.0  ;;  %v4271_v1 = vmul.f32 %v9105_v10, %v9105_v10  ;;  %v6056_v35 = vor.u32 %v7044_v3, %v6053_v30  ;;  %v6117_v3 = vld [vmem:[%s9830_s1 + $0x778] sm:$0xf0] }
 0x3f1   : > { %4107 = vmatmul.bf16.gmra.mxu3 %v5992_v45  ;;  %4151 = vadd.xlane.f32.xlu1 %v4150_v43 }
 0x3f2   : > { %v4317_v61 = vsel %vm4128_vm0, %v4271_v1, 0.0 }
 0x3f3   : > { %v3979_v26 = vpop.f32.mrf.mxu2  ;;  %4318 = vadd.xlane.f32.xlu0 %v4317_v61  ;;  %v3803_v9 = vpop.f32.mrf.mxu0 }
 0x3f4   : > { %v4068_v56 = vpop.f32.mrf.mxu3  ;;  %v3980_v11 = vadd.f32 %v3979_v26, %v3891_v59  ;;  %v3892_v5 = vpop.f32.mrf.mxu1  ;;  %v3804_v0 = vadd.f32 %v3803_v9, %v8621_v60  ;;  %v6045_v60 = vld [vmem:[%s9830_s1 + $0x6f0] sm:$0xf0] }
 0x3f5   : > { %v6048_v40 = vor.u32 %v7043_v46, %v6045_v60  ;;  %v7059_v46 = vld [vmem:[%s9830_s1 + $0x734] sm:$0xf]  ;;  %v6115_v60 = vld [vmem:[%s9830_s1 + $0x738] sm:$0xf] }
 0x3f6   : > { %v9113_v16 = vadd.f32 %v4068_v56, %v3980_v11  ;;  %v3893_v31 = vadd.f32 %v3892_v5, %v3804_v0 }
 0x3f8   : > { %v4153_v44 = vsel %vm4128_vm0, %v9113_v16, 0.0  ;;  %v4272_v13 = vmul.f32 %v9113_v16, %v9113_v16 }
 0x3f9   : > { %4154 = vadd.xlane.f32.xlu2 %v4153_v44 }
 0x3fa   : > { %v4320_v54 = vsel %vm4128_vm0, %v4272_v13, 0.0 }
 0x3fb   : > { %v3981_v37 = vpop.f32.mrf.mxu2  ;;  %4321 = vadd.xlane.f32.xlu1 %v4320_v54  ;;  %v3806_v23 = vpop.f32.mrf.mxu0 }
 0x3fc   : > { %v4070_v33 = vpop.f32.mrf.mxu3  ;;  %v3982_v42 = vadd.f32 %v3981_v37, %v3893_v31  ;;  %v3895_v21 = vpop.f32.mrf.mxu1  ;;  %v3807_v25 = vadd.f32 %v3806_v23, %v8624_v51 }
 0x3fe   : > { %v9145_v45 = vadd.f32 %v4070_v33, %v3982_v42  ;;  %3845 = vmatmul.bf16.gmra.mxu0 %v6044_v47  ;;  %v3896_v59 = vadd.f32 %v3895_v21, %v3807_v25  ;;  %v6108_v33 = vor.u32 %v7067_v15, %v6107_v20  ;;  %v6116_v21 = vor.u32 %v7068_v8, %v6115_v60  ;;  %v6179_v8 = vld [vmem:[%s9830_s1 + $0x7b8] sm:$0xf] }
 0x3ff   : > { %3934 = vmatmul.bf16.gmra.mxu1 %v6048_v40 }
 0x400   : > { %4023 = vmatmul.bf16.gmra.mxu2 %v6052_v2  ;;  %v4156_v43 = vsel %vm4128_vm0, %v9145_v45, 0.0  ;;  %v4273_v1 = vmul.f32 %v9145_v45, %v9145_v45  ;;  %v6120_v2 = vor.u32 %v7060_v22, %v6117_v3  ;;  %v7084_v22 = vld [vmem:[%s9830_s1 + $0x7f4] sm:$0xf0]  ;;  %v7076_v3 = vld [vmem:[%s9830_s1 + $0x7bc] sm:$0xf] }
 0x401   : > { %4112 = vmatmul.bf16.gmra.mxu3 %v6056_v35  ;;  %4157 = vadd.xlane.f32.xlu0 %v4156_v43 }
 0x402   : > { %v4323_v61 = vsel %vm4128_vm0, %v4273_v1, 0.0 }
 0x403   : > { %v3984_v26 = vpop.f32.mrf.mxu2  ;;  %4324 = vadd.xlane.f32.xlu2 %v4323_v61  ;;  %v3808_v9 = vpop.f32.mrf.mxu0 }
 0x404   : > { %v4073_v56 = vpop.f32.mrf.mxu3  ;;  %v3985_v11 = vadd.f32 %v3984_v26, %v3896_v59  ;;  %v3897_v51 = vpop.f32.mrf.mxu1  ;;  %v3809_v0 = vadd.f32 %v3808_v9, %v8651_v53  ;;  %v6109_v53 = vld [vmem:[%s9830_s1 + $0x770] sm:$0xf0]  ;;  %v7168_v59 = vmov 4.0  }
 0x405   : > { %v6112_v47 = vor.u32 %v7059_v46, %v6109_v53  ;;  %7094 = vrcp.f32 %v7168_v59  ;;  %v6171_v46 = vld [vmem:[%s9830_s1 + $0x7b0] sm:$0xf] }
 0x406   : > { %v9153_v5 = vadd.f32 %v4073_v56, %v3985_v11  ;;  %v3898_v30 = vadd.f32 %v3897_v51, %v3809_v0 }
 0x408   : > { %v4159_v44 = vsel %vm4128_vm0, %v9153_v5, 0.0  ;;  %v4274_v13 = vmul.f32 %v9153_v5, %v9153_v5 }
 0x409   : > { %4160 = vadd.xlane.f32.xlu1 %v4159_v44  ;;  %v7083_v44 = vld [vmem:[%s9830_s1 + $0x7ec] sm:$0xf0] }
 0x40a   : > { %v4326_v31 = vsel %vm4128_vm0, %v4274_v13, 0.0  ;;  %v7075_v13 = vld [vmem:[%s9830_s1 + $0x7b4] sm:$0xf] }
 0x40b   : > { %v3986_v54 = vpop.f32.mrf.mxu2  ;;  %4327 = vadd.xlane.f32.xlu0 %v4326_v31  ;;  %v3811_v42 = vpop.f32.mrf.mxu0 }
 0x40c   : > { %v4075_v37 = vpop.f32.mrf.mxu3  ;;  %v3987_v40 = vadd.f32 %v3986_v54, %v3898_v30  ;;  %v3900_v23 = vpop.f32.mrf.mxu1  ;;  %v3812_v25 = vadd.f32 %v3811_v42, %v8654_v39  ;;  %v6181_v30 = vld [vmem:[%s9830_s1 + $0x7f8] sm:$0xf0] }
 0x40d   : > { %v7095_v15 = vpop.eup %7094 }
 0x40e   : > { %v9185_v35 = vadd.f32 %v4075_v37, %v3987_v40  ;;  %3850 = vmatmul.bf16.gmra.mxu0 %v6108_v33  ;;  %v3901_v61 = vadd.f32 %v3900_v23, %v3812_v25  ;;  %v4226_v37 = vmul.f32 4.0, %v7095_v15  ;;  %v6172_v40 = vor.u32 %v7083_v44, %v6171_v46 }
 0x40f   : > { %3939 = vmatmul.bf16.gmra.mxu1 %v6112_v47  ;;  %v6180_v25 = vor.u32 %v7084_v22, %v6179_v8  ;;  %vm4230_vm1 = vweird.f32 %v7095_v15 }
 0x410   : > { %4028 = vmatmul.bf16.gmra.mxu2 %v6116_v21  ;;  %v4162_v43 = vsel %vm4128_vm0, %v9185_v35, 0.0  ;;  %v4275_v1 = vmul.f32 %v9185_v35, %v9185_v35 }
 0x411   : > { %4117 = vmatmul.bf16.gmra.mxu3 %v6120_v2  ;;  %4163 = vadd.xlane.f32.xlu2 %v4162_v43  ;;  %v6184_v43 = vor.u32 %v7076_v3, %v6181_v30 }
 0x412   : > { %v4329_v26 = vsel %vm4128_vm0, %v4275_v1, 0.0 }
 0x413   : > { %v3989_v56 = vpop.f32.mrf.mxu2  ;;  %4330 = vadd.xlane.f32.xlu1 %v4329_v26  ;;  %v3813_v9 = vpop.f32.mrf.mxu0 }
 0x414   : > { %v4078_v11 = vpop.f32.mrf.mxu3  ;;  %v3990_v39 = vadd.f32 %v3989_v56, %v3901_v61  ;;  %v3902_v51 = vpop.f32.mrf.mxu1  ;;  %v3814_v20 = vadd.f32 %v3813_v9, %v8681_v32  ;;  %v6173_v32 = vld [vmem:[%s9830_s1 + $0x7f0] sm:$0xf0]  ;;  %v4227_v61 = vsub.f32 1.0, %v4226_v37 }
 0x415   : > { %v6176_v42 = vor.u32 %v7075_v13, %v6173_v32 }
 0x416   : > { %v9193_v0 = vadd.f32 %v4078_v11, %v3990_v39  ;;  %v3903_v31 = vadd.f32 %v3902_v51, %v3814_v20  ;;  %v4228_v9 = vmul.f32 %v7095_v15, %v4227_v61 }
 0x418   : > { %v4165_v53 = vsel %vm4128_vm0, %v9193_v0, 0.0  ;;  %v4276_v60 = vmul.f32 %v9193_v0, %v9193_v0 }
 0x419   : > { %4166 = vadd.xlane.f32.xlu0 %v4165_v53 }
 0x41a   : > { %v4332_v54 = vsel %vm4128_vm0, %v4276_v60, 0.0  ;;  %v4229_v60 = vadd.f32 %v7095_v15, %v4228_v9 }
 0x41b   : > { %v3991_v33 = vpop.f32.mrf.mxu2  ;;  %4333 = vadd.xlane.f32.xlu2 %v4332_v54  ;;  %v3816_v21 = vpop.f32.mrf.mxu0 }
 0x41c   : > { %v4080_v47 = vpop.f32.mrf.mxu3  ;;  %v3992_v23 = vadd.f32 %v3991_v33, %v3903_v31  ;;  %v3905_v2 = vpop.f32.mrf.mxu1  ;;  %v3817_v59 = vadd.f32 %v3816_v21, %v8684_v28  ;;  %v9241_v30 = vsel %vm4230_vm1, %v7095_v15, %v4229_v60 }
 0x41e   : > { %v9225_v1 = vadd.f32 %v4080_v47, %v3992_v23  ;;  %3855 = vmatmul.bf16.gmra.mxu0 %v6172_v40  ;;  %v3906_v11 = vadd.f32 %v3905_v2, %v3817_v59 }
 0x41f   : > { %3944 = vmatmul.bf16.gmra.mxu1 %v6176_v42 }
 0x420   : > { %4033 = vmatmul.bf16.gmra.mxu2 %v6180_v25  ;;  %v4168_v26 = vsel %vm4128_vm0, %v9225_v1, 0.0  ;;  %v4277_v56 = vmul.f32 %v9225_v1, %v9225_v1 }
 0x421   : > { %4122 = vmatmul.bf16.gmra.mxu3 %v6184_v43  ;;  %4169 = vadd.xlane.f32.xlu1 %v4168_v26 }
 0x422   : > { %v4335_v39 = vsel %vm4128_vm0, %v4277_v56, 0.0 }
 0x423   : > { %v3994_v51 = vpop.f32.mrf.mxu2  ;;  %4336 = vadd.xlane.f32.xlu0 %v4335_v39  ;;  %v3818_v46 = vpop.f32.mrf.mxu0 }
 0x424   : > { %v4083_v20 = vpop.f32.mrf.mxu3  ;;  %v3995_v28 = vadd.f32 %v3994_v51, %v3906_v11  ;;  %v3907_v44 = vpop.f32.mrf.mxu1  ;;  %v3819_v53 = vadd.f32 %v3818_v46, %v8711_v63 }
 0x426   : > { %v9233_v13 = vadd.f32 %v4083_v20, %v3995_v28  ;;  %v3908_v22 = vadd.f32 %v3907_v44, %v3819_v53 }
 0x428   : > { %v4171_v32 = vsel %vm4128_vm0, %v9233_v13, 0.0  ;;  %v4278_v8 = vmul.f32 %v9233_v13, %v9233_v13 }
 0x429   : > { %4172 = vadd.xlane.f32.xlu2 %v4171_v32 }
 0x42a   : > { %v4338_v3 = vsel %vm4128_vm0, %v4278_v8, 0.0 }
 0x42b   : > { %v3996_v31 = vpop.f32.mrf.mxu2  ;;  %4339 = vadd.xlane.f32.xlu1 %v4338_v3  ;;  %v3821_v63 = vpop.f32.mrf.mxu0 }
 0x42c   : > { %v4085_v54 = vpop.f32.mrf.mxu3  ;;  %v3997_v37 = vadd.f32 %v3996_v31, %v3908_v22  ;;  %v4131_v33 = vpop.xlane.xlu0 %4130  ;;  %v3822_v23 = vadd.f32 %v3821_v63, %v8714_v55 }
 0x42d   : > { %v9244_v47 = vmul.f32 %v9241_v30, %v4131_v33  ;;  %v3910_v40 = vpop.f32.mrf.mxu1 }
 0x42e   : > { %v9246_v42 = vadd.f32 %v4085_v54, %v3997_v37  ;;  %v4298_v21 = vpop.xlane.xlu2 %4297  ;;  %v3911_v61 = vadd.f32 %v3910_v40, %v3822_v23 }
 0x42f   : > { %v4424_v2 = vmul.f32 %v9244_v47, %v9244_v47  ;;  %v4392_v15 = vmul.f32 %v4298_v21, %v9241_v30 }
 0x430   : > { %v4174_v25 = vsel %vm4128_vm0, %v9246_v42, 0.0  ;;  %v4279_v43 = vmul.f32 %v9246_v42, %v9246_v42 }
 0x431   : > { %v4456_v59 = vsub.f32 %v4392_v15, %v4424_v2  ;;  %4175 = vadd.xlane.f32.xlu0 %v4174_v25 }
 0x432   : > { %v4341_v26 = vsel %vm4128_vm0, %v4279_v43, 0.0 }
 0x433   : > { %v4488_v56 = vmax.f32 %v4456_v59, 0.0  ;;  %v3999_v11 = vpop.f32.mrf.mxu2  ;;  %4342 = vadd.xlane.f32.xlu2 %v4341_v26  ;;  %v3823_v51 = vpop.f32.mrf.mxu0 }
 0x434   : > { %v4088_v55 = vpop.f32.mrf.mxu3  ;;  %v4000_v39 = vadd.f32 %v3999_v11, %v3911_v61  ;;  %v4134_v9 = vpop.xlane.xlu0 %4133  ;;  %v3824_v44 = vadd.f32 %v3823_v51, %v8741_v58 }
 0x435   : > { %v4552_v20 = vadd.f32 1e-05, %v4488_v56  ;;  %v3912_v28 = vpop.f32.mrf.mxu1  ;;  %v9265_v32 = vmul.f32 %v9241_v30, %v4134_v9 }
 0x436   : > { %v9257_v46 = vadd.f32 %v4088_v55, %v4000_v39  ;;  %v3913_v8 = vadd.f32 %v3912_v28, %v3824_v44 }
 0x437   : > { %7096 = vrsqrt.f32 %v4552_v20  ;;  %v4425_v63 = vmul.f32 %v9265_v32, %v9265_v32  ;;  %vm4590_vm3 = vweird.f32 %v4552_v20 }
 0x438   : > { %v4177_v53 = vsel %vm4128_vm0, %v9257_v46, 0.0  ;;  %v4280_v60 = vmul.f32 %v9257_v46, %v9257_v46 }
 0x439   : > { %4178 = vadd.xlane.f32.xlu1 %v4177_v53 }
 0x43a   : > { %v4344_v22 = vsel %vm4128_vm0, %v4280_v60, 0.0 }
 0x43b   : > { %v4001_v3 = vpop.f32.mrf.mxu2  ;;  %4345 = vadd.xlane.f32.xlu0 %v4344_v22  ;;  %v3826_v23 = vpop.f32.mrf.mxu0 }
 0x43c   : > { %v4090_v31 = vpop.f32.mrf.mxu3  ;;  %v4002_v54 = vadd.f32 %v4001_v3, %v3913_v8  ;;  %v4137_v37 = vpop.xlane.xlu1 %4136  ;;  %v3827_v25 = vadd.f32 %v3826_v23, %v8744_v62 }
 0x43d   : > { %v4301_v58 = vpop.xlane.xlu0 %4300  ;;  %v7097_v33 = vpop.eup %7096  ;;  %v9279_v56 = vmul.f32 %v9241_v30, %v4137_v37 }
 0x43e   : > { %v4393_v40 = vmul.f32 %v4301_v58, %v9241_v30  ;;  %v3915_v21 = vpop.f32.mrf.mxu1  ;;  %v4585_v2 = vmul.f32 %v7097_v33, %v4552_v20  ;;  %v9271_v15 = vadd.f32 %v4090_v31, %v4002_v54  ;;  %vm4591_vm2 = vweird.f32 %v7097_v33 }
 0x43f   : > { %v3916_v39 = vadd.f32 %v3915_v21, %v3827_v25  ;;  %v4426_v8 = vmul.f32 %v9279_v56, %v9279_v56  ;;  %vm4592_vm4 = vmor %vm4590_vm3, %vm4591_vm2 }
 0x440   : > { %v4457_v43 = vsub.f32 %v4393_v40, %v4425_v63  ;;  %v4586_v59 = vmul.f32 %v7097_v33, %v4585_v2  ;;  %v4180_v61 = vsel %vm4128_vm0, %v9271_v15, 0.0  ;;  %v4281_v26 = vmul.f32 %v9271_v15, %v9271_v15 }
 0x441   : > { %4181 = vadd.xlane.f32.xlu2 %v4180_v61  ;;  %v4520_v40 = vsub.f32 %v8953_v7, %v9244_v47 }
 0x442   : > { %v4489_v11 = vmax.f32 %v4457_v43, 0.0  ;;  %v4587_v55 = vmul.f32 0.5, %v4586_v59  ;;  %v4347_v9 = vsel %vm4128_vm0, %v4281_v26, 0.0 }
 0x443   : > { %v4004_v62 = vpop.f32.mrf.mxu2  ;;  %4348 = vadd.xlane.f32.xlu1 %v4347_v9  ;;  %v3828_v3 = vpop.f32.mrf.mxu0 }
 0x444   : > { %v9282_v51 = vadd.f32 1e-05, %v4489_v11  ;;  %v4093_v28 = vpop.f32.mrf.mxu3  ;;  %v4588_v44 = vsub.f32 1.5, %v4587_v55  ;;  %v4005_v53 = vadd.f32 %v4004_v62, %v3916_v39  ;;  %v4304_v60 = vpop.xlane.xlu1 %4303  ;;  %v3829_v58 = vadd.f32 %v3828_v3, %v8771_v48 }
 0x445   : > { %v4394_v22 = vmul.f32 %v4304_v60, %v9241_v30 }
 0x446   : > { %7098 = vrsqrt.f32 %v9282_v51  ;;  %v3917_v31 = vpop.f32.mrf.mxu1  ;;  %v4589_v54 = vmul.f32 %v7097_v33, %v4588_v44  ;;  %v9288_v37 = vadd.f32 %v4093_v28, %v4005_v53  ;;  %v4307_v63 = vpop.xlane.xlu2 %4306  ;;  %vm4600_vm8 = vweird.f32 %v9282_v51 }
 0x447   : > { %v4458_v23 = vsub.f32 %v4394_v22, %v4426_v8  ;;  %v3918_v20 = vadd.f32 %v3917_v31, %v3829_v58 }
 0x448   : > { %v4593_v21 = vsel %vm4592_vm4, %v7097_v33, %v4589_v54  ;;  %v4183_v2 = vsel %vm4128_vm0, %v9288_v37, 0.0  ;;  %v4282_v25 = vmul.f32 %v9288_v37, %v9288_v37  ;;  %v4395_v54 = vmul.f32 %v4307_v63, %v9241_v30 }
 0x449   : > { %v4904_v43 = vmul.f32 %v4593_v21, %v4520_v40  ;;  %v4490_v59 = vmax.f32 %v4458_v23, 0.0  ;;  %4184 = vadd.xlane.f32.xlu0 %v4183_v2 }
 0x44a   : > { %v4350_v48 = vsel %vm4128_vm0, %v4282_v25, 0.0 }
 0x44b   : > { %vm4936_vm5 = vcmp.ge.f32.partialorder %v4904_v43, 0.0  ;;  %v4968_v26 = vmul.f32 0.2, %v4904_v43  ;;  %v9299_v7 = vadd.f32 1e-05, %v4490_v59  ;;  %v4006_v47 = vpop.f32.mrf.mxu2  ;;  %4351 = vadd.xlane.f32.xlu2 %v4350_v48  ;;  %v3831_v28 = vpop.f32.mrf.mxu0 }
 0x44c   : > { %v7099_v61 = vpop.eup %7098  ;;  %v4095_v33 = vpop.f32.mrf.mxu3  ;;  %v4007_v55 = vadd.f32 %v4006_v47, %v3918_v20  ;;  %v3832_v22 = vadd.f32 %v3831_v28, %v8774_v18  ;;  %v4521_v28 = vsub.f32 %v8985_v57, %v9265_v32 }
 0x44d   : > { %v4595_v11 = vmul.f32 %v7099_v61, %v9282_v51  ;;  %v4140_v39 = vpop.xlane.xlu1 %4139  ;;  %v5000_v9 = vsel %vm4936_vm5, %v4904_v43, %v4968_v26  ;;  %7100 = vrsqrt.f32 %v9299_v7  ;;  %vm4601_vm7 = vweird.f32 %v7099_v61 }
 0x44e   : > { %v9309_v62 = vmul.f32 %v9241_v30, %v4140_v39  ;;  %v3920_v44 = vpop.f32.mrf.mxu1  ;;  %v5032_v53 = vpack.c.bf16 %v5000_v9, %v5000_v9  ;;  %v9311_v8 = vadd.f32 %v4095_v33, %v4007_v55  ;;  %v4143_v3 = vpop.xlane.xlu2 %4142  ;;  %vm4602_vm9 = vmor %vm4600_vm8, %vm4601_vm7  ;;  %vm4610_vm12 = vweird.f32 %v9299_v7 }
 0x44f   : > { %v4596_v60 = vmul.f32 %v7099_v61, %v4595_v11  ;;  %v4310_v31 = vpop.xlane.xlu0 %4309  ;;  %v9318_v40 = vmul.f32 %v9241_v30, %v4143_v3  ;;  %v3921_v59 = vadd.f32 %v3920_v44, %v3832_v22 }
 0x450   : > { %v4427_v58 = vmul.f32 %v9309_v62, %v9309_v62  ;;  %5065 = vst.msk [vmem:[%s9305_s30] sm:$0xf] %vm5064_vm6, %v5032_v53  ;;  %v4186_v21 = vsel %vm4128_vm0, %v9311_v8, 0.0  ;;  %v4283_v2 = vmul.f32 %v9311_v8, %v9311_v8  ;;  %v4396_v63 = vmul.f32 %v4310_v31, %v9241_v30 }
 0x451   : > { %v4597_v23 = vmul.f32 0.5, %v4596_v60  ;;  %v4428_v25 = vmul.f32 %v9318_v40, %v9318_v40  ;;  %4187 = vadd.xlane.f32.xlu1 %v4186_v21 }
 0x452   : > { %v4459_v18 = vsub.f32 %v4395_v54, %v4427_v58  ;;  %v4353_v20 = vsel %vm4128_vm0, %v4283_v2, 0.0 }
 0x453   : > { %v4598_v43 = vsub.f32 1.5, %v4597_v23  ;;  %v7101_v48 = vpop.eup %7100  ;;  %v4460_v47 = vsub.f32 %v4396_v63, %v4428_v25  ;;  %v4009_v33 = vpop.f32.mrf.mxu2  ;;  %4354 = vadd.xlane.f32.xlu0 %v4353_v20 }
 0x454   : > { %v4491_v26 = vmax.f32 %v4459_v18, 0.0  ;;  %v4098_v11 = vpop.f32.mrf.mxu3  ;;  %v4605_v39 = vmul.f32 %v7101_v48, %v9299_v7  ;;  %v4010_v9 = vadd.f32 %v4009_v33, %v3921_v59  ;;  %v3833_v60 = vpop.f32.mrf.mxu0  ;;  %vm4611_vm10 = vweird.f32 %v7101_v48 }
 0x455   : > { %v4599_v55 = vmul.f32 %v7099_v61, %v4598_v43  ;;  %v4492_v44 = vmax.f32 %v4460_v47, 0.0  ;;  %v3834_v58 = vadd.f32 %v3833_v60, %v8801_v41  ;;  %vm4612_vm13 = vmor %vm4610_vm12, %vm4611_vm10 }
 0x456   : > { %v9334_v53 = vadd.f32 1e-05, %v4491_v26  ;;  %v3922_v22 = vpop.f32.mrf.mxu1  ;;  %v4606_v31 = vmul.f32 %v7101_v48, %v4605_v39  ;;  %v9336_v54 = vadd.f32 %v4098_v11, %v4010_v9  ;;  %v4146_v23 = vpop.xlane.xlu2 %4145 }
 0x457   : > { %v4603_v3 = vsel %vm4602_vm9, %v7099_v61, %v4599_v55  ;;  %v9340_v21 = vadd.f32 1e-05, %v4492_v44  ;;  %v4313_v2 = vpop.xlane.xlu1 %4312  ;;  %v9343_v32 = vmul.f32 %v9241_v30, %v4146_v23  ;;  %v3923_v61 = vadd.f32 %v3922_v22, %v3834_v58 }
 0x458   : > { %v4905_v51 = vmul.f32 %v4603_v3, %v4521_v28  ;;  %7102 = vrsqrt.f32 %v9334_v53  ;;  %v4607_v57 = vmul.f32 0.5, %v4606_v31  ;;  %v4397_v41 = vmul.f32 %v4313_v2, %v9241_v30 }
 0x459   : > { %7104 = vrsqrt.f32 %v9340_v21  ;;  %v4429_v63 = vmul.f32 %v9343_v32, %v9343_v32  ;;  %v4189_v43 = vsel %vm4128_vm0, %v9336_v54, 0.0  ;;  %v4284_v47 = vmul.f32 %v9336_v54, %v9336_v54 }
 0x45a   : > { %vm4937_vm11 = vcmp.ge.f32.partialorder %v4905_v51, 0.0  ;;  %v4969_v18 = vmul.f32 0.2, %v4905_v51  ;;  %v4608_v25 = vsub.f32 1.5, %v4607_v57  ;;  %4190 = vadd.xlane.f32.xlu2 %v4189_v43  ;;  %v4522_v44 = vsub.f32 %v8992_v34, %v9279_v56 }
 0x45b   : > { %v4011_v20 = vpop.f32.mrf.mxu2  ;;  %v4461_v55 = vsub.f32 %v4397_v41, %v4429_v63  ;;  %v4356_v7 = vsel %vm4128_vm0, %v4284_v47, 0.0  ;;  %vm4620_vm14 = vweird.f32 %v9334_v53  ;;  %vm4630_vm4 = vweird.f32 %v9340_v21 }
 0x45c   : > { %v5001_v59 = vsel %vm4937_vm11, %v4905_v51, %v4969_v18  ;;  %v4100_v26 = vpop.f32.mrf.mxu3  ;;  %v4609_v11 = vmul.f32 %v7101_v48, %v4608_v25  ;;  %v4012_v39 = vadd.f32 %v4011_v20, %v3923_v61  ;;  %v4149_v9 = vpop.xlane.xlu0 %4148  ;;  %4357 = vadd.xlane.f32.xlu1 %v4356_v7 }
 0x45d   : > { %v5033_v33 = vpack.c.bf16 %v5001_v59, %v5001_v59  ;;  %v9361_v60 = vmul.f32 %v9241_v30, %v4149_v9  ;;  %v3836_v22 = vpop.f32.mrf.mxu0  ;;  %v4493_v23 = vmax.f32 %v4461_v55, 0.0 }
 0x45e   : > { %v9354_v28 = vpop.eup %7102  ;;  %v3925_v3 = vpop.f32.mrf.mxu1  ;;  %v4613_v31 = vsel %vm4612_vm13, %v7101_v48, %v4609_v11  ;;  %v9369_v56 = vadd.f32 %v4100_v26, %v4012_v39  ;;  %v3837_v41 = vadd.f32 %v3836_v22, %v8804_v17 }
 0x45f   : > { %5066 = vst.msk [vmem:[%s9305_s30 + $0x4] sm:$0xf] %vm5064_vm6, %v5033_v33  ;;  %v4615_v58 = vmul.f32 %v9354_v28, %v9334_v53  ;;  %v4316_v51 = vpop.xlane.xlu2 %4315  ;;  %v9367_v2 = vpop.eup %7104  ;;  %v4906_v34 = vmul.f32 %v4613_v31, %v4522_v44  ;;  %v4430_v57 = vmul.f32 %v9361_v60, %v9361_v60  ;;  %v9377_v61 = vadd.f32 1e-05, %v4493_v23 }
 0x460   : > { %v4625_v48 = vmul.f32 %v9367_v2, %v9340_v21  ;;  %v4398_v63 = vmul.f32 %v4316_v51, %v9241_v30  ;;  %vm4621_vm1 = vweird.f32 %v9354_v28  ;;  %v3926_v26 = vadd.f32 %v3925_v3, %v3837_v41 }
 0x461   : > { %v4616_v18 = vmul.f32 %v9354_v28, %v4615_v58  ;;  %vm4938_vm15 = vcmp.ge.f32.partialorder %v4906_v34, 0.0  ;;  %v4970_v25 = vmul.f32 0.2, %v4906_v34  ;;  %7106 = vrsqrt.f32 %v9377_v61  ;;  %vm4622_vm3 = vmor %vm4620_vm14, %vm4621_vm1 }
 0x462   : > { %v4626_v59 = vmul.f32 %v9367_v2, %v4625_v48  ;;  %v4462_v47 = vsub.f32 %v4398_v63, %v4430_v57  ;;  %v4192_v33 = vsel %vm4128_vm0, %v9369_v56, 0.0  ;;  %v4285_v44 = vmul.f32 %v9369_v56, %v9369_v56 }
 0x463   : > { %v4617_v43 = vmul.f32 0.5, %v4616_v18  ;;  %v5002_v20 = vsel %vm4938_vm15, %v4906_v34, %v4970_v25  ;;  %v4014_v11 = vpop.f32.mrf.mxu2  ;;  %4193 = vadd.xlane.f32.xlu0 %v4192_v33  ;;  %vm4631_vm2 = vweird.f32 %v9367_v2  ;;  %v4523_v25 = vsub.f32 %v9024_v50, %v9309_v62 }
 0x464   : > { %v4103_v55 = vpop.f32.mrf.mxu3  ;;  %v5034_v39 = vpack.c.bf16 %v5002_v20, %v5002_v20  ;;  %v4627_v9 = vmul.f32 0.5, %v4626_v59  ;;  %v4152_v7 = vpop.xlane.xlu1 %4151  ;;  %v4494_v22 = vmax.f32 %v4462_v47, 0.0  ;;  %v4015_v31 = vadd.f32 %v4014_v11, %v3926_v26  ;;  %vm4632_vm5 = vmor %vm4630_vm4, %vm4631_vm2 }
 0x465   : > { %v4618_v17 = vsub.f32 1.5, %v4617_v43  ;;  %v9390_v3 = vmul.f32 %v9241_v30, %v4152_v7  ;;  %v3838_v58 = vpop.f32.mrf.mxu0  ;;  %v4359_v57 = vsel %vm4128_vm0, %v4285_v44, 0.0  ;;  %v4524_v53 = vsub.f32 %v9031_v38, %v9318_v40 }
 0x466   : > { %v3927_v23 = vpop.f32.mrf.mxu1  ;;  %5067 = vst.msk [vmem:[%s9305_s30 + $0x8] sm:$0xf] %vm5064_vm6, %v5034_v39  ;;  %v4628_v34 = vsub.f32 1.5, %v4627_v9  ;;  %v3839_v18 = vadd.f32 %v3838_v58, %v8831_v29  ;;  %v4319_v48 = vpop.xlane.xlu0 %4318  ;;  %v9403_v41 = vadd.f32 1e-05, %v4494_v22  ;;  %v9405_v63 = vadd.f32 %v4103_v55, %v4015_v31  ;;  %4360 = vadd.xlane.f32.xlu2 %v4359_v57 }
 0x467   : > { %v4619_v51 = vmul.f32 %v9354_v28, %v4618_v17  ;;  %v4431_v43 = vmul.f32 %v9390_v3, %v9390_v3  ;;  %v9409_v59 = vpop.eup %7106  ;;  %v4399_v50 = vmul.f32 %v4319_v48, %v9241_v30  ;;  %vm4640_vm10 = vweird.f32 %v9377_v61 }
 0x468   : > { %v4629_v20 = vmul.f32 %v9367_v2, %v4628_v34  ;;  %v4635_v26 = vmul.f32 %v9409_v59, %v9377_v61  ;;  %7108 = vrsqrt.f32 %v9403_v41  ;;  %v3928_v47 = vadd.f32 %v3927_v23, %v3839_v18 }
 0x469   : > { %v4623_v29 = vsel %vm4622_vm3, %v9354_v28, %v4619_v51  ;;  %v4463_v33 = vsub.f32 %v4399_v50, %v4431_v43  ;;  %v4195_v21 = vsel %vm4128_vm0, %v9405_v63, 0.0  ;;  %vm4641_vm8 = vweird.f32 %v9409_v59 }
 0x46a   : > { %v4907_v62 = vmul.f32 %v4623_v29, %v4523_v25  ;;  %v4633_v28 = vsel %vm4632_vm5, %v9367_v2, %v4629_v20  ;;  %v4636_v38 = vmul.f32 %v9409_v59, %v4635_v26  ;;  %4196 = vadd.xlane.f32.xlu1 %v4195_v21  ;;  %v4286_v2 = vmul.f32 %v9405_v63, %v9405_v63  ;;  %vm4642_vm11 = vmor %vm4640_vm10, %vm4641_vm8 }
 0x46b   : > { %v4908_v55 = vmul.f32 %v4633_v28, %v4524_v53  ;;  %v4016_v40 = vpop.f32.mrf.mxu2  ;;  %v4495_v17 = vmax.f32 %v4463_v33, 0.0  ;;  %v4525_v26 = vsub.f32 %v9065_v24, %v9343_v32  ;;  %vm4650_vm14 = vweird.f32 %v9403_v41 }
 0x46c   : > { %vm4939_vm7 = vcmp.ge.f32.partialorder %v4907_v62, 0.0  ;;  %v4971_v11 = vmul.f32 0.2, %v4907_v62  ;;  %v4105_v39 = vpop.f32.mrf.mxu3  ;;  %v4017_v9 = vadd.f32 %v4016_v40, %v3928_v47  ;;  %v4155_v44 = vpop.xlane.xlu2 %4154  ;;  %v4637_v31 = vmul.f32 0.5, %v4636_v38 }
 0x46d   : > { %vm4940_vm9 = vcmp.ge.f32.partialorder %v4908_v55, 0.0  ;;  %v4972_v22 = vmul.f32 0.2, %v4908_v55  ;;  %v3841_v58 = vpop.f32.mrf.mxu0  ;;  %v9429_v34 = vadd.f32 1e-05, %v4495_v17  ;;  %v4362_v18 = vsel %vm4128_vm0, %v4286_v2, 0.0 }
 0x46e   : > { %v5003_v7 = vsel %vm4939_vm7, %v4907_v62, %v4971_v11  ;;  %v3930_v23 = vpop.f32.mrf.mxu1  ;;  %v9431_v57 = vadd.f32 %v4105_v39, %v4017_v9  ;;  %v7109_v48 = vpop.eup %7108  ;;  %v4638_v43 = vsub.f32 1.5, %v4637_v31  ;;  %4363 = vadd.xlane.f32.xlu0 %v4362_v18  ;;  %v9435_v29 = vmul.f32 %v9241_v30, %v4155_v44 }
 0x46f   : > { %v5035_v51 = vpack.c.bf16 %v5003_v7, %v5003_v7  ;;  %v5004_v25 = vsel %vm4940_vm9, %v4908_v55, %v4972_v22  ;;  %v3842_v20 = vadd.f32 %v3841_v58, %v8834_v36  ;;  %v4322_v50 = vpop.xlane.xlu1 %4321  ;;  %v4645_v53 = vmul.f32 %v7109_v48, %v9403_v41 }
 0x470   : > { %v5036_v62 = vpack.c.bf16 %v5004_v25, %v5004_v25  ;;  %7110 = vrsqrt.f32 %v9429_v34  ;;  %v4639_v28 = vmul.f32 %v9409_v59, %v4638_v43  ;;  %v4432_v47 = vmul.f32 %v9435_v29, %v9435_v29 }
 0x471   : > { %5068 = vst.msk [vmem:[%s9305_s30 + $0xc] sm:$0xf] %vm5064_vm6, %v5035_v51  ;;  %v4646_v36 = vmul.f32 %v7109_v48, %v4645_v53  ;;  %v3931_v33 = vadd.f32 %v3930_v23, %v3842_v20  ;;  %v4400_v21 = vmul.f32 %v4322_v50, %v9241_v30  ;;  %v4198_v11 = vsel %vm4128_vm0, %v9431_v57, 0.0 }
 0x472   : > { %5069 = vst.msk [vmem:[%s9305_s30 + $0x10] sm:$0xf] %vm5064_vm6, %v5036_v62  ;;  %v4643_v24 = vsel %vm4642_vm11, %v9409_v59, %v4639_v28  ;;  %4199 = vadd.xlane.f32.xlu2 %v4198_v11  ;;  %v4287_v55 = vmul.f32 %v9431_v57, %v9431_v57  ;;  %vm4651_vm12 = vweird.f32 %v7109_v48  ;;  %v4526_v18 = vsub.f32 %v9073_v52, %v9361_v60 }
 0x473   : > { %v4019_v32 = vpop.f32.mrf.mxu2  ;;  %v4909_v38 = vmul.f32 %v4643_v24, %v4525_v26  ;;  %v4647_v40 = vmul.f32 0.5, %v4646_v36  ;;  %v4464_v39 = vsub.f32 %v4400_v21, %v4432_v47  ;;  %vm4652_vm15 = vmor %vm4650_vm14, %vm4651_vm12  ;;  %vm4660_vm1 = vweird.f32 %v9429_v34 }
 0x474   : > { %v4108_v61 = vpop.f32.mrf.mxu3  ;;  %v4020_v17 = vadd.f32 %v4019_v32, %v3931_v33  ;;  %v4158_v9 = vpop.xlane.xlu0 %4157  ;;  %v4365_v2 = vsel %vm4128_vm0, %v4287_v55, 0.0 }
 0x475   : > { %v9460_v44 = vmul.f32 %v9241_v30, %v4158_v9  ;;  %v3843_v7 = vpop.f32.mrf.mxu0  ;;  %vm4941_vm13 = vcmp.ge.f32.partialorder %v4909_v38, 0.0  ;;  %v4973_v31 = vmul.f32 0.2, %v4909_v38  ;;  %v4648_v58 = vsub.f32 1.5, %v4647_v40  ;;  %4366 = vadd.xlane.f32.xlu1 %v4365_v2 }
 0x476   : > { %v3932_v22 = vpop.f32.mrf.mxu1  ;;  %v7111_v59 = vpop.eup %7110  ;;  %v4496_v23 = vmax.f32 %v4464_v39, 0.0  ;;  %v9465_v43 = vadd.f32 %v4108_v61, %v4020_v17  ;;  %v3844_v52 = vadd.f32 %v3843_v7, %v8861_v19 }
 0x477   : > { %v4325_v51 = vpop.xlane.xlu2 %4324  ;;  %v4655_v25 = vmul.f32 %v7111_v59, %v9429_v34  ;;  %v4433_v20 = vmul.f32 %v9460_v44, %v9460_v44  ;;  %v5005_v50 = vsel %vm4941_vm13, %v4909_v38, %v4973_v31  ;;  %v4649_v62 = vmul.f32 %v7109_v48, %v4648_v58 }
 0x478   : > { %v9470_v53 = vadd.f32 1e-05, %v4496_v23  ;;  %v5037_v26 = vpack.c.bf16 %v5005_v50, %v5005_v50  ;;  %v4401_v60 = vmul.f32 %v4325_v51, %v9241_v30  ;;  %v4201_v36 = vsel %vm4128_vm0, %v9465_v43, 0.0 }
 0x479   : > { %v4656_v28 = vmul.f32 %v7111_v59, %v4655_v25  ;;  %v4653_v47 = vsel %vm4652_vm15, %v7109_v48, %v4649_v62  ;;  %4202 = vadd.xlane.f32.xlu0 %v4201_v36  ;;  %vm4661_vm2 = vweird.f32 %v7111_v59  ;;  %v3933_v19 = vadd.f32 %v3932_v22, %v3844_v52 }
 0x47a   : > { %7112 = vrsqrt.f32 %v9470_v53  ;;  %5070 = vst.msk [vmem:[%s9305_s30 + $0x14] sm:$0xf] %vm5064_vm6, %v5037_v26  ;;  %v4910_v33 = vmul.f32 %v4653_v47, %v4526_v18  ;;  %v4465_v21 = vsub.f32 %v4401_v60, %v4433_v20  ;;  %v4288_v48 = vmul.f32 %v9465_v43, %v9465_v43  ;;  %vm4662_vm4 = vmor %vm4660_vm1, %vm4661_vm2 }
 0x47b   : > { %v4657_v41 = vmul.f32 0.5, %v4656_v28  ;;  %v4021_v11 = vpop.f32.mrf.mxu2  ;;  %v4527_v20 = vsub.f32 %v9105_v10, %v9390_v3  ;;  %vm4670_vm8 = vweird.f32 %v9470_v53 }
 0x47c   : > { %v4110_v24 = vpop.f32.mrf.mxu3  ;;  %v4161_v32 = vpop.xlane.xlu1 %4160  ;;  %vm4942_vm3 = vcmp.ge.f32.partialorder %v4910_v33, 0.0  ;;  %v4974_v61 = vmul.f32 0.2, %v4910_v33  ;;  %v4497_v38 = vmax.f32 %v4465_v21, 0.0  ;;  %v4022_v17 = vadd.f32 %v4021_v11, %v3933_v19 }
 0x47d   : > { %v4658_v55 = vsub.f32 1.5, %v4657_v41  ;;  %v3846_v40 = vpop.f32.mrf.mxu0  ;;  %v4368_v9 = vsel %vm4128_vm0, %v4288_v48, 0.0  ;;  %v9485_v2 = vmul.f32 %v9241_v30, %v4161_v32 }
 0x47e   : > { %v3935_v39 = vpop.f32.mrf.mxu1  ;;  %v3847_v7 = vadd.f32 %v3846_v40, %v8864_v14  ;;  %v4328_v22 = vpop.xlane.xlu0 %4327  ;;  %v5006_v31 = vsel %vm4942_vm3, %v4910_v33, %v4974_v61  ;;  %v9488_v23 = vadd.f32 1e-05, %v4497_v38  ;;  %4369 = vadd.xlane.f32.xlu2 %v4368_v9  ;;  %v9496_v50 = vadd.f32 %v4110_v24, %v4022_v17 }
 0x47f   : > { %v4659_v58 = vmul.f32 %v7111_v59, %v4658_v55  ;;  %v4402_v51 = vmul.f32 %v4328_v22, %v9241_v30  ;;  %v5038_v25 = vpack.c.bf16 %v5006_v31, %v5006_v31  ;;  %v4434_v14 = vmul.f32 %v9485_v2, %v9485_v2 }
 0x480   : > { %v7113_v18 = vpop.eup %7112  ;;  %7114 = vrsqrt.f32 %v9488_v23  ;;  %v3936_v52 = vadd.f32 %v3935_v39, %v3847_v7  ;;  %v4204_v3 = vsel %vm4128_vm0, %v9496_v50, 0.0  ;;  %v4289_v36 = vmul.f32 %v9496_v50, %v9496_v50 }
 0x481   : > { %v4663_v62 = vsel %vm4662_vm4, %v7111_v59, %v4659_v58  ;;  %v4665_v26 = vmul.f32 %v7113_v18, %v9470_v53  ;;  %5071 = vst.msk [vmem:[%s9305_s30 + $0x18] sm:$0xf] %vm5064_vm6, %v5038_v25  ;;  %v4466_v60 = vsub.f32 %v4402_v51, %v4434_v14  ;;  %4205 = vadd.xlane.f32.xlu1 %v4204_v3  ;;  %vm4671_vm7 = vweird.f32 %v7113_v18 }
 0x482   : > { %v4911_v28 = vmul.f32 %v4663_v62, %v4527_v20  ;;  %v4371_v24 = vsel %vm4128_vm0, %v4289_v36, 0.0  ;;  %v4528_v25 = vsub.f32 %v9113_v16, %v9435_v29  ;;  %vm4672_vm9 = vmor %vm4670_vm8, %vm4671_vm7  ;;  %vm4680_vm12 = vweird.f32 %v9488_v23 }
 0x483   : > { %v4666_v10 = vmul.f32 %v7113_v18, %v4665_v26  ;;  %v4024_v34 = vpop.f32.mrf.mxu2  ;;  %v4498_v33 = vmax.f32 %v4466_v60, 0.0  ;;  %4372 = vadd.xlane.f32.xlu0 %v4371_v24 }
 0x484   : > { %v4113_v47 = vpop.f32.mrf.mxu3  ;;  %vm4943_vm5 = vcmp.ge.f32.partialorder %v4911_v28, 0.0  ;;  %v4975_v59 = vmul.f32 0.2, %v4911_v28  ;;  %v4025_v41 = vadd.f32 %v4024_v34, %v3936_v52  ;;  %v4164_v21 = vpop.xlane.xlu2 %4163 }
 0x485   : > { %v4667_v11 = vmul.f32 0.5, %v4666_v10  ;;  %v9510_v19 = vmul.f32 %v9241_v30, %v4164_v21  ;;  %v3848_v48 = vpop.f32.mrf.mxu0  ;;  %v9512_v55 = vadd.f32 1e-05, %v4498_v33 }
 0x486   : > { %v3937_v32 = vpop.f32.mrf.mxu1  ;;  %v5007_v61 = vsel %vm4943_vm5, %v4911_v28, %v4975_v59  ;;  %v9514_v38 = vadd.f32 %v4113_v47, %v4025_v41  ;;  %v3849_v40 = vadd.f32 %v3848_v48, %v8891_v12  ;;  %v4331_v39 = vpop.xlane.xlu1 %4330 }
 0x487   : > { %v7115_v17 = vpop.eup %7114  ;;  %v5039_v9 = vpack.c.bf16 %v5007_v61, %v5007_v61  ;;  %v4668_v7 = vsub.f32 1.5, %v4667_v11  ;;  %v4435_v22 = vmul.f32 %v9510_v19, %v9510_v19  ;;  %7116 = vrsqrt.f32 %v9512_v55 }
 0x488   : > { %v4675_v31 = vmul.f32 %v7115_v17, %v9488_v23  ;;  %v4403_v51 = vmul.f32 %v4331_v39, %v9241_v30  ;;  %v4207_v12 = vsel %vm4128_vm0, %v9514_v38, 0.0  ;;  %v3938_v14 = vadd.f32 %v3937_v32, %v3849_v40 }
 0x489   : > { %5072 = vst.msk [vmem:[%s9305_s30 + $0x1c] sm:$0xf] %vm5064_vm6, %v5039_v9  ;;  %v4669_v58 = vmul.f32 %v7113_v18, %v4668_v7  ;;  %4208 = vadd.xlane.f32.xlu2 %v4207_v12  ;;  %v4290_v62 = vmul.f32 %v9514_v38, %v9514_v38  ;;  %vm4681_vm10 = vweird.f32 %v7115_v17  ;;  %v4529_v7 = vsub.f32 %v9145_v45, %v9460_v44 }
 0x48a   : > { %v4676_v20 = vmul.f32 %v7115_v17, %v4675_v31  ;;  %v4467_v28 = vsub.f32 %v4403_v51, %v4435_v22  ;;  %vm4682_vm13 = vmor %vm4680_vm12, %vm4681_vm10  ;;  %vm4690_vm1 = vweird.f32 %v9512_v55 }
 0x48b   : > { %v4673_v26 = vsel %vm4672_vm9, %v7113_v18, %v4669_v58  ;;  %v4026_v52 = vpop.f32.mrf.mxu2  ;;  %v4374_v34 = vsel %vm4128_vm0, %v4290_v62, 0.0 }
 0x48c   : > { %v4115_v60 = vpop.f32.mrf.mxu3  ;;  %v4912_v53 = vmul.f32 %v4673_v26, %v4528_v25  ;;  %v4677_v10 = vmul.f32 0.5, %v4676_v20  ;;  %v4027_v3 = vadd.f32 %v4026_v52, %v3938_v14  ;;  %v4167_v47 = vpop.xlane.xlu0 %4166  ;;  %v4499_v36 = vmax.f32 %v4467_v28, 0.0  ;;  %4375 = vadd.xlane.f32.xlu1 %v4374_v34 }
 0x48d   : > { %v9533_v16 = vmul.f32 %v9241_v30, %v4167_v47  ;;  %v3851_v29 = vpop.f32.mrf.mxu0  ;;  %v7117_v33 = vpop.eup %7116 }
 0x48e   : > { %v3940_v59 = vpop.f32.mrf.mxu1  ;;  %vm4944_vm11 = vcmp.ge.f32.partialorder %v4912_v53, 0.0  ;;  %v4976_v18 = vmul.f32 0.2, %v4912_v53  ;;  %v4678_v41 = vsub.f32 1.5, %v4677_v10  ;;  %v9535_v21 = vadd.f32 %v4115_v60, %v4027_v3  ;;  %v4334_v48 = vpop.xlane.xlu2 %4333 }
 0x48f   : > { %v4685_v11 = vmul.f32 %v7117_v33, %v9512_v55  ;;  %v9539_v24 = vadd.f32 1e-05, %v4499_v36  ;;  %v4436_v40 = vmul.f32 %v9533_v16, %v9533_v16  ;;  %v3852_v39 = vadd.f32 %v3851_v29, %v8894_v6 }
 0x490   : > { %v5008_v32 = vsel %vm4944_vm11, %v4912_v53, %v4976_v18  ;;  %v4679_v61 = vmul.f32 %v7115_v17, %v4678_v41  ;;  %v4404_v58 = vmul.f32 %v4334_v48, %v9241_v30  ;;  %v4210_v51 = vsel %vm4128_vm0, %v9535_v21, 0.0 }
 0x491   : > { %v5040_v9 = vpack.c.bf16 %v5008_v32, %v5008_v32  ;;  %v4686_v23 = vmul.f32 %v7117_v33, %v4685_v11  ;;  %7118 = vrsqrt.f32 %v9539_v24  ;;  %v3941_v31 = vadd.f32 %v3940_v59, %v3852_v39  ;;  %4211 = vadd.xlane.f32.xlu0 %v4210_v51 }
 0x492   : > { %v4683_v22 = vsel %vm4682_vm13, %v7115_v17, %v4679_v61  ;;  %v4291_v45 = vmul.f32 %v9535_v21, %v9535_v21  ;;  %vm4691_vm14 = vweird.f32 %v7117_v33  ;;  %v4468_v44 = vsub.f32 %v4404_v58, %v4436_v40 }
 0x493   : > { %5073 = vst.msk [vmem:[%s9305_s30 + $0x20] sm:$0xf] %vm5064_vm6, %v5040_v9  ;;  %v4913_v12 = vmul.f32 %v4683_v22, %v4529_v7  ;;  %v4687_v6 = vmul.f32 0.5, %v4686_v23  ;;  %v4029_v25 = vpop.f32.mrf.mxu2  ;;  %v4530_v55 = vsub.f32 %v9153_v5, %v9485_v2  ;;  %vm4692_vm2 = vmor %vm4690_vm1, %vm4691_vm14  ;;  %vm4700_vm5 = vweird.f32 %v9539_v24 }
 0x494   : > { %v4118_v20 = vpop.f32.mrf.mxu3  ;;  %v4030_v14 = vadd.f32 %v4029_v25, %v3941_v31  ;;  %v4170_v17 = vpop.xlane.xlu1 %4169  ;;  %v4377_v28 = vsel %vm4128_vm0, %v4291_v45, 0.0  ;;  %v4500_v53 = vmax.f32 %v4468_v44, 0.0 }
 0x495   : > { %vm4945_vm15 = vcmp.ge.f32.partialorder %v4913_v12, 0.0  ;;  %v4977_v62 = vmul.f32 0.2, %v4913_v12  ;;  %v4688_v26 = vsub.f32 1.5, %v4687_v6  ;;  %v3853_v52 = vpop.f32.mrf.mxu0  ;;  %4378 = vadd.xlane.f32.xlu2 %v4377_v28  ;;  %v9558_v10 = vmul.f32 %v9241_v30, %v4170_v17 }
 0x496   : > { %v3942_v60 = vpop.f32.mrf.mxu1  ;;  %v3854_v3 = vadd.f32 %v3853_v52, %v8921_v4  ;;  %v4337_v34 = vpop.xlane.xlu0 %4336  ;;  %v9561_v59 = vadd.f32 %v4118_v20, %v4030_v14  ;;  %v9568_v48 = vadd.f32 1e-05, %v4500_v53 }
 0x497   : > { %v7119_v47 = vpop.eup %7118  ;;  %v5009_v36 = vsel %vm4945_vm15, %v4913_v12, %v4977_v62  ;;  %v4689_v29 = vmul.f32 %v7117_v33, %v4688_v26  ;;  %v4405_v18 = vmul.f32 %v4337_v34, %v9241_v30  ;;  %v4437_v4 = vmul.f32 %v9558_v10, %v9558_v10 }
 0x498   : > { %v5041_v41 = vpack.c.bf16 %v5009_v36, %v5009_v36  ;;  %v4695_v11 = vmul.f32 %v7119_v47, %v9539_v24  ;;  %7120 = vrsqrt.f32 %v9568_v48  ;;  %v3943_v39 = vadd.f32 %v3942_v60, %v3854_v3 }
 0x499   : > { %v4693_v32 = vsel %vm4692_vm2, %v7117_v33, %v4689_v29  ;;  %v4469_v9 = vsub.f32 %v4405_v18, %v4437_v4  ;;  %v4213_v5 = vsel %vm4128_vm0, %v9561_v59, 0.0  ;;  %v4292_v23 = vmul.f32 %v9561_v59, %v9561_v59 }
 0x49a   : > { %5074 = vst.msk [vmem:[%s9305_s30 + $0x24] sm:$0xf] %vm5064_vm6, %v5041_v41  ;;  %v4914_v61 = vmul.f32 %v4693_v32, %v4530_v55  ;;  %v4696_v40 = vmul.f32 %v7119_v47, %v4695_v11  ;;  %4214 = vadd.xlane.f32.xlu1 %v4213_v5  ;;  %vm4701_vm4 = vweird.f32 %v7119_v47  ;;  %vm4710_vm10 = vweird.f32 %v9568_v48 }
 0x49b   : > { %v4031_v2 = vpop.f32.mrf.mxu2  ;;  %v4501_v51 = vmax.f32 %v4469_v9, 0.0  ;;  %v4380_v12 = vsel %vm4128_vm0, %v4292_v23, 0.0  ;;  %vm4702_vm7 = vmor %vm4700_vm5, %vm4701_vm4 }
 0x49c   : > { %v4120_v7 = vpop.f32.mrf.mxu3  ;;  %vm4946_vm3 = vcmp.ge.f32.partialorder %v4914_v61, 0.0  ;;  %v4978_v33 = vmul.f32 0.2, %v4914_v61  ;;  %v4697_v22 = vmul.f32 0.5, %v4696_v40  ;;  %v4032_v31 = vadd.f32 %v4031_v2, %v3943_v39  ;;  %v4173_v58 = vpop.xlane.xlu2 %4172  ;;  %4381 = vadd.xlane.f32.xlu0 %v4380_v12 }
 0x49d   : > { %v9581_v6 = vmul.f32 %v9241_v30, %v4173_v58  ;;  %v3856_v25 = vpop.f32.mrf.mxu0  ;;  %v9586_v26 = vadd.f32 1e-05, %v4501_v51  ;;  %v4532_v12 = vsub.f32 %v9193_v0, %v9533_v16 }
 0x49e   : > { %v5010_v20 = vsel %vm4946_vm3, %v4914_v61, %v4978_v33  ;;  %v4698_v45 = vsub.f32 1.5, %v4697_v22  ;;  %v9583_v44 = vadd.f32 %v4120_v7, %v4032_v31  ;;  %v3857_v14 = vadd.f32 %v3856_v25, %v8924_v27  ;;  %v4340_v17 = vpop.xlane.xlu1 %4339  ;;  %v3945_v52 = vpop.f32.mrf.mxu1 }
 0x49f   : > { %v5042_v62 = vpack.c.bf16 %v5010_v20, %v5010_v20  ;;  %v4438_v28 = vmul.f32 %v9581_v6, %v9581_v6  ;;  %v7121_v60 = vpop.eup %7120  ;;  %v4406_v3 = vmul.f32 %v4340_v17, %v9241_v30  ;;  %v4531_v27 = vsub.f32 %v9185_v35, %v9510_v19 }
 0x4a0   : > { %v4699_v53 = vmul.f32 %v7119_v47, %v4698_v45  ;;  %v4216_v34 = vsel %vm4128_vm0, %v9583_v44, 0.0  ;;  %v4705_v36 = vmul.f32 %v7121_v60, %v9568_v48  ;;  %7122 = vrsqrt.f32 %v9586_v26 }
 0x4a1   : > { %5075 = vst.msk [vmem:[%s9305_s30 + $0x28] sm:$0xf] %vm5064_vm6, %v5042_v62  ;;  %4217 = vadd.xlane.f32.xlu2 %v4216_v34  ;;  %v3946_v18 = vadd.f32 %v3945_v52, %v3857_v14  ;;  %v4470_v24 = vsub.f32 %v4406_v3, %v4438_v28  ;;  %vm4711_vm9 = vweird.f32 %v7121_v60  ;;  %vm4720_vm14 = vweird.f32 %v9586_v26 }
 0x4a2   : > { %v4703_v29 = vsel %vm4702_vm7, %v7119_v47, %v4699_v53  ;;  %v4706_v55 = vmul.f32 %v7121_v60, %v4705_v36  ;;  %vm4712_vm11 = vmor %vm4710_vm10, %vm4711_vm9 }
 0x4a3   : > { %v4915_v41 = vmul.f32 %v4703_v29, %v4531_v27  ;;  %v4034_v11 = vpop.f32.mrf.mxu2  ;;  %v4502_v4 = vmax.f32 %v4470_v24, 0.0 }
 0x4a4   : > { %v4123_v32 = vpop.f32.mrf.mxu3  ;;  %v4035_v61 = vadd.f32 %v4034_v11, %v3946_v18  ;;  %v4176_v40 = vpop.xlane.xlu0 %4175  ;;  %v4707_v35 = vmul.f32 0.5, %v4706_v55 }
 0x4a5   : > { %vm4947_vm8 = vcmp.ge.f32.partialorder %v4915_v41, 0.0  ;;  %v4979_v39 = vmul.f32 0.2, %v4915_v41  ;;  %v9602_v19 = vmul.f32 %v9241_v30, %v4176_v40  ;;  %v3858_v9 = vpop.f32.mrf.mxu0  ;;  %v9604_v5 = vadd.f32 1e-05, %v4502_v4 }
 0x4a6   : > { %v9606_v2 = vadd.f32 %v4123_v32, %v4035_v61  ;;  %v3859_v47 = vadd.f32 %v3858_v9, %v8950_v49  ;;  %v4343_v7 = vpop.xlane.xlu2 %4342  ;;  %v7123_v23 = vpop.eup %7122  ;;  %v4708_v22 = vsub.f32 1.5, %v4707_v35  ;;  %v4533_v9 = vsub.f32 %v9225_v1, %v9558_v10 }
 0x4a7   : > { %v5011_v33 = vsel %vm4947_vm8, %v4915_v41, %v4979_v39  ;;  %v4439_v31 = vmul.f32 %v9602_v19, %v9602_v19  ;;  %v4715_v51 = vmul.f32 %v7123_v23, %v9586_v26  ;;  %7124 = vrsqrt.f32 %v9604_v5  ;;  %v3947_v49 = vpop.f32.mrf.mxu1 }
 0x4a8   : > { %v5043_v58 = vpack.c.bf16 %v5011_v33, %v5011_v33  ;;  %v4709_v25 = vmul.f32 %v7121_v60, %v4708_v22  ;;  %v4407_v20 = vmul.f32 %v4343_v7, %v9241_v30  ;;  %v3948_v14 = vadd.f32 %v3947_v49, %v3859_v47 }
 0x4a9   : > { %v4716_v45 = vmul.f32 %v7123_v23, %v4715_v51  ;;  %v4219_v17 = vsel %vm4128_vm0, %v9606_v2, 0.0  ;;  %v4294_v62 = vmul.f32 %v9606_v2, %v9606_v2  ;;  %vm4721_vm12 = vweird.f32 %v7123_v23 }
 0x4aa   : > { %5076 = vst.msk [vmem:[%s9305_s30 + $0x2c] sm:$0xf] %vm5064_vm6, %v5043_v58  ;;  %v4713_v28 = vsel %vm4712_vm11, %v7121_v60, %v4709_v25  ;;  %v4471_v52 = vsub.f32 %v4407_v20, %v4439_v31  ;;  %4220 = vadd.xlane.f32.xlu0 %v4219_v17  ;;  %vm4722_vm15 = vmor %vm4720_vm14, %vm4721_vm12  ;;  %vm4730_vm3 = vweird.f32 %v9604_v5 }
 0x4ab   : > { %v4036_v0 = vpop.f32.mrf.mxu2  ;;  %v4916_v16 = vmul.f32 %v4713_v28, %v4532_v12  ;;  %v4717_v48 = vmul.f32 0.5, %v4716_v45  ;;  %v4386_v3 = vsel %vm4128_vm0, %v4294_v62, 0.0  ;;  %v4293_v45 = vmul.f32 %v9583_v44, %v9583_v44 }
 0x4ac   : > { %v4037_v53 = vadd.f32 %v4036_v0, %v3948_v14  ;;  %v4179_v34 = vpop.xlane.xlu1 %4178  ;;  %v4503_v27 = vmax.f32 %v4471_v52, 0.0  ;;  %v4125_v36 = vpop.f32.mrf.mxu3  ;;  %4387 = vadd.xlane.f32.xlu2 %v4386_v3  ;;  %v4534_v0 = vsub.f32 %v9233_v13, %v9581_v6 }
 0x4ad   : > { %v9625_v29 = vmul.f32 %v9241_v30, %v4179_v34  ;;  %v7125_v18 = vpop.eup %7124  ;;  %vm4948_vm13 = vcmp.ge.f32.partialorder %v4916_v16, 0.0  ;;  %v4980_v24 = vmul.f32 0.2, %v4916_v16  ;;  %v4718_v60 = vsub.f32 1.5, %v4717_v48 }
 0x4ae   : > { %v9627_v41 = vadd.f32 %v4125_v36, %v4037_v53  ;;  %v4346_v55 = vpop.xlane.xlu0 %4345  ;;  %v4725_v11 = vmul.f32 %v7125_v18, %v9604_v5  ;;  %v9630_v32 = vadd.f32 1e-05, %v4503_v27  ;;  %vm4731_vm1 = vweird.f32 %v7125_v18 }
 0x4af   : > { %v4440_v4 = vmul.f32 %v9625_v29, %v9625_v29  ;;  %v5012_v61 = vsel %vm4948_vm13, %v4916_v16, %v4980_v24  ;;  %v4719_v40 = vmul.f32 %v7123_v23, %v4718_v60  ;;  %v4408_v39 = vmul.f32 %v4346_v55, %v9241_v30  ;;  %vm4732_vm4 = vmor %vm4730_vm3, %vm4731_vm1 }
 0x4b0   : > { %v5044_v35 = vpack.c.bf16 %v5012_v61, %v5012_v61  ;;  %v4726_v47 = vmul.f32 %v7125_v18, %v4725_v11  ;;  %7126 = vrsqrt.f32 %v9630_v32  ;;  %v4222_v22 = vsel %vm4128_vm0, %v9627_v41, 0.0 }
 0x4b1   : > { %v4723_v7 = vsel %vm4722_vm15, %v7123_v23, %v4719_v40  ;;  %v4472_v33 = vsub.f32 %v4408_v39, %v4440_v4  ;;  %v4295_v31 = vmul.f32 %v9627_v41, %v9627_v41  ;;  %4223 = vadd.xlane.f32.xlu1 %v4222_v22  ;;  %v4383_v34 = vsel %vm4128_vm0, %v4293_v45, 0.0 }
 0x4b2   : > { %5077 = vst.msk [vmem:[%s9305_s30 + $0x30] sm:$0xf] %vm5064_vm6, %v5044_v35  ;;  %v4917_v26 = vmul.f32 %v4723_v7, %v4533_v9  ;;  %v4727_v58 = vmul.f32 0.5, %v4726_v47  ;;  %v4535_v7 = vsub.f32 %v9246_v42, %v9602_v19 }
 0x4b3   : > { %v4504_v1 = vmax.f32 %v4472_v33, 0.0  ;;  %v4389_v10 = vsel %vm4128_vm0, %v4295_v31, 0.0  ;;  %vm4740_vm0 = vweird.f32 %v9630_v32 }
 0x4b4   : > { %v4182_v51 = vpop.xlane.xlu2 %4181  ;;  %vm4949_vm2 = vcmp.ge.f32.partialorder %v4917_v26, 0.0  ;;  %v4981_v12 = vmul.f32 0.2, %v4917_v26  ;;  %v4728_v23 = vsub.f32 1.5, %v4727_v58  ;;  %4390 = vadd.xlane.f32.xlu0 %v4389_v10 }
 0x4b5   : > { %v9648_v25 = vmul.f32 %v9241_v30, %v4182_v51  ;;  %v9650_v49 = vadd.f32 1e-05, %v4504_v1 }
 0x4b6   : > { %v4349_v20 = vpop.xlane.xlu1 %4348  ;;  %v7127_v14 = vpop.eup %7126  ;;  %v5013_v17 = vsel %vm4949_vm2, %v4917_v26, %v4981_v12  ;;  %v4729_v62 = vmul.f32 %v7125_v18, %v4728_v23 }
 0x4b7   : > { %v4441_v28 = vmul.f32 %v9648_v25, %v9648_v25  ;;  %v5045_v52 = vpack.c.bf16 %v5013_v17, %v5013_v17  ;;  %v4735_v16 = vmul.f32 %v7127_v14, %v9630_v32  ;;  %7128 = vrsqrt.f32 %v9650_v49 }
 0x4b8   : > { %v4733_v48 = vsel %vm4732_vm4, %v7125_v18, %v4729_v62  ;;  %v4409_v53 = vmul.f32 %v4349_v20, %v9241_v30  ;;  %vm4741_vm7 = vweird.f32 %v7127_v14  ;;  %vm4750_vm11 = vweird.f32 %v9650_v49 }
 0x4b9   : > { %5078 = vst.msk [vmem:[%s9305_s30 + $0x34] sm:$0xf] %vm5064_vm6, %v5045_v52  ;;  %v4918_v3 = vmul.f32 %v4733_v48, %v4534_v0  ;;  %v4736_v5 = vmul.f32 %v7127_v14, %v4735_v16  ;;  %4384 = vadd.xlane.f32.xlu1 %v4383_v34  ;;  %vm4742_vm8 = vmor %vm4740_vm0, %vm4741_vm7  ;;  %v4536_v62 = vsub.f32 %v9257_v46, %v9625_v29 }
 0x4ba   : > { %v4473_v27 = vsub.f32 %v4409_v53, %v4441_v28 }
 0x4bb   : > { %vm4950_vm5 = vcmp.ge.f32.partialorder %v4918_v3, 0.0  ;;  %v4982_v36 = vmul.f32 0.2, %v4918_v3  ;;  %v4737_v13 = vmul.f32 0.5, %v4736_v5 }
 0x4bc   : > { %v4185_v6 = vpop.xlane.xlu0 %4184  ;;  %v4505_v24 = vmax.f32 %v4473_v27, 0.0 }
 0x4bd   : > { %v9667_v60 = vmul.f32 %v9241_v30, %v4185_v6  ;;  %v7129_v18 = vpop.eup %7128  ;;  %v5014_v55 = vsel %vm4950_vm5, %v4918_v3, %v4982_v36  ;;  %v4738_v11 = vsub.f32 1.5, %v4737_v13 }
 0x4be   : > { %v4352_v4 = vpop.xlane.xlu2 %4351  ;;  %v5046_v61 = vpack.c.bf16 %v5014_v55, %v5014_v55  ;;  %v4745_v40 = vmul.f32 %v7129_v18, %v9650_v49  ;;  %v4569_v39 = vadd.f32 1e-05, %v4505_v24  ;;  %vm4751_vm9 = vweird.f32 %v7129_v18 }
 0x4bf   : > { %v4739_v35 = vmul.f32 %v7127_v14, %v4738_v11  ;;  %v4442_v9 = vmul.f32 %v9667_v60, %v9667_v60  ;;  %v4410_v47 = vmul.f32 %v4352_v4, %v9241_v30  ;;  %vm4752_vm12 = vmor %vm4750_vm11, %vm4751_vm9  ;;  %v4537_v55 = vsub.f32 %v9271_v15, %v9648_v25 }
 0x4c0   : > { %5079 = vst.msk [vmem:[%s9305_s30 + $0x38] sm:$0xf] %vm5064_vm6, %v5046_v61  ;;  %v4746_v33 = vmul.f32 %v7129_v18, %v4745_v40  ;;  %7130 = vrsqrt.f32 %v4569_v39  ;;  %vm4760_vm15 = vweird.f32 %v4569_v39 }
 0x4c1   : > { %v4743_v22 = vsel %vm4742_vm8, %v7127_v14, %v4739_v35  ;;  %v4474_v31 = vsub.f32 %v4410_v47, %v4442_v9 }
 0x4c2   : > { %v4919_v26 = vmul.f32 %v4743_v22, %v4535_v7  ;;  %v4747_v58 = vmul.f32 0.5, %v4746_v33 }
 0x4c3   : > { %v4506_v1 = vmax.f32 %v4474_v31, 0.0 }
 0x4c4   : > { %v4188_v32 = vpop.xlane.xlu1 %4187  ;;  %vm4951_vm10 = vcmp.ge.f32.partialorder %v4919_v26, 0.0  ;;  %v4983_v10 = vmul.f32 0.2, %v4919_v26  ;;  %v4748_v51 = vsub.f32 1.5, %v4747_v58 }
 0x4c5   : > { %v9679_v12 = vmul.f32 %v9241_v30, %v4188_v32  ;;  %v4570_v23 = vadd.f32 1e-05, %v4506_v1  ;;  %v4538_v1 = vsub.f32 %v9288_v37, %v9667_v60 }
 0x4c6   : > { %v4355_v20 = vpop.xlane.xlu0 %4354  ;;  %v7131_v42 = vpop.eup %7130  ;;  %v5015_v19 = vsel %vm4951_vm10, %v4919_v26, %v4983_v10  ;;  %v4749_v45 = vmul.f32 %v7129_v18, %v4748_v51 }
 0x4c7   : > { %v4443_v14 = vmul.f32 %v9679_v12, %v9679_v12  ;;  %v5047_v17 = vpack.c.bf16 %v5015_v19, %v5015_v19  ;;  %v4755_v28 = vmul.f32 %v7131_v42, %v4569_v39  ;;  %7132 = vrsqrt.f32 %v4570_v23 }
 0x4c8   : > { %v4753_v52 = vsel %vm4752_vm12, %v7129_v18, %v4749_v45  ;;  %v4411_v0 = vmul.f32 %v4355_v20, %v9241_v30  ;;  %vm4761_vm14 = vweird.f32 %v7131_v42  ;;  %vm4770_vm4 = vweird.f32 %v4570_v23 }
 0x4c9   : > { %5080 = vst.msk [vmem:[%s9305_s30 + $0x3c] sm:$0xf] %vm5064_vm6, %v5047_v17  ;;  %v4920_v16 = vmul.f32 %v4753_v52, %v4536_v62  ;;  %v4756_v48 = vmul.f32 %v7131_v42, %v4755_v28  ;;  %vm4762_vm1 = vmor %vm4760_vm15, %vm4761_vm14 }
 0x4ca   : > { %v4475_v53 = vsub.f32 %v4411_v0, %v4443_v14 }
 0x4cb   : > { %vm4952_vm13 = vcmp.ge.f32.partialorder %v4920_v16, 0.0  ;;  %v4984_v49 = vmul.f32 0.2, %v4920_v16  ;;  %v4757_v3 = vmul.f32 0.5, %v4756_v48 }
 0x4cc   : > { %v4507_v5 = vmax.f32 %v4475_v53, 0.0 }
 0x4cd   : > { %v7133_v34 = vpop.eup %7132  ;;  %v5016_v27 = vsel %vm4952_vm13, %v4920_v16, %v4984_v49  ;;  %v4758_v46 = vsub.f32 1.5, %v4757_v3  ;;  %v4191_v29 = vpop.xlane.xlu2 %4190  ;;  %v4539_v3 = vsub.f32 %v9311_v8, %v9679_v12 }
 0x4ce   : > { %v5048_v36 = vpack.c.bf16 %v5016_v27, %v5016_v27  ;;  %v4765_v13 = vmul.f32 %v7133_v34, %v4570_v23  ;;  %v4571_v6 = vadd.f32 1e-05, %v4507_v5  ;;  %v9691_v18 = vmul.f32 %v9241_v30, %v4191_v29 }
 0x4cf   : > { %v4759_v24 = vmul.f32 %v7131_v42, %v4758_v46  ;;  %v4358_v4 = vpop.xlane.xlu1 %4357  ;;  %vm4771_vm3 = vweird.f32 %v7133_v34 }
 0x4d0   : > { %5081 = vst.msk [vmem:[%s9305_s30 + $0x40] sm:$0xf] %vm5064_vm6, %v5048_v36  ;;  %v4766_v11 = vmul.f32 %v7133_v34, %v4765_v13  ;;  %7134 = vrsqrt.f32 %v4571_v6  ;;  %v4444_v40 = vmul.f32 %v9691_v18, %v9691_v18  ;;  %v4412_v35 = vmul.f32 %v4358_v4, %v9241_v30  ;;  %vm4772_vm5 = vmor %vm4770_vm4, %vm4771_vm3 }
 0x4d1   : > { %v4763_v61 = vsel %vm4762_vm1, %v7131_v42, %v4759_v24  ;;  %vm4780_vm8 = vweird.f32 %v4571_v6 }
 0x4d2   : > { %v4921_v9 = vmul.f32 %v4763_v61, %v4537_v55  ;;  %v4767_v39 = vmul.f32 0.5, %v4766_v11  ;;  %v4476_v47 = vsub.f32 %v4412_v35, %v4444_v40 }
 0x4d4   : > { %vm4953_vm2 = vcmp.ge.f32.partialorder %v4921_v9, 0.0  ;;  %v4985_v7 = vmul.f32 0.2, %v4921_v9  ;;  %v4768_v33 = vsub.f32 1.5, %v4767_v39  ;;  %v4508_v22 = vmax.f32 %v4476_v47, 0.0 }
 0x4d6   : > { %v7135_v15 = vpop.eup %7134  ;;  %v5017_v25 = vsel %vm4953_vm2, %v4921_v9, %v4985_v7  ;;  %v4769_v31 = vmul.f32 %v7133_v34, %v4768_v33  ;;  %v4194_v26 = vpop.xlane.xlu0 %4193  ;;  %v4572_v10 = vadd.f32 1e-05, %v4508_v22  ;;  %v4540_v33 = vsub.f32 %v9336_v54, %v9691_v18 }
 0x4d7   : > { %v5049_v58 = vpack.c.bf16 %v5017_v25, %v5017_v25  ;;  %v4775_v32 = vmul.f32 %v7135_v15, %v4571_v6  ;;  %v9703_v20 = vmul.f32 %v9241_v30, %v4194_v26  ;;  %vm4781_vm0 = vweird.f32 %v7135_v15 }
 0x4d8   : > { %v4773_v51 = vsel %vm4772_vm5, %v7133_v34, %v4769_v31  ;;  %7136 = vrsqrt.f32 %v4572_v10  ;;  %vm4782_vm9 = vmor %vm4780_vm8, %vm4781_vm0  ;;  %vm4790_vm12 = vweird.f32 %v4572_v10 }
 0x4d9   : > { %5082 = vst.msk [vmem:[%s9305_s30 + $0x44] sm:$0xf] %vm5064_vm6, %v5049_v58  ;;  %v4922_v42 = vmul.f32 %v4773_v51, %v4538_v1  ;;  %v4776_v19 = vmul.f32 %v7135_v15, %v4775_v32  ;;  %v4361_v45 = vpop.xlane.xlu2 %4360  ;;  %v4445_v23 = vmul.f32 %v9703_v20, %v9703_v20 }
 0x4da   : > { %v4413_v14 = vmul.f32 %v4361_v45, %v9241_v30 }
 0x4db   : > { %vm4954_vm7 = vcmp.ge.f32.partialorder %v4922_v42, 0.0  ;;  %v4986_v37 = vmul.f32 0.2, %v4922_v42  ;;  %v4777_v60 = vmul.f32 0.5, %v4776_v19 }
 0x4dc   : > { %v4477_v17 = vsub.f32 %v4413_v14, %v4445_v23 }
 0x4dd   : > { %v5018_v62 = vsel %vm4954_vm7, %v4922_v42, %v4986_v37  ;;  %v4778_v28 = vsub.f32 1.5, %v4777_v60  ;;  %v4197_v52 = vpop.xlane.xlu1 %4196 }
 0x4de   : > { %v5050_v0 = vpack.c.bf16 %v5018_v62, %v5018_v62  ;;  %v4509_v16 = vmax.f32 %v4477_v17, 0.0  ;;  %v9711_v48 = vmul.f32 %v9241_v30, %v4197_v52  ;;  %v7137_v53 = vpop.eup %7136  ;;  %v4541_v62 = vsub.f32 %v9369_v56, %v9703_v20 }
 0x4df   : > { %v4779_v49 = vmul.f32 %v7135_v15, %v4778_v28  ;;  %v4785_v5 = vmul.f32 %v7137_v53, %v4572_v10  ;;  %vm4791_vm11 = vweird.f32 %v7137_v53 }
 0x4e0   : > { %5083 = vst.msk [vmem:[%s9305_s30 + $0x48] sm:$0xf] %vm5064_vm6, %v5050_v0  ;;  %v4573_v34 = vadd.f32 1e-05, %v4509_v16  ;;  %v4446_v46 = vmul.f32 %v9711_v48, %v9711_v48  ;;  %vm4792_vm13 = vmor %vm4790_vm12, %vm4791_vm11 }
 0x4e1   : > { %v4783_v27 = vsel %vm4782_vm9, %v7135_v15, %v4779_v49  ;;  %v4364_v29 = vpop.xlane.xlu0 %4363  ;;  %v4786_v13 = vmul.f32 %v7137_v53, %v4785_v5 }
 0x4e2   : > { %v4923_v36 = vmul.f32 %v4783_v27, %v4539_v3  ;;  %7138 = vrsqrt.f32 %v4573_v34  ;;  %v4414_v24 = vmul.f32 %v4364_v29, %v9241_v30  ;;  %vm4800_vm1 = vweird.f32 %v4573_v34 }
 0x4e3   : > { %v4787_v55 = vmul.f32 0.5, %v4786_v13 }
 0x4e4   : > { %vm4955_vm10 = vcmp.ge.f32.partialorder %v4923_v36, 0.0  ;;  %v4987_v6 = vmul.f32 0.2, %v4923_v36  ;;  %v4478_v11 = vsub.f32 %v4414_v24, %v4446_v46 }
 0x4e5   : > { %v4200_v4 = vpop.xlane.xlu2 %4199  ;;  %v4788_v12 = vsub.f32 1.5, %v4787_v55 }
 0x4e6   : > { %v5019_v8 = vsel %vm4955_vm10, %v4923_v36, %v4987_v6  ;;  %v9721_v61 = vmul.f32 %v9241_v30, %v4200_v4  ;;  %v4510_v35 = vmax.f32 %v4478_v11, 0.0 }
 0x4e7   : > { %v5051_v40 = vpack.c.bf16 %v5019_v8, %v5019_v8  ;;  %v4789_v39 = vmul.f32 %v7137_v53, %v4788_v12  ;;  %v4542_v8 = vsub.f32 %v9405_v63, %v9711_v48 }
 0x4e8   : > { %v7139_v9 = vpop.eup %7138  ;;  %v4447_v47 = vmul.f32 %v9721_v61, %v9721_v61  ;;  %v4367_v7 = vpop.xlane.xlu1 %4366  ;;  %v4574_v15 = vadd.f32 1e-05, %v4510_v35 }
 0x4e9   : > { %5084 = vst.msk [vmem:[%s9305_s30 + $0x4c] sm:$0xf] %vm5064_vm6, %v5051_v40  ;;  %v4795_v22 = vmul.f32 %v7139_v9, %v4573_v34  ;;  %v4415_v25 = vmul.f32 %v4367_v7, %v9241_v30  ;;  %v4793_v31 = vsel %vm4792_vm13, %v7137_v53, %v4789_v39  ;;  %vm4801_vm15 = vweird.f32 %v7139_v9 }
 0x4ea   : > { %v4924_v26 = vmul.f32 %v4793_v31, %v4540_v33  ;;  %7140 = vrsqrt.f32 %v4574_v15  ;;  %vm4802_vm2 = vmor %vm4800_vm1, %vm4801_vm15  ;;  %vm4810_vm5 = vweird.f32 %v4574_v15 }
 0x4eb   : > { %v4796_v58 = vmul.f32 %v7139_v9, %v4795_v22  ;;  %v4479_v1 = vsub.f32 %v4415_v25, %v4447_v47 }
 0x4ec   : > { %vm4956_vm14 = vcmp.ge.f32.partialorder %v4924_v26, 0.0  ;;  %v4988_v32 = vmul.f32 0.2, %v4924_v26  ;;  %v4203_v51 = vpop.xlane.xlu0 %4202 }
 0x4ed   : > { %v4797_v10 = vmul.f32 0.5, %v4796_v58  ;;  %v4511_v42 = vmax.f32 %v4479_v1, 0.0  ;;  %v9731_v19 = vmul.f32 %v9241_v30, %v4203_v51 }
 0x4ee   : > { %v5020_v54 = vsel %vm4956_vm14, %v4924_v26, %v4988_v32 }
 0x4ef   : > { %v4798_v18 = vsub.f32 1.5, %v4797_v10  ;;  %v5052_v45 = vpack.c.bf16 %v5020_v54, %v5020_v54  ;;  %v4575_v23 = vadd.f32 1e-05, %v4511_v42  ;;  %v4448_v60 = vmul.f32 %v9731_v19, %v9731_v19 }
 0x4f0   : > { %v7141_v14 = vpop.eup %7140  ;;  %v4543_v10 = vsub.f32 %v9431_v57, %v9721_v61 }
 0x4f1   : > { %v4799_v37 = vmul.f32 %v7139_v9, %v4798_v18  ;;  %v4370_v17 = vpop.xlane.xlu2 %4369  ;;  %5085 = vst.msk [vmem:[%s9305_s30 + $0x50] sm:$0xf] %vm5064_vm6, %v5052_v45  ;;  %v4805_v28 = vmul.f32 %v7141_v14, %v4574_v15  ;;  %7142 = vrsqrt.f32 %v4575_v23  ;;  %vm4811_vm4 = vweird.f32 %v7141_v14 }
 0x4f2   : > { %v4416_v0 = vmul.f32 %v4370_v17, %v9241_v30  ;;  %vm4812_vm7 = vmor %vm4810_vm5, %vm4811_vm4  ;;  %vm4820_vm9 = vweird.f32 %v4575_v23 }
 0x4f3   : > { %v4803_v52 = vsel %vm4802_vm2, %v7139_v9, %v4799_v37  ;;  %v4806_v53 = vmul.f32 %v7141_v14, %v4805_v28 }
 0x4f4   : > { %v4925_v16 = vmul.f32 %v4803_v52, %v4541_v62  ;;  %v4480_v49 = vsub.f32 %v4416_v0, %v4448_v60  ;;  %v4206_v34 = vpop.xlane.xlu1 %4205 }
 0x4f5   : > { %v4807_v5 = vmul.f32 0.5, %v4806_v53  ;;  %v9741_v46 = vmul.f32 %v9241_v30, %v4206_v34 }
 0x4f6   : > { %vm4957_vm3 = vcmp.ge.f32.partialorder %v4925_v16, 0.0  ;;  %v4989_v3 = vmul.f32 0.2, %v4925_v16  ;;  %v4512_v27 = vmax.f32 %v4480_v49, 0.0  ;;  %v4373_v36 = vpop.xlane.xlu0 %4372 }
 0x4f7   : > { %v7143_v29 = vpop.eup %7142  ;;  %v4808_v20 = vsub.f32 1.5, %v4807_v5  ;;  %v4449_v11 = vmul.f32 %v9741_v46, %v9741_v46  ;;  %v4417_v4 = vmul.f32 %v4373_v36, %v9241_v30  ;;  %v4544_v5 = vsub.f32 %v9465_v43, %v9731_v19 }
 0x4f8   : > { %v5021_v56 = vsel %vm4957_vm3, %v4925_v16, %v4989_v3  ;;  %v4815_v24 = vmul.f32 %v7143_v29, %v4575_v23  ;;  %v4576_v6 = vadd.f32 1e-05, %v4512_v27  ;;  %vm4821_vm0 = vweird.f32 %v7143_v29 }
 0x4f9   : > { %v5053_v13 = vpack.c.bf16 %v5021_v56, %v5021_v56  ;;  %v4809_v55 = vmul.f32 %v7141_v14, %v4808_v20  ;;  %v4481_v35 = vsub.f32 %v4417_v4, %v4449_v11  ;;  %vm4822_vm10 = vmor %vm4820_vm9, %vm4821_vm0 }
 0x4fa   : > { %v4816_v12 = vmul.f32 %v7143_v29, %v4815_v24  ;;  %7144 = vrsqrt.f32 %v4576_v6  ;;  %vm4830_vm13 = vweird.f32 %v4576_v6 }
 0x4fb   : > { %5086 = vst.msk [vmem:[%s9305_s30 + $0x54] sm:$0xf] %vm5064_vm6, %v5053_v13  ;;  %v4813_v40 = vsel %vm4812_vm7, %v7141_v14, %v4809_v55  ;;  %v4513_v33 = vmax.f32 %v4481_v35, 0.0 }
 0x4fc   : > { %v4209_v9 = vpop.xlane.xlu2 %4208  ;;  %v4926_v39 = vmul.f32 %v4813_v40, %v4542_v8  ;;  %v4817_v47 = vmul.f32 0.5, %v4816_v12 }
 0x4fd   : > { %v9751_v7 = vmul.f32 %v9241_v30, %v4209_v9  ;;  %v4577_v25 = vadd.f32 1e-05, %v4513_v33  ;;  %v4545_v9 = vsub.f32 %v9496_v50, %v9741_v46 }
 0x4fe   : > { %vm4958_vm8 = vcmp.ge.f32.partialorder %v4926_v39, 0.0  ;;  %v4990_v22 = vmul.f32 0.2, %v4926_v39  ;;  %v4818_v15 = vsub.f32 1.5, %v4817_v47 }
 0x4ff   : > { %v4450_v63 = vmul.f32 %v9751_v7, %v9751_v7  ;;  %v4376_v48 = vpop.xlane.xlu1 %4375  ;;  %7146 = vrsqrt.f32 %v4577_v25  ;;  %vm4840_vm2 = vweird.f32 %v4577_v25 }
 0x500   : > { %v4418_v31 = vmul.f32 %v4376_v48, %v9241_v30  ;;  %v7145_v26 = vpop.eup %7144  ;;  %v5022_v58 = vsel %vm4958_vm8, %v4926_v39, %v4990_v22  ;;  %v4819_v1 = vmul.f32 %v7143_v29, %v4818_v15 }
 0x501   : > { %v5054_v32 = vpack.c.bf16 %v5022_v58, %v5022_v58  ;;  %v4825_v51 = vmul.f32 %v7145_v26, %v4576_v6  ;;  %vm4831_vm12 = vweird.f32 %v7145_v26 }
 0x502   : > { %v4823_v42 = vsel %vm4822_vm10, %v7143_v29, %v4819_v1  ;;  %v4482_v54 = vsub.f32 %v4418_v31, %v4450_v63  ;;  %vm4832_vm14 = vmor %vm4830_vm13, %vm4831_vm12 }
 0x503   : > { %5087 = vst.msk [vmem:[%s9305_s30 + $0x58] sm:$0xf] %vm5064_vm6, %v5054_v32  ;;  %v4927_v18 = vmul.f32 %v4823_v42, %v4543_v10  ;;  %v4826_v45 = vmul.f32 %v7145_v26, %v4825_v51  ;;  %v4546_v32 = vsub.f32 %v9514_v38, %v9751_v7 }
 0x504   : > { %v4514_v14 = vmax.f32 %v4482_v54, 0.0  ;;  %v4212_v37 = vpop.xlane.xlu0 %4211 }
 0x505   : > { %vm4959_vm11 = vcmp.ge.f32.partialorder %v4927_v18, 0.0  ;;  %v4991_v60 = vmul.f32 0.2, %v4927_v18  ;;  %v4827_v23 = vmul.f32 0.5, %v4826_v45  ;;  %v9762_v17 = vmul.f32 %v9241_v30, %v4212_v37  ;;  %v7147_v61 = vpop.eup %7146 }
 0x506   : > { %v4578_v57 = vadd.f32 1e-05, %v4514_v14  ;;  %v4835_v53 = vmul.f32 %v7147_v61, %v4577_v25  ;;  %vm4841_vm15 = vweird.f32 %v7147_v61 }
 0x507   : > { %v5023_v62 = vsel %vm4959_vm11, %v4927_v18, %v4991_v60  ;;  %v4828_v28 = vsub.f32 1.5, %v4827_v23  ;;  %v4451_v52 = vmul.f32 %v9762_v17, %v9762_v17  ;;  %vm4842_vm3 = vmor %vm4840_vm2, %vm4841_vm15 }
 0x508   : > { %v4379_v0 = vpop.xlane.xlu2 %4378  ;;  %v5055_v16 = vpack.c.bf16 %v5023_v62, %v5023_v62  ;;  %7148 = vrsqrt.f32 %v4578_v57  ;;  %v4836_v34 = vmul.f32 %v7147_v61, %v4835_v53  ;;  %vm4850_vm7 = vweird.f32 %v4578_v57 }
 0x509   : > { %v4829_v49 = vmul.f32 %v7145_v26, %v4828_v28  ;;  %v4419_v3 = vmul.f32 %v4379_v0, %v9241_v30  ;;  %v4547_v0 = vsub.f32 %v9535_v21, %v9762_v17 }
 0x50a   : > { %5088 = vst.msk [vmem:[%s9305_s30 + $0x5c] sm:$0xf] %vm5064_vm6, %v5055_v16  ;;  %v4837_v20 = vmul.f32 0.5, %v4836_v34 }
 0x50b   : > { %v4833_v27 = vsel %vm4832_vm14, %v7145_v26, %v4829_v49  ;;  %v4483_v29 = vsub.f32 %v4419_v3, %v4451_v52 }
 0x50c   : > { %v4928_v56 = vmul.f32 %v4833_v27, %v4544_v5  ;;  %v4838_v6 = vsub.f32 1.5, %v4837_v20 }
 0x50d   : > { %v4515_v36 = vmax.f32 %v4483_v29, 0.0  ;;  %v4215_v13 = vpop.xlane.xlu1 %4214 }
 0x50e   : > { %v7149_v24 = vpop.eup %7148  ;;  %vm4960_vm1 = vcmp.ge.f32.partialorder %v4928_v56, 0.0  ;;  %v4992_v55 = vmul.f32 0.2, %v4928_v56  ;;  %v9772_v11 = vmul.f32 %v9241_v30, %v4215_v13  ;;  %v4839_v12 = vmul.f32 %v7147_v61, %v4838_v6 }
 0x50f   : > { %v4845_v4 = vmul.f32 %v7149_v24, %v4578_v57  ;;  %v4579_v8 = vadd.f32 1e-05, %v4515_v36  ;;  %v4382_v43 = vpop.xlane.xlu0 %4381  ;;  %vm4851_vm5 = vweird.f32 %v7149_v24 }
 0x510   : > { %v5024_v19 = vsel %vm4960_vm1, %v4928_v56, %v4992_v55  ;;  %v4452_v40 = vmul.f32 %v9772_v11, %v9772_v11  ;;  %v4843_v47 = vsel %vm4842_vm3, %v7147_v61, %v4839_v12  ;;  %v4420_v33 = vmul.f32 %v4382_v43, %v9241_v30  ;;  %vm4852_vm0 = vmor %vm4850_vm7, %vm4851_vm5 }
 0x511   : > { %v5056_v35 = vpack.c.bf16 %v5024_v19, %v5024_v19  ;;  %v4846_v39 = vmul.f32 %v7149_v24, %v4845_v4  ;;  %7150 = vrsqrt.f32 %v4579_v8  ;;  %v4929_v22 = vmul.f32 %v4843_v47, %v4545_v9 }
 0x512   : > { %v4484_v63 = vsub.f32 %v4420_v33, %v4452_v40  ;;  %vm4860_vm10 = vweird.f32 %v4579_v8  ;;  %v4548_v43 = vsub.f32 %v9561_v59, %v9772_v11 }
 0x513   : > { %5089 = vst.msk [vmem:[%s9305_s30 + $0x60] sm:$0xf] %vm5064_vm6, %v5056_v35  ;;  %v4847_v15 = vmul.f32 0.5, %v4846_v39  ;;  %vm4961_vm4 = vcmp.ge.f32.partialorder %v4929_v22, 0.0  ;;  %v4993_v48 = vmul.f32 0.2, %v4929_v22 }
 0x514   : > { %v4516_v31 = vmax.f32 %v4484_v63, 0.0  ;;  %v4218_v26 = vpop.xlane.xlu2 %4217 }
 0x515   : > { %v4848_v25 = vsub.f32 1.5, %v4847_v15  ;;  %v5025_v46 = vsel %vm4961_vm4, %v4929_v22, %v4993_v48 }
 0x516   : > { %v5057_v1 = vpack.c.bf16 %v5025_v46, %v5025_v46  ;;  %v4580_v51 = vadd.f32 1e-05, %v4516_v31 }
 0x517   : > { %v7151_v50 = vpop.eup %7150  ;;  %v4849_v58 = vmul.f32 %v7149_v24, %v4848_v25 }
 0x518   : > { %v4855_v10 = vmul.f32 %v7151_v50, %v4579_v8  ;;  %5090 = vst.msk [vmem:[%s9305_s30 + $0x64] sm:$0xf] %vm5064_vm6, %v5057_v1  ;;  %7152 = vrsqrt.f32 %v4580_v51  ;;  %vm4861_vm9 = vweird.f32 %v7151_v50  ;;  %vm4870_vm14 = vweird.f32 %v4580_v51 }
 0x519   : > { %v4853_v42 = vsel %vm4852_vm0, %v7149_v24, %v4849_v58  ;;  %vm4862_vm11 = vmor %vm4860_vm10, %vm4861_vm9  ;;  %v9803_v8 = vmul.f32 %v9241_v30, %v4218_v26 }
 0x51a   : > { %v4930_v54 = vmul.f32 %v4853_v42, %v4546_v32  ;;  %v4856_v18 = vmul.f32 %v7151_v50, %v4855_v10 }
 0x51b   : > { %v4453_v47 = vmul.f32 %v9803_v8, %v9803_v8 }
 0x51c   : > { %vm4962_vm8 = vcmp.ge.f32.partialorder %v4930_v54, 0.0  ;;  %v4994_v45 = vmul.f32 0.2, %v4930_v54  ;;  %v4857_v14 = vmul.f32 0.5, %v4856_v18 }
 0x51d   : > { %v4221_v37 = vpop.xlane.xlu0 %4220 }
 0x51e   : > { %v9787_v60 = vmul.f32 %v9241_v30, %v4221_v37  ;;  %v5026_v23 = vsel %vm4962_vm8, %v4930_v54, %v4994_v45  ;;  %v4858_v57 = vsub.f32 1.5, %v4857_v14  ;;  %v7153_v28 = vpop.eup %7152 }
 0x51f   : > { %v4388_v38 = vpop.xlane.xlu2 %4387  ;;  %v5058_v7 = vpack.c.bf16 %v5026_v23, %v5026_v23  ;;  %v4865_v16 = vmul.f32 %v7153_v28, %v4580_v51  ;;  %vm4871_vm13 = vweird.f32 %v7153_v28 }
 0x520   : > { %v4454_v61 = vmul.f32 %v9787_v60, %v9787_v60  ;;  %v4422_v62 = vmul.f32 %v4388_v38, %v9241_v30  ;;  %v4859_v52 = vmul.f32 %v7151_v50, %v4858_v57  ;;  %vm4872_vm15 = vmor %vm4870_vm14, %vm4871_vm13  ;;  %v4550_v1 = vsub.f32 %v9606_v2, %v9787_v60 }
 0x521   : > { %5091 = vst.msk [vmem:[%s9305_s30 + $0x68] sm:$0xf] %vm5064_vm6, %v5058_v7  ;;  %v4866_v5 = vmul.f32 %v7153_v28, %v4865_v16 }
 0x522   : > { %v4486_v53 = vsub.f32 %v4422_v62, %v4454_v61  ;;  %v4863_v49 = vsel %vm4862_vm11, %v7151_v50, %v4859_v52 }
 0x523   : > { %v4931_v3 = vmul.f32 %v4863_v49, %v4547_v0  ;;  %v4867_v56 = vmul.f32 0.5, %v4866_v5  ;;  %v4549_v0 = vsub.f32 %v9583_v44, %v9803_v8 }
 0x524   : > { %v4518_v34 = vmax.f32 %v4486_v53, 0.0  ;;  %v4224_v27 = vpop.xlane.xlu1 %4223 }
 0x525   : > { %vm4963_vm12 = vcmp.ge.f32.partialorder %v4931_v3, 0.0  ;;  %v4995_v29 = vmul.f32 0.2, %v4931_v3  ;;  %v9797_v36 = vmul.f32 %v9241_v30, %v4224_v27  ;;  %v4868_v55 = vsub.f32 1.5, %v4867_v56 }
 0x526   : > { %v4582_v20 = vadd.f32 1e-05, %v4518_v34 }
 0x527   : > { %v4391_v13 = vpop.xlane.xlu0 %4390  ;;  %v5027_v24 = vsel %vm4963_vm12, %v4931_v3, %v4995_v29  ;;  %v4455_v17 = vmul.f32 %v9797_v36, %v9797_v36  ;;  %v4869_v4 = vmul.f32 %v7153_v28, %v4868_v55  ;;  %v4551_v60 = vsub.f32 %v9627_v41, %v9797_v36 }
 0x528   : > { %7154 = vrsqrt.f32 %v4582_v20  ;;  %v5059_v21 = vpack.c.bf16 %v5027_v24, %v5027_v24  ;;  %v4423_v6 = vmul.f32 %v4391_v13, %v9241_v30  ;;  %vm4890_vm3 = vweird.f32 %v4582_v20 }
 0x529   : > { %v4873_v12 = vsel %vm4872_vm15, %v7153_v28, %v4869_v4 }
 0x52a   : > { %5092 = vst.msk [vmem:[%s9305_s30 + $0x6c] sm:$0xf] %vm5064_vm6, %v5059_v21  ;;  %v4487_v19 = vsub.f32 %v4423_v6, %v4455_v17  ;;  %v4932_v40 = vmul.f32 %v4873_v12, %v4548_v43 }
 0x52c   : > { %v4519_v35 = vmax.f32 %v4487_v19, 0.0  ;;  %v4385_v9 = vpop.xlane.xlu1 %4384  ;;  %vm4964_vm1 = vcmp.ge.f32.partialorder %v4932_v40, 0.0  ;;  %v4996_v22 = vmul.f32 0.2, %v4932_v40 }
 0x52d   : > { %v4421_v33 = vmul.f32 %v4385_v9, %v9241_v30 }
 0x52e   : > { %v7155_v39 = vpop.eup %7154  ;;  %v4583_v63 = vadd.f32 1e-05, %v4519_v35  ;;  %v5028_v25 = vsel %vm4964_vm1, %v4932_v40, %v4996_v22 }
 0x52f   : > { %v4885_v15 = vmul.f32 %v7155_v39, %v4582_v20  ;;  %v4485_v48 = vsub.f32 %v4421_v33, %v4453_v47  ;;  %v5060_v11 = vpack.c.bf16 %v5028_v25, %v5028_v25  ;;  %vm4891_vm2 = vweird.f32 %v7155_v39 }
 0x530   : > { %7156 = vrsqrt.f32 %v4583_v63  ;;  %vm4892_vm4 = vmor %vm4890_vm3, %vm4891_vm2  ;;  %vm4900_vm0 = vweird.f32 %v4583_v63 }
 0x531   : > { %v4886_v59 = vmul.f32 %v7155_v39, %v4885_v15  ;;  %v4517_v31 = vmax.f32 %v4485_v48, 0.0  ;;  %5093 = vst.msk [vmem:[%s9305_s30 + $0x70] sm:$0xf] %vm5064_vm6, %v5060_v11 }
 0x533   : > { %v4887_v26 = vmul.f32 0.5, %v4886_v59  ;;  %v4581_v50 = vadd.f32 1e-05, %v4517_v31 }
 0x535   : > { %v4888_v46 = vsub.f32 1.5, %v4887_v26  ;;  %7158 = vrsqrt.f32 %v4581_v50  ;;  %vm4880_vm10 = vweird.f32 %v4581_v50 }
 0x536   : > { %v7157_v30 = vpop.eup %7156 }
 0x537   : > { %v4889_v58 = vmul.f32 %v7155_v39, %v4888_v46  ;;  %v4895_v10 = vmul.f32 %v7157_v30, %v4583_v63  ;;  %vm4901_vm7 = vweird.f32 %v7157_v30 }
 0x538   : > { %vm4902_vm8 = vmor %vm4900_vm0, %vm4901_vm7 }
 0x539   : > { %v4893_v32 = vsel %vm4892_vm4, %v7155_v39, %v4889_v58  ;;  %v4896_v42 = vmul.f32 %v7157_v30, %v4895_v10 }
 0x53a   : > { %v4934_v51 = vmul.f32 %v4893_v32, %v4550_v1 }
 0x53b   : > { %v7159_v54 = vpop.eup %7158  ;;  %v4897_v45 = vmul.f32 0.5, %v4896_v42 }
 0x53c   : > { %vm4966_vm5 = vcmp.ge.f32.partialorder %v4934_v51, 0.0  ;;  %v4998_v18 = vmul.f32 0.2, %v4934_v51  ;;  %v4875_v14 = vmul.f32 %v7159_v54, %v4581_v50  ;;  %vm4881_vm9 = vweird.f32 %v7159_v54 }
 0x53d   : > { %v4898_v57 = vsub.f32 1.5, %v4897_v45  ;;  %vm4882_vm12 = vmor %vm4880_vm10, %vm4881_vm9 }
 0x53e   : > { %v5030_v37 = vsel %vm4966_vm5, %v4934_v51, %v4998_v18  ;;  %v4876_v38 = vmul.f32 %v7159_v54, %v4875_v14 }
 0x53f   : > { %v5062_v23 = vpack.c.bf16 %v5030_v37, %v5030_v37  ;;  %v4899_v7 = vmul.f32 %v7157_v30, %v4898_v57 }
 0x540   : > { %v4877_v2 = vmul.f32 0.5, %v4876_v38 }
 0x541   : > { %5095 = vst.msk [vmem:[%s9305_s30 + $0x78] sm:$0xf] %vm5064_vm6, %v5062_v23  ;;  %v4903_v61 = vsel %vm4902_vm8, %v7157_v30, %v4899_v7 }
 0x542   : > { %v4878_v62 = vsub.f32 1.5, %v4877_v2  ;;  %v4935_v28 = vmul.f32 %v4903_v61, %v4551_v60 }
 0x544   : > { %v4879_v52 = vmul.f32 %v7159_v54, %v4878_v62  ;;  %vm4967_vm11 = vcmp.ge.f32.partialorder %v4935_v28, 0.0  ;;  %v4999_v16 = vmul.f32 0.2, %v4935_v28 }
 0x546   : > { %v4883_v53 = vsel %vm4882_vm12, %v7159_v54, %v4879_v52  ;;  %v5031_v49 = vsel %vm4967_vm11, %v4935_v28, %v4999_v16 }
 0x547   : > { %v4933_v3 = vmul.f32 %v4883_v53, %v4549_v0  ;;  %v5063_v5 = vpack.c.bf16 %v5031_v49, %v5031_v49 }
 0x549   : > { %vm4965_vm13 = vcmp.ge.f32.partialorder %v4933_v3, 0.0  ;;  %v4997_v41 = vmul.f32 0.2, %v4933_v3  ;;  %5096 = vst.msk [vmem:[%s9305_s30 + $0x7c] sm:$0xf] %vm5064_vm6, %v5063_v5 }
 0x54b   : > { %v5029_v34 = vsel %vm4965_vm13, %v4933_v3, %v4997_v41 }
 0x54c   : > { %v5061_v27 = vpack.c.bf16 %v5029_v34, %v5029_v34 }
 0x54e   : > { %5094 = vst.msk [vmem:[%s9305_s30 + $0x74] sm:$0xf] %vm5064_vm6, %v5061_v27 }
 0x54f PF: > { %s12_s9 = sadd.s32 1, %s7166_s9  }
 0x550   : > { %p9_p4 = scmp.ge.s32.totalorder %s12_s9, 4  }
 0x552   :  { %11 = sbr.rel (!%p9_p4) target bundleno = 1 (0x1), region = 58 }

// kernel: patchgan_forward.9
= control target key start
LH: loop header
LB: loop body
LE: loop exit
PB: predicated region body
PF: predicated region fallthrough
CT: control target
= control target key end

     0   :  { %s4050_s9 = smov 0   ;;  %s4344_s0 = inlined_call_operand.vmem [shape: bf16[2,4096,4], index: 0, kind: input, shape index: {}]   ;;  %s4345_s1 = inlined_call_operand.vmem [shape: bf16[1,4096], index: 1, kind: input, shape index: {}]   ;;  %s4346_s2 = inlined_call_operand.vmem [shape: f32[2,1,4], index: 2, kind: output, shape index: {}]  }
   0x1 LB: > { %s2729_s10 = sadd.s32 4294967295, %s4033_s9   ;;  %p2733_p0 = scmp.ge.s32.totalorder %s4033_s9, 1  ;;  %s4033_s9 = sphi %s4050_s9, %s12_s9  }
   0x2   : > { %p112_p1 = scmp.lt.s32.totalorder %s4033_s9, 3 }
   0x4   : > { %p113_p2 = pnand %p2733_p0, %p112_p1 }
   0x5   : > { %p132_p3 = scmp.lt.s32.totalorder (!%p113_p2), %s2729_s10, 1 }
   0x6   : > { %116 = sbr.rel (%p113_p2) target bundleno = 413 (0x19d), region = 28 }
   0xb   : > { %s4348_s10 = smov (!%p132_p3, %s2729_s10), 1  ;;  %v652_v20 = vld [vmem:[%s4345_s1] sm:$0xff]  ;;  %v653_v52 = vld [vmem:[%s4345_s1 + $0x8] sm:$0xff]  ;;  %vm2680_vm0 = vcmask 24576  }
   0xc   : > { %s3762_s11 = sshll.u32 %s4348_s10, 11  ;;  %657 = vst [vmem:[#allocation1] ss:$9 sm:$0xff] %v652_v20  ;;  %s139_s25 = scalar_lea.vmem %s4346_s2, %s4348_s10 }
   0xd   : > { %s4064_s14 = scalar_lea.vmem %s4344_s0, %s3762_s11 }
   0xe   : > { %v3770_v0 = vld [vmem:[%s4064_s14 + $0x38] sm:$0xff]  ;;  %v3769_v4 = vld [vmem:[%s4064_s14 + $0x30] sm:$0xff]  ;;  %v3768_v8 = vld [vmem:[%s4064_s14 + $0x28] sm:$0xff] }
   0xf   : > { %v3778_v1 = vld [vmem:[%s4064_s14 + $0x78] sm:$0xff]  ;;  %2264 = vmatpush.bf16.msra.mxu0 %v3770_v0  ;;  %v3777_v5 = vld [vmem:[%s4064_s14 + $0x70] sm:$0xff]  ;;  %v3776_v9 = vld [vmem:[%s4064_s14 + $0x68] sm:$0xff] }
  0x10   : > { %v3786_v2 = vld [vmem:[%s4064_s14 + $0xb8] sm:$0xff]  ;;  %2277 = vmatpush.bf16.msra.mxu1 %v3778_v1  ;;  %v3785_v6 = vld [vmem:[%s4064_s14 + $0xb0] sm:$0xff]  ;;  %v3784_v10 = vld [vmem:[%s4064_s14 + $0xa8] sm:$0xff] }
  0x11   : > { %v3794_v3 = vld [vmem:[%s4064_s14 + $0xf8] sm:$0xff]  ;;  %2290 = vmatpush.bf16.msra.mxu2 %v3786_v2  ;;  %v3793_v7 = vld [vmem:[%s4064_s14 + $0xf0] sm:$0xff]  ;;  %v3792_v11 = vld [vmem:[%s4064_s14 + $0xe8] sm:$0xff] }
  0x12   : > { %2303 = vmatpush.bf16.msra.mxu3 %v3794_v3  ;;  %v3767_v12 = vld [vmem:[%s4064_s14 + $0x20] sm:$0xff]  ;;  %v3766_v16 = vld [vmem:[%s4064_s14 + $0x18] sm:$0xff]  ;;  %v3765_v21 = vld [vmem:[%s4064_s14 + $0x10] sm:$0xff] }
  0x13   : > { %2265 = vmatpush.bf16.msra.mxu0 %v3769_v4  ;;  %v3775_v13 = vld [vmem:[%s4064_s14 + $0x60] sm:$0xff]  ;;  %v3774_v17 = vld [vmem:[%s4064_s14 + $0x58] sm:$0xff]  ;;  %v3773_v22 = vld [vmem:[%s4064_s14 + $0x50] sm:$0xff] }
  0x14   : > { %2278 = vmatpush.bf16.msra.mxu1 %v3777_v5  ;;  %v3783_v14 = vld [vmem:[%s4064_s14 + $0xa0] sm:$0xff]  ;;  %v3782_v18 = vld [vmem:[%s4064_s14 + $0x98] sm:$0xff]  ;;  %v3781_v23 = vld [vmem:[%s4064_s14 + $0x90] sm:$0xff] }
  0x15   : > { %2291 = vmatpush.bf16.msra.mxu2 %v3785_v6  ;;  %v3791_v15 = vld [vmem:[%s4064_s14 + $0xe0] sm:$0xff]  ;;  %v3790_v19 = vld [vmem:[%s4064_s14 + $0xd8] sm:$0xff]  ;;  %v3789_v24 = vld [vmem:[%s4064_s14 + $0xd0] sm:$0xff] }
  0x16   : > { %2304 = vmatpush.bf16.msra.mxu3 %v3793_v7  ;;  %v3764_v25 = vld [vmem:[%s4064_s14 + $0x8] sm:$0xff]  ;;  %v3763_v29 = vld [vmem:[%s4064_s14] sm:$0xff]  ;;  %v3802_v33 = vld [vmem:[%s4064_s14 + $0x138] sm:$0xff] }
  0x17   : > { %2266 = vmatpush.bf16.msra.mxu0 %v3768_v8  ;;  %v3772_v26 = vld [vmem:[%s4064_s14 + $0x48] sm:$0xff]  ;;  %v3771_v30 = vld [vmem:[%s4064_s14 + $0x40] sm:$0xff]  ;;  %v3810_v34 = vld [vmem:[%s4064_s14 + $0x178] sm:$0xff] }
  0x18   : > { %2279 = vmatpush.bf16.msra.mxu1 %v3776_v9  ;;  %v3780_v27 = vld [vmem:[%s4064_s14 + $0x88] sm:$0xff]  ;;  %v3779_v31 = vld [vmem:[%s4064_s14 + $0x80] sm:$0xff]  ;;  %v3818_v35 = vld [vmem:[%s4064_s14 + $0x1b8] sm:$0xff] }
  0x19   : > { %2292 = vmatpush.bf16.msra.mxu2 %v3784_v10  ;;  %v3788_v28 = vld [vmem:[%s4064_s14 + $0xc8] sm:$0xff]  ;;  %v3787_v32 = vld [vmem:[%s4064_s14 + $0xc0] sm:$0xff]  ;;  %v3826_v36 = vld [vmem:[%s4064_s14 + $0x1f8] sm:$0xff] }
  0x1a   : > { %2305 = vmatpush.bf16.msra.mxu3 %v3792_v11  ;;  %v3801_v37 = vld [vmem:[%s4064_s14 + $0x130] sm:$0xff]  ;;  %v658_v39 = vld [vmem:[#allocation1] sm:$0xff]  ;;  %v3800_v45 = vld [vmem:[%s4064_s14 + $0x128] sm:$0xff] }
  0x1b   : > { %2267 = vmatpush.bf16.msra.mxu0 %v3767_v12  ;;  %v660_v38 = vld [vmem:[#allocation1 + $0x12] sm:$0xff]  ;;  %v661_v41 = vld [vmem:[#allocation1 + $0x1b] sm:$0xff]  ;;  %v659_v42 = vld [vmem:[#allocation1 + $0x9] sm:$0xff] }
  0x1c   : > { %2280 = vmatpush.bf16.msra.mxu1 %v3775_v13  ;;  %v3809_v40 = vld [vmem:[%s4064_s14 + $0x170] sm:$0xff]  ;;  %v3808_v46 = vld [vmem:[%s4064_s14 + $0x168] sm:$0xff]  ;;  %v665_v51 = vld [vmem:[#allocation1 + $0x3f] sm:$0xff] }
  0x1d   : > { %2293 = vmatpush.bf16.msra.mxu2 %v3783_v14  ;;  %v3817_v43 = vld [vmem:[%s4064_s14 + $0x1b0] sm:$0xff]  ;;  %v3816_v47 = vld [vmem:[%s4064_s14 + $0x1a8] sm:$0xff]  ;;  %v3799_v54 = vld [vmem:[%s4064_s14 + $0x120] sm:$0xff] }
  0x1e   : > { %2306 = vmatpush.bf16.msra.mxu3 %v3791_v15  ;;  %v3825_v44 = vld [vmem:[%s4064_s14 + $0x1f0] sm:$0xff]  ;;  %v3824_v48 = vld [vmem:[%s4064_s14 + $0x1e8] sm:$0xff]  ;;  %v3807_v55 = vld [vmem:[%s4064_s14 + $0x160] sm:$0xff] }
  0x1f   : > { %2268 = vmatpush.bf16.msra.mxu0 %v3766_v16  ;;  %v664_v49 = vld [vmem:[#allocation1 + $0x36] sm:$0xff]  ;;  %v662_v50 = vld [vmem:[#allocation1 + $0x24] sm:$0xff]  ;;  %v663_v53 = vld [vmem:[#allocation1 + $0x2d] sm:$0xff] }
  0x20   : > { %2281 = vmatpush.bf16.msra.mxu1 %v3774_v17  ;;  %667 = vst [vmem:[#allocation1] ss:$9 sm:$0xff] %v653_v52  ;;  %v3815_v56 = vld [vmem:[%s4064_s14 + $0x1a0] sm:$0xff]  ;;  %v3798_v58 = vld [vmem:[%s4064_s14 + $0x118] sm:$0xff]  ;;  %v3797_v62 = vld [vmem:[%s4064_s14 + $0x110] sm:$0xff] }
  0x21   : > { %2294 = vmatpush.bf16.msra.mxu2 %v3782_v18  ;;  %v3823_v57 = vld [vmem:[%s4064_s14 + $0x1e0] sm:$0xff]  ;;  %v3806_v59 = vld [vmem:[%s4064_s14 + $0x158] sm:$0xff]  ;;  %v3805_v63 = vld [vmem:[%s4064_s14 + $0x150] sm:$0xff] }
  0x22   : > { %2307 = vmatpush.bf16.msra.mxu3 %v3790_v19  ;;  %v3814_v60 = vld [vmem:[%s4064_s14 + $0x198] sm:$0xff]  ;;  %v3813_v0 = vld [vmem:[%s4064_s14 + $0x190] sm:$0xff]  ;;  %v3796_v2 = vld [vmem:[%s4064_s14 + $0x108] sm:$0xff] }
  0x23   : > { %2269 = vmatpush.bf16.msra.mxu0 %v3765_v21  ;;  %v3822_v61 = vld [vmem:[%s4064_s14 + $0x1d8] sm:$0xff]  ;;  %v3821_v1 = vld [vmem:[%s4064_s14 + $0x1d0] sm:$0xff]  ;;  %v3804_v3 = vld [vmem:[%s4064_s14 + $0x148] sm:$0xff] }
  0x24   : > { %2282 = vmatpush.bf16.msra.mxu1 %v3773_v22  ;;  %v3812_v4 = vld [vmem:[%s4064_s14 + $0x188] sm:$0xff]  ;;  %v3795_v6 = vld [vmem:[%s4064_s14 + $0x100] sm:$0xff]  ;;  %v3834_v10 = vld [vmem:[%s4064_s14 + $0x238] sm:$0xff] }
  0x25   : > { %2295 = vmatpush.bf16.msra.mxu2 %v3781_v23  ;;  %v3820_v5 = vld [vmem:[%s4064_s14 + $0x1c8] sm:$0xff]  ;;  %v3803_v7 = vld [vmem:[%s4064_s14 + $0x140] sm:$0xff]  ;;  %v3842_v11 = vld [vmem:[%s4064_s14 + $0x278] sm:$0xff] }
  0x26   : > { %2308 = vmatpush.bf16.msra.mxu3 %v3789_v24  ;;  %v3811_v8 = vld [vmem:[%s4064_s14 + $0x180] sm:$0xff]  ;;  %v3850_v12 = vld [vmem:[%s4064_s14 + $0x2b8] sm:$0xff]  ;;  %v3833_v14 = vld [vmem:[%s4064_s14 + $0x230] sm:$0xff] }
  0x27   : > { %2270 = vmatpush.bf16.msra.mxu0 %v3764_v25  ;;  %v3819_v9 = vld [vmem:[%s4064_s14 + $0x1c0] sm:$0xff]  ;;  %v3858_v13 = vld [vmem:[%s4064_s14 + $0x2f8] sm:$0xff]  ;;  %v3841_v15 = vld [vmem:[%s4064_s14 + $0x270] sm:$0xff] }
  0x28   : > { %2283 = vmatpush.bf16.msra.mxu1 %v3772_v26  ;;  %v3849_v16 = vld [vmem:[%s4064_s14 + $0x2b0] sm:$0xff]  ;;  %v3832_v18 = vld [vmem:[%s4064_s14 + $0x228] sm:$0xff]  ;;  %v3831_v22 = vld [vmem:[%s4064_s14 + $0x220] sm:$0xff] }
  0x29   : > { %2296 = vmatpush.bf16.msra.mxu2 %v3780_v27  ;;  %v3857_v17 = vld [vmem:[%s4064_s14 + $0x2f0] sm:$0xff]  ;;  %v3840_v19 = vld [vmem:[%s4064_s14 + $0x268] sm:$0xff]  ;;  %v3839_v23 = vld [vmem:[%s4064_s14 + $0x260] sm:$0xff] }
  0x2a   : > { %2309 = vmatpush.bf16.msra.mxu3 %v3788_v28  ;;  %v3848_v20 = vld [vmem:[%s4064_s14 + $0x2a8] sm:$0xff]  ;;  %v3847_v24 = vld [vmem:[%s4064_s14 + $0x2a0] sm:$0xff]  ;;  %v3830_v26 = vld [vmem:[%s4064_s14 + $0x218] sm:$0xff] }
  0x2b   : > { %2271 = vmatpush.bf16.msra.mxu0 %v3763_v29  ;;  %v3856_v21 = vld [vmem:[%s4064_s14 + $0x2e8] sm:$0xff]  ;;  %v3855_v25 = vld [vmem:[%s4064_s14 + $0x2e0] sm:$0xff]  ;;  %v3838_v27 = vld [vmem:[%s4064_s14 + $0x258] sm:$0xff] }
  0x2c   : > { %2284 = vmatpush.bf16.msra.mxu1 %v3771_v30  ;;  %v3846_v28 = vld [vmem:[%s4064_s14 + $0x298] sm:$0xff]  ;;  %v3829_v30 = vld [vmem:[%s4064_s14 + $0x210] sm:$0xff] }
  0x2d   : > { %2297 = vmatpush.bf16.msra.mxu2 %v3779_v31  ;;  %v3854_v29 = vld [vmem:[%s4064_s14 + $0x2d8] sm:$0xff]  ;;  %v3837_v31 = vld [vmem:[%s4064_s14 + $0x250] sm:$0xff] }
  0x2e   : > { %2310 = vmatpush.bf16.msra.mxu3 %v3787_v32  ;;  %2272 = vmatmul.bf16.vlgmr.msra.gmra.mxu0 %v658_v39  ;;  %v3845_v32 = vld [vmem:[%s4064_s14 + $0x290] sm:$0xff]  ;;  %v3835_v39 = vld [vmem:[%s4064_s14 + $0x240] sm:$0xff] }
  0x2f   : > { %2316 = vmatpush.bf16.msrb.mxu0 %v3802_v33  ;;  %2285 = vmatmul.bf16.vlgmr.msra.gmra.mxu1 %v659_v42  ;;  %v3853_v33 = vld [vmem:[%s4064_s14 + $0x2d0] sm:$0xff]  ;;  %v3866_v42 = vld [vmem:[%s4064_s14 + $0x338] sm:$0xff] }
  0x30   : > { %2329 = vmatpush.bf16.msrb.mxu1 %v3810_v34  ;;  %2298 = vmatmul.bf16.vlgmr.msra.gmra.mxu2 %v660_v38  ;;  %v3828_v34 = vld [vmem:[%s4064_s14 + $0x208] sm:$0xff]  ;;  %v3827_v38 = vld [vmem:[%s4064_s14 + $0x200] sm:$0xff]  ;;  %v3881_v52 = vld [vmem:[%s4064_s14 + $0x3b0] sm:$0xff] }
  0x31   : > { %2342 = vmatpush.bf16.msrb.mxu2 %v3818_v35  ;;  %2311 = vmatmul.bf16.vlgmr.msra.gmra.mxu3 %v661_v41  ;;  %v3836_v35 = vld [vmem:[%s4064_s14 + $0x248] sm:$0xff]  ;;  %v3851_v41 = vld [vmem:[%s4064_s14 + $0x2c0] sm:$0xff] }
  0x32   : > { %2355 = vmatpush.bf16.msrb.mxu3 %v3826_v36  ;;  %v3844_v36 = vld [vmem:[%s4064_s14 + $0x288] sm:$0xff] }
  0x33   : > { %2317 = vmatpush.bf16.msrb.mxu0 %v3801_v37  ;;  %v3852_v37 = vld [vmem:[%s4064_s14 + $0x2c8] sm:$0xff] }
  0x34   : > { %2330 = vmatpush.bf16.msrb.mxu1 %v3809_v40  ;;  %v3843_v40 = vld [vmem:[%s4064_s14 + $0x280] sm:$0xff] }
  0x35   : > { %2343 = vmatpush.bf16.msrb.mxu2 %v3817_v43  ;;  %v3874_v43 = vld [vmem:[%s4064_s14 + $0x378] sm:$0xff] }
  0x36   : > { %2356 = vmatpush.bf16.msrb.mxu3 %v3825_v44  ;;  %v3882_v44 = vld [vmem:[%s4064_s14 + $0x3b8] sm:$0xff] }
  0x37   : > { %2318 = vmatpush.bf16.msrb.mxu0 %v3800_v45  ;;  %v3890_v45 = vld [vmem:[%s4064_s14 + $0x3f8] sm:$0xff] }
  0x38   : > { %2331 = vmatpush.bf16.msrb.mxu1 %v3808_v46  ;;  %v668_v46 = vld [vmem:[#allocation1] sm:$0xff] }
  0x39   : > { %2344 = vmatpush.bf16.msrb.mxu2 %v3816_v47  ;;  %v670_v47 = vld [vmem:[#allocation1 + $0x12] sm:$0xff] }
  0x3a   : > { %2357 = vmatpush.bf16.msrb.mxu3 %v3824_v48  ;;  %v669_v48 = vld [vmem:[#allocation1 + $0x9] sm:$0xff] }
  0x3b   : > { %2319 = vmatpush.bf16.msrb.mxu0 %v3799_v54  ;;  %v3864_v54 = vld [vmem:[%s4064_s14 + $0x328] sm:$0xff] }
  0x3c   : > { %2332 = vmatpush.bf16.msrb.mxu1 %v3807_v55  ;;  %v3872_v55 = vld [vmem:[%s4064_s14 + $0x368] sm:$0xff] }
  0x3d   : > { %2345 = vmatpush.bf16.msrb.mxu2 %v3815_v56  ;;  %v3880_v56 = vld [vmem:[%s4064_s14 + $0x3a8] sm:$0xff] }
  0x3e   : > { %2358 = vmatpush.bf16.msrb.mxu3 %v3823_v57  ;;  %v3888_v57 = vld [vmem:[%s4064_s14 + $0x3e8] sm:$0xff] }
  0x3f   : > { %2320 = vmatpush.bf16.msrb.mxu0 %v3798_v58  ;;  %v3863_v58 = vld [vmem:[%s4064_s14 + $0x320] sm:$0xff] }
  0x40   : > { %2333 = vmatpush.bf16.msrb.mxu1 %v3806_v59  ;;  %v3871_v59 = vld [vmem:[%s4064_s14 + $0x360] sm:$0xff] }
  0x41   : > { %2346 = vmatpush.bf16.msrb.mxu2 %v3814_v60  ;;  %v3879_v60 = vld [vmem:[%s4064_s14 + $0x3a0] sm:$0xff] }
  0x42   : > { %2359 = vmatpush.bf16.msrb.mxu3 %v3822_v61  ;;  %v3887_v61 = vld [vmem:[%s4064_s14 + $0x3e0] sm:$0xff] }
  0x43   : > { %2321 = vmatpush.bf16.msrb.mxu0 %v3797_v62  ;;  %v3862_v62 = vld [vmem:[%s4064_s14 + $0x318] sm:$0xff] }
  0x44   : > { %2334 = vmatpush.bf16.msrb.mxu1 %v3805_v63  ;;  %v3870_v63 = vld [vmem:[%s4064_s14 + $0x358] sm:$0xff] }
  0x45   : > { %2347 = vmatpush.bf16.msrb.mxu2 %v3813_v0  ;;  %v3878_v0 = vld [vmem:[%s4064_s14 + $0x398] sm:$0xff] }
  0x46   : > { %2360 = vmatpush.bf16.msrb.mxu3 %v3821_v1  ;;  %v3886_v1 = vld [vmem:[%s4064_s14 + $0x3d8] sm:$0xff] }
  0x47   : > { %2322 = vmatpush.bf16.msrb.mxu0 %v3796_v2  ;;  %v3861_v2 = vld [vmem:[%s4064_s14 + $0x310] sm:$0xff] }
  0x48   : > { %2335 = vmatpush.bf16.msrb.mxu1 %v3804_v3  ;;  %v3869_v3 = vld [vmem:[%s4064_s14 + $0x350] sm:$0xff] }
  0x49   : > { %2348 = vmatpush.bf16.msrb.mxu2 %v3812_v4  ;;  %v3877_v4 = vld [vmem:[%s4064_s14 + $0x390] sm:$0xff] }
  0x4a   : > { %2361 = vmatpush.bf16.msrb.mxu3 %v3820_v5  ;;  %v3885_v5 = vld [vmem:[%s4064_s14 + $0x3d0] sm:$0xff] }
  0x4b   : > { %2323 = vmatpush.bf16.msrb.mxu0 %v3795_v6  ;;  %v3860_v6 = vld [vmem:[%s4064_s14 + $0x308] sm:$0xff] }
  0x4c   : > { %2336 = vmatpush.bf16.msrb.mxu1 %v3803_v7  ;;  %v3868_v7 = vld [vmem:[%s4064_s14 + $0x348] sm:$0xff] }
  0x4d   : > { %2349 = vmatpush.bf16.msrb.mxu2 %v3811_v8  ;;  %v3876_v8 = vld [vmem:[%s4064_s14 + $0x388] sm:$0xff] }
  0x4e   : > { %2362 = vmatpush.bf16.msrb.mxu3 %v3819_v9  ;;  %2324 = vmatmul.bf16.vlgmr.msrb.gmra.mxu0 %v662_v50  ;;  %v3865_v50 = vld [vmem:[%s4064_s14 + $0x330] sm:$0xff]  ;;  %v3884_v9 = vld [vmem:[%s4064_s14 + $0x3c8] sm:$0xff] }
  0x4f   : > { %2368 = vmatpush.bf16.msra.mxu0 %v3834_v10  ;;  %2337 = vmatmul.bf16.vlgmr.msrb.gmra.mxu1 %v663_v53  ;;  %v3889_v53 = vld [vmem:[%s4064_s14 + $0x3f0] sm:$0xff]  ;;  %v672_v10 = vld [vmem:[#allocation1 + $0x24] sm:$0xff] }
  0x50   : > { %2381 = vmatpush.bf16.msra.mxu1 %v3842_v11  ;;  %2350 = vmatmul.bf16.vlgmr.msrb.gmra.mxu2 %v664_v49  ;;  %v671_v49 = vld [vmem:[#allocation1 + $0x1b] sm:$0xff] }
  0x51   : > { %2394 = vmatpush.bf16.msra.mxu2 %v3850_v12  ;;  %2363 = vmatmul.bf16.vlgmr.msrb.gmra.mxu3 %v665_v51  ;;  %v3873_v51 = vld [vmem:[%s4064_s14 + $0x370] sm:$0xff] }
  0x52   : > { %2407 = vmatpush.bf16.msra.mxu3 %v3858_v13  ;;  %v674_v11 = vld [vmem:[#allocation1 + $0x36] sm:$0xff]  ;;  %v673_v12 = vld [vmem:[#allocation1 + $0x2d] sm:$0xff]  ;;  %v675_v13 = vld [vmem:[#allocation1 + $0x3f] sm:$0xff] }
  0x53   : > { %2369 = vmatpush.bf16.msra.mxu0 %v3833_v14  ;;  %v654_v14 = vld [vmem:[%s4345_s1 + $0x10] sm:$0xff] }
  0x54   : > { %2382 = vmatpush.bf16.msra.mxu1 %v3841_v15  ;;  %677 = vst [vmem:[#allocation1] ss:$9 sm:$0xff] %v654_v14  ;;  %v3859_v15 = vld [vmem:[%s4064_s14 + $0x300] sm:$0xff] }
  0x55   : > { %2395 = vmatpush.bf16.msra.mxu2 %v3849_v16  ;;  %v3867_v16 = vld [vmem:[%s4064_s14 + $0x340] sm:$0xff] }
  0x56   : > { %2408 = vmatpush.bf16.msra.mxu3 %v3857_v17  ;;  %v3875_v17 = vld [vmem:[%s4064_s14 + $0x380] sm:$0xff] }
  0x57   : > { %2370 = vmatpush.bf16.msra.mxu0 %v3832_v18  ;;  %v3883_v18 = vld [vmem:[%s4064_s14 + $0x3c0] sm:$0xff] }
  0x58   : > { %2383 = vmatpush.bf16.msra.mxu1 %v3840_v19  ;;  %v3898_v19 = vld [vmem:[%s4064_s14 + $0x438] sm:$0xff] }
  0x59   : > { %2396 = vmatpush.bf16.msra.mxu2 %v3848_v20  ;;  %v3906_v20 = vld [vmem:[%s4064_s14 + $0x478] sm:$0xff] }
  0x5a   : > { %2409 = vmatpush.bf16.msra.mxu3 %v3856_v21  ;;  %v3914_v21 = vld [vmem:[%s4064_s14 + $0x4b8] sm:$0xff] }
  0x5b   : > { %2371 = vmatpush.bf16.msra.mxu0 %v3831_v22  ;;  %v3922_v22 = vld [vmem:[%s4064_s14 + $0x4f8] sm:$0xff] }
  0x5c   : > { %2384 = vmatpush.bf16.msra.mxu1 %v3839_v23  ;;  %v3897_v23 = vld [vmem:[%s4064_s14 + $0x430] sm:$0xff] }
  0x5d   : > { %2397 = vmatpush.bf16.msra.mxu2 %v3847_v24  ;;  %v3905_v24 = vld [vmem:[%s4064_s14 + $0x470] sm:$0xff] }
  0x5e   : > { %2410 = vmatpush.bf16.msra.mxu3 %v3855_v25  ;;  %v3913_v25 = vld [vmem:[%s4064_s14 + $0x4b0] sm:$0xff] }
  0x5f   : > { %2372 = vmatpush.bf16.msra.mxu0 %v3830_v26  ;;  %v3921_v26 = vld [vmem:[%s4064_s14 + $0x4f0] sm:$0xff] }
  0x60   : > { %2385 = vmatpush.bf16.msra.mxu1 %v3838_v27  ;;  %v3896_v27 = vld [vmem:[%s4064_s14 + $0x428] sm:$0xff] }
  0x61   : > { %2398 = vmatpush.bf16.msra.mxu2 %v3846_v28  ;;  %v3904_v28 = vld [vmem:[%s4064_s14 + $0x468] sm:$0xff] }
  0x62   : > { %2411 = vmatpush.bf16.msra.mxu3 %v3854_v29  ;;  %v3912_v29 = vld [vmem:[%s4064_s14 + $0x4a8] sm:$0xff] }
  0x63   : > { %2373 = vmatpush.bf16.msra.mxu0 %v3829_v30  ;;  %v3920_v30 = vld [vmem:[%s4064_s14 + $0x4e8] sm:$0xff] }
  0x64   : > { %2386 = vmatpush.bf16.msra.mxu1 %v3837_v31  ;;  %v3895_v31 = vld [vmem:[%s4064_s14 + $0x420] sm:$0xff] }
  0x65   : > { %2399 = vmatpush.bf16.msra.mxu2 %v3845_v32  ;;  %v3903_v32 = vld [vmem:[%s4064_s14 + $0x460] sm:$0xff] }
  0x66   : > { %2412 = vmatpush.bf16.msra.mxu3 %v3853_v33  ;;  %v3911_v33 = vld [vmem:[%s4064_s14 + $0x4a0] sm:$0xff] }
  0x67   : > { %2374 = vmatpush.bf16.msra.mxu0 %v3828_v34  ;;  %v3919_v34 = vld [vmem:[%s4064_s14 + $0x4e0] sm:$0xff] }
  0x68   : > { %2387 = vmatpush.bf16.msra.mxu1 %v3836_v35  ;;  %v3894_v35 = vld [vmem:[%s4064_s14 + $0x418] sm:$0xff] }
  0x69   : > { %2400 = vmatpush.bf16.msra.mxu2 %v3844_v36  ;;  %v3902_v36 = vld [vmem:[%s4064_s14 + $0x458] sm:$0xff] }
  0x6a   : > { %2413 = vmatpush.bf16.msra.mxu3 %v3852_v37  ;;  %v3910_v37 = vld [vmem:[%s4064_s14 + $0x498] sm:$0xff] }
  0x6b   : > { %2375 = vmatpush.bf16.msra.mxu0 %v3827_v38  ;;  %v3918_v38 = vld [vmem:[%s4064_s14 + $0x4d8] sm:$0xff] }
  0x6c   : > { %2388 = vmatpush.bf16.msra.mxu1 %v3835_v39  ;;  %v3893_v39 = vld [vmem:[%s4064_s14 + $0x410] sm:$0xff] }
  0x6d   : > { %2401 = vmatpush.bf16.msra.mxu2 %v3843_v40  ;;  %v3901_v40 = vld [vmem:[%s4064_s14 + $0x450] sm:$0xff] }
  0x6e   : > { %2414 = vmatpush.bf16.msra.mxu3 %v3851_v41  ;;  %2376 = vmatmul.bf16.vlgmr.msra.gmra.mxu0 %v668_v46  ;;  %v3909_v41 = vld [vmem:[%s4064_s14 + $0x490] sm:$0xff]  ;;  %v3916_v46 = vld [vmem:[%s4064_s14 + $0x4c8] sm:$0xff] }
  0x6f   : > { %2420 = vmatpush.bf16.msrb.mxu0 %v3866_v42  ;;  %2389 = vmatmul.bf16.vlgmr.msra.gmra.mxu1 %v669_v48  ;;  %v3917_v42 = vld [vmem:[%s4064_s14 + $0x4d0] sm:$0xff]  ;;  %v3899_v48 = vld [vmem:[%s4064_s14 + $0x440] sm:$0xff] }
  0x70   : > { %2433 = vmatpush.bf16.msrb.mxu1 %v3874_v43  ;;  %2402 = vmatmul.bf16.vlgmr.msra.gmra.mxu2 %v670_v47  ;;  %v3892_v43 = vld [vmem:[%s4064_s14 + $0x408] sm:$0xff]  ;;  %v3891_v47 = vld [vmem:[%s4064_s14 + $0x400] sm:$0xff] }
  0x71   : > { %2446 = vmatpush.bf16.msrb.mxu2 %v3882_v44  ;;  %2415 = vmatmul.bf16.vlgmr.msra.gmra.mxu3 %v671_v49  ;;  %v3900_v44 = vld [vmem:[%s4064_s14 + $0x448] sm:$0xff]  ;;  %v3907_v49 = vld [vmem:[%s4064_s14 + $0x480] sm:$0xff] }
  0x72   : > { %2459 = vmatpush.bf16.msrb.mxu3 %v3890_v45  ;;  %v3908_v45 = vld [vmem:[%s4064_s14 + $0x488] sm:$0xff] }
  0x73   : > { %2421 = vmatpush.bf16.msrb.mxu0 %v3865_v50  ;;  %v3915_v50 = vld [vmem:[%s4064_s14 + $0x4c0] sm:$0xff] }
  0x74   : > { %2434 = vmatpush.bf16.msrb.mxu1 %v3873_v51  ;;  %v3930_v51 = vld [vmem:[%s4064_s14 + $0x538] sm:$0xff] }
  0x75   : > { %2447 = vmatpush.bf16.msrb.mxu2 %v3881_v52  ;;  %v3938_v52 = vld [vmem:[%s4064_s14 + $0x578] sm:$0xff] }
  0x76   : > { %2460 = vmatpush.bf16.msrb.mxu3 %v3889_v53  ;;  %v3946_v53 = vld [vmem:[%s4064_s14 + $0x5b8] sm:$0xff] }
  0x77   : > { %2422 = vmatpush.bf16.msrb.mxu0 %v3864_v54  ;;  %v3954_v54 = vld [vmem:[%s4064_s14 + $0x5f8] sm:$0xff] }
  0x78   : > { %2435 = vmatpush.bf16.msrb.mxu1 %v3872_v55  ;;  %v678_v55 = vld [vmem:[#allocation1] sm:$0xff] }
  0x79   : > { %2448 = vmatpush.bf16.msrb.mxu2 %v3880_v56  ;;  %v680_v56 = vld [vmem:[#allocation1 + $0x12] sm:$0xff] }
  0x7a   : > { %2461 = vmatpush.bf16.msrb.mxu3 %v3888_v57  ;;  %v679_v57 = vld [vmem:[#allocation1 + $0x9] sm:$0xff] }
  0x7b   : > { %2423 = vmatpush.bf16.msrb.mxu0 %v3863_v58  ;;  %v681_v58 = vld [vmem:[#allocation1 + $0x1b] sm:$0xff] }
  0x7c   : > { %2436 = vmatpush.bf16.msrb.mxu1 %v3871_v59  ;;  %v3929_v59 = vld [vmem:[%s4064_s14 + $0x530] sm:$0xff] }
  0x7d   : > { %2449 = vmatpush.bf16.msrb.mxu2 %v3879_v60  ;;  %v3937_v60 = vld [vmem:[%s4064_s14 + $0x570] sm:$0xff] }
  0x7e   : > { %2462 = vmatpush.bf16.msrb.mxu3 %v3887_v61  ;;  %v3945_v61 = vld [vmem:[%s4064_s14 + $0x5b0] sm:$0xff] }
  0x7f   : > { %2424 = vmatpush.bf16.msrb.mxu0 %v3862_v62  ;;  %v3953_v62 = vld [vmem:[%s4064_s14 + $0x5f0] sm:$0xff] }
  0x80   : > { %2437 = vmatpush.bf16.msrb.mxu1 %v3870_v63  ;;  %v3928_v63 = vld [vmem:[%s4064_s14 + $0x528] sm:$0xff] }
  0x81   : > { %2450 = vmatpush.bf16.msrb.mxu2 %v3878_v0  ;;  %v3936_v0 = vld [vmem:[%s4064_s14 + $0x568] sm:$0xff] }
  0x82   : > { %2463 = vmatpush.bf16.msrb.mxu3 %v3886_v1  ;;  %v3944_v1 = vld [vmem:[%s4064_s14 + $0x5a8] sm:$0xff] }
  0x83   : > { %2425 = vmatpush.bf16.msrb.mxu0 %v3861_v2  ;;  %v3952_v2 = vld [vmem:[%s4064_s14 + $0x5e8] sm:$0xff] }
  0x84   : > { %2438 = vmatpush.bf16.msrb.mxu1 %v3869_v3 }
  0x85   : > { %2451 = vmatpush.bf16.msrb.mxu2 %v3877_v4  ;;  %v3927_v4 = vld [vmem:[%s4064_s14 + $0x520] sm:$0xff] }
  0x86   : > { %2464 = vmatpush.bf16.msrb.mxu3 %v3885_v5  ;;  %v3935_v5 = vld [vmem:[%s4064_s14 + $0x560] sm:$0xff] }
  0x87   : > { %2426 = vmatpush.bf16.msrb.mxu0 %v3860_v6 }
  0x88   : > { %2439 = vmatpush.bf16.msrb.mxu1 %v3868_v7  ;;  %v3943_v7 = vld [vmem:[%s4064_s14 + $0x5a0] sm:$0xff] }
  0x89   : > { %2452 = vmatpush.bf16.msrb.mxu2 %v3876_v8  ;;  %v3951_v8 = vld [vmem:[%s4064_s14 + $0x5e0] sm:$0xff] }
  0x8a   : > { %2465 = vmatpush.bf16.msrb.mxu3 %v3884_v9 }
  0x8b   : > { %2427 = vmatpush.bf16.msrb.mxu0 %v3859_v15 }
  0x8c   : > { %2440 = vmatpush.bf16.msrb.mxu1 %v3867_v16 }
  0x8d   : > { %2453 = vmatpush.bf16.msrb.mxu2 %v3875_v17 }
  0x8e   : > { %2466 = vmatpush.bf16.msrb.mxu3 %v3883_v18  ;;  %2428 = vmatmul.bf16.vlgmr.msrb.gmra.mxu0 %v672_v10  ;;  %v3926_v10 = vld [vmem:[%s4064_s14 + $0x518] sm:$0xff]  ;;  %v3925_v18 = vld [vmem:[%s4064_s14 + $0x510] sm:$0xff] }
  0x8f   : > { %2472 = vmatpush.bf16.msra.mxu0 %v3898_v19  ;;  %2441 = vmatmul.bf16.vlgmr.msrb.gmra.mxu1 %v673_v12  ;;  %v3942_v12 = vld [vmem:[%s4064_s14 + $0x598] sm:$0xff]  ;;  %v3933_v19 = vld [vmem:[%s4064_s14 + $0x550] sm:$0xff] }
  0x90   : > { %2485 = vmatpush.bf16.msra.mxu1 %v3906_v20  ;;  %2454 = vmatmul.bf16.vlgmr.msrb.gmra.mxu2 %v674_v11  ;;  %v3934_v11 = vld [vmem:[%s4064_s14 + $0x558] sm:$0xff] }
  0x91   : > { %2498 = vmatpush.bf16.msra.mxu2 %v3914_v21  ;;  %2467 = vmatmul.bf16.vlgmr.msrb.gmra.mxu3 %v675_v13  ;;  %v3950_v13 = vld [vmem:[%s4064_s14 + $0x5d8] sm:$0xff] }
  0x92   : > { %2511 = vmatpush.bf16.msra.mxu3 %v3922_v22  ;;  %v3941_v22 = vld [vmem:[%s4064_s14 + $0x590] sm:$0xff] }
  0x93   : > { %2473 = vmatpush.bf16.msra.mxu0 %v3897_v23  ;;  %v3949_v23 = vld [vmem:[%s4064_s14 + $0x5d0] sm:$0xff] }
  0x94   : > { %2486 = vmatpush.bf16.msra.mxu1 %v3905_v24  ;;  %v3924_v24 = vld [vmem:[%s4064_s14 + $0x508] sm:$0xff] }
  0x95   : > { %2499 = vmatpush.bf16.msra.mxu2 %v3913_v25  ;;  %v3932_v25 = vld [vmem:[%s4064_s14 + $0x548] sm:$0xff] }
  0x96   : > { %2512 = vmatpush.bf16.msra.mxu3 %v3921_v26  ;;  %v3940_v26 = vld [vmem:[%s4064_s14 + $0x588] sm:$0xff] }
  0x97   : > { %2474 = vmatpush.bf16.msra.mxu0 %v3896_v27  ;;  %v3948_v27 = vld [vmem:[%s4064_s14 + $0x5c8] sm:$0xff] }
  0x98   : > { %2487 = vmatpush.bf16.msra.mxu1 %v3904_v28  ;;  %v682_v28 = vld [vmem:[#allocation1 + $0x24] sm:$0xff] }
  0x99   : > { %2500 = vmatpush.bf16.msra.mxu2 %v3912_v29  ;;  %v684_v29 = vld [vmem:[#allocation1 + $0x36] sm:$0xff] }
  0x9a   : > { %2513 = vmatpush.bf16.msra.mxu3 %v3920_v30 }
  0x9b   : > { %2475 = vmatpush.bf16.msra.mxu0 %v3895_v31  ;;  %v683_v31 = vld [vmem:[#allocation1 + $0x2d] sm:$0xff] }
  0x9c   : > { %2488 = vmatpush.bf16.msra.mxu1 %v3903_v32  ;;  %v685_v32 = vld [vmem:[#allocation1 + $0x3f] sm:$0xff] }
  0x9d   : > { %2501 = vmatpush.bf16.msra.mxu2 %v3911_v33 }
  0x9e   : > { %2514 = vmatpush.bf16.msra.mxu3 %v3919_v34  ;;  %v655_v34 = vld [vmem:[%s4345_s1 + $0x18] sm:$0xff] }
  0x9f   : > { %2476 = vmatpush.bf16.msra.mxu0 %v3894_v35  ;;  %687 = vst [vmem:[#allocation1] ss:$9 sm:$0xff] %v655_v34  ;;  %v3923_v35 = vld [vmem:[%s4064_s14 + $0x500] sm:$0xff]  ;;  %v4016_v34 = vld [vmem:[%s4064_s14 + $0x7e8] sm:$0xff] }
  0xa0   : > { %2489 = vmatpush.bf16.msra.mxu1 %v3902_v36  ;;  %v3931_v36 = vld [vmem:[%s4064_s14 + $0x540] sm:$0xff] }
  0xa1   : > { %2502 = vmatpush.bf16.msra.mxu2 %v3910_v37  ;;  %v3939_v37 = vld [vmem:[%s4064_s14 + $0x580] sm:$0xff] }
  0xa2   : > { %2515 = vmatpush.bf16.msra.mxu3 %v3918_v38  ;;  %v3947_v38 = vld [vmem:[%s4064_s14 + $0x5c0] sm:$0xff] }
  0xa3   : > { %2477 = vmatpush.bf16.msra.mxu0 %v3893_v39  ;;  %v3962_v39 = vld [vmem:[%s4064_s14 + $0x638] sm:$0xff] }
  0xa4   : > { %2490 = vmatpush.bf16.msra.mxu1 %v3901_v40  ;;  %v3970_v40 = vld [vmem:[%s4064_s14 + $0x678] sm:$0xff] }
  0xa5   : > { %2503 = vmatpush.bf16.msra.mxu2 %v3909_v41  ;;  %v3978_v41 = vld [vmem:[%s4064_s14 + $0x6b8] sm:$0xff] }
  0xa6   : > { %2516 = vmatpush.bf16.msra.mxu3 %v3917_v42  ;;  %v3986_v42 = vld [vmem:[%s4064_s14 + $0x6f8] sm:$0xff] }
  0xa7   : > { %2478 = vmatpush.bf16.msra.mxu0 %v3892_v43  ;;  %v3961_v43 = vld [vmem:[%s4064_s14 + $0x630] sm:$0xff] }
  0xa8   : > { %2491 = vmatpush.bf16.msra.mxu1 %v3900_v44  ;;  %v3969_v44 = vld [vmem:[%s4064_s14 + $0x670] sm:$0xff] }
  0xa9   : > { %2504 = vmatpush.bf16.msra.mxu2 %v3908_v45  ;;  %v3977_v45 = vld [vmem:[%s4064_s14 + $0x6b0] sm:$0xff] }
  0xaa   : > { %2517 = vmatpush.bf16.msra.mxu3 %v3916_v46  ;;  %v3985_v46 = vld [vmem:[%s4064_s14 + $0x6f0] sm:$0xff] }
  0xab   : > { %2479 = vmatpush.bf16.msra.mxu0 %v3891_v47  ;;  %v2273_v3 = vpop.f32.mrf.mxu0  ;;  %v3960_v47 = vld [vmem:[%s4064_s14 + $0x628] sm:$0xff] }
  0xac   : > { %2492 = vmatpush.bf16.msra.mxu1 %v3899_v48  ;;  %v2286_v6 = vpop.f32.mrf.mxu1  ;;  %v3968_v48 = vld [vmem:[%s4064_s14 + $0x668] sm:$0xff] }
  0xad   : > { %2505 = vmatpush.bf16.msra.mxu2 %v3907_v49  ;;  %v2287_v9 = vadd.f32 %v2286_v6, %v2273_v3  ;;  %v3976_v49 = vld [vmem:[%s4064_s14 + $0x6a8] sm:$0xff]  ;;  %v3957_v3 = vld [vmem:[%s4064_s14 + $0x610] sm:$0xff] }
  0xae   : > { %2518 = vmatpush.bf16.msra.mxu3 %v3915_v50  ;;  %2480 = vmatmul.bf16.vlgmr.msra.gmra.mxu0 %v678_v55  ;;  %v3984_v50 = vld [vmem:[%s4064_s14 + $0x6e8] sm:$0xff] }
  0xaf   : > { %2524 = vmatpush.bf16.msrb.mxu0 %v3930_v51  ;;  %2493 = vmatmul.bf16.vlgmr.msra.gmra.mxu1 %v679_v57  ;;  %v3983_v57 = vld [vmem:[%s4064_s14 + $0x6e0] sm:$0xff] }
  0xb0   : > { %2537 = vmatpush.bf16.msrb.mxu1 %v3938_v52  ;;  %2506 = vmatmul.bf16.vlgmr.msra.gmra.mxu2 %v680_v56  ;;  %v3959_v52 = vld [vmem:[%s4064_s14 + $0x620] sm:$0xff] }
  0xb1   : > { %2550 = vmatpush.bf16.msrb.mxu2 %v3946_v53  ;;  %2519 = vmatmul.bf16.vlgmr.msra.gmra.mxu3 %v681_v58  ;;  %v3967_v53 = vld [vmem:[%s4064_s14 + $0x660] sm:$0xff] }
  0xb2   : > { %2563 = vmatpush.bf16.msrb.mxu3 %v3954_v54  ;;  %v3975_v56 = vld [vmem:[%s4064_s14 + $0x6a0] sm:$0xff] }
  0xb3   : > { %2525 = vmatpush.bf16.msrb.mxu0 %v3929_v59  ;;  %v2299_v14 = vpop.f32.mrf.mxu2  ;;  %v2275_v17 = vpop.f32.mrf.mxu0  ;;  %v3958_v59 = vld [vmem:[%s4064_s14 + $0x618] sm:$0xff] }
  0xb4   : > { %2538 = vmatpush.bf16.msrb.mxu1 %v3937_v60  ;;  %v2300_v15 = vadd.f32 %v2299_v14, %v2287_v9  ;;  %v2312_v16 = vpop.f32.mrf.mxu3  ;;  %v2288_v21 = vpop.f32.mrf.mxu1  ;;  %v3966_v60 = vld [vmem:[%s4064_s14 + $0x658] sm:$0xff]  ;;  %v3956_v9 = vld [vmem:[%s4064_s14 + $0x608] sm:$0xff]  ;;  %v3971_v17 = vld [vmem:[%s4064_s14 + $0x680] sm:$0xff] }
  0xb5   : > { %2551 = vmatpush.bf16.msrb.mxu2 %v3945_v61  ;;  %v3974_v61 = vld [vmem:[%s4064_s14 + $0x698] sm:$0xff] }
  0xb6   : > { %2564 = vmatpush.bf16.msrb.mxu3 %v3953_v62  ;;  %v4257_v20 = vadd.f32 %v2312_v16, %v2300_v15  ;;  %v3982_v62 = vld [vmem:[%s4064_s14 + $0x6d8] sm:$0xff]  ;;  %v3955_v15 = vld [vmem:[%s4064_s14 + $0x600] sm:$0xff] }
  0xb7   : > { %2526 = vmatpush.bf16.msrb.mxu0 %v3928_v63  ;;  %v3963_v16 = vld [vmem:[%s4064_s14 + $0x640] sm:$0xff]  ;;  %v4010_v21 = vld [vmem:[%s4064_s14 + $0x7b8] sm:$0xff] }
  0xb8   : > { %2539 = vmatpush.bf16.msrb.mxu1 %v3936_v0 }
  0xb9   : > { %2552 = vmatpush.bf16.msrb.mxu2 %v3944_v1 }
  0xba   : > { %2565 = vmatpush.bf16.msrb.mxu3 %v3952_v2 }
  0xbb   : > { %2527 = vmatpush.bf16.msrb.mxu0 %v3927_v4  ;;  %v2301_v30 = vpop.f32.mrf.mxu2  ;;  %v3965_v4 = vld [vmem:[%s4064_s14 + $0x650] sm:$0xff] }
  0xbc   : > { %2540 = vmatpush.bf16.msrb.mxu1 %v3935_v5  ;;  %v2314_v33 = vpop.f32.mrf.mxu3  ;;  %v4017_v30 = vld [vmem:[%s4064_s14 + $0x7f0] sm:$0xff] }
  0xbd   : > { %2553 = vmatpush.bf16.msrb.mxu2 %v3943_v7  ;;  %v3973_v7 = vld [vmem:[%s4064_s14 + $0x690] sm:$0xff]  ;;  %v4008_v33 = vld [vmem:[%s4064_s14 + $0x7a8] sm:$0xff] }
  0xbe   : > { %2566 = vmatpush.bf16.msrb.mxu3 %v3951_v8  ;;  %v3981_v8 = vld [vmem:[%s4064_s14 + $0x6d0] sm:$0xff] }
  0xbf   : > { %2528 = vmatpush.bf16.msrb.mxu0 %v3926_v10  ;;  %v3964_v10 = vld [vmem:[%s4064_s14 + $0x648] sm:$0xff] }
  0xc0   : > { %2541 = vmatpush.bf16.msrb.mxu1 %v3934_v11  ;;  %v3972_v11 = vld [vmem:[%s4064_s14 + $0x688] sm:$0xff] }
  0xc1   : > { %2554 = vmatpush.bf16.msrb.mxu2 %v3942_v12  ;;  %v3980_v12 = vld [vmem:[%s4064_s14 + $0x6c8] sm:$0xff] }
  0xc2   : > { %2567 = vmatpush.bf16.msrb.mxu3 %v3950_v13 }
  0xc3   : > { %2529 = vmatpush.bf16.msrb.mxu0 %v3925_v18  ;;  %v3979_v18 = vld [vmem:[%s4064_s14 + $0x6c0] sm:$0xff] }
  0xc4   : > { %2542 = vmatpush.bf16.msrb.mxu1 %v3933_v19  ;;  %v3994_v19 = vld [vmem:[%s4064_s14 + $0x738] sm:$0xff] }
  0xc5   : > { %2555 = vmatpush.bf16.msrb.mxu2 %v3941_v22  ;;  %v4018_v22 = vld [vmem:[%s4064_s14 + $0x7f8] sm:$0xff] }
  0xc6   : > { %2568 = vmatpush.bf16.msrb.mxu3 %v3949_v23  ;;  %v688_v23 = vld [vmem:[#allocation1] sm:$0xff] }
  0xc7   : > { %2530 = vmatpush.bf16.msrb.mxu0 %v3924_v24  ;;  %v690_v24 = vld [vmem:[#allocation1 + $0x12] sm:$0xff] }
  0xc8   : > { %2543 = vmatpush.bf16.msrb.mxu1 %v3932_v25  ;;  %v689_v25 = vld [vmem:[#allocation1 + $0x9] sm:$0xff] }
  0xc9   : > { %2556 = vmatpush.bf16.msrb.mxu2 %v3940_v26  ;;  %v691_v26 = vld [vmem:[#allocation1 + $0x1b] sm:$0xff] }
  0xca   : > { %2569 = vmatpush.bf16.msrb.mxu3 %v3948_v27  ;;  %v3993_v27 = vld [vmem:[%s4064_s14 + $0x730] sm:$0xff] }
  0xcb   : > { %2531 = vmatpush.bf16.msrb.mxu0 %v3923_v35  ;;  %v2325_v51 = vpop.f32.mrf.mxu0 }
  0xcc   : > { %2544 = vmatpush.bf16.msrb.mxu1 %v3931_v36  ;;  %v2326_v54 = vadd.f32 %v2325_v51, %v4257_v20  ;;  %v2338_v55 = vpop.f32.mrf.mxu1  ;;  %v4002_v20 = vld [vmem:[%s4064_s14 + $0x778] sm:$0xff] }
  0xcd   : > { %2557 = vmatpush.bf16.msrb.mxu2 %v3939_v37  ;;  %v3991_v37 = vld [vmem:[%s4064_s14 + $0x720] sm:$0xff] }
  0xce   : > { %2570 = vmatpush.bf16.msrb.mxu3 %v3947_v38  ;;  %2532 = vmatmul.bf16.vlgmr.msrb.gmra.mxu0 %v682_v28  ;;  %v2339_v58 = vadd.f32 %v2338_v55, %v2326_v54  ;;  %v4001_v28 = vld [vmem:[%s4064_s14 + $0x770] sm:$0xff]  ;;  %v3999_v38 = vld [vmem:[%s4064_s14 + $0x760] sm:$0xff] }
  0xcf   : > { %2576 = vmatpush.bf16.msra.mxu0 %v3962_v39  ;;  %2545 = vmatmul.bf16.vlgmr.msrb.gmra.mxu1 %v683_v31  ;;  %v3992_v31 = vld [vmem:[%s4064_s14 + $0x728] sm:$0xff]  ;;  %v4005_v55 = vld [vmem:[%s4064_s14 + $0x790] sm:$0xff] }
  0xd0   : > { %2589 = vmatpush.bf16.msra.mxu1 %v3970_v40  ;;  %2558 = vmatmul.bf16.vlgmr.msrb.gmra.mxu2 %v684_v29  ;;  %v4009_v29 = vld [vmem:[%s4064_s14 + $0x7b0] sm:$0xff]  ;;  %v4007_v40 = vld [vmem:[%s4064_s14 + $0x7a0] sm:$0xff] }
  0xd1   : > { %2602 = vmatpush.bf16.msra.mxu2 %v3978_v41  ;;  %2571 = vmatmul.bf16.vlgmr.msrb.gmra.mxu3 %v685_v32  ;;  %v4000_v32 = vld [vmem:[%s4064_s14 + $0x768] sm:$0xff]  ;;  %v4015_v41 = vld [vmem:[%s4064_s14 + $0x7e0] sm:$0xff] }
  0xd2   : > { %2615 = vmatpush.bf16.msra.mxu3 %v3986_v42 }
  0xd3   : > { %2577 = vmatpush.bf16.msra.mxu0 %v3961_v43  ;;  %v2351_v63 = vpop.f32.mrf.mxu2  ;;  %v2327_v2 = vpop.f32.mrf.mxu0  ;;  %v3990_v43 = vld [vmem:[%s4064_s14 + $0x718] sm:$0xff] }
  0xd4   : > { %2590 = vmatpush.bf16.msra.mxu1 %v3969_v44  ;;  %v2352_v0 = vadd.f32 %v2351_v63, %v2339_v58  ;;  %v2364_v1 = vpop.f32.mrf.mxu3  ;;  %v2340_v6 = vpop.f32.mrf.mxu1  ;;  %v3998_v44 = vld [vmem:[%s4064_s14 + $0x758] sm:$0xff]  ;;  %v3996_v58 = vld [vmem:[%s4064_s14 + $0x748] sm:$0xff]  ;;  %v3987_v63 = vld [vmem:[%s4064_s14 + $0x700] sm:$0xff] }
  0xd5   : > { %2603 = vmatpush.bf16.msra.mxu2 %v3977_v45  ;;  %v4006_v45 = vld [vmem:[%s4064_s14 + $0x798] sm:$0xff]  ;;  %v4011_v2 = vld [vmem:[%s4064_s14 + $0x7c0] sm:$0xff] }
  0xd6   : > { %2616 = vmatpush.bf16.msra.mxu3 %v3985_v46  ;;  %v2365_v5 = vadd.f32 %v2364_v1, %v2352_v0  ;;  %v4014_v46 = vld [vmem:[%s4064_s14 + $0x7d8] sm:$0xff]  ;;  %v3995_v0 = vld [vmem:[%s4064_s14 + $0x740] sm:$0xff] }
  0xd7   : > { %2578 = vmatpush.bf16.msra.mxu0 %v3960_v47  ;;  %v4003_v1 = vld [vmem:[%s4064_s14 + $0x780] sm:$0xff] }
  0xd8   : > { %2591 = vmatpush.bf16.msra.mxu1 %v3968_v48  ;;  %v695_v6 = vld [vmem:[#allocation1 + $0x3f] sm:$0xff] }
  0xd9   : > { %2604 = vmatpush.bf16.msra.mxu2 %v3976_v49 }
  0xda   : > { %2617 = vmatpush.bf16.msra.mxu3 %v3984_v50 }
  0xdb   : > { %2579 = vmatpush.bf16.msra.mxu0 %v3959_v52  ;;  %v2353_v13 = vpop.f32.mrf.mxu2  ;;  %v3989_v52 = vld [vmem:[%s4064_s14 + $0x710] sm:$0xff] }
  0xdc   : > { %2592 = vmatpush.bf16.msra.mxu1 %v3967_v53  ;;  %v2366_v14 = vpop.f32.mrf.mxu3  ;;  %v3997_v53 = vld [vmem:[%s4064_s14 + $0x750] sm:$0xff] }
  0xdd   : > { %2605 = vmatpush.bf16.msra.mxu2 %v3975_v56  ;;  %v4013_v56 = vld [vmem:[%s4064_s14 + $0x7d0] sm:$0xff] }
  0xde   : > { %2618 = vmatpush.bf16.msra.mxu3 %v3983_v57  ;;  %v3988_v57 = vld [vmem:[%s4064_s14 + $0x708] sm:$0xff] }
  0xdf   : > { %2580 = vmatpush.bf16.msra.mxu0 %v3958_v59  ;;  %v4004_v59 = vld [vmem:[%s4064_s14 + $0x788] sm:$0xff] }
  0xe0   : > { %2593 = vmatpush.bf16.msra.mxu1 %v3966_v60  ;;  %v4012_v60 = vld [vmem:[%s4064_s14 + $0x7c8] sm:$0xff] }
  0xe1   : > { %2606 = vmatpush.bf16.msra.mxu2 %v3974_v61 }
  0xe2   : > { %2619 = vmatpush.bf16.msra.mxu3 %v3982_v62 }
  0xe3   : > { %2581 = vmatpush.bf16.msra.mxu0 %v3957_v3  ;;  %v692_v3 = vld [vmem:[#allocation1 + $0x24] sm:$0xff] }
  0xe4   : > { %2594 = vmatpush.bf16.msra.mxu1 %v3965_v4  ;;  %v693_v4 = vld [vmem:[#allocation1 + $0x2d] sm:$0xff] }
  0xe5   : > { %2607 = vmatpush.bf16.msra.mxu2 %v3973_v7 }
  0xe6   : > { %2620 = vmatpush.bf16.msra.mxu3 %v3981_v8 }
  0xe7   : > { %2582 = vmatpush.bf16.msra.mxu0 %v3956_v9 }
  0xe8   : > { %2595 = vmatpush.bf16.msra.mxu1 %v3964_v10 }
  0xe9   : > { %2608 = vmatpush.bf16.msra.mxu2 %v3972_v11 }
  0xea   : > { %2621 = vmatpush.bf16.msra.mxu3 %v3980_v12 }
  0xeb   : > { %2583 = vmatpush.bf16.msra.mxu0 %v3955_v15  ;;  %v2377_v35 = vpop.f32.mrf.mxu0 }
  0xec   : > { %2596 = vmatpush.bf16.msra.mxu1 %v3963_v16  ;;  %v2378_v36 = vadd.f32 %v2377_v35, %v2365_v5  ;;  %v2390_v39 = vpop.f32.mrf.mxu1  ;;  %v694_v5 = vld [vmem:[#allocation1 + $0x36] sm:$0xff] }
  0xed   : > { %2609 = vmatpush.bf16.msra.mxu2 %v3971_v17 }
  0xee   : > { %2622 = vmatpush.bf16.msra.mxu3 %v3979_v18  ;;  %2584 = vmatmul.bf16.vlgmr.msra.gmra.mxu0 %v688_v23  ;;  %v2391_v42 = vadd.f32 %v2390_v39, %v2378_v36 }
  0xef   : > { %2628 = vmatpush.bf16.msrb.mxu0 %v3994_v19  ;;  %2597 = vmatmul.bf16.vlgmr.msra.gmra.mxu1 %v689_v25 }
  0xf0   : > { %2641 = vmatpush.bf16.msrb.mxu1 %v4002_v20  ;;  %2610 = vmatmul.bf16.vlgmr.msra.gmra.mxu2 %v690_v24 }
  0xf1   : > { %2654 = vmatpush.bf16.msrb.mxu2 %v4010_v21  ;;  %2623 = vmatmul.bf16.vlgmr.msra.gmra.mxu3 %v691_v26 }
  0xf2   : > { %2667 = vmatpush.bf16.msrb.mxu3 %v4018_v22 }
  0xf3   : > { %2629 = vmatpush.bf16.msrb.mxu0 %v3993_v27  ;;  %v2403_v47 = vpop.f32.mrf.mxu2  ;;  %v2379_v50 = vpop.f32.mrf.mxu0 }
  0xf4   : > { %2642 = vmatpush.bf16.msrb.mxu1 %v4001_v28  ;;  %v2404_v48 = vadd.f32 %v2403_v47, %v2391_v42  ;;  %v2416_v49 = vpop.f32.mrf.mxu3  ;;  %v2392_v54 = vpop.f32.mrf.mxu1 }
  0xf5   : > { %2655 = vmatpush.bf16.msrb.mxu2 %v4009_v29 }
  0xf6   : > { %2668 = vmatpush.bf16.msrb.mxu3 %v4017_v30  ;;  %v2417_v51 = vadd.f32 %v2416_v49, %v2404_v48 }
  0xf7   : > { %2630 = vmatpush.bf16.msrb.mxu0 %v3992_v31 }
  0xf8   : > { %2643 = vmatpush.bf16.msrb.mxu1 %v4000_v32 }
  0xf9   : > { %2656 = vmatpush.bf16.msrb.mxu2 %v4008_v33 }
  0xfa   : > { %2669 = vmatpush.bf16.msrb.mxu3 %v4016_v34 }
  0xfb   : > { %2631 = vmatpush.bf16.msrb.mxu0 %v3991_v37  ;;  %v2405_v61 = vpop.f32.mrf.mxu2 }
  0xfc   : > { %2644 = vmatpush.bf16.msrb.mxu1 %v3999_v38  ;;  %v2418_v62 = vpop.f32.mrf.mxu3 }
  0xfd   : > { %2657 = vmatpush.bf16.msrb.mxu2 %v4007_v40 }
  0xfe   : > { %2670 = vmatpush.bf16.msrb.mxu3 %v4015_v41 }
  0xff   : > { %2632 = vmatpush.bf16.msrb.mxu0 %v3990_v43 }
 0x100   : > { %2645 = vmatpush.bf16.msrb.mxu1 %v3998_v44 }
 0x101   : > { %2658 = vmatpush.bf16.msrb.mxu2 %v4006_v45 }
 0x102   : > { %2671 = vmatpush.bf16.msrb.mxu3 %v4014_v46 }
 0x103   : > { %2633 = vmatpush.bf16.msrb.mxu0 %v3989_v52 }
 0x104   : > { %2646 = vmatpush.bf16.msrb.mxu1 %v3997_v53 }
 0x105   : > { %2659 = vmatpush.bf16.msrb.mxu2 %v4005_v55 }
 0x106   : > { %2672 = vmatpush.bf16.msrb.mxu3 %v4013_v56 }
 0x107   : > { %2634 = vmatpush.bf16.msrb.mxu0 %v3988_v57 }
 0x108   : > { %2647 = vmatpush.bf16.msrb.mxu1 %v3996_v58 }
 0x109   : > { %2660 = vmatpush.bf16.msrb.mxu2 %v4004_v59 }
 0x10a   : > { %2673 = vmatpush.bf16.msrb.mxu3 %v4012_v60 }
 0x10b   : > { %2635 = vmatpush.bf16.msrb.mxu0 %v3987_v63  ;;  %v2429_v7 = vpop.f32.mrf.mxu0 }
 0x10c   : > { %2648 = vmatpush.bf16.msrb.mxu1 %v3995_v0  ;;  %v2430_v8 = vadd.f32 %v2429_v7, %v2417_v51  ;;  %v2442_v9 = vpop.f32.mrf.mxu1 }
 0x10d   : > { %2661 = vmatpush.bf16.msrb.mxu2 %v4003_v1 }
 0x10e   : > { %2674 = vmatpush.bf16.msrb.mxu3 %v4011_v2  ;;  %2636 = vmatmul.bf16.vlgmr.msrb.gmra.mxu0 %v692_v3  ;;  %v2443_v10 = vadd.f32 %v2442_v9, %v2430_v8 }
 0x10f   : > { %2649 = vmatmul.bf16.vlgmr.msrb.gmra.mxu1 %v693_v4 }
 0x110   : > { %2662 = vmatmul.bf16.vlgmr.msrb.gmra.mxu2 %v694_v5 }
 0x111   : > { %2675 = vmatmul.bf16.vlgmr.msrb.gmra.mxu3 %v695_v6 }
 0x113   : > { %v2455_v11 = vpop.f32.mrf.mxu2  ;;  %v2431_v14 = vpop.f32.mrf.mxu0 }
 0x114   : > { %v2456_v12 = vadd.f32 %v2455_v11, %v2443_v10  ;;  %v2468_v13 = vpop.f32.mrf.mxu3  ;;  %v2444_v16 = vpop.f32.mrf.mxu1 }
 0x116   : > { %v2469_v15 = vadd.f32 %v2468_v13, %v2456_v12 }
 0x11b   : > { %v2457_v17 = vpop.f32.mrf.mxu2 }
 0x11c   : > { %v2470_v18 = vpop.f32.mrf.mxu3 }
 0x12b   : > { %v2481_v19 = vpop.f32.mrf.mxu0 }
 0x12c   : > { %v2482_v20 = vadd.f32 %v2481_v19, %v2469_v15  ;;  %v2494_v21 = vpop.f32.mrf.mxu1 }
 0x12e   : > { %v2495_v22 = vadd.f32 %v2494_v21, %v2482_v20 }
 0x133   : > { %v2507_v23 = vpop.f32.mrf.mxu2  ;;  %v2483_v26 = vpop.f32.mrf.mxu0 }
 0x134   : > { %v2508_v24 = vadd.f32 %v2507_v23, %v2495_v22  ;;  %v2520_v25 = vpop.f32.mrf.mxu3  ;;  %v2496_v28 = vpop.f32.mrf.mxu1 }
 0x136   : > { %v2521_v27 = vadd.f32 %v2520_v25, %v2508_v24 }
 0x13b   : > { %v2509_v29 = vpop.f32.mrf.mxu2 }
 0x13c   : > { %v2522_v30 = vpop.f32.mrf.mxu3 }
 0x14b   : > { %v2533_v31 = vpop.f32.mrf.mxu0 }
 0x14c   : > { %v2546_v32 = vpop.f32.mrf.mxu1  ;;  %v2534_v42 = vadd.f32 %v2533_v31, %v2521_v27 }
 0x14e   : > { %v2547_v46 = vadd.f32 %v2546_v32, %v2534_v42 }
 0x153   : > { %v2559_v33 = vpop.f32.mrf.mxu2  ;;  %v2535_v35 = vpop.f32.mrf.mxu0 }
 0x154   : > { %v2572_v34 = vpop.f32.mrf.mxu3  ;;  %v2548_v36 = vpop.f32.mrf.mxu1  ;;  %v2560_v47 = vadd.f32 %v2559_v33, %v2547_v46 }
 0x156   : > { %v2573_v50 = vadd.f32 %v2572_v34, %v2560_v47 }
 0x15b   : > { %v2561_v37 = vpop.f32.mrf.mxu2 }
 0x15c   : > { %v2574_v38 = vpop.f32.mrf.mxu3 }
 0x16b   : > { %v2585_v39 = vpop.f32.mrf.mxu0 }
 0x16c   : > { %v2598_v40 = vpop.f32.mrf.mxu1  ;;  %v2586_v51 = vadd.f32 %v2585_v39, %v2573_v50 }
 0x16e   : > { %v2599_v52 = vadd.f32 %v2598_v40, %v2586_v51 }
 0x173   : > { %v2611_v41 = vpop.f32.mrf.mxu2  ;;  %v2587_v44 = vpop.f32.mrf.mxu0 }
 0x174   : > { %v2624_v43 = vpop.f32.mrf.mxu3  ;;  %v2600_v45 = vpop.f32.mrf.mxu1  ;;  %v2612_v53 = vadd.f32 %v2611_v41, %v2599_v52 }
 0x176   : > { %v2625_v54 = vadd.f32 %v2624_v43, %v2612_v53 }
 0x17b   : > { %v2613_v48 = vpop.f32.mrf.mxu2 }
 0x17c   : > { %v2626_v49 = vpop.f32.mrf.mxu3 }
 0x18b   : > { %v2637_v55 = vpop.f32.mrf.mxu0 }
 0x18c   : > { %v2650_v56 = vpop.f32.mrf.mxu1  ;;  %v2638_v57 = vadd.f32 %v2637_v55, %v2625_v54 }
 0x18e   : > { %v2651_v58 = vadd.f32 %v2650_v56, %v2638_v57 }
 0x193   : > { %v2663_v59 = vpop.f32.mrf.mxu2  ;;  %v2639_v62 = vpop.f32.mrf.mxu0 }
 0x194   : > { %v2676_v60 = vpop.f32.mrf.mxu3  ;;  %v2664_v61 = vadd.f32 %v2663_v59, %v2651_v58  ;;  %v2652_v63 = vpop.f32.mrf.mxu1 }
 0x196   : > { %v2677_v0 = vadd.f32 %v2676_v60, %v2664_v61 }
 0x198   : > { %2681 = vst.msk [vmem:[%s139_s25] sm:$0x1] %vm2680_vm0, %v2677_v0 }
 0x19b   : > { %v2665_v1 = vpop.f32.mrf.mxu2 }
 0x19c   : > { %v2678_v2 = vpop.f32.mrf.mxu3 }
 0x19d PF: > { %s12_s9 = sadd.s32 1, %s4033_s9  }
 0x19e   : > { %p9_p4 = scmp.ge.s32.totalorder %s12_s9, 4  }
 0x1a0   :  { %11 = sbr.rel (!%p9_p4) target bundleno = 1 (0x1), region = 58 }

</bundles_post_ra>
